<compile_context>
chip_gen: v5e
topology: v5e:2x2
jax: 0.10.0
libtpu: 0.0.40
codegen_flags: <defaults>
</compile_context>

<pallas_src>
import numpy as np
import jax
import jax.numpy as jnp
from jax.experimental import pallas as pl
from jax.experimental.pallas import tpu as pltpu

BOARD_SHAPE = (1 + 6 + 6, 8, 8)   # (13, 8, 8)
MOVES_SIZE = 1968
PADDED_MOVES = 2048               # next multiple of 128

IN_FLAT = 8 * 8 * 13              # 832  (H*W*C, HWC flatten)
H1_FLAT = 8 * 8 * 8               # 512  conv1 output
H2_FLAT = 6 * 6 * 16              # 576  conv2 output
H3_FLAT = 4 * 4 * 32              # 512  conv3 output
HEAD_COLS = 384                   # 256 policy hidden | 1 value | 127 zero pad


def _round_up(n, m):
    return (n + m - 1) // m * m


# ----------------------------- fused Pallas kernel ---------------------------

def _fused_forward_kernel(x_ref, w1_ref, b1_ref, w2_ref, b2_ref, w3_ref, b3_ref,
                          wh_ref, bh_ref, wp2_ref, bp2_ref, out_ref):
    bf16, f32 = jnp.bfloat16, jnp.float32

    def mm(a, w_ref):
        # bf16 MXU matmul, f32 accumulation.
        return jnp.dot(a.astype(bf16), w_ref[...], preferred_element_type=f32)

    x = x_ref[...]                                            # (TB, 832) f32
    h1 = jnp.maximum(mm(x, w1_ref) + b1_ref[...], 0.0)       # (TB, 512)  conv1+ReLU
    h2 = jnp.maximum(mm(h1, w2_ref) + b2_ref[...], 0.0)      # (TB, 576)  conv2+ReLU
    h3 = mm(h2, w3_ref) + b3_ref[...]                        # (TB, 512)  conv3

    # Fused policy-linear-1 + value head (flatten permutation folded into wh).
    hv = mm(h3, wh_ref) + bh_ref[...]                        # (TB, 384)
    hidden = jnp.maximum(hv[:, :256], 0.0)                   # (TB, 256)
    value = jnp.tanh(hv[:, 256:257])                         # (TB, 1), f32 tanh

    # Policy-linear-2 (padded to 2048 lanes) + numerically stable log_softmax
    # in f32.  Padded logits carry a -1e30 bias -> exp() == 0, never the max.
    logits = mm(hidden, wp2_ref) + bp2_ref[...]               # (TB, 2048) f32
    m = jnp.max(logits, axis=-1, keepdims=True)
    shifted = logits - m
    lse = jnp.log(jnp.sum(jnp.exp(shifted), axis=-1, keepdims=True))
    logp = shifted - lse

    # Fold tanh(value) into the spare padded lane MOVES_SIZE of the single
    # lane-dense output block (no separate last-dim-1 output stream).
    lane = jax.lax.broadcasted_iota(jnp.int32, logp.shape, 1)
    out_ref[...] = jnp.where(lane == MOVES_SIZE, value, logp).astype(out_ref.dtype)


# --------------------------- wrapper / pallas_call ----------------------------

def _choose_tb(batch):
    """Batch tile: multiple of 8; 128-256 at realistic sizes; >=2 grid steps
    when the batch allows it (keeps both v7x TensorCores busy)."""
    b8 = _round_up(batch, 8)
    if b8 <= 128:
        return b8
    if b8 <= 512:
        return 128
    return 256


def forward(kp, x_nchw):
    B = x_nchw.shape[0]
    C, H, W = BOARD_SHAPE
    # NCHW -> NHWC -> (B, H*W*C).  Tiny input (~3.3 KB/image); pure layout glue.
    x = jnp.transpose(x_nchw, (0, 2, 3, 1)).astype(jnp.float32).reshape(B, H * W * C)

    TB = _choose_tb(B)
    B_pad = _round_up(B, TB)
    if B_pad != B:
        x = jnp.pad(x, ((0, B_pad - B), (0, 0)))
    grid_b = B_pad // TB

    mm_flops = (IN_FLAT * H1_FLAT + H1_FLAT * H2_FLAT + H2_FLAT * H3_FLAT
                + H3_FLAT * HEAD_COLS + 256 * PADDED_MOVES)
    flops = 2 * B_pad * mm_flops
    weight_bytes = 2 * mm_flops + 4 * (H1_FLAT + H2_FLAT + H3_FLAT + HEAD_COLS + PADDED_MOVES)
    io_bytes = 4 * B_pad * (IN_FLAT + PADDED_MOVES)

    const = lambda b: (0, 0)   # weights resident in VMEM across the batch grid

    out = pl.pallas_call(
        _fused_forward_kernel,
        out_shape=jax.ShapeDtypeStruct((B_pad, PADDED_MOVES), jnp.float32),
        grid=(grid_b,),
        in_specs=[
            pl.BlockSpec((TB, IN_FLAT), lambda b: (b, 0)),        # x tile
            pl.BlockSpec((IN_FLAT, H1_FLAT), const),              # conv1 dense (bf16)
            pl.BlockSpec((1, H1_FLAT), const),
            pl.BlockSpec((H1_FLAT, H2_FLAT), const),              # conv2 dense (bf16)
            pl.BlockSpec((1, H2_FLAT), const),
            pl.BlockSpec((H2_FLAT, H3_FLAT), const),              # conv3 dense (bf16)
            pl.BlockSpec((1, H3_FLAT), const),
            pl.BlockSpec((H3_FLAT, HEAD_COLS), const),            # policy1 + value (bf16)
            pl.BlockSpec((1, HEAD_COLS), const),
            pl.BlockSpec((256, PADDED_MOVES), const),             # policy2 padded (bf16)
            pl.BlockSpec((1, PADDED_MOVES), const),
        ],
        out_specs=pl.BlockSpec((TB, PADDED_MOVES), lambda b: (b, 0)),
        compiler_params=pltpu.CompilerParams(dimension_semantics=("parallel",)),
        cost_estimate=pl.CostEstimate(flops=flops,
                                      transcendentals=B_pad * (PADDED_MOVES + 2),
                                      bytes_accessed=weight_bytes + io_bytes),
    )(x, kp["w1"], kp["b1"], kp["w2"], kp["b2"], kp["w3"], kp["b3"],
      kp["wh"], kp["bh"], kp["wp2"], kp["bp2"])

    policy = out[:B, :MOVES_SIZE]
    value = out[:B, MOVES_SIZE:MOVES_SIZE + 1]
    return policy, value


# --------------------------- parameter construction ---------------------------

def init_params(key):
    """Parameters in PyTorch layout: conv (out,in,kh,kw), linear (out,in)."""
    ks = jax.random.split(key, 12)
    cin = BOARD_SHAPE[0]

    def conv_w(k, out_c, in_c, kk):
        return jax.random.normal(k, (out_c, in_c, kk, kk), jnp.float32) / jnp.sqrt(in_c * kk * kk)

    def lin_w(k, out_f, in_f):
        return jax.random.normal(k, (out_f, in_f), jnp.float32) / jnp.sqrt(in_f)

    flat = 32 * 4 * 4
    return {
        "w1": conv_w(ks[0], 8, cin, 1), "b1": 0.01 * jax.random.normal(ks[1], (8,), jnp.float32),
        "w2": conv_w(ks[2], 16, 8, 3), "b2": 0.01 * jax.random.normal(ks[3], (16,), jnp.float32),
        "w3": conv_w(ks[4], 32, 16, 3), "b3": 0.01 * jax.random.normal(ks[5], (32,), jnp.float32),
        "p1_w": lin_w(ks[6], 256, flat), "p1_b": 0.01 * jax.random.normal(ks[7], (256,), jnp.float32),
        "p2_w": lin_w(ks[8], MOVES_SIZE, 256), "p2_b": 0.01 * jax.random.normal(ks[9], (MOVES_SIZE,), jnp.float32),
        "v_w": lin_w(ks[10], 1, flat), "v_b": 0.01 * jax.random.normal(ks[11], (1,), jnp.float32),
    }


def pack_params(p):
    """One-time host-side repacking into the fused kernel's weight layout.
    Matmul weights are stored bf16 (operands); biases stay f32."""
    f32 = np.float32

    def conv_as_matmul(w, h_in, w_in):
        """(Cout,Cin,kh,kw) valid conv -> dense (h_in*w_in*Cin, h_out*w_out*Cout)
        acting on HWC-flattened images (index = (h*W + w)*C + c)."""
        w = np.asarray(w, f32)
        c_out, c_in, kh, kw = w.shape
        h_out, w_out = h_in - kh + 1, w_in - kw + 1
        m = np.zeros((h_in * w_in * c_in, h_out * w_out * c_out), f32)
        for oh in range(h_out):
            for ow in range(w_out):
                c0 = (oh * w_out + ow) * c_out
                for dh in range(kh):
                    for dw in range(kw):
                        r0 = ((oh + dh) * w_in + (ow + dw)) * c_in
                        m[r0:r0 + c_in, c0:c0 + c_out] = w[:, :, dh, dw].T
        return m

    def tile_bias(b, n_pix):
        return np.tile(np.asarray(b, f32), n_pix)[None, :]

    w1 = conv_as_matmul(p["w1"], 8, 8)       # (832, 512)
    b1 = tile_bias(p["b1"], 64)
    w2 = conv_as_matmul(p["w2"], 8, 8)       # (512, 576)
    b2 = tile_bias(p["b2"], 36)
    w3 = conv_as_matmul(p["w3"], 6, 6)       # (576, 512)
    b3 = tile_bias(p["b3"], 16)

    # Flatten permutation: kernel feature index m = (oh*4 + ow)*32 + c maps to
    # PyTorch NCHW-flatten index p = c*16 + oh*4 + ow.
    oh, ow, c = np.meshgrid(np.arange(4), np.arange(4), np.arange(32), indexing="ij")
    perm = (c * 16 + oh * 4 + ow).reshape(-1)                       # (512,)

    wp1 = np.asarray(p["p1_w"], f32).T[perm, :]                     # (512, 256)
    wv = np.asarray(p["v_w"], f32).T[perm, :]                       # (512, 1)
    wh = np.concatenate([wp1, wv, np.zeros((512, 127), f32)], axis=1)             # (512, 384)
    bh = np.concatenate([np.asarray(p["p1_b"], f32), np.asarray(p["v_b"], f32),
                         np.zeros((127,), f32)])[None, :]                          # (1, 384)

    npad = PADDED_MOVES - MOVES_SIZE
    wp2 = np.concatenate([np.asarray(p["p2_w"], f32).T, np.zeros((256, npad), f32)], axis=1)
    bp2 = np.concatenate([np.asarray(p["p2_b"], f32), np.full((npad,), -1e30, f32)])[None, :]

    bf = lambda a: jnp.asarray(a, jnp.bfloat16)
    fl = lambda a: jnp.asarray(a, jnp.float32)
    return {
        "w1": bf(w1), "b1": fl(b1),
        "w2": bf(w2), "b2": fl(b2),
        "w3": bf(w3), "b3": fl(b3),
        "wh": bf(wh), "bh": fl(bh),
        "wp2": bf(wp2), "bp2": fl(bp2),
    }


# ------------------- matched-precision packed reference -----------------------

def packed_reference(kp, x_nchw):
    """Plain-JAX forward with the SAME packed bf16 weights / f32 accumulation as
    the kernel — tight structural check independent of bf16 drift."""
    B = x_nchw.shape[0]
    x = jnp.transpose(x_nchw, (0, 2, 3, 1)).astype(jnp.float32).reshape(B, -1)

    def mm(a, w):
        return jnp.dot(a.astype(jnp.bfloat16), w, preferred_element_type=jnp.float32)

    h1 = jnp.maximum(mm(x, kp["w1"]) + kp["b1"], 0.0)
    h2 = jnp.maximum(mm(h1, kp["w2"]) + kp["b2"], 0.0)
    h3 = mm(h2, kp["w3"]) + kp["b3"]
    hv = mm(h3, kp["wh"]) + kp["bh"]
    hidden = jnp.maximum(hv[:, :256], 0.0)
    value = jnp.tanh(hv[:, 256:257])
    logits = mm(hidden, kp["wp2"]) + kp["bp2"]
    policy = jax.nn.log_softmax(logits, axis=-1)[:, :MOVES_SIZE]
    return policy, value


# --------------------------- plain-JAX f32 reference --------------------------

def reference_forward(p, x_nchw):
    hp = jax.lax.Precision.HIGHEST
    h = jnp.einsum("bchw,oc->bohw", x_nchw.astype(jnp.float32),
                   p["w1"][:, :, 0, 0], precision=hp)
    h = jax.nn.relu(h + p["b1"][None, :, None, None])

    def conv3x3(h, w, b):
        Ho, Wo = h.shape[2] - 2, h.shape[3] - 2
        out = jnp.zeros((h.shape[0], w.shape[0], Ho, Wo), jnp.float32)
        for dh in range(3):
            for dw in range(3):
                out = out + jnp.einsum("bchw,oc->bohw",
                                       h[:, :, dh:dh + Ho, dw:dw + Wo],
                                       w[:, :, dh, dw], precision=hp)
        return out + b[None, :, None, None]

    h = jax.nn.relu(conv3x3(h, p["w2"], p["b2"]))
    h = conv3x3(h, p["w3"], p["b3"])
    feats = h.reshape(h.shape[0], -1)                      # PyTorch NCHW flatten
    hidden = jax.nn.relu(jnp.dot(feats, p["p1_w"].T, precision=hp) + p["p1_b"])
    logits = jnp.dot(hidden, p["p2_w"].T, precision=hp) + p["p2_b"]
    policy = jax.nn.log_softmax(logits, axis=1)
    value = jnp.tanh(jnp.dot(feats, p["v_w"].T, precision=hp) + p["v_b"])
    return policy, value


# --------------------------------- main ---------------------------------------

if __name__ == "__main__":
    key = jax.random.PRNGKey(0)
    k_param, k_input = jax.random.split(key)
    params = init_params(k_param)
    kparams = pack_params(params)

    batch = 2
    x = jax.random.normal(k_input, (batch,) + BOARD_SHAPE, jnp.float32)  # NCHW

    policy, value = jax.jit(forward)(kparams, x)
    policy, value = jax.block_until_ready((policy, value))

    assert policy.shape == (batch, MOVES_SIZE)
    assert value.shape == (batch, 1)
    # log_softmax rows must sum to ~1 in probability space
    assert jnp.allclose(jnp.sum(jnp.exp(policy), axis=1), 1.0, atol=1e-4)
    assert jnp.all(jnp.abs(value) <= 1.0)

    # Tight check: same packed weights / same bf16 operand casts in plain JAX.
    mp_pol, mp_val = packed_reference(kparams, x)
    assert float(jnp.max(jnp.abs(policy - mp_pol))) < 5e-3, "policy mismatch vs packed reference"
    assert float(jnp.max(jnp.abs(value - mp_val))) < 5e-3, "value mismatch vs packed reference"

    # Loose end-to-end check vs the f32 PyTorch-semantics reference (bf16 drift).
    ref_pol, ref_val = reference_forward(params, x)
    assert float(jnp.max(jnp.abs(policy - ref_pol))) < 1e-1, "policy mismatch vs f32 reference"
    assert float(jnp.max(jnp.abs(value - ref_val))) < 5e-2, "value mismatch vs f32 reference"

    print("KERNEL_OK")
</pallas_src>

<mosaic_0001>
module attributes {stable_mosaic.version = 11 : i64} {
  func.func @_fused_forward_kernel(%arg0: i32, %arg1: memref<8x832xf32, #tpu.memory_space<vmem>>, %arg2: memref<832x512xbf16, #tpu.memory_space<vmem>>, %arg3: memref<1x512xf32, #tpu.memory_space<vmem>>, %arg4: memref<512x576xbf16, #tpu.memory_space<vmem>>, %arg5: memref<1x576xf32, #tpu.memory_space<vmem>>, %arg6: memref<576x512xbf16, #tpu.memory_space<vmem>>, %arg7: memref<1x512xf32, #tpu.memory_space<vmem>>, %arg8: memref<512x384xbf16, #tpu.memory_space<vmem>>, %arg9: memref<1x384xf32, #tpu.memory_space<vmem>>, %arg10: memref<256x2048xbf16, #tpu.memory_space<vmem>>, %arg11: memref<1x2048xf32, #tpu.memory_space<vmem>>, %arg12: memref<8x2048xf32, #tpu.memory_space<vmem>>) attributes {dimension_semantics = [#tpu.dimension_semantics<parallel>], iteration_bounds = array<i64: 1>, scalar_prefetch = 0 : i64, scratch_operands = 0 : i64, tpu.core_type = #tpu.core_type<tc>, window_params = [{transform_indices = @transform_0, window_bounds = array<i64: 8, 832>}, {pipeline_mode = #tpu.pipeline_mode<synchronous>, transform_indices = @transform_1, window_bounds = array<i64: 832, 512>}, {pipeline_mode = #tpu.pipeline_mode<synchronous>, transform_indices = @transform_2, window_bounds = array<i64: 1, 512>}, {pipeline_mode = #tpu.pipeline_mode<synchronous>, transform_indices = @transform_3, window_bounds = array<i64: 512, 576>}, {pipeline_mode = #tpu.pipeline_mode<synchronous>, transform_indices = @transform_4, window_bounds = array<i64: 1, 576>}, {pipeline_mode = #tpu.pipeline_mode<synchronous>, transform_indices = @transform_5, window_bounds = array<i64: 576, 512>}, {pipeline_mode = #tpu.pipeline_mode<synchronous>, transform_indices = @transform_6, window_bounds = array<i64: 1, 512>}, {pipeline_mode = #tpu.pipeline_mode<synchronous>, transform_indices = @transform_7, window_bounds = array<i64: 512, 384>}, {pipeline_mode = #tpu.pipeline_mode<synchronous>, transform_indices = @transform_8, window_bounds = array<i64: 1, 384>}, {pipeline_mode = #tpu.pipeline_mode<synchronous>, transform_indices = @transform_9, window_bounds = array<i64: 256, 2048>}, {pipeline_mode = #tpu.pipeline_mode<synchronous>, transform_indices = @transform_10, window_bounds = array<i64: 1, 2048>}, {transform_indices = @transform_11, window_bounds = array<i64: 8, 2048>}]} {
    %c0 = arith.constant 0 : index
    %c0_0 = arith.constant 0 : index
    %0 = vector.load %arg1[%c0, %c0_0] : memref<8x832xf32, #tpu.memory_space<vmem>>, vector<8x832xf32>
    %1 = arith.truncf %0 : vector<8x832xf32> to vector<8x832xbf16>
    %c0_1 = arith.constant 0 : index
    %c0_2 = arith.constant 0 : index
    %2 = vector.load %arg2[%c0_1, %c0_2] : memref<832x512xbf16, #tpu.memory_space<vmem>>, vector<832x512xbf16>
    %cst = arith.constant dense<0.000000e+00> : vector<8x512xf32>
    %3 = tpu.matmul %1, %2, %cst {dimension_numbers = #tpu.dot_dimension_numbers<[1], [0], [0], [1], [0, 0, 1, 1], [], []>} : vector<8x832xbf16>, vector<832x512xbf16>, vector<8x512xf32> -> vector<8x512xf32>
    %c0_3 = arith.constant 0 : index
    %c0_4 = arith.constant 0 : index
    %4 = vector.load %arg3[%c0_3, %c0_4] : memref<1x512xf32, #tpu.memory_space<vmem>>, vector<1x512xf32>
    %5 = vector.broadcast %4 : vector<1x512xf32> to vector<8x512xf32>
    %6 = arith.addf %3, %5 : vector<8x512xf32>
    %cst_5 = arith.constant 0.000000e+00 : f32
    %7 = vector.broadcast %cst_5 : f32 to vector<8x512xf32>
    %8 = arith.maximumf %6, %7 : vector<8x512xf32>
    %9 = arith.truncf %8 : vector<8x512xf32> to vector<8x512xbf16>
    %c0_6 = arith.constant 0 : index
    %c0_7 = arith.constant 0 : index
    %10 = vector.load %arg4[%c0_6, %c0_7] : memref<512x576xbf16, #tpu.memory_space<vmem>>, vector<512x576xbf16>
    %cst_8 = arith.constant dense<0.000000e+00> : vector<8x576xf32>
    %11 = tpu.matmul %9, %10, %cst_8 {dimension_numbers = #tpu.dot_dimension_numbers<[1], [0], [0], [1], [0, 0, 1, 1], [], []>} : vector<8x512xbf16>, vector<512x576xbf16>, vector<8x576xf32> -> vector<8x576xf32>
    %c0_9 = arith.constant 0 : index
    %c0_10 = arith.constant 0 : index
    %12 = vector.load %arg5[%c0_9, %c0_10] : memref<1x576xf32, #tpu.memory_space<vmem>>, vector<1x576xf32>
    %13 = vector.broadcast %12 : vector<1x576xf32> to vector<8x576xf32>
    %14 = arith.addf %11, %13 : vector<8x576xf32>
    %cst_11 = arith.constant 0.000000e+00 : f32
    %15 = vector.broadcast %cst_11 : f32 to vector<8x576xf32>
    %16 = arith.maximumf %14, %15 : vector<8x576xf32>
    %17 = arith.truncf %16 : vector<8x576xf32> to vector<8x576xbf16>
    %c0_12 = arith.constant 0 : index
    %c0_13 = arith.constant 0 : index
    %18 = vector.load %arg6[%c0_12, %c0_13] : memref<576x512xbf16, #tpu.memory_space<vmem>>, vector<576x512xbf16>
    %cst_14 = arith.constant dense<0.000000e+00> : vector<8x512xf32>
    %19 = tpu.matmul %17, %18, %cst_14 {dimension_numbers = #tpu.dot_dimension_numbers<[1], [0], [0], [1], [0, 0, 1, 1], [], []>} : vector<8x576xbf16>, vector<576x512xbf16>, vector<8x512xf32> -> vector<8x512xf32>
    %c0_15 = arith.constant 0 : index
    %c0_16 = arith.constant 0 : index
    %20 = vector.load %arg7[%c0_15, %c0_16] : memref<1x512xf32, #tpu.memory_space<vmem>>, vector<1x512xf32>
    %21 = vector.broadcast %20 : vector<1x512xf32> to vector<8x512xf32>
    %22 = arith.addf %19, %21 : vector<8x512xf32>
    %23 = arith.truncf %22 : vector<8x512xf32> to vector<8x512xbf16>
    %c0_17 = arith.constant 0 : index
    %c0_18 = arith.constant 0 : index
    %24 = vector.load %arg8[%c0_17, %c0_18] : memref<512x384xbf16, #tpu.memory_space<vmem>>, vector<512x384xbf16>
    %cst_19 = arith.constant dense<0.000000e+00> : vector<8x384xf32>
    %25 = tpu.matmul %23, %24, %cst_19 {dimension_numbers = #tpu.dot_dimension_numbers<[1], [0], [0], [1], [0, 0, 1, 1], [], []>} : vector<8x512xbf16>, vector<512x384xbf16>, vector<8x384xf32> -> vector<8x384xf32>
    %c0_20 = arith.constant 0 : index
    %c0_21 = arith.constant 0 : index
    %26 = vector.load %arg9[%c0_20, %c0_21] : memref<1x384xf32, #tpu.memory_space<vmem>>, vector<1x384xf32>
    %27 = vector.broadcast %26 : vector<1x384xf32> to vector<8x384xf32>
    %28 = arith.addf %25, %27 : vector<8x384xf32>
    %29 = vector.extract_strided_slice %28 {offsets = [0, 0], sizes = [8, 256], strides = [1, 1]} : vector<8x384xf32> to vector<8x256xf32>
    %cst_22 = arith.constant 0.000000e+00 : f32
    %30 = vector.broadcast %cst_22 : f32 to vector<8x256xf32>
    %31 = arith.maximumf %29, %30 : vector<8x256xf32>
    %32 = vector.extract_strided_slice %28 {offsets = [0, 256], sizes = [8, 1], strides = [1, 1]} : vector<8x384xf32> to vector<8x1xf32>
    %33 = math.tanh %32 : vector<8x1xf32>
    %34 = arith.truncf %31 : vector<8x256xf32> to vector<8x256xbf16>
    %c0_23 = arith.constant 0 : index
    %c0_24 = arith.constant 0 : index
    %35 = vector.load %arg10[%c0_23, %c0_24] : memref<256x2048xbf16, #tpu.memory_space<vmem>>, vector<256x2048xbf16>
    %cst_25 = arith.constant dense<0.000000e+00> : vector<8x2048xf32>
    %36 = tpu.matmul %34, %35, %cst_25 {dimension_numbers = #tpu.dot_dimension_numbers<[1], [0], [0], [1], [0, 0, 1, 1], [], []>} : vector<8x256xbf16>, vector<256x2048xbf16>, vector<8x2048xf32> -> vector<8x2048xf32>
    %c0_26 = arith.constant 0 : index
    %c0_27 = arith.constant 0 : index
    %37 = vector.load %arg11[%c0_26, %c0_27] : memref<1x2048xf32, #tpu.memory_space<vmem>>, vector<1x2048xf32>
    %38 = vector.broadcast %37 : vector<1x2048xf32> to vector<8x2048xf32>
    %39 = arith.addf %36, %38 : vector<8x2048xf32>
    %cst_28 = arith.constant dense<0xFF800000> : vector<8xf32>
    %40 = vector.multi_reduction <maximumf>, %39, %cst_28 [1] : vector<8x2048xf32> to vector<8xf32>
    %41 = vector.shape_cast %40 : vector<8xf32> to vector<8x1xf32>
    %42 = vector.broadcast %41 : vector<8x1xf32> to vector<8x2048xf32>
    %43 = arith.subf %39, %42 : vector<8x2048xf32>
    %44 = math.exp %43 : vector<8x2048xf32>
    %cst_29 = arith.constant dense<0.000000e+00> : vector<8xf32>
    %45 = vector.multi_reduction <add>, %44, %cst_29 [1] : vector<8x2048xf32> to vector<8xf32>
    %46 = vector.shape_cast %45 : vector<8xf32> to vector<8x1xf32>
    %47 = math.log %46 : vector<8x1xf32>
    %48 = vector.broadcast %47 : vector<8x1xf32> to vector<8x2048xf32>
    %49 = arith.subf %43, %48 : vector<8x2048xf32>
    %50 = tpu.iota {dimensions = array<i32: 1>} : vector<8x2048xi32>
    %c1968_i32 = arith.constant 1968 : i32
    %51 = vector.broadcast %c1968_i32 : i32 to vector<8x2048xi32>
    %52 = arith.cmpi eq, %50, %51 : vector<8x2048xi32>
    %53 = vector.shape_cast %33 : vector<8x1xf32> to vector<8x1xf32>
    %54 = vector.broadcast %53 : vector<8x1xf32> to vector<8x2048xf32>
    %55 = arith.select %52, %54, %49 : vector<8x2048xi1>, vector<8x2048xf32>
    %c0_30 = arith.constant 0 : index
    %c0_31 = arith.constant 0 : index
    %56 = vector.load %arg12[%c0_30, %c0_31] : memref<8x2048xf32, #tpu.memory_space<vmem>>, vector<8x2048xf32>
    tpu.vector_store %arg12[%c0_30, %c0_31], %55 {strides = array<i32>} : memref<8x2048xf32, #tpu.memory_space<vmem>>, vector<8x2048xf32>,
    return
  }
  func.func @transform_0(%arg0: i32) -> (i32, i32) {
    %c0_i32 = arith.constant 0 : i32
    %c0_i32_0 = arith.constant 0 : i32
    return %arg0, %c0_i32 : i32, i32
  }
  func.func @transform_1(%arg0: i32) -> (i32, i32) {
    %c0_i32 = arith.constant 0 : i32
    %c0_i32_0 = arith.constant 0 : i32
    %c0_i32_1 = arith.constant 0 : i32
    return %c0_i32, %c0_i32_0 : i32, i32
  }
  func.func @transform_2(%arg0: i32) -> (i32, i32) {
    %c0_i32 = arith.constant 0 : i32
    %c0_i32_0 = arith.constant 0 : i32
    %c0_i32_1 = arith.constant 0 : i32
    return %c0_i32, %c0_i32_0 : i32, i32
  }
  func.func @transform_3(%arg0: i32) -> (i32, i32) {
    %c0_i32 = arith.constant 0 : i32
    %c0_i32_0 = arith.constant 0 : i32
    %c0_i32_1 = arith.constant 0 : i32
    return %c0_i32, %c0_i32_0 : i32, i32
  }
  func.func @transform_4(%arg0: i32) -> (i32, i32) {
    %c0_i32 = arith.constant 0 : i32
    %c0_i32_0 = arith.constant 0 : i32
    %c0_i32_1 = arith.constant 0 : i32
    return %c0_i32, %c0_i32_0 : i32, i32
  }
  func.func @transform_5(%arg0: i32) -> (i32, i32) {
    %c0_i32 = arith.constant 0 : i32
    %c0_i32_0 = arith.constant 0 : i32
    %c0_i32_1 = arith.constant 0 : i32
    return %c0_i32, %c0_i32_0 : i32, i32
  }
  func.func @transform_6(%arg0: i32) -> (i32, i32) {
    %c0_i32 = arith.constant 0 : i32
    %c0_i32_0 = arith.constant 0 : i32
    %c0_i32_1 = arith.constant 0 : i32
    return %c0_i32, %c0_i32_0 : i32, i32
  }
  func.func @transform_7(%arg0: i32) -> (i32, i32) {
    %c0_i32 = arith.constant 0 : i32
    %c0_i32_0 = arith.constant 0 : i32
    %c0_i32_1 = arith.constant 0 : i32
    return %c0_i32, %c0_i32_0 : i32, i32
  }
  func.func @transform_8(%arg0: i32) -> (i32, i32) {
    %c0_i32 = arith.constant 0 : i32
    %c0_i32_0 = arith.constant 0 : i32
    %c0_i32_1 = arith.constant 0 : i32
    return %c0_i32, %c0_i32_0 : i32, i32
  }
  func.func @transform_9(%arg0: i32) -> (i32, i32) {
    %c0_i32 = arith.constant 0 : i32
    %c0_i32_0 = arith.constant 0 : i32
    %c0_i32_1 = arith.constant 0 : i32
    return %c0_i32, %c0_i32_0 : i32, i32
  }
  func.func @transform_10(%arg0: i32) -> (i32, i32) {
    %c0_i32 = arith.constant 0 : i32
    %c0_i32_0 = arith.constant 0 : i32
    %c0_i32_1 = arith.constant 0 : i32
    return %c0_i32, %c0_i32_0 : i32, i32
  }
  func.func @transform_11(%arg0: i32) -> (i32, i32) {
    %c0_i32 = arith.constant 0 : i32
    %c0_i32_0 = arith.constant 0 : i32
    return %arg0, %c0_i32 : i32, i32
  }
}

</mosaic_0001>

<bundles_post_ra>
// kernel: forward.1
= control target key start
LH: loop header
LB: loop body
LE: loop exit
PB: predicated region body
PF: predicated region fallthrough
CT: control target
= control target key end

     0   :  { %16 = vsyncpa [#allocation3], 0  ;;  %s14725_s0 = inlined_call_operand.vmem [shape: f32[8,832], index: 0, kind: input, shape index: {}]   ;;  %s14726_s1 = inlined_call_operand.hbm [shape: bf16[832,512], index: 1, kind: input, shape index: {}]   ;;  %s14727_s2 = inlined_call_operand.vmem [shape: f32[1,512], index: 2, kind: input, shape index: {}]   ;;  %s14728_s3 = inlined_call_operand.vmem [shape: bf16[512,576], index: 3, kind: input, shape index: {}]   ;;  %s14729_s4 = inlined_call_operand.vmem [shape: f32[1,576], index: 4, kind: input, shape index: {}]   ;;  %s14730_s5 = inlined_call_operand.hbm [shape: bf16[576,512], index: 5, kind: input, shape index: {}]   ;;  %s14731_s6 = inlined_call_operand.vmem [shape: f32[1,512], index: 6, kind: input, shape index: {}]   ;;  %s14732_s7 = inlined_call_operand.hbm [shape: bf16[512,384], index: 7, kind: input, shape index: {}]   ;;  %s14733_s8 = inlined_call_operand.vmem [shape: f32[1,384], index: 8, kind: input, shape index: {}]   ;;  %s14734_s9 = inlined_call_operand.vmem [shape: bf16[256,2048], index: 9, kind: input, shape index: {}]   ;;  %s14735_s10 = inlined_call_operand.vmem [shape: f32[1,2048], index: 10, kind: input, shape index: {}]   ;;  %s14736_s11 = inlined_call_operand.vmem [shape: f32[8,2048], index: 11, kind: output, shape index: {}]  }
   0x1   :  { %17 = vsyncpa [#allocation5], 0  ;;  %s43_s19 = sshll.u32 %s14730_s5, 4  ;;  %s11605_s20 = smov [#allocation4]   ;;  %s44_s19 = int_to_ptr.hbm [resolvable:$true] %s43_s19 }
   0x2   :  { %s45_s21 = sshll.u32 %s11605_s20, 4  ;;  %s24_s24 = sshll.u32 %s14726_s1, 4  ;;  %s46_s21 = int_to_ptr.vmem [resolvable:$true] %s45_s21  ;;  %s25_s24 = int_to_ptr.hbm [resolvable:$true] %s24_s24 }
   0x3   :  { %s11606_s25 = smov 256   ;;  %s11607_s26 = smov 16  }
   0x4   :  { %51 = dma.hbm_to_vmem [thread:$0]  %s44_s19, 18432, %s46_s21, [#allocation5], %s11606_s25, %s11606_s25, %s11607_s26  }
   0x5   :  { %s11608_s27 = smov [#allocation2]   ;;  %s58_s12 = sshll.u32 %s14732_s7, 4  ;;  %s59_s12 = int_to_ptr.hbm [resolvable:$true] %s58_s12 }
   0x6   :  { %s26_s28 = sshll.u32 %s11608_s27, 4  ;;  %s11609_s5 = smov [#allocation6]   ;;  %s27_s28 = int_to_ptr.vmem [resolvable:$true] %s26_s28 }
   0x7   :  { %32 = dma.hbm_to_vmem [thread:$0]  %s25_s24, 26624, %s27_s28, [#allocation3], %s11606_s25, %s11606_s25, %s11607_s26  }
   0x8   :  { %s60_s13 = sshll.u32 %s11609_s5, 4  ;;  %s11610_s14 = smov 192   ;;  %s61_s13 = int_to_ptr.vmem [resolvable:$true] %s60_s13 }
   0x9   :  { %s11611_s15 = smov 12  }
   0xa   :  { %66 = dma.hbm_to_vmem [thread:$0]  %s59_s12, 12288, %s61_s13, [#allocation5], %s11610_s14, %s11610_s14, %s11611_s15  }
   0xb   :  { %11601 = dma.done.wait [#allocation3], 26624  }
   0xc   :  { %11602 = vsyncadd [#allocation3], 4294940672 }
   0xd   :  { %11603 = dma.done.wait [#allocation5], 30720  }
   0xe   :  { %11604 = vsyncadd [#allocation5], 4294936576  ;;  %v7268_v0 = vld [vmem:[#allocation2 + $0xe0] sm:$0xf]  ;;  %v10648_v1 = vld [vmem:[#allocation2 + $0xec] sm:$0xf0] }
   0xf   :  { %v7396_v2 = vld [vmem:[#allocation2 + $0x1e0] sm:$0xf]  ;;  %v7269_v3 = vor.u32 %v10648_v1, %v7268_v0  ;;  %v10680_v4 = vld [vmem:[#allocation2 + $0x1ec] sm:$0xf0]  ;;  %vm1358_vm0 = vcmask 523264  }
  0x10   :  { %v7524_v5 = vld [vmem:[#allocation2 + $0x2e0] sm:$0xf]  ;;  %v10712_v6 = vld [vmem:[#allocation2 + $0x2ec] sm:$0xf0]  ;;  %v7397_v7 = vor.u32 %v10680_v4, %v7396_v2 }
  0x11   :  { %v7525_v8 = vor.u32 %v10712_v6, %v7524_v5  ;;  %v7652_v9 = vld [vmem:[#allocation2 + $0x3e0] sm:$0xf]  ;;  %v10744_v10 = vld [vmem:[#allocation2 + $0x3ec] sm:$0xf0]  ;;  %1362 = vmatpush.bf16.msra.mxu0 %v7269_v3 }
  0x12   :  { %v7252_v11 = vld [vmem:[#allocation2 + $0xc0] sm:$0xf]  ;;  %v7653_v12 = vor.u32 %v10744_v10, %v7652_v9  ;;  %v10644_v13 = vld [vmem:[#allocation2 + $0xcc] sm:$0xf0]  ;;  %1375 = vmatpush.bf16.msra.mxu1 %v7397_v7 }
  0x13   :  { %v7380_v14 = vld [vmem:[#allocation2 + $0x1c0] sm:$0xf]  ;;  %v10676_v15 = vld [vmem:[#allocation2 + $0x1cc] sm:$0xf0]  ;;  %1388 = vmatpush.bf16.msra.mxu2 %v7525_v8  ;;  %v7253_v16 = vor.u32 %v10644_v13, %v7252_v11 }
  0x14   :  { %v7381_v17 = vor.u32 %v10676_v15, %v7380_v14  ;;  %v7508_v18 = vld [vmem:[#allocation2 + $0x2c0] sm:$0xf]  ;;  %v10708_v19 = vld [vmem:[#allocation2 + $0x2cc] sm:$0xf0]  ;;  %1401 = vmatpush.bf16.msra.mxu3 %v7653_v12 }
  0x15   :  { %v7636_v20 = vld [vmem:[#allocation2 + $0x3c0] sm:$0xf]  ;;  %v7509_v21 = vor.u32 %v10708_v19, %v7508_v18  ;;  %v10740_v22 = vld [vmem:[#allocation2 + $0x3cc] sm:$0xf0]  ;;  %1363 = vmatpush.bf16.msra.mxu0 %v7253_v16 }
  0x16   :  { %v7236_v23 = vld [vmem:[#allocation2 + $0xa0] sm:$0xf]  ;;  %v10640_v24 = vld [vmem:[#allocation2 + $0xac] sm:$0xf0]  ;;  %v7637_v25 = vor.u32 %v10740_v22, %v7636_v20  ;;  %1376 = vmatpush.bf16.msra.mxu1 %v7381_v17 }
  0x17   :  { %v7364_v26 = vld [vmem:[#allocation2 + $0x1a0] sm:$0xf]  ;;  %v10672_v27 = vld [vmem:[#allocation2 + $0x1ac] sm:$0xf0]  ;;  %v7237_v29 = vor.u32 %v10640_v24, %v7236_v23  ;;  %1389 = vmatpush.bf16.msra.mxu2 %v7509_v21 }
  0x18   :  { %v7492_v28 = vld [vmem:[#allocation2 + $0x2a0] sm:$0xf]  ;;  %v10704_v30 = vld [vmem:[#allocation2 + $0x2ac] sm:$0xf0]  ;;  %v7365_v33 = vor.u32 %v10672_v27, %v7364_v26  ;;  %1402 = vmatpush.bf16.msra.mxu3 %v7637_v25 }
  0x19   :  { %v7620_v31 = vld [vmem:[#allocation2 + $0x3a0] sm:$0xf]  ;;  %v10736_v32 = vld [vmem:[#allocation2 + $0x3ac] sm:$0xf0]  ;;  %v7493_v34 = vor.u32 %v10704_v30, %v7492_v28  ;;  %1364 = vmatpush.bf16.msra.mxu0 %v7237_v29 }
  0x1a   :  { %v7220_v35 = vld [vmem:[#allocation2 + $0x80] sm:$0xf]  ;;  %v10636_v36 = vld [vmem:[#allocation2 + $0x8c] sm:$0xf0]  ;;  %v7621_v38 = vor.u32 %v10736_v32, %v7620_v31  ;;  %1377 = vmatpush.bf16.msra.mxu1 %v7365_v33 }
  0x1b   :  { %v7348_v37 = vld [vmem:[#allocation2 + $0x180] sm:$0xf]  ;;  %v10668_v39 = vld [vmem:[#allocation2 + $0x18c] sm:$0xf0]  ;;  %v7221_v44 = vor.u32 %v10636_v36, %v7220_v35  ;;  %1390 = vmatpush.bf16.msra.mxu2 %v7493_v34 }
  0x1c   :  { %v7476_v40 = vld [vmem:[#allocation2 + $0x280] sm:$0xf]  ;;  %v10700_v41 = vld [vmem:[#allocation2 + $0x28c] sm:$0xf0]  ;;  %v7349_v45 = vor.u32 %v10668_v39, %v7348_v37  ;;  %1403 = vmatpush.bf16.msra.mxu3 %v7621_v38  ;;  %v10646_v37 = vld [vmem:[#allocation2 + $0xe4] sm:$0xf] }
  0x1d   :  { %v7604_v42 = vld [vmem:[#allocation2 + $0x380] sm:$0xf]  ;;  %v10732_v43 = vld [vmem:[#allocation2 + $0x38c] sm:$0xf0]  ;;  %v7477_v46 = vor.u32 %v10700_v41, %v7476_v40  ;;  %1365 = vmatpush.bf16.msra.mxu0 %v7221_v44  ;;  %v7270_v38 = vld [vmem:[#allocation2 + $0xf0] sm:$0xf0] }
  0x1e   :  { %v7204_v47 = vld [vmem:[#allocation2 + $0x60] sm:$0xf]  ;;  %v10632_v48 = vld [vmem:[#allocation2 + $0x6c] sm:$0xf0]  ;;  %v7605_v50 = vor.u32 %v10732_v43, %v7604_v42  ;;  %1378 = vmatpush.bf16.msra.mxu1 %v7349_v45 }
  0x1f   :  { %v7332_v49 = vld [vmem:[#allocation2 + $0x160] sm:$0xf]  ;;  %v10664_v51 = vld [vmem:[#allocation2 + $0x16c] sm:$0xf0]  ;;  %v7205_v56 = vor.u32 %v10632_v48, %v7204_v47  ;;  %1391 = vmatpush.bf16.msra.mxu2 %v7477_v46  ;;  %v7273_v47 = vor.u32 %v10646_v37, %v7270_v38 }
  0x20   :  { %v7460_v52 = vld [vmem:[#allocation2 + $0x260] sm:$0xf]  ;;  %v10696_v53 = vld [vmem:[#allocation2 + $0x26c] sm:$0xf0]  ;;  %v7333_v57 = vor.u32 %v10664_v51, %v7332_v49  ;;  %1404 = vmatpush.bf16.msra.mxu3 %v7605_v50 }
  0x21   :  { %v7588_v54 = vld [vmem:[#allocation2 + $0x360] sm:$0xf]  ;;  %v10728_v55 = vld [vmem:[#allocation2 + $0x36c] sm:$0xf0]  ;;  %v7461_v58 = vor.u32 %v10696_v53, %v7460_v52  ;;  %1366 = vmatpush.bf16.msra.mxu0 %v7205_v56  ;;  %v10642_v52 = vld [vmem:[#allocation2 + $0xc4] sm:$0xf] }
  0x22   :  { %v7188_v59 = vld [vmem:[#allocation2 + $0x40] sm:$0xf]  ;;  %v10628_v60 = vld [vmem:[#allocation2 + $0x4c] sm:$0xf0]  ;;  %v7589_v62 = vor.u32 %v10728_v55, %v7588_v54  ;;  %1379 = vmatpush.bf16.msra.mxu1 %v7333_v57  ;;  %v7254_v53 = vld [vmem:[#allocation2 + $0xd0] sm:$0xf0] }
  0x23   :  { %v7316_v61 = vld [vmem:[#allocation2 + $0x140] sm:$0xf]  ;;  %v10660_v63 = vld [vmem:[#allocation2 + $0x14c] sm:$0xf0]  ;;  %v7189_v4 = vor.u32 %v10628_v60, %v7188_v59  ;;  %1392 = vmatpush.bf16.msra.mxu2 %v7461_v58 }
  0x24   :  { %v7444_v0 = vld [vmem:[#allocation2 + $0x240] sm:$0xf]  ;;  %v10692_v1 = vld [vmem:[#allocation2 + $0x24c] sm:$0xf0]  ;;  %v7317_v5 = vor.u32 %v10660_v63, %v7316_v61  ;;  %1405 = vmatpush.bf16.msra.mxu3 %v7589_v62  ;;  %v7257_v63 = vor.u32 %v10642_v52, %v7254_v53 }
  0x25   :  { %v7572_v2 = vld [vmem:[#allocation2 + $0x340] sm:$0xf]  ;;  %v10724_v3 = vld [vmem:[#allocation2 + $0x34c] sm:$0xf0]  ;;  %v7445_v6 = vor.u32 %v10692_v1, %v7444_v0  ;;  %1367 = vmatpush.bf16.msra.mxu0 %v7189_v4  ;;  %v7238_v4 = vld [vmem:[#allocation2 + $0xb0] sm:$0xf0] }
  0x26   :  { %v7172_v7 = vld [vmem:[#allocation2 + $0x20] sm:$0xf]  ;;  %v10624_v8 = vld [vmem:[#allocation2 + $0x2c] sm:$0xf0]  ;;  %v7573_v10 = vor.u32 %v10724_v3, %v7572_v2  ;;  %1380 = vmatpush.bf16.msra.mxu1 %v7317_v5  ;;  %v87_v2 = vld [vmem:[%s14725_s0 + $0x8] sm:$0xff] }
  0x27   :  { %v7300_v9 = vld [vmem:[#allocation2 + $0x120] sm:$0xf]  ;;  %v10656_v11 = vld [vmem:[#allocation2 + $0x12c] sm:$0xf0]  ;;  %v7173_v16 = vor.u32 %v10624_v8, %v7172_v7  ;;  %1393 = vmatpush.bf16.msra.mxu2 %v7445_v6  ;;  %v10638_v3 = vld [vmem:[#allocation2 + $0xa4] sm:$0xf]  ;;  %v11697_v5 = vpack.c.bf16 %v87_v2, %v87_v2 }
  0x28   :  { %v7428_v12 = vld [vmem:[#allocation2 + $0x220] sm:$0xf]  ;;  %v10688_v13 = vld [vmem:[#allocation2 + $0x22c] sm:$0xf0]  ;;  %v7301_v19 = vor.u32 %v10656_v11, %v7300_v9  ;;  %1406 = vmatpush.bf16.msra.mxu3 %v7573_v10  ;;  %v89_v6 = vld [vmem:[%s14725_s0 + $0x18] sm:$0xff] }
  0x29   :  { %v7556_v14 = vld [vmem:[#allocation2 + $0x320] sm:$0xf]  ;;  %v10720_v15 = vld [vmem:[#allocation2 + $0x32c] sm:$0xf0]  ;;  %v7429_v20 = vor.u32 %v10688_v13, %v7428_v12  ;;  %1368 = vmatpush.bf16.msra.mxu0 %v7173_v16  ;;  %v11702_v9 = vpack.c.bf16 %v89_v6, %v89_v6  ;;  %v10618_v6 = vld [vmem:[#allocation2 + $0x4] sm:$0xf] }
  0x2a   :  { %v7156_v17 = vld [vmem:[#allocation2] sm:$0xf]  ;;  %v10620_v18 = vld [vmem:[#allocation2 + $0xc] sm:$0xf0]  ;;  %v7557_v24 = vor.u32 %v10720_v15, %v7556_v14  ;;  %1381 = vmatpush.bf16.msra.mxu1 %v7301_v19  ;;  %v7241_v15 = vor.u32 %v10638_v3, %v7238_v4  ;;  %v7222_v19 = vld [vmem:[#allocation2 + $0x90] sm:$0xf0] }
  0x2b   :  { %v7284_v21 = vld [vmem:[#allocation2 + $0x100] sm:$0xf]  ;;  %v10652_v22 = vld [vmem:[#allocation2 + $0x10c] sm:$0xf0]  ;;  %v7157_v31 = vor.u32 %v10620_v18, %v7156_v17  ;;  %1394 = vmatpush.bf16.msra.mxu2 %v7429_v20  ;;  %v10634_v18 = vld [vmem:[#allocation2 + $0x84] sm:$0xf] }
  0x2c   :  { %v7412_v23 = vld [vmem:[#allocation2 + $0x200] sm:$0xf]  ;;  %v10684_v25 = vld [vmem:[#allocation2 + $0x20c] sm:$0xf0]  ;;  %v7285_v35 = vor.u32 %v10652_v22, %v7284_v21  ;;  %1407 = vmatpush.bf16.msra.mxu3 %v7557_v24  ;;  %v10678_v20 = vld [vmem:[#allocation2 + $0x1e4] sm:$0xf] }
  0x2d   :  { %v7540_v26 = vld [vmem:[#allocation2 + $0x300] sm:$0xf]  ;;  %v10716_v27 = vld [vmem:[#allocation2 + $0x30c] sm:$0xf0]  ;;  %v7413_v36 = vor.u32 %v10684_v25, %v7412_v23  ;;  %1369 = vmatpush.bf16.msra.mxu0 %v7157_v31  ;;  %v7398_v21 = vld [vmem:[#allocation2 + $0x1f0] sm:$0xf0] }
  0x2e   :  { %v7780_v28 = vld [vmem:[#allocation2 + $0x4e0] sm:$0xf]  ;;  %v10776_v29 = vld [vmem:[#allocation2 + $0x4ec] sm:$0xf0]  ;;  %v7541_v39 = vor.u32 %v10716_v27, %v7540_v26  ;;  %1382 = vmatpush.bf16.msra.mxu1 %v7285_v35  ;;  %v7225_v27 = vor.u32 %v10634_v18, %v7222_v19  ;;  %v10630_v31 = vld [vmem:[#allocation2 + $0x64] sm:$0xf] }
  0x2f   :  { %v7908_v30 = vld [vmem:[#allocation2 + $0x5e0] sm:$0xf]  ;;  %v10808_v32 = vld [vmem:[#allocation2 + $0x5ec] sm:$0xf0]  ;;  %v7781_v40 = vor.u32 %v10776_v29, %v7780_v28  ;;  %1395 = vmatpush.bf16.msra.mxu2 %v7413_v36  ;;  %v7401_v28 = vor.u32 %v10678_v20, %v7398_v21  ;;  %v10774_v18 = vld [vmem:[#allocation2 + $0x4e4] sm:$0xf] }
  0x30   :  { %v7972_v33 = vld [vmem:[#allocation2 + $0x660] sm:$0xf]  ;;  %v10824_v34 = vld [vmem:[#allocation2 + $0x66c] sm:$0xf0]  ;;  %v7909_v42 = vor.u32 %v10808_v32, %v7908_v30  ;;  %1408 = vmatpush.bf16.msra.mxu3 %v7541_v39  ;;  %v7206_v32 = vld [vmem:[#allocation2 + $0x70] sm:$0xf0] }
  0x31   :  { %v88_v41 = vld [vmem:[%s14725_s0 + $0x10] sm:$0xff]  ;;  %v7973_v43 = vor.u32 %v10824_v34, %v7972_v33  ;;  %v7764_v44 = vld [vmem:[#allocation2 + $0x4c0] sm:$0xf]  ;;  %1414 = vmatpush.bf16.msrb.mxu0 %v7781_v40  ;;  %1383 = vmatmul.bf16.vlgmr.msra.gmra.mxu1 %v11697_v5  ;;  %v10674_v33 = vld [vmem:[#allocation2 + $0x1c4] sm:$0xf]  ;;  %v7209_v40 = vor.u32 %v10630_v31, %v7206_v32 }
  0x32   :  { %v10772_v45 = vld [vmem:[#allocation2 + $0x4cc] sm:$0xf0]  ;;  %v7892_v46 = vld [vmem:[#allocation2 + $0x5c0] sm:$0xf]  ;;  %v11685_v51 = vpack.c.bf16 %v88_v41, %v88_v41  ;;  %1427 = vmatpush.bf16.msrb.mxu1 %v7909_v42  ;;  %v7382_v34 = vld [vmem:[#allocation2 + $0x1d0] sm:$0xf0] }
  0x33   :  { %v10804_v48 = vld [vmem:[#allocation2 + $0x5cc] sm:$0xf0]  ;;  %v7956_v49 = vld [vmem:[#allocation2 + $0x640] sm:$0xf]  ;;  %v7765_v54 = vor.u32 %v10772_v45, %v7764_v44  ;;  %1444 = vmatpush.bf16.msrb.mxu2 %v7973_v43  ;;  %1409 = vmatmul.bf16.vlgmr.msra.gmra.mxu3 %v11702_v9  ;;  %v7385_v41 = vor.u32 %v10674_v33, %v7382_v34  ;;  %v10626_v44 = vld [vmem:[#allocation2 + $0x44] sm:$0xf] }
  0x34   :  { %v10820_v50 = vld [vmem:[#allocation2 + $0x64c] sm:$0xf0]  ;;  %v7748_v55 = vld [vmem:[#allocation2 + $0x4a0] sm:$0xf]  ;;  %v7893_v57 = vor.u32 %v10804_v48, %v7892_v46  ;;  %1453 = vmatpush.bf16.msrb.mxu3 %v7273_v47  ;;  %1396 = vmatmul.bf16.vlgmr.msra.gmra.mxu2 %v11685_v51  ;;  %v7190_v45 = vld [vmem:[#allocation2 + $0x50] sm:$0xf0] }
  0x35   :  { %v86_v56 = vld [vmem:[%s14725_s0] sm:$0xff]  ;;  %v7957_v58 = vor.u32 %v10820_v50, %v7956_v49  ;;  %v10768_v59 = vld [vmem:[#allocation2 + $0x4ac] sm:$0xf0]  ;;  %1415 = vmatpush.bf16.msrb.mxu0 %v7765_v54  ;;  %v7366_v47 = vld [vmem:[#allocation2 + $0x1b0] sm:$0xf0]  ;;  %v7193_v54 = vor.u32 %v10626_v44, %v7190_v45 }
  0x36   :  { %v7876_v60 = vld [vmem:[#allocation2 + $0x5a0] sm:$0xf]  ;;  %v10800_v61 = vld [vmem:[#allocation2 + $0x5ac] sm:$0xf0]  ;;  %v11690_v62 = vpack.c.bf16 %v86_v56, %v86_v56  ;;  %v7749_v7 = vor.u32 %v10768_v59, %v7748_v55  ;;  %1428 = vmatpush.bf16.msrb.mxu1 %v7893_v57  ;;  %v10670_v46 = vld [vmem:[#allocation2 + $0x1a4] sm:$0xf] }
  0x37   :  { %v7940_v0 = vld [vmem:[#allocation2 + $0x620] sm:$0xf]  ;;  %v10816_v1 = vld [vmem:[#allocation2 + $0x62c] sm:$0xf0]  ;;  %1445 = vmatpush.bf16.msrb.mxu2 %v7957_v58  ;;  %v7877_v10 = vor.u32 %v10800_v61, %v7876_v60  ;;  %v7369_v55 = vor.u32 %v10670_v46, %v7366_v47  ;;  %v10622_v58 = vld [vmem:[#allocation2 + $0x24] sm:$0xf] }
  0x38   :  { %1370 = vmatmul.bf16.vlgmr.msra.gmra.mxu0 %v11690_v62  ;;  %v7732_v8 = vld [vmem:[#allocation2 + $0x480] sm:$0xf]  ;;  %v7941_v11 = vor.u32 %v10816_v1, %v7940_v0  ;;  %v10764_v12 = vld [vmem:[#allocation2 + $0x48c] sm:$0xf0]  ;;  %1454 = vmatpush.bf16.msrb.mxu3 %v7257_v63  ;;  %v7174_v59 = vld [vmem:[#allocation2 + $0x30] sm:$0xf0] }
  0x39   :  { %v7860_v13 = vld [vmem:[#allocation2 + $0x580] sm:$0xf]  ;;  %v10796_v14 = vld [vmem:[#allocation2 + $0x58c] sm:$0xf0]  ;;  %1416 = vmatpush.bf16.msrb.mxu0 %v7749_v7  ;;  %v7733_v22 = vor.u32 %v10764_v12, %v7732_v8  ;;  %v10666_v60 = vld [vmem:[#allocation2 + $0x184] sm:$0xf]  ;;  %v7177_v7 = vor.u32 %v10622_v58, %v7174_v59 }
  0x3a   :  { %v7924_v16 = vld [vmem:[#allocation2 + $0x600] sm:$0xf]  ;;  %v10812_v17 = vld [vmem:[#allocation2 + $0x60c] sm:$0xf0]  ;;  %1429 = vmatpush.bf16.msrb.mxu1 %v7877_v10  ;;  %v7861_v23 = vor.u32 %v10796_v14, %v7860_v13  ;;  %v7350_v61 = vld [vmem:[#allocation2 + $0x190] sm:$0xf0] }
  0x3b   :  { %1446 = vmatpush.bf16.msrb.mxu2 %v7941_v11  ;;  %v7925_v24 = vor.u32 %v10812_v17, %v7924_v16  ;;  %v7716_v25 = vld [vmem:[#allocation2 + $0x460] sm:$0xf]  ;;  %v10760_v26 = vld [vmem:[#allocation2 + $0x46c] sm:$0xf0]  ;;  %v7353_v8 = vor.u32 %v10666_v60, %v7350_v61  ;;  %v7158_v10 = vld [vmem:[#allocation2 + $0x10] sm:$0xf0] }
  0x3c   :  { %1455 = vmatpush.bf16.msrb.mxu3 %v7241_v15  ;;  %v7844_v29 = vld [vmem:[#allocation2 + $0x560] sm:$0xf]  ;;  %v10792_v30 = vld [vmem:[#allocation2 + $0x56c] sm:$0xf0]  ;;  %v7717_v35 = vor.u32 %v10760_v26, %v7716_v25  ;;  %v10710_v11 = vld [vmem:[#allocation2 + $0x2e4] sm:$0xf] }
  0x3d   :  { %1417 = vmatpush.bf16.msrb.mxu0 %v7733_v22  ;;  %v92_v36 = vld [vmem:[%s14725_s0 + $0x30] sm:$0xff]  ;;  %v7845_v37 = vor.u32 %v10792_v30, %v7844_v29  ;;  %v7700_v38 = vld [vmem:[#allocation2 + $0x440] sm:$0xf]  ;;  %v10662_v13 = vld [vmem:[#allocation2 + $0x164] sm:$0xf] }
  0x3e   :  { %1430 = vmatpush.bf16.msrb.mxu1 %v7861_v23  ;;  %v10756_v39 = vld [vmem:[#allocation2 + $0x44c] sm:$0xf0]  ;;  %v7828_v42 = vld [vmem:[#allocation2 + $0x540] sm:$0xf]  ;;  %v11709_v48 = vpack.c.bf16 %v92_v36, %v92_v36  ;;  %v7526_v12 = vld [vmem:[#allocation2 + $0x2f0] sm:$0xf0] }
  0x3f   :  { %1447 = vmatpush.bf16.msrb.mxu2 %v7925_v24  ;;  %v10788_v43 = vld [vmem:[#allocation2 + $0x54c] sm:$0xf0]  ;;  %v7701_v49 = vor.u32 %v10756_v39, %v7700_v38  ;;  %v7684_v52 = vld [vmem:[#allocation2 + $0x420] sm:$0xf]  ;;  %v7334_v14 = vld [vmem:[#allocation2 + $0x170] sm:$0xf0]  ;;  %v7529_v21 = vor.u32 %v10710_v11, %v7526_v12  ;;  %v7161_v24 = vor.u32 %v10618_v6, %v7158_v10 }
  0x40   :  { %1456 = vmatpush.bf16.msrb.mxu3 %v7225_v27  ;;  %v7829_v50 = vor.u32 %v10788_v43, %v7828_v42  ;;  %v10752_v53 = vld [vmem:[#allocation2 + $0x42c] sm:$0xf0]  ;;  %v7812_v56 = vld [vmem:[#allocation2 + $0x520] sm:$0xf]  ;;  %v10742_v15 = vld [vmem:[#allocation2 + $0x3e4] sm:$0xf]  ;;  %v7337_v25 = vor.u32 %v10662_v13, %v7334_v14 }
  0x41   :  { %1418 = vmatpush.bf16.msrb.mxu0 %v7717_v35  ;;  %v10784_v57 = vld [vmem:[#allocation2 + $0x52c] sm:$0xf0]  ;;  %v7685_v63 = vor.u32 %v10752_v53, %v7684_v52  ;;  %v7668_v0 = vld [vmem:[#allocation2 + $0x400] sm:$0xf]  ;;  %v7654_v17 = vld [vmem:[#allocation2 + $0x3f0] sm:$0xf0] }
  0x42   :  { %1431 = vmatpush.bf16.msrb.mxu1 %v7845_v37  ;;  %v10748_v1 = vld [vmem:[#allocation2 + $0x40c] sm:$0xf0]  ;;  %v7813_v2 = vor.u32 %v10784_v57, %v7812_v56  ;;  %v7796_v3 = vld [vmem:[#allocation2 + $0x500] sm:$0xf]  ;;  %v7782_v19 = vld [vmem:[#allocation2 + $0x4f0] sm:$0xf0] }
  0x43   :  { %1466 = vmatpush.bf16.msra.mxu2 %v7401_v28  ;;  %v10780_v4 = vld [vmem:[#allocation2 + $0x50c] sm:$0xf0]  ;;  %v7669_v16 = vor.u32 %v10748_v1, %v7668_v0  ;;  %v90_v22 = vld [vmem:[%s14725_s0 + $0x20] sm:$0xff]  ;;  %v91_v23 = vld [vmem:[%s14725_s0 + $0x28] sm:$0xff]  ;;  %v7657_v28 = vor.u32 %v10742_v15, %v7654_v17  ;;  %v7785_v29 = vor.u32 %v10774_v18, %v7782_v19 }
  0x44   :  { %1457 = vmatpush.bf16.msrb.mxu3 %v7209_v40  ;;  %7986 = vmatmul.msk.bf16.vlgmr.msrb.gmra.mxu2 %vm1358_vm0, %v11709_v48  ;;  %v7797_v20 = vor.u32 %v10780_v4, %v7796_v3  ;;  %v10706_v26 = vld [vmem:[#allocation2 + $0x2c4] sm:$0xf]  ;;  %v7510_v27 = vld [vmem:[#allocation2 + $0x2d0] sm:$0xf0]  ;;  %v11719_v33 = vpack.c.bf16 %v90_v22, %v90_v22  ;;  %v11721_v34 = vpack.c.bf16 %v91_v23, %v91_v23 }
  0x45   :  { %1419 = vmatpush.bf16.msrb.mxu0 %v7701_v49  ;;  %v10658_v30 = vld [vmem:[#allocation2 + $0x144] sm:$0xf]  ;;  %v7318_v31 = vld [vmem:[#allocation2 + $0x150] sm:$0xf0]  ;;  %v7513_v38 = vor.u32 %v10706_v26, %v7510_v27 }
  0x46   :  { %1432 = vmatpush.bf16.msrb.mxu1 %v7829_v50  ;;  %v10738_v32 = vld [vmem:[#allocation2 + $0x3c4] sm:$0xf]  ;;  %v7638_v35 = vld [vmem:[#allocation2 + $0x3d0] sm:$0xf0]  ;;  %v7321_v39 = vor.u32 %v10658_v30, %v7318_v31 }
  0x47   :  { %1467 = vmatpush.bf16.msra.mxu2 %v7385_v41  ;;  %v10770_v36 = vld [vmem:[#allocation2 + $0x4c4] sm:$0xf]  ;;  %v7766_v37 = vld [vmem:[#allocation2 + $0x4d0] sm:$0xf0]  ;;  %v7641_v42 = vor.u32 %v10738_v32, %v7638_v35 }
  0x48   :  { %1458 = vmatpush.bf16.msrb.mxu3 %v7193_v54  ;;  %v10702_v40 = vld [vmem:[#allocation2 + $0x2a4] sm:$0xf]  ;;  %v7494_v41 = vld [vmem:[#allocation2 + $0x2b0] sm:$0xf0]  ;;  %v7769_v43 = vor.u32 %v10770_v36, %v7766_v37 }
  0x49   :  { %1420 = vmatpush.bf16.msrb.mxu0 %v7685_v63  ;;  %v10654_v44 = vld [vmem:[#allocation2 + $0x124] sm:$0xf]  ;;  %v7302_v45 = vld [vmem:[#allocation2 + $0x130] sm:$0xf0]  ;;  %v7497_v52 = vor.u32 %v10702_v40, %v7494_v41 }
  0x4a   :  { %1433 = vmatpush.bf16.msrb.mxu1 %v7813_v2  ;;  %v10734_v46 = vld [vmem:[#allocation2 + $0x3a4] sm:$0xf]  ;;  %v7622_v47 = vld [vmem:[#allocation2 + $0x3b0] sm:$0xf0]  ;;  %v7305_v53 = vor.u32 %v10654_v44, %v7302_v45 }
  0x4b   :  { %1468 = vmatpush.bf16.msra.mxu2 %v7369_v55  ;;  %v10766_v49 = vld [vmem:[#allocation2 + $0x4a4] sm:$0xf]  ;;  %v7750_v50 = vld [vmem:[#allocation2 + $0x4b0] sm:$0xf0]  ;;  %v7625_v56 = vor.u32 %v10734_v46, %v7622_v47 }
  0x4c   :  { %1459 = vmatpush.bf16.msrb.mxu3 %v7177_v7  ;;  %v10698_v54 = vld [vmem:[#allocation2 + $0x284] sm:$0xf]  ;;  %v7478_v55 = vld [vmem:[#allocation2 + $0x290] sm:$0xf0]  ;;  %v7753_v57 = vor.u32 %v10766_v49, %v7750_v50 }
  0x4d   :  { %1421 = vmatpush.bf16.msrb.mxu0 %v7669_v16  ;;  %v10650_v58 = vld [vmem:[#allocation2 + $0x104] sm:$0xf]  ;;  %v7286_v59 = vld [vmem:[#allocation2 + $0x110] sm:$0xf0]  ;;  %v7481_v1 = vor.u32 %v10698_v54, %v7478_v55 }
  0x4e   :  { %1434 = vmatpush.bf16.msrb.mxu1 %v7797_v20  ;;  %v10730_v60 = vld [vmem:[#allocation2 + $0x384] sm:$0xf]  ;;  %v7606_v61 = vld [vmem:[#allocation2 + $0x390] sm:$0xf0]  ;;  %v7289_v4 = vor.u32 %v10650_v58, %v7286_v59 }
  0x4f   :  { %1469 = vmatpush.bf16.msra.mxu2 %v7353_v8  ;;  %v10762_v63 = vld [vmem:[#allocation2 + $0x484] sm:$0xf]  ;;  %v7734_v0 = vld [vmem:[#allocation2 + $0x490] sm:$0xf0]  ;;  %v7609_v8 = vor.u32 %v10730_v60, %v7606_v61  ;;  %v7276_v61 = vld [vmem:[#allocation2 + $0xe8] sm:$0xf] }
  0x50   :  { %1460 = vmatpush.bf16.msrb.mxu3 %v7161_v24  ;;  %1422 = vmatmul.bf16.vlgmr.msrb.gmra.mxu0 %v11719_v33  ;;  %v10806_v2 = vld [vmem:[#allocation2 + $0x5e4] sm:$0xf]  ;;  %v7910_v3 = vld [vmem:[#allocation2 + $0x5f0] sm:$0xf0]  ;;  %v7737_v10 = vor.u32 %v10762_v63, %v7734_v0  ;;  %v10649_v63 = vld [vmem:[#allocation2 + $0xf4] sm:$0xf0] }
  0x51   :  { %1479 = vmatpush.bf16.msra.mxu0 %v7529_v21  ;;  %1435 = vmatmul.bf16.vlgmr.msrb.gmra.mxu1 %v11721_v34  ;;  %v10694_v6 = vld [vmem:[#allocation2 + $0x264] sm:$0xf]  ;;  %v7462_v7 = vld [vmem:[#allocation2 + $0x270] sm:$0xf0]  ;;  %v7913_v12 = vor.u32 %v10806_v2, %v7910_v3  ;;  %v10681_v2 = vld [vmem:[#allocation2 + $0x1f4] sm:$0xf0] }
  0x52   :  { %1492 = vmatpush.bf16.msra.mxu1 %v7657_v28  ;;  %v10726_v11 = vld [vmem:[#allocation2 + $0x364] sm:$0xf]  ;;  %v7590_v13 = vld [vmem:[#allocation2 + $0x370] sm:$0xf0]  ;;  %v7465_v16 = vor.u32 %v10694_v6, %v7462_v7 }
  0x53   :  { %1470 = vmatpush.bf16.msra.mxu2 %v7337_v25  ;;  %1461 = vmatmul.bf16.vlgmr.msrb.gmra.mxu3 %v11690_v62  ;;  %v10758_v14 = vld [vmem:[#allocation2 + $0x464] sm:$0xf]  ;;  %v7718_v15 = vld [vmem:[#allocation2 + $0x470] sm:$0xf0]  ;;  %v7593_v21 = vor.u32 %v10726_v11, %v7590_v13 }
  0x54   :  { %1505 = vmatpush.bf16.msra.mxu3 %v7785_v29  ;;  %v10802_v17 = vld [vmem:[#allocation2 + $0x5c4] sm:$0xf]  ;;  %v7894_v18 = vld [vmem:[#allocation2 + $0x5d0] sm:$0xf0]  ;;  %v7721_v22 = vor.u32 %v10758_v14, %v7718_v15  ;;  %v7260_v14 = vld [vmem:[#allocation2 + $0xc8] sm:$0xf] }
  0x55   :  { %1480 = vmatpush.bf16.msra.mxu0 %v7513_v38  ;;  %v10690_v19 = vld [vmem:[#allocation2 + $0x244] sm:$0xf]  ;;  %v7446_v20 = vld [vmem:[#allocation2 + $0x250] sm:$0xf0]  ;;  %v7897_v24 = vor.u32 %v10802_v17, %v7894_v18  ;;  %v10645_v15 = vld [vmem:[#allocation2 + $0xd4] sm:$0xf0] }
  0x56   :  { %1493 = vmatpush.bf16.msra.mxu1 %v7641_v42  ;;  %v10722_v23 = vld [vmem:[#allocation2 + $0x344] sm:$0xf]  ;;  %v7574_v25 = vld [vmem:[#allocation2 + $0x350] sm:$0xf0]  ;;  %v7449_v28 = vor.u32 %v10690_v19, %v7446_v20  ;;  %v7388_v17 = vld [vmem:[#allocation2 + $0x1c8] sm:$0xf] }
  0x57   :  { %1471 = vmatpush.bf16.msra.mxu2 %v7321_v39  ;;  %v10754_v26 = vld [vmem:[#allocation2 + $0x444] sm:$0xf]  ;;  %v7702_v27 = vld [vmem:[#allocation2 + $0x450] sm:$0xf0]  ;;  %v7577_v35 = vor.u32 %v10722_v23, %v7574_v25  ;;  %v10677_v18 = vld [vmem:[#allocation2 + $0x1d4] sm:$0xf0] }
  0x58   :  { %1506 = vmatpush.bf16.msra.mxu3 %v7769_v43  ;;  %v10798_v29 = vld [vmem:[#allocation2 + $0x5a4] sm:$0xf]  ;;  %v7878_v30 = vld [vmem:[#allocation2 + $0x5b0] sm:$0xf0]  ;;  %v7705_v36 = vor.u32 %v10754_v26, %v7702_v27  ;;  %v7244_v26 = vld [vmem:[#allocation2 + $0xa8] sm:$0xf] }
  0x59   :  { %1481 = vmatpush.bf16.msra.mxu0 %v7497_v52  ;;  %v10686_v31 = vld [vmem:[#allocation2 + $0x224] sm:$0xf]  ;;  %v7430_v32 = vld [vmem:[#allocation2 + $0x230] sm:$0xf0]  ;;  %v7881_v38 = vor.u32 %v10798_v29, %v7878_v30  ;;  %v10641_v27 = vld [vmem:[#allocation2 + $0xb4] sm:$0xf0] }
  0x5a   :  { %1494 = vmatpush.bf16.msra.mxu1 %v7625_v56  ;;  %v10718_v37 = vld [vmem:[#allocation2 + $0x324] sm:$0xf]  ;;  %v7558_v39 = vld [vmem:[#allocation2 + $0x330] sm:$0xf0]  ;;  %v7433_v42 = vor.u32 %v10686_v31, %v7430_v32  ;;  %v7372_v29 = vld [vmem:[#allocation2 + $0x1a8] sm:$0xf] }
  0x5b   :  { %1472 = vmatpush.bf16.msra.mxu2 %v7305_v53  ;;  %v10750_v40 = vld [vmem:[#allocation2 + $0x424] sm:$0xf]  ;;  %v7686_v41 = vld [vmem:[#allocation2 + $0x430] sm:$0xf0]  ;;  %v7561_v49 = vor.u32 %v10718_v37, %v7558_v39  ;;  %v10673_v30 = vld [vmem:[#allocation2 + $0x1b4] sm:$0xf0]  ;;  %v7245_v37 = vor.u32 %v10641_v27, %v7244_v26 }
  0x5c   :  { %1507 = vmatpush.bf16.msra.mxu3 %v7753_v57  ;;  %v10794_v43 = vld [vmem:[#allocation2 + $0x584] sm:$0xf]  ;;  %v7862_v44 = vld [vmem:[#allocation2 + $0x590] sm:$0xf0]  ;;  %v7689_v50 = vor.u32 %v10750_v40, %v7686_v41  ;;  %v7532_v39 = vld [vmem:[#allocation2 + $0x2e8] sm:$0xf]  ;;  %v7373_v41 = vor.u32 %v10673_v30, %v7372_v29 }
  0x5d   :  { %1482 = vmatpush.bf16.msra.mxu0 %v7481_v1  ;;  %v10682_v45 = vld [vmem:[#allocation2 + $0x204] sm:$0xf]  ;;  %v7414_v46 = vld [vmem:[#allocation2 + $0x210] sm:$0xf0]  ;;  %v7865_v55 = vor.u32 %v10794_v43, %v7862_v44  ;;  %v7404_v1 = vld [vmem:[#allocation2 + $0x1e8] sm:$0xf] }
  0x5e   :  { %1495 = vmatpush.bf16.msra.mxu1 %v7609_v8  ;;  %v10714_v47 = vld [vmem:[#allocation2 + $0x304] sm:$0xf]  ;;  %v7542_v52 = vld [vmem:[#allocation2 + $0x310] sm:$0xf0]  ;;  %v7417_v59 = vor.u32 %v10682_v45, %v7414_v46  ;;  %v10713_v40 = vld [vmem:[#allocation2 + $0x2f4] sm:$0xf0] }
  0x5f   :  { %1473 = vmatpush.bf16.msra.mxu2 %v7289_v4  ;;  %v10822_v53 = vld [vmem:[#allocation2 + $0x664] sm:$0xf]  ;;  %v7974_v54 = vld [vmem:[#allocation2 + $0x670] sm:$0xf0]  ;;  %v7545_v3 = vor.u32 %v10714_v47, %v7542_v52  ;;  %v10637_v43 = vld [vmem:[#allocation2 + $0x94] sm:$0xf0] }
  0x60   :  { %1508 = vmatpush.bf16.msra.mxu3 %v7737_v10  ;;  %v10746_v56 = vld [vmem:[#allocation2 + $0x404] sm:$0xf]  ;;  %v7670_v57 = vld [vmem:[#allocation2 + $0x410] sm:$0xf0]  ;;  %v7977_v0 = vor.u32 %v10822_v53, %v7974_v54  ;;  %v7277_v10 = vor.u32 %v10649_v63, %v7276_v61  ;;  %v7356_v44 = vld [vmem:[#allocation2 + $0x188] sm:$0xf] }
  0x61   :  { %1483 = vmatpush.bf16.msra.mxu0 %v7465_v16  ;;  %v10790_v58 = vld [vmem:[#allocation2 + $0x564] sm:$0xf]  ;;  %v7846_v60 = vld [vmem:[#allocation2 + $0x570] sm:$0xf0]  ;;  %v7673_v4 = vor.u32 %v10746_v56, %v7670_v57  ;;  %v10669_v46 = vld [vmem:[#allocation2 + $0x194] sm:$0xf0] }
  0x62   :  { %1474 = vmatmul.bf16.vlgmr.msra.gmra.mxu2 %v11697_v5  ;;  %1496 = vmatpush.bf16.msra.mxu1 %v7593_v21  ;;  %v10818_v6 = vld [vmem:[#allocation2 + $0x644] sm:$0xf]  ;;  %v7958_v7 = vld [vmem:[#allocation2 + $0x650] sm:$0xf0]  ;;  %v7849_v8 = vor.u32 %v10790_v58, %v7846_v60  ;;  %v7660_v47 = vld [vmem:[#allocation2 + $0x3e8] sm:$0xf]  ;;  %v7357_v56 = vor.u32 %v10669_v46, %v7356_v44 }
  0x63   :  { %1518 = vmatpush.bf16.msrb.mxu2 %v7913_v12  ;;  %v10786_v11 = vld [vmem:[#allocation2 + $0x544] sm:$0xf]  ;;  %v7405_v12 = vor.u32 %v10681_v2, %v7404_v1  ;;  %v7830_v13 = vld [vmem:[#allocation2 + $0x550] sm:$0xf0]  ;;  %v7961_v16 = vor.u32 %v10818_v6, %v7958_v7  ;;  %v7516_v54 = vld [vmem:[#allocation2 + $0x2c8] sm:$0xf] }
  0x64   :  { %1509 = vmatpush.bf16.msra.mxu3 %v7721_v22  ;;  %v10814_v19 = vld [vmem:[#allocation2 + $0x624] sm:$0xf]  ;;  %v7942_v20 = vld [vmem:[#allocation2 + $0x630] sm:$0xf0]  ;;  %v7833_v21 = vor.u32 %v10786_v11, %v7830_v13  ;;  %v7261_v22 = vor.u32 %v10645_v15, %v7260_v14  ;;  %v7212_v58 = vld [vmem:[#allocation2 + $0x68] sm:$0xf] }
  0x65   :  { %1484 = vmatpush.bf16.msra.mxu0 %v7449_v28  ;;  %v10782_v23 = vld [vmem:[#allocation2 + $0x524] sm:$0xf]  ;;  %v7814_v25 = vld [vmem:[#allocation2 + $0x530] sm:$0xf0]  ;;  %v7945_v28 = vor.u32 %v10814_v19, %v7942_v20  ;;  %v7340_v60 = vld [vmem:[#allocation2 + $0x168] sm:$0xf] }
  0x66   :  { %1497 = vmatpush.bf16.msra.mxu1 %v7577_v35  ;;  %v10778_v31 = vld [vmem:[#allocation2 + $0x504] sm:$0xf]  ;;  %v7926_v35 = vld [vmem:[#allocation2 + $0x610] sm:$0xf0]  ;;  %v10665_v61 = vld [vmem:[#allocation2 + $0x174] sm:$0xf0] }
  0x67   :  { %1519 = vmatpush.bf16.msrb.mxu2 %v7897_v24  ;;  %v7389_v24 = vor.u32 %v10677_v18, %v7388_v17  ;;  %v10810_v32 = vld [vmem:[#allocation2 + $0x604] sm:$0xf]  ;;  %v7644_v63 = vld [vmem:[#allocation2 + $0x3c8] sm:$0xf]  ;;  %v7341_v6 = vor.u32 %v10665_v61, %v7340_v60  ;;  %v10737_v14 = vld [vmem:[#allocation2 + $0x3b4] sm:$0xf0] }
  0x68   :  { %1510 = vmatpush.bf16.msra.mxu3 %v7705_v36  ;;  %v7817_v36 = vor.u32 %v10782_v23, %v7814_v25  ;;  %v7929_v45 = vor.u32 %v10810_v32, %v7926_v35  ;;  %v7324_v11 = vld [vmem:[#allocation2 + $0x148] sm:$0xf]  ;;  %v10701_v18 = vld [vmem:[#allocation2 + $0x294] sm:$0xf0] }
  0x69   :  { %1485 = vmatpush.bf16.msra.mxu0 %v7433_v42  ;;  %v7228_v42 = vld [vmem:[#allocation2 + $0x88] sm:$0xf]  ;;  %v10733_v26 = vld [vmem:[#allocation2 + $0x394] sm:$0xf0] }
  0x6a   :  { %1498 = vmatpush.bf16.msra.mxu1 %v7561_v49  ;;  %v10745_v49 = vld [vmem:[#allocation2 + $0x3f4] sm:$0xf0]  ;;  %v7229_v53 = vor.u32 %v10637_v43, %v7228_v42  ;;  %v7628_v13 = vld [vmem:[#allocation2 + $0x3a8] sm:$0xf] }
  0x6b   :  { %1520 = vmatpush.bf16.msrb.mxu2 %v7881_v38  ;;  %v7798_v38 = vld [vmem:[#allocation2 + $0x510] sm:$0xf0]  ;;  %v7661_v57 = vor.u32 %v10745_v49, %v7660_v47  ;;  %v7484_v17 = vld [vmem:[#allocation2 + $0x288] sm:$0xf]  ;;  %v7629_v20 = vor.u32 %v10737_v14, %v7628_v13  ;;  %v10777_v43 = vld [vmem:[#allocation2 + $0x4f4] sm:$0xf0] }
  0x6c   :  { %1511 = vmatpush.bf16.msra.mxu3 %v7689_v50  ;;  %v7533_v50 = vor.u32 %v10713_v40, %v7532_v39  ;;  %v7801_v52 = vor.u32 %v10778_v31, %v7798_v38  ;;  %v7308_v23 = vld [vmem:[#allocation2 + $0x128] sm:$0xf]  ;;  %v7485_v27 = vor.u32 %v10701_v18, %v7484_v17  ;;  %v10697_v31 = vld [vmem:[#allocation2 + $0x274] sm:$0xf0] }
  0x6d   :  { %1486 = vmatpush.bf16.msra.mxu0 %v7417_v59  ;;  %v10633_v59 = vld [vmem:[#allocation2 + $0x74] sm:$0xf0]  ;;  %v7612_v25 = vld [vmem:[#allocation2 + $0x388] sm:$0xf] }
  0x6e   :  { %1499 = vmatpush.bf16.msra.mxu1 %v7545_v3  ;;  %v7213_v2 = vor.u32 %v10633_v59, %v7212_v58  ;;  %v7500_v3 = vld [vmem:[#allocation2 + $0x2a8] sm:$0xf]  ;;  %v7613_v35 = vor.u32 %v10733_v26, %v7612_v25  ;;  %v10653_v38 = vld [vmem:[#allocation2 + $0x114] sm:$0xf0] }
  0x6f   :  { %1521 = vmatpush.bf16.msrb.mxu2 %v7865_v55  ;;  %v10709_v55 = vld [vmem:[#allocation2 + $0x2d4] sm:$0xf0]  ;;  %v7164_v29 = vld [vmem:[#allocation2 + $0x8] sm:$0xf] }
  0x70   :  { %1512 = vmatpush.bf16.msra.mxu3 %v7673_v4  ;;  %1487 = vmatmul.bf16.vlgmr.msra.gmra.mxu0 %v11685_v51  ;;  %v7517_v1 = vor.u32 %v10709_v55, %v7516_v54  ;;  %v10705_v4 = vld [vmem:[#allocation2 + $0x2b4] sm:$0xf0]  ;;  %v7468_v30 = vld [vmem:[#allocation2 + $0x268] sm:$0xf] }
  0x71   :  { %1535 = vmatpush.bf16.msrb.mxu0 %v7977_v0  ;;  %1500 = vmatmul.bf16.vlgmr.msra.gmra.mxu1 %v11702_v9  ;;  %v10741_v0 = vld [vmem:[#allocation2 + $0x3d4] sm:$0xf0]  ;;  %v7501_v15 = vor.u32 %v10705_v4, %v7500_v3  ;;  %v7596_v39 = vld [vmem:[#allocation2 + $0x368] sm:$0xf]  ;;  %v7469_v42 = vor.u32 %v10697_v31, %v7468_v30 }
  0x72   :  { %1544 = vmatpush.bf16.msrb.mxu1 %v7277_v10  ;;  %v7645_v7 = vor.u32 %v10741_v0, %v7644_v63  ;;  %v10629_v10 = vld [vmem:[#allocation2 + $0x54] sm:$0xf0]  ;;  %v7916_v44 = vld [vmem:[#allocation2 + $0x5e8] sm:$0xf] }
  0x73   :  { %1522 = vmatpush.bf16.msrb.mxu2 %v7849_v8  ;;  %1513 = vmatmul.bf16.vlgmr.msra.gmra.mxu3 %v11719_v33  ;;  %v7196_v8 = vld [vmem:[#allocation2 + $0x48] sm:$0xf]  ;;  %v10729_v40 = vld [vmem:[#allocation2 + $0x374] sm:$0xf0] }
  0x74   :  { %1557 = vmatpush.bf16.msrb.mxu3 %v7405_v12  ;;  %v10661_v12 = vld [vmem:[#allocation2 + $0x154] sm:$0xf0]  ;;  %v7452_v47 = vld [vmem:[#allocation2 + $0x248] sm:$0xf] }
  0x75   :  { %1536 = vmatpush.bf16.msrb.mxu0 %v7961_v16  ;;  %v7197_v16 = vor.u32 %v10629_v10, %v7196_v8  ;;  %v7325_v19 = vor.u32 %v10661_v12, %v7324_v11  ;;  %v10693_v49 = vld [vmem:[#allocation2 + $0x254] sm:$0xf0]  ;;  %v7580_v55 = vld [vmem:[#allocation2 + $0x348] sm:$0xf] }
  0x76   :  { %1545 = vmatpush.bf16.msrb.mxu1 %v7261_v22  ;;  %v10625_v22 = vld [vmem:[#allocation2 + $0x34] sm:$0xf0]  ;;  %v7453_v58 = vor.u32 %v10693_v49, %v7452_v47  ;;  %v7900_v60 = vld [vmem:[#allocation2 + $0x5c8] sm:$0xf] }
  0x77   :  { %1523 = vmatpush.bf16.msrb.mxu2 %v7833_v21  ;;  %v7180_v21 = vld [vmem:[#allocation2 + $0x28] sm:$0xf]  ;;  %v10773_v59 = vld [vmem:[#allocation2 + $0x4d4] sm:$0xf0] }
  0x78   :  { %1558 = vmatpush.bf16.msrb.mxu3 %v7389_v24  ;;  %v10657_v24 = vld [vmem:[#allocation2 + $0x134] sm:$0xf0]  ;;  %v7436_v63 = vld [vmem:[#allocation2 + $0x228] sm:$0xf] }
  0x79   :  { %1537 = vmatpush.bf16.msrb.mxu0 %v7945_v28  ;;  %v7181_v28 = vor.u32 %v10625_v22, %v7180_v21  ;;  %v7309_v32 = vor.u32 %v10657_v24, %v7308_v23  ;;  %v10805_v61 = vld [vmem:[#allocation2 + $0x5d4] sm:$0xf0]  ;;  %v7564_v4 = vld [vmem:[#allocation2 + $0x328] sm:$0xf] }
  0x7a   :  { %1546 = vmatpush.bf16.msrb.mxu1 %v7245_v37  ;;  %v7292_v37 = vld [vmem:[#allocation2 + $0x108] sm:$0xf]  ;;  %v10689_v0 = vld [vmem:[#allocation2 + $0x234] sm:$0xf0]  ;;  %v7901_v3 = vor.u32 %v10805_v61, %v7900_v60 }
  0x7b   :  { %1524 = vmatpush.bf16.msrb.mxu2 %v7817_v36  ;;  %v10621_v36 = vld [vmem:[#allocation2 + $0x14] sm:$0xf0]  ;;  %v7437_v8 = vor.u32 %v10689_v0, %v7436_v63  ;;  %v7884_v11 = vld [vmem:[#allocation2 + $0x5a8] sm:$0xf] }
  0x7c   :  { %1559 = vmatpush.bf16.msrb.mxu3 %v7373_v41  ;;  %v7788_v41 = vld [vmem:[#allocation2 + $0x4e8] sm:$0xf]  ;;  %v7165_v46 = vor.u32 %v10621_v36, %v7164_v29  ;;  %v10769_v10 = vld [vmem:[#allocation2 + $0x4b4] sm:$0xf0]  ;;  %v7278_v29 = vld [vmem:[#allocation2 + $0xf8] sm:$0xf0] }
  0x7d   :  { %1538 = vmatpush.bf16.msrb.mxu0 %v7929_v45  ;;  %v10809_v45 = vld [vmem:[#allocation2 + $0x5f4] sm:$0xf0]  ;;  %v7420_v13 = vld [vmem:[#allocation2 + $0x208] sm:$0xf] }
  0x7e   :  { %1547 = vmatpush.bf16.msrb.mxu1 %v7229_v53  ;;  %v7789_v53 = vor.u32 %v10777_v43, %v7788_v41  ;;  %v7917_v54 = vor.u32 %v10809_v45, %v7916_v44  ;;  %v10801_v12 = vld [vmem:[#allocation2 + $0x5b4] sm:$0xf0]  ;;  %v7740_v22 = vld [vmem:[#allocation2 + $0x488] sm:$0xf]  ;;  %v10643_v43 = vld [vmem:[#allocation2 + $0xcc] sm:$0xf] }
  0x7f   :  { %1525 = vmatpush.bf16.msrb.mxu2 %v7801_v52  ;;  %v7597_v52 = vor.u32 %v10729_v40, %v7596_v39  ;;  %v10685_v14 = vld [vmem:[#allocation2 + $0x214] sm:$0xf0]  ;;  %v7868_v25 = vld [vmem:[#allocation2 + $0x588] sm:$0xf]  ;;  %v7262_v44 = vld [vmem:[#allocation2 + $0xd8] sm:$0xf0] }
  0x80   :  { %1560 = vmatpush.bf16.msrb.mxu3 %v7357_v56  ;;  %7987 = vmatmul.msk.bf16.vlgmr.msrb.gmra.mxu0 %vm1358_vm0, %v11709_v48  ;;  %v10725_v56 = vld [vmem:[#allocation2 + $0x354] sm:$0xf0]  ;;  %v7421_v23 = vor.u32 %v10685_v14, %v7420_v13  ;;  %v7964_v31 = vld [vmem:[#allocation2 + $0x648] sm:$0xf] }
  0x81   :  { %1570 = vmatpush.bf16.msra.mxu0 %v7533_v50  ;;  %v7293_v50 = vor.u32 %v10653_v38, %v7292_v37  ;;  %v10825_v17 = vld [vmem:[#allocation2 + $0x674] sm:$0xf0]  ;;  %v7724_v37 = vld [vmem:[#allocation2 + $0x468] sm:$0xf] }
  0x82   :  { %1526 = vmatmul.bf16.vlgmr.msrb.gmra.mxu2 %v11721_v34  ;;  %1548 = vmatpush.bf16.msrb.mxu1 %v7213_v2  ;;  %v10717_v21 = vld [vmem:[#allocation2 + $0x314] sm:$0xf0]  ;;  %v7852_v40 = vld [vmem:[#allocation2 + $0x568] sm:$0xf] }
  0x83   :  { %1583 = vmatpush.bf16.msra.mxu2 %v7661_v57  ;;  %v7772_v57 = vld [vmem:[#allocation2 + $0x4c8] sm:$0xf]  ;;  %v10765_v24 = vld [vmem:[#allocation2 + $0x494] sm:$0xf0] }
  0x84   :  { %1561 = vmatpush.bf16.msrb.mxu3 %v7341_v6  ;;  %v7773_v2 = vor.u32 %v10773_v59, %v7772_v57  ;;  %v10721_v6 = vld [vmem:[#allocation2 + $0x334] sm:$0xf0]  ;;  %v7948_v45 = vld [vmem:[#allocation2 + $0x628] sm:$0xf]  ;;  %v10639_v57 = vld [vmem:[#allocation2 + $0xac] sm:$0xf] }
  0x85   :  { %1571 = vmatpush.bf16.msra.mxu0 %v7517_v1  ;;  %v7581_v1 = vor.u32 %v10725_v56, %v7580_v55  ;;  %v10797_v26 = vld [vmem:[#allocation2 + $0x594] sm:$0xf0]  ;;  %v7932_v59 = vld [vmem:[#allocation2 + $0x608] sm:$0xf] }
  0x86   :  { %1549 = vmatpush.bf16.msrb.mxu1 %v7197_v16  ;;  %v7980_v16 = vld [vmem:[#allocation2 + $0x668] sm:$0xf]  ;;  %v7869_v36 = vor.u32 %v10797_v26, %v7868_v25  ;;  %v10761_v39 = vld [vmem:[#allocation2 + $0x474] sm:$0xf0]  ;;  %v7534_v25 = vld [vmem:[#allocation2 + $0x2f8] sm:$0xf0] }
  0x87   :  { %1584 = vmatpush.bf16.msra.mxu2 %v7645_v7  ;;  %v7756_v7 = vld [vmem:[#allocation2 + $0x4a8] sm:$0xf]  ;;  %v10793_v41 = vld [vmem:[#allocation2 + $0x574] sm:$0xf0]  ;;  %v7725_v47 = vor.u32 %v10761_v39, %v7724_v37  ;;  %v10743_v26 = vld [vmem:[#allocation2 + $0x3ec] sm:$0xf] }
  0x88   :  { %1562 = vmatpush.bf16.msrb.mxu3 %v7325_v19  ;;  %v7757_v18 = vor.u32 %v10769_v10, %v7756_v7  ;;  %v7885_v19 = vor.u32 %v10801_v12, %v7884_v11  ;;  %v7853_v49 = vor.u32 %v10793_v41, %v7852_v40  ;;  %v10789_v55 = vld [vmem:[#allocation2 + $0x554] sm:$0xf0]  ;;  %v7692_v0 = vld [vmem:[#allocation2 + $0x428] sm:$0xf]  ;;  %v10635_v10 = vld [vmem:[#allocation2 + $0x8c] sm:$0xf] }
  0x89   :  { %1572 = vmatpush.bf16.msra.mxu0 %v7501_v15  ;;  %v7565_v15 = vor.u32 %v10721_v6, %v7564_v4  ;;  %v10813_v60 = vld [vmem:[#allocation2 + $0x614] sm:$0xf0]  ;;  %v7820_v6 = vld [vmem:[#allocation2 + $0x528] sm:$0xf]  ;;  %v7230_v11 = vld [vmem:[#allocation2 + $0x98] sm:$0xf0] }
  0x8a   :  { %1550 = vmatpush.bf16.msrb.mxu1 %v7181_v28  ;;  %v10647_v28 = vld [vmem:[#allocation2 + $0xec] sm:$0xf]  ;;  %v10753_v4 = vld [vmem:[#allocation2 + $0x434] sm:$0xf0]  ;;  %v7676_v13 = vld [vmem:[#allocation2 + $0x408] sm:$0xf] }
  0x8b   :  { %1585 = vmatpush.bf16.msra.mxu2 %v7629_v20  ;;  %v7548_v20 = vld [vmem:[#allocation2 + $0x308] sm:$0xf]  ;;  %v7281_v38 = vor.u32 %v10647_v28, %v7278_v29  ;;  %v10785_v7 = vld [vmem:[#allocation2 + $0x534] sm:$0xf0]  ;;  %v7693_v14 = vor.u32 %v10753_v4, %v7692_v0  ;;  %v7374_v37 = vld [vmem:[#allocation2 + $0x1b8] sm:$0xf0] }
  0x8c   :  { %1563 = vmatpush.bf16.msrb.mxu3 %v7309_v32  ;;  %v7549_v30 = vor.u32 %v10717_v21, %v7548_v20  ;;  %v10821_v32 = vld [vmem:[#allocation2 + $0x654] sm:$0xf0]  ;;  %v7804_v20 = vld [vmem:[#allocation2 + $0x508] sm:$0xf]  ;;  %v7198_v39 = vld [vmem:[#allocation2 + $0x58] sm:$0xf0] }
  0x8d   :  { %1573 = vmatpush.bf16.msra.mxu0 %v7485_v27  ;;  %v7981_v27 = vor.u32 %v10825_v17, %v7980_v16  ;;  %v10749_v16 = vld [vmem:[#allocation2 + $0x414] sm:$0xf0]  ;;  %v10675_v17 = vld [vmem:[#allocation2 + $0x1cc] sm:$0xf]  ;;  %v7518_v41 = vld [vmem:[#allocation2 + $0x2d8] sm:$0xf0] }
  0x8e   :  { %1551 = vmatpush.bf16.msrb.mxu1 %v7165_v46  ;;  %v10817_v46 = vld [vmem:[#allocation2 + $0x634] sm:$0xf0]  ;;  %v7677_v29 = vor.u32 %v10749_v16, %v7676_v13  ;;  %v10707_v40 = vld [vmem:[#allocation2 + $0x2cc] sm:$0xf]  ;;  %v7486_v4 = vld [vmem:[#allocation2 + $0x298] sm:$0xf0] }
  0x8f   :  { %1586 = vmatpush.bf16.msra.mxu2 %v7613_v35  ;;  %v7741_v35 = vor.u32 %v10765_v24, %v7740_v22  ;;  %v7949_v56 = vor.u32 %v10817_v46, %v7948_v45  ;;  %v10781_v21 = vld [vmem:[#allocation2 + $0x514] sm:$0xf0]  ;;  %v10631_v22 = vld [vmem:[#allocation2 + $0x6c] sm:$0xf]  ;;  %v7521_v46 = vor.u32 %v10707_v40, %v7518_v41 }
  0x90   :  { %1564 = vmatpush.bf16.msrb.mxu3 %v7293_v50  ;;  %v7708_v50 = vld [vmem:[#allocation2 + $0x448] sm:$0xf]  ;;  %v10711_v24 = vld [vmem:[#allocation2 + $0x2ec] sm:$0xf] }
  0x91   :  { %1574 = vmatpush.bf16.msra.mxu0 %v7469_v42  ;;  %1552 = vmatmul.bf16.vlgmr.msrb.gmra.mxu1 %v11690_v62  ;;  %v7965_v42 = vor.u32 %v10821_v32, %v7964_v31  ;;  %v7537_v32 = vor.u32 %v10711_v24, %v7534_v25  ;;  %v10663_v0 = vld [vmem:[#allocation2 + $0x16c] sm:$0xf]  ;;  %v7774_v24 = vld [vmem:[#allocation2 + $0x4d8] sm:$0xf0] }
  0x92   :  { %1596 = vmatpush.bf16.msra.mxu1 %v7789_v53  ;;  %v10757_v53 = vld [vmem:[#allocation2 + $0x454] sm:$0xf0] }
  0x93   :  { %1587 = vmatpush.bf16.msra.mxu2 %v7597_v52  ;;  %1565 = vmatmul.bf16.vlgmr.msrb.gmra.mxu3 %v11697_v5  ;;  %v7265_v52 = vor.u32 %v10643_v43, %v7262_v44  ;;  %v7709_v61 = vor.u32 %v10757_v53, %v7708_v50  ;;  %v7646_v43 = vld [vmem:[#allocation2 + $0x3d8] sm:$0xf0] }
  0x94   :  { %1609 = vmatpush.bf16.msra.mxu3 %v7917_v54  ;;  %v7836_v54 = vld [vmem:[#allocation2 + $0x548] sm:$0xf]  ;;  %v7358_v50 = vld [vmem:[#allocation2 + $0x198] sm:$0xf0] }
  0x95   :  { %1575 = vmatpush.bf16.msra.mxu0 %v7453_v58  ;;  %v7246_v58 = vld [vmem:[#allocation2 + $0xb8] sm:$0xf0]  ;;  %v7837_v63 = vor.u32 %v10789_v55, %v7836_v54  ;;  %v10703_v54 = vld [vmem:[#allocation2 + $0x2ac] sm:$0xf] }
  0x96   :  { %1597 = vmatpush.bf16.msra.mxu1 %v7773_v2  ;;  %v7406_v2 = vld [vmem:[#allocation2 + $0x1f8] sm:$0xf0] }
  0x97   :  { %1588 = vmatpush.bf16.msra.mxu2 %v7581_v1  ;;  %v10679_v1 = vld [vmem:[#allocation2 + $0x1ec] sm:$0xf]  ;;  %v7182_v53 = vld [vmem:[#allocation2 + $0x38] sm:$0xf0] }
  0x98   :  { %1610 = vmatpush.bf16.msra.mxu3 %v7901_v3  ;;  %v7249_v3 = vor.u32 %v10639_v57, %v7246_v58  ;;  %v7409_v12 = vor.u32 %v10679_v1, %v7406_v2  ;;  %v7502_v55 = vld [vmem:[#allocation2 + $0x2b8] sm:$0xf0] }
  0x99   :  { %1576 = vmatpush.bf16.msra.mxu0 %v7437_v8  ;;  %v7933_v8 = vor.u32 %v10813_v60, %v7932_v59  ;;  %v7630_v57 = vld [vmem:[#allocation2 + $0x3b8] sm:$0xf0]  ;;  %v10619_v59 = vld [vmem:[#allocation2 + $0xc] sm:$0xf] }
  0x9a   :  { %1598 = vmatpush.bf16.msra.mxu1 %v7757_v18  ;;  %v7390_v18 = vld [vmem:[#allocation2 + $0x1d8] sm:$0xf0] }
  0x9b   :  { %1589 = vmatpush.bf16.msra.mxu2 %v7565_v15  ;;  %v7821_v15 = vor.u32 %v10785_v7, %v7820_v6  ;;  %v7393_v28 = vor.u32 %v10675_v17, %v7390_v18  ;;  %v7342_v1 = vld [vmem:[#allocation2 + $0x178] sm:$0xf0]  ;;  %v10731_v6 = vld [vmem:[#allocation2 + $0x38c] sm:$0xf] }
  0x9c   :  { %1611 = vmatpush.bf16.msra.mxu3 %v7885_v19  ;;  %v7233_v19 = vor.u32 %v10635_v10, %v7230_v11  ;;  %v7614_v7 = vld [vmem:[#allocation2 + $0x398] sm:$0xf0]  ;;  %v7345_v11 = vor.u32 %v10663_v0, %v7342_v1  ;;  %v10695_v18 = vld [vmem:[#allocation2 + $0x26c] sm:$0xf] }
  0x9d   :  { %1577 = vmatpush.bf16.msra.mxu0 %v7421_v23  ;;  %v7214_v23 = vld [vmem:[#allocation2 + $0x78] sm:$0xf0]  ;;  %v7617_v16 = vor.u32 %v10731_v6, %v7614_v7  ;;  %v10715_v1 = vld [vmem:[#allocation2 + $0x30c] sm:$0xf] }
  0x9e   :  { %1599 = vmatpush.bf16.msra.mxu1 %v7741_v35  ;;  %v7217_v31 = vor.u32 %v10631_v22, %v7214_v23  ;;  %v10627_v35 = vld [vmem:[#allocation2 + $0x4c] sm:$0xf]  ;;  %v7790_v10 = vld [vmem:[#allocation2 + $0x4f8] sm:$0xf0] }
  0x9f   :  { %1590 = vmatpush.bf16.msra.mxu2 %v7549_v30  ;;  %v7805_v30 = vor.u32 %v10781_v21, %v7804_v20  ;;  %v7201_v45 = vor.u32 %v10627_v35, %v7198_v39  ;;  %v10727_v20 = vld [vmem:[#allocation2 + $0x36c] sm:$0xf]  ;;  %v7598_v22 = vld [vmem:[#allocation2 + $0x378] sm:$0xf0] }
  0xa0   :  { %1612 = vmatpush.bf16.msra.mxu3 %v7869_v36  ;;  %1578 = vmatmul.bf16.vlgmr.msra.gmra.mxu0 %v11685_v51  ;;  %v10671_v36 = vld [vmem:[#allocation2 + $0x1ac] sm:$0xf]  ;;  %v7454_v35 = vld [vmem:[#allocation2 + $0x258] sm:$0xf0] }
  0xa1   :  { %1626 = vmatpush.bf16.msrb.mxu0 %v7981_v27  ;;  %v7662_v27 = vld [vmem:[#allocation2 + $0x3f8] sm:$0xf0]  ;;  %v7377_v44 = vor.u32 %v10671_v36, %v7374_v37  ;;  %v10771_v23 = vld [vmem:[#allocation2 + $0x4cc] sm:$0xf] }
  0xa2   :  { %1591 = vmatmul.bf16.vlgmr.msra.gmra.mxu2 %v11702_v9  ;;  %1600 = vmatpush.bf16.msra.mxu1 %v7725_v47  ;;  %v10623_v47 = vld [vmem:[#allocation2 + $0x2c] sm:$0xf]  ;;  %v7582_v37 = vld [vmem:[#allocation2 + $0x358] sm:$0xf0] }
  0xa3   :  { %1635 = vmatpush.bf16.msrb.mxu2 %v7281_v38  ;;  %v7665_v38 = vor.u32 %v10743_v26, %v7662_v27  ;;  %v7185_v60 = vor.u32 %v10623_v47, %v7182_v53  ;;  %v10655_v27 = vld [vmem:[#allocation2 + $0x12c] sm:$0xf]  ;;  %v7758_v39 = vld [vmem:[#allocation2 + $0x4b8] sm:$0xf0] }
  0xa4   :  { %1613 = vmatpush.bf16.msra.mxu3 %v7853_v49  ;;  %v10667_v49 = vld [vmem:[#allocation2 + $0x18c] sm:$0xf]  ;;  %v7918_v53 = vld [vmem:[#allocation2 + $0x5f8] sm:$0xf0] }
  0xa5   :  { %1627 = vmatpush.bf16.msrb.mxu0 %v7965_v42  ;;  %v10739_v42 = vld [vmem:[#allocation2 + $0x3cc] sm:$0xf]  ;;  %v7361_v58 = vor.u32 %v10667_v49, %v7358_v50  ;;  %v7422_v0 = vld [vmem:[#allocation2 + $0x218] sm:$0xf0] }
  0xa6   :  { %1601 = vmatpush.bf16.msra.mxu1 %v7709_v61  ;;  %v7505_v61 = vor.u32 %v10703_v54, %v7502_v55  ;;  %v10723_v36 = vld [vmem:[#allocation2 + $0x34c] sm:$0xf]  ;;  %v7566_v55 = vld [vmem:[#allocation2 + $0x338] sm:$0xf0] }
  0xa7   :  { %1636 = vmatpush.bf16.msrb.mxu2 %v7265_v52  ;;  %v7649_v52 = vor.u32 %v10739_v42, %v7646_v43  ;;  %v10687_v42 = vld [vmem:[#allocation2 + $0x22c] sm:$0xf]  ;;  %v7585_v47 = vor.u32 %v10723_v36, %v7582_v37  ;;  %v7550_v6 = vld [vmem:[#allocation2 + $0x318] sm:$0xf0] }
  0xa8   :  { %1614 = vmatpush.bf16.msra.mxu3 %v7837_v63  ;;  %v7166_v63 = vld [vmem:[#allocation2 + $0x18] sm:$0xf0]  ;;  %v10719_v50 = vld [vmem:[#allocation2 + $0x32c] sm:$0xf] }
  0xa9   :  { %1628 = vmatpush.bf16.msrb.mxu0 %v7949_v56  ;;  %v10735_v56 = vld [vmem:[#allocation2 + $0x3ac] sm:$0xf] }
  0xaa   :  { %1602 = vmatpush.bf16.msra.mxu1 %v7693_v14  ;;  %v7633_v2 = vor.u32 %v10735_v56, %v7630_v57  ;;  %v10659_v14 = vld [vmem:[#allocation2 + $0x14c] sm:$0xf]  ;;  %v7742_v57 = vld [vmem:[#allocation2 + $0x498] sm:$0xf0] }
  0xab   :  { %1637 = vmatpush.bf16.msrb.mxu2 %v7249_v3  ;;  %v10699_v3 = vld [vmem:[#allocation2 + $0x28c] sm:$0xf] }
  0xac   :  { %1615 = vmatpush.bf16.msra.mxu3 %v7821_v15  ;;  %v7489_v13 = vor.u32 %v10699_v3, %v7486_v4  ;;  %v7326_v15 = vld [vmem:[#allocation2 + $0x158] sm:$0xf0]  ;;  %v10763_v56 = vld [vmem:[#allocation2 + $0x48c] sm:$0xf]  ;;  %v7569_v3 = vor.u32 %v10719_v50, %v7566_v55 }
  0xad   :  { %1629 = vmatpush.bf16.msrb.mxu0 %v7933_v8  ;;  %v10775_v8 = vld [vmem:[#allocation2 + $0x4ec] sm:$0xf]  ;;  %v7329_v25 = vor.u32 %v10659_v14, %v7326_v15  ;;  %v7745_v4 = vor.u32 %v10763_v56, %v7742_v57  ;;  %v7982_v14 = vld [vmem:[#allocation2 + $0x678] sm:$0xf0]  ;;  %v8132_v15 = vld [vmem:[%s14728_s3 + $0x118] sm:$0xf] }
  0xae   :  { %1603 = vmatpush.bf16.msra.mxu1 %v7677_v29  ;;  %v7793_v17 = vor.u32 %v10775_v8, %v7790_v10  ;;  %v11743_v29 = vpop.f32.mrf.mxu1  ;;  %v10803_v7 = vld [vmem:[#allocation2 + $0x5cc] sm:$0xf]  ;;  %v7902_v8 = vld [vmem:[#allocation2 + $0x5d8] sm:$0xf0] }
  0xaf   :  { %1638 = vmatpush.bf16.msrb.mxu2 %v7233_v19  ;;  %v7470_v19 = vld [vmem:[#allocation2 + $0x278] sm:$0xf0]  ;;  %v10759_v10 = vld [vmem:[#allocation2 + $0x46c] sm:$0xf] }
  0xb0   :  { %1616 = vmatpush.bf16.msra.mxu3 %v7805_v30  ;;  %7988 = vmatmul.msk.bf16.vlgmr.msrb.gmra.mxu0 %vm1358_vm0, %v11709_v48  ;;  %v7473_v26 = vor.u32 %v10695_v18, %v7470_v19  ;;  %v7601_v30 = vor.u32 %v10727_v20, %v7598_v22  ;;  %v7905_v18 = vor.u32 %v10803_v7, %v7902_v8  ;;  %v7854_v55 = vld [vmem:[#allocation2 + $0x578] sm:$0xf0] }
  0xb1   :  { %1648 = vmatpush.bf16.msra.mxu0 %v7409_v12  ;;  %1604 = vmatmul.bf16.vlgmr.msra.gmra.mxu1 %v11719_v33  ;;  %v7169_v12 = vor.u32 %v10619_v59, %v7166_v63  ;;  %v10683_v63 = vld [vmem:[#allocation2 + $0x20c] sm:$0xf]  ;;  %v7553_v20 = vor.u32 %v10715_v1, %v7550_v6  ;;  %v8292_v1 = vld [vmem:[%s14728_s3 + $0x258] sm:$0xf]  ;;  %v7838_v7 = vld [vmem:[#allocation2 + $0x558] sm:$0xf0] }
  0xb2   :  { %1661 = vmatpush.bf16.msrb.mxu1 %v7537_v32  ;;  %v10691_v32 = vld [vmem:[#allocation2 + $0x24c] sm:$0xf] }
  0xb3   :  { %1639 = vmatpush.bf16.msrb.mxu2 %v7217_v31  ;;  %1617 = vmatmul.bf16.vlgmr.msra.gmra.mxu3 %v11721_v34  ;;  %v7777_v31 = vor.u32 %v10771_v23, %v7774_v24  ;;  %v7457_v43 = vor.u32 %v10691_v32, %v7454_v35  ;;  %v10799_v23 = vld [vmem:[#allocation2 + $0x5ac] sm:$0xf]  ;;  %v7886_v24 = vld [vmem:[#allocation2 + $0x5b8] sm:$0xf0]  ;;  %v8112_v32 = vld [vmem:[%s14728_s3 + $0xf0] sm:$0xf] }
  0xb4   :  { %1674 = vmatpush.bf16.msrb.mxu3 %v7665_v38  ;;  %v10767_v38 = vld [vmem:[#allocation2 + $0x4ac] sm:$0xf]  ;;  %v10858_v35 = vld [vmem:[%s14728_s3 + $0x100] sm:$0xf0]  ;;  %v7889_v37 = vor.u32 %v10799_v23, %v7886_v24 }
  0xb5   :  { %1649 = vmatpush.bf16.msra.mxu0 %v7393_v28  ;;  %v11741_v21 = vpop.f32.mrf.mxu0  ;;  %v7310_v28 = vld [vmem:[#allocation2 + $0x138] sm:$0xf0]  ;;  %v7761_v49 = vor.u32 %v10767_v38, %v7758_v39  ;;  %v10795_v39 = vld [vmem:[#allocation2 + $0x58c] sm:$0xf] }
  0xb6   :  { %1662 = vmatpush.bf16.msrb.mxu1 %v7521_v46  ;;  %v7313_v41 = vor.u32 %v10655_v27, %v7310_v28  ;;  %v7294_v46 = vld [vmem:[#allocation2 + $0x118] sm:$0xf0]  ;;  %v11748_v59 = vpop.f32.mrf.mxu3  ;;  %v10755_v27 = vld [vmem:[#allocation2 + $0x44c] sm:$0xf] }
  0xb7   :  { %1640 = vmatpush.bf16.msrb.mxu2 %v7201_v45  ;;  %v11745_v40 = vpop.f32.mrf.mxu2  ;;  %v10651_v45 = vld [vmem:[#allocation2 + $0x10c] sm:$0xf]  ;;  %v7710_v28 = vld [vmem:[#allocation2 + $0x458] sm:$0xf0] }
  0xb8   :  { %1675 = vmatpush.bf16.msrb.mxu3 %v7649_v52  ;;  %v10807_v52 = vld [vmem:[#allocation2 + $0x5ec] sm:$0xf] }
  0xb9   :  { %1650 = vmatpush.bf16.msra.mxu0 %v7377_v44  ;;  %v7438_v44 = vld [vmem:[#allocation2 + $0x238] sm:$0xf0]  ;;  %v10787_v6 = vld [vmem:[#allocation2 + $0x54c] sm:$0xf] }
  0xba   :  { %1663 = vmatpush.bf16.msrb.mxu1 %v7505_v61  ;;  %v7921_v61 = vor.u32 %v10807_v52, %v7918_v53 }
  0xbb   :  { %1641 = vmatpush.bf16.msrb.mxu2 %v7185_v60  ;;  %v7441_v60 = vor.u32 %v10687_v42, %v7438_v44  ;;  %v10751_v44 = vld [vmem:[#allocation2 + $0x42c] sm:$0xf] }
  0xbc   :  { %1676 = vmatpush.bf16.msrb.mxu3 %v7633_v2  ;;  %v1386_v2 = vpop.f32.mrf.mxu1 }
  0xbd   :  { %1651 = vmatpush.bf16.msra.mxu0 %v7361_v58  ;;  %v1373_v54 = vpop.f32.mrf.mxu0  ;;  %v7297_v58 = vor.u32 %v10651_v45, %v7294_v46  ;;  %v7694_v45 = vld [vmem:[#allocation2 + $0x438] sm:$0xf0]  ;;  %v10815_v46 = vld [vmem:[#allocation2 + $0x62c] sm:$0xf] }
  0xbe   :  { %1664 = vmatpush.bf16.msrb.mxu1 %v7489_v13  ;;  %v1412_v36 = vpop.f32.mrf.mxu3  ;;  %v7697_v54 = vor.u32 %v10751_v44, %v7694_v45  ;;  %v10903_v2 = vld [vmem:[%s14728_s3 + $0x268] sm:$0xf0]  ;;  %v10888_v44 = vld [vmem:[%s14728_s3 + $0x1f0] sm:$0xf0] }
  0xbf   :  { %1642 = vmatpush.bf16.msrb.mxu2 %v7169_v12  ;;  %v10823_v12 = vld [vmem:[#allocation2 + $0x66c] sm:$0xf]  ;;  %v1399_v13 = vpop.f32.mrf.mxu2 }
  0xc0   :  { %1677 = vmatpush.bf16.msrb.mxu3 %v7617_v16  ;;  %v10863_v16 = vld [vmem:[%s14728_s3 + $0x128] sm:$0xf0]  ;;  %v8293_v13 = vor.u32 %v10903_v2, %v8292_v1  ;;  %v10856_v2 = vld [vmem:[%s14728_s3 + $0xf4] sm:$0xf] }
  0xc1   :  { %1652 = vmatpush.bf16.msra.mxu0 %v7345_v11  ;;  %v7726_v11 = vld [vmem:[#allocation2 + $0x478] sm:$0xf0] }
  0xc2   :  { %1643 = vmatmul.bf16.vlgmr.msrb.gmra.mxu2 %v11690_v62  ;;  %1665 = vmatpush.bf16.msrb.mxu1 %v7473_v26  ;;  %v11753_v62 = vld [vmem:[%s14727_s2] sm:$0xf]  ;;  %v7729_v22 = vor.u32 %v10759_v10, %v7726_v11  ;;  %v8133_v26 = vor.u32 %v10863_v16, %v8132_v15  ;;  %v10843_v15 = vld [vmem:[%s14728_s3 + $0x88] sm:$0xf0]  ;;  %v7841_v16 = vor.u32 %v10787_v6, %v7838_v7  ;;  %v8412_v6 = vld [vmem:[%s14728_s3 + $0x348] sm:$0xf] }
  0xc3   :  { %1687 = vmatpush.bf16.msra.mxu2 %v7793_v17  ;;  %v7425_v17 = vor.u32 %v10683_v63, %v7422_v0  ;;  %v310_v19 = vperm.slane %v11753_v62, 0  ;;  %v7934_v63 = vld [vmem:[#allocation2 + $0x618] sm:$0xf0]  ;;  %v8072_v0 = vld [vmem:[%s14728_s3 + $0xa0] sm:$0xf] }
  0xc4   :  { %1678 = vmatpush.bf16.msrb.mxu3 %v7601_v30  ;;  %v10819_v30 = vld [vmem:[#allocation2 + $0x64c] sm:$0xf]  ;;  %v10933_v7 = vld [vmem:[%s14728_s3 + $0x358] sm:$0xf0] }
  0xc5   :  { %1653 = vmatpush.bf16.msra.mxu0 %v7329_v25  ;;  %v7985_v25 = vor.u32 %v10823_v12, %v7982_v14  ;;  %v1372_v38 = vadd.f32 %v11741_v21, %v310_v19  ;;  %v10853_v21 = vld [vmem:[%s14728_s3 + $0xd8] sm:$0xf0]  ;;  %v8052_v14 = vld [vmem:[%s14728_s3 + $0x78] sm:$0xf] }
  0xc6   :  { %1666 = vmatpush.bf16.msrb.mxu1 %v7457_v43  ;;  %v8113_v43 = vor.u32 %v10858_v35, %v8112_v32  ;;  %v8053_v23 = vor.u32 %v10843_v15, %v8052_v14  ;;  %v7806_v32 = vld [vmem:[#allocation2 + $0x518] sm:$0xf0]  ;;  %v10851_v14 = vld [vmem:[%s14728_s3 + $0xcc] sm:$0xf]  ;;  %v8094_v15 = vld [vmem:[%s14728_s3 + $0xdc] sm:$0xf0] }
  0xc7   :  { %1688 = vmatpush.bf16.msra.mxu2 %v7777_v31  ;;  %v7966_v31 = vld [vmem:[#allocation2 + $0x658] sm:$0xf0]  ;;  %v11777_v50 = vpop.f32.mrf.mxu2  ;;  %v1385_v53 = vadd.f32 %v11743_v29, %v1372_v38 }
  0xc8   :  { %1679 = vmatpush.bf16.msrb.mxu3 %v7585_v47  ;;  %v7969_v42 = vor.u32 %v10819_v30, %v7966_v31  ;;  %v7950_v47 = vld [vmem:[#allocation2 + $0x638] sm:$0xf0]  ;;  %v10779_v31 = vld [vmem:[#allocation2 + $0x50c] sm:$0xf] }
  0xc9   :  { %1654 = vmatpush.bf16.msra.mxu0 %v7313_v41  ;;  %v7870_v41 = vld [vmem:[#allocation2 + $0x598] sm:$0xf0]  ;;  %v7953_v56 = vor.u32 %v10815_v46, %v7950_v47  ;;  %v8452_v46 = vld [vmem:[%s14728_s3 + $0x398] sm:$0xf]  ;;  %v10943_v47 = vld [vmem:[%s14728_s3 + $0x3a8] sm:$0xf0] }
  0xca   :  { %1667 = vmatpush.bf16.msrb.mxu1 %v7441_v60  ;;  %v7873_v52 = vor.u32 %v10795_v39, %v7870_v41  ;;  %v7678_v60 = vld [vmem:[#allocation2 + $0x418] sm:$0xf0]  ;;  %v8012_v39 = vld [vmem:[%s14728_s3 + $0x28] sm:$0xf] }
  0xcb   :  { %1689 = vmatpush.bf16.msra.mxu2 %v7761_v49  ;;  %v8092_v49 = vld [vmem:[%s14728_s3 + $0xc8] sm:$0xf]  ;;  %v10893_v30 = vld [vmem:[%s14728_s3 + $0x218] sm:$0xf0] }
  0xcc   :  { %1680 = vmatpush.bf16.msrb.mxu3 %v7569_v3  ;;  %v8093_v57 = vor.u32 %v10853_v21, %v8092_v49  ;;  %v1398_v3 = vadd.f32 %v11745_v40, %v1385_v53  ;;  %v10833_v41 = vld [vmem:[%s14728_s3 + $0x38] sm:$0xf0]  ;;  %v7992_v21 = vld [vmem:[%s14728_s3] sm:$0xf]  ;;  %v8212_v53 = vld [vmem:[%s14728_s3 + $0x1b8] sm:$0xf] }
  0xcd   :  { %1655 = vmatpush.bf16.msra.mxu0 %v7297_v58  ;;  %v10747_v58 = vld [vmem:[#allocation2 + $0x40c] sm:$0xf]  ;;  %v1423_v8 = vpop.f32.mrf.mxu0  ;;  %v8013_v45 = vor.u32 %v10833_v41, %v8012_v39  ;;  %v10896_v39 = vld [vmem:[%s14728_s3 + $0x234] sm:$0xf]  ;;  %v8274_v41 = vld [vmem:[%s14728_s3 + $0x244] sm:$0xf0] }
  0xce   :  { %1668 = vmatpush.bf16.msrb.mxu1 %v7425_v17  ;;  %v1436_v12 = vpop.f32.mrf.mxu1  ;;  %v8272_v17 = vld [vmem:[%s14728_s3 + $0x230] sm:$0xf]  ;;  %v1411_v19 = vadd.f32 %v11748_v59, %v1398_v3  ;;  %v8114_v3 = vld [vmem:[%s14728_s3 + $0x104] sm:$0xf0] }
  0xcf   :  { %1690 = vmatpush.bf16.msra.mxu2 %v7745_v4  ;;  %v7681_v4 = vor.u32 %v10747_v58, %v7678_v60  ;;  %v1451_v40 = vpop.f32.mrf.mxu2  ;;  %v8432_v58 = vld [vmem:[%s14728_s3 + $0x370] sm:$0xf]  ;;  %v10938_v60 = vld [vmem:[%s14728_s3 + $0x380] sm:$0xf0] }
  0xd0   :  { %1656 = vmatmul.bf16.vlgmr.msra.gmra.mxu0 %v11697_v5  ;;  %1681 = vmatpush.bf16.msrb.mxu3 %v7553_v20  ;;  %v7713_v5 = vor.u32 %v10755_v27, %v7710_v28  ;;  %v10783_v20 = vld [vmem:[#allocation2 + $0x52c] sm:$0xf]  ;;  %v1424_v24 = vadd.f32 %v1423_v8, %v1411_v19  ;;  %v10838_v27 = vld [vmem:[%s14728_s3 + $0x60] sm:$0xf0]  ;;  %v8252_v28 = vld [vmem:[%s14728_s3 + $0x208] sm:$0xf]  ;;  %v8433_v1 = vor.u32 %v10938_v60, %v8432_v58 }
  0xd1   :  { %1700 = vmatpush.bf16.msrb.mxu0 %v7921_v61  ;;  %1669 = vmatmul.bf16.vlgmr.msrb.gmra.mxu1 %v11685_v51  ;;  %v10791_v51 = vld [vmem:[#allocation2 + $0x56c] sm:$0xf]  ;;  %v8392_v40 = vld [vmem:[%s14728_s3 + $0x320] sm:$0xf] }
  0xd2   :  { %1717 = vmatpush.bf16.msra.mxu1 %v7985_v25  ;;  %v10811_v61 = vld [vmem:[#allocation2 + $0x60c] sm:$0xf]  ;;  %v7857_v29 = vor.u32 %v10791_v51, %v7854_v55  ;;  %v10861_v51 = vld [vmem:[%s14728_s3 + $0x11c] sm:$0xf]  ;;  %v8134_v55 = vld [vmem:[%s14728_s3 + $0x12c] sm:$0xf0] }
  0xd3   :  { %1691 = vmatpush.bf16.msra.mxu2 %v7729_v22  ;;  %1682 = vmatmul.bf16.vlgmr.msrb.gmra.mxu3 %v11702_v9  ;;  %v10848_v9 = vld [vmem:[%s14728_s3 + $0xb0] sm:$0xf0]  ;;  %v7937_v10 = vor.u32 %v10811_v61, %v7934_v63  ;;  %v7822_v22 = vld [vmem:[#allocation2 + $0x538] sm:$0xf0]  ;;  %v8152_v19 = vld [vmem:[%s14728_s3 + $0x140] sm:$0xf] }
  0xd4   :  { %2770 = vmatpush.bf16.msra.mxu3 %v8133_v26  ;;  %v8073_v11 = vor.u32 %v10848_v9, %v8072_v0  ;;  %v8032_v26 = vld [vmem:[%s14728_s3 + $0x50] sm:$0xf]  ;;  %v7825_v59 = vor.u32 %v10783_v20, %v7822_v22  ;;  %v8137_v0 = vor.u32 %v10861_v51, %v8134_v55  ;;  %v10868_v22 = vld [vmem:[%s14728_s3 + $0x150] sm:$0xf0]  ;;  %v10913_v51 = vld [vmem:[%s14728_s3 + $0x2b8] sm:$0xf0] }
  0xd5   :  { %1701 = vmatpush.bf16.msrb.mxu0 %v7905_v18  ;;  %v10898_v18 = vld [vmem:[%s14728_s3 + $0x240] sm:$0xf0]  ;;  %v8033_v36 = vor.u32 %v10838_v27, %v8032_v26  ;;  %v8192_v9 = vld [vmem:[%s14728_s3 + $0x190] sm:$0xf]  ;;  %v10831_v60 = vld [vmem:[%s14728_s3 + $0x2c] sm:$0xf] }
  0xd6   :  { %1718 = vmatpush.bf16.msra.mxu1 %v7969_v42  ;;  %v8273_v25 = vor.u32 %v10898_v18, %v8272_v17  ;;  %v11820_v35 = vpop.f32.mrf.mxu3  ;;  %v1438_v38 = vpop.f32.mrf.mxu1  ;;  %v7809_v42 = vor.u32 %v10779_v31, %v7806_v32  ;;  %v8097_v18 = vor.u32 %v10851_v14, %v8094_v15  ;;  %v8294_v26 = vld [vmem:[%s14728_s3 + $0x26c] sm:$0xf0]  ;;  %v8153_v31 = vor.u32 %v10868_v22, %v8152_v19  ;;  %v8140_v15 = vld [vmem:[%s14728_s3 + $0x120] sm:$0xf]  ;;  %v10936_v19 = vld [vmem:[%s14728_s3 + $0x374] sm:$0xf] }
  0xd7   :  { %1692 = vmatpush.bf16.msra.mxu2 %v7713_v5  ;;  %v1437_v5 = vadd.f32 %v1436_v12, %v1424_v24  ;;  %v8413_v12 = vor.u32 %v10933_v7, %v8412_v6  ;;  %v8074_v24 = vld [vmem:[%s14728_s3 + $0xb4] sm:$0xf0]  ;;  %v8454_v6 = vld [vmem:[%s14728_s3 + $0x3ac] sm:$0xf0] }
  0xd8   :  { %2771 = vmatpush.bf16.msra.mxu3 %v8113_v43  ;;  %v8232_v43 = vld [vmem:[%s14728_s3 + $0x1e0] sm:$0xf]  ;;  %v8214_v14 = vld [vmem:[%s14728_s3 + $0x1cc] sm:$0xf0] }
  0xd9   :  { %1702 = vmatpush.bf16.msrb.mxu0 %v7889_v37  ;;  %v1425_v37 = vpop.f32.mrf.mxu0  ;;  %v8233_v49 = vor.u32 %v10888_v44, %v8232_v43  ;;  %v8352_v44 = vld [vmem:[%s14728_s3 + $0x2d0] sm:$0xf] }
  0xda   :  { %1719 = vmatpush.bf16.msra.mxu1 %v7953_v56 }
  0xdb   :  { %1693 = vmatpush.bf16.msra.mxu2 %v7697_v54  ;;  %v8453_v54 = vor.u32 %v10943_v47, %v8452_v46 }
  0xdc   :  { %2772 = vmatpush.bf16.msra.mxu3 %v8093_v57 }
  0xdd   :  { %1703 = vmatpush.bf16.msrb.mxu0 %v7873_v52  ;;  %v10828_v52 = vld [vmem:[%s14728_s3 + $0x10] sm:$0xf0] }
  0xde   :  { %1720 = vmatpush.bf16.msra.mxu1 %v7937_v10  ;;  %v1464_v56 = vpop.f32.mrf.mxu3  ;;  %v7993_v57 = vor.u32 %v10828_v52, %v7992_v21  ;;  %v8117_v10 = vor.u32 %v10856_v2, %v8114_v3  ;;  %v10891_v21 = vld [vmem:[%s14728_s3 + $0x20c] sm:$0xf]  ;;  %v8254_v52 = vld [vmem:[%s14728_s3 + $0x21c] sm:$0xf0]  ;;  %v10908_v2 = vld [vmem:[%s14728_s3 + $0x290] sm:$0xf0] }
  0xdf   :  { %1694 = vmatpush.bf16.msra.mxu2 %v7681_v4  ;;  %v8257_v58 = vor.u32 %v10891_v21, %v8254_v52 }
  0xe0   :  { %2773 = vmatpush.bf16.msra.mxu3 %v8073_v11  ;;  %v8172_v11 = vld [vmem:[%s14728_s3 + $0x168] sm:$0xf] }
  0xe1   :  { %1704 = vmatpush.bf16.msrb.mxu0 %v7857_v29  ;;  %7989 = vmatmul.msk.bf16.vlgmr.msra.gmra.mxu1 %vm1358_vm0, %v11709_v48  ;;  %v1450_v48 = vadd.f32 %v11777_v50, %v1437_v5  ;;  %v10883_v50 = vld [vmem:[%s14728_s3 + $0x1c8] sm:$0xf0]  ;;  %v10878_v29 = vld [vmem:[%s14728_s3 + $0x1a0] sm:$0xf0]  ;;  %v10841_v5 = vld [vmem:[%s14728_s3 + $0x7c] sm:$0xf] }
  0xe2   :  { %2783 = vmatpush.bf16.msrb.mxu1 %v8293_v13  ;;  %1695 = vmatmul.bf16.vlgmr.msra.gmra.mxu2 %v11719_v33  ;;  %v8253_v33 = vor.u32 %v10893_v30, %v8252_v28  ;;  %v8213_v63 = vor.u32 %v10883_v50, %v8212_v53  ;;  %v8193_v4 = vor.u32 %v10878_v29, %v8192_v9  ;;  %v10873_v13 = vld [vmem:[%s14728_s3 + $0x178] sm:$0xf0]  ;;  %v8372_v28 = vld [vmem:[%s14728_s3 + $0x2f8] sm:$0xf]  ;;  %v10923_v30 = vld [vmem:[%s14728_s3 + $0x308] sm:$0xf0] }
  0xe3   :  { %2796 = vmatpush.bf16.msrb.mxu2 %v8453_v54  ;;  %v1726_v61 = vmax.f32 %v1450_v48, 0.0  ;;  %v8173_v17 = vor.u32 %v10873_v13, %v8172_v11  ;;  %v8373_v37 = vor.u32 %v10923_v30, %v8372_v28  ;;  %v8277_v48 = vor.u32 %v10896_v39, %v8274_v41  ;;  %v8332_v50 = vld [vmem:[%s14728_s3 + $0x2a8] sm:$0xf]  ;;  %v7994_v11 = vld [vmem:[%s14728_s3 + $0x14] sm:$0xf0] }
  0xe4   :  { %2774 = vmatpush.bf16.msra.mxu3 %v8053_v23  ;;  %v10846_v23 = vld [vmem:[%s14728_s3 + $0xa4] sm:$0xf]  ;;  %v10859_v28 = vld [vmem:[%s14728_s3 + $0x108] sm:$0xf0]  ;;  %v8174_v41 = vld [vmem:[%s14728_s3 + $0x17c] sm:$0xf0] }
  0xe5   :  { %1705 = vmatpush.bf16.msrb.mxu0 %v7841_v16  ;;  %v11886_v8 = vpack.c.bf16 %v1726_v61, %v1726_v61  ;;  %v10928_v16 = vld [vmem:[%s14728_s3 + $0x330] sm:$0xf0]  ;;  %v8077_v32 = vor.u32 %v10846_v23, %v8074_v24  ;;  %v8014_v61 = vld [vmem:[%s14728_s3 + $0x3c] sm:$0xf0] }
  0xe6   :  { %2784 = vmatpush.bf16.msrb.mxu1 %v8273_v25  ;;  %v8393_v20 = vor.u32 %v10928_v16, %v8392_v40  ;;  %v10901_v25 = vld [vmem:[%s14728_s3 + $0x25c] sm:$0xf]  ;;  %v8017_v3 = vor.u32 %v10831_v60, %v8014_v61  ;;  %v10864_v40 = vld [vmem:[%s14728_s3 + $0x130] sm:$0xf0]  ;;  %v8374_v60 = vld [vmem:[%s14728_s3 + $0x30c] sm:$0xf0] }
  0xe7   :  { %2797 = vmatpush.bf16.msrb.mxu2 %v8433_v1  ;;  %v8297_v38 = vor.u32 %v10901_v25, %v8294_v26  ;;  %v8312_v1 = vld [vmem:[%s14728_s3 + $0x280] sm:$0xf]  ;;  %v8141_v23 = vor.u32 %v10864_v40, %v8140_v15  ;;  %v10876_v25 = vld [vmem:[%s14728_s3 + $0x194] sm:$0xf]  ;;  %v8194_v26 = vld [vmem:[%s14728_s3 + $0x1a4] sm:$0xf0] }
  0xe8   :  { %2775 = vmatpush.bf16.msra.mxu3 %v8033_v36  ;;  %v10839_v15 = vld [vmem:[%s14728_s3 + $0x68] sm:$0xf0] }
  0xe9   :  { %1706 = vmatpush.bf16.msrb.mxu0 %v7825_v59  ;;  %v311_v59 = vperm.slane %v11753_v62, 1 }
  0xea   :  { %2785 = vmatpush.bf16.msrb.mxu1 %v8253_v33  ;;  %v8054_v33 = vld [vmem:[%s14728_s3 + $0x8c] sm:$0xf0] }
  0xeb   :  { %2798 = vmatpush.bf16.msrb.mxu2 %v8413_v12  ;;  %v1463_v43 = vadd.f32 %v11820_v35, %v311_v59  ;;  %v8057_v46 = vor.u32 %v10841_v5, %v8054_v33  ;;  %v8034_v35 = vld [vmem:[%s14728_s3 + $0x64] sm:$0xf0]  ;;  %v10881_v12 = vld [vmem:[%s14728_s3 + $0x1bc] sm:$0xf]  ;;  %v8120_v59 = vld [vmem:[%s14728_s3 + $0xf8] sm:$0xf] }
  0xec   :  { %2776 = vmatpush.bf16.msra.mxu3 %v8013_v45  ;;  %v10918_v45 = vld [vmem:[%s14728_s3 + $0x2e0] sm:$0xf0]  ;;  %v8217_v22 = vor.u32 %v10881_v12, %v8214_v14  ;;  %v8121_v5 = vor.u32 %v10859_v28, %v8120_v59  ;;  %v10871_v33 = vld [vmem:[%s14728_s3 + $0x16c] sm:$0xf]  ;;  %v8354_v12 = vld [vmem:[%s14728_s3 + $0x2e4] sm:$0xf0] }
  0xed   :  { %1707 = vmatpush.bf16.msrb.mxu0 %v7809_v42  ;;  %v1488_v36 = vpop.f32.mrf.mxu0  ;;  %v8353_v47 = vor.u32 %v10918_v45, %v8352_v44  ;;  %v10926_v45 = vld [vmem:[%s14728_s3 + $0x324] sm:$0xf]  ;;  %v8040_v14 = vld [vmem:[%s14728_s3 + $0x58] sm:$0xf] }
  0xee   :  { %2786 = vmatpush.bf16.msrb.mxu1 %v8233_v49  ;;  %v1501_v42 = vpop.f32.mrf.mxu1  ;;  %v10836_v49 = vld [vmem:[%s14728_s3 + $0x54] sm:$0xf]  ;;  %v10834_v59 = vld [vmem:[%s14728_s3 + $0x40] sm:$0xf0] }
  0xef   :  { %2799 = vmatpush.bf16.msrb.mxu2 %v8393_v20  ;;  %v8037_v55 = vor.u32 %v10836_v49, %v8034_v35  ;;  %v8434_v20 = vld [vmem:[%s14728_s3 + $0x384] sm:$0xf0]  ;;  %v10866_v35 = vld [vmem:[%s14728_s3 + $0x144] sm:$0xf] }
  0xf0   :  { %1708 = vmatmul.bf16.vlgmr.msrb.gmra.mxu0 %v11721_v34  ;;  %v1475_v34 = vpop.f32.mrf.mxu2  ;;  %2777 = vmatpush.bf16.msra.mxu3 %v7993_v57  ;;  %v8333_v57 = vor.u32 %v10913_v51, %v8332_v50  ;;  %v10849_v50 = vld [vmem:[%s14728_s3 + $0xb8] sm:$0xf0] }
  0xf1   :  { %v1476_v53 = vadd.f32 %v1475_v34, %v1463_v43  ;;  %v8313_v34 = vor.u32 %v10908_v2, %v8312_v1  ;;  %v10854_v43 = vld [vmem:[%s14728_s3 + $0xe0] sm:$0xf0]  ;;  %v10844_v1 = vld [vmem:[%s14728_s3 + $0x90] sm:$0xf0] }
  0xf2   :  { %2787 = vmatpush.bf16.msrb.mxu1 %v8213_v63  ;;  %v10886_v63 = vld [vmem:[%s14728_s3 + $0x1e4] sm:$0xf] }
  0xf3   :  { %2778 = vmatmul.bf16.vlgmr.msra.gmra.mxu3 %v11886_v8  ;;  %2800 = vmatpush.bf16.msrb.mxu2 %v8373_v37  ;;  %v1489_v29 = vadd.f32 %v1488_v36, %v1476_v53  ;;  %v10931_v36 = vld [vmem:[%s14728_s3 + $0x34c] sm:$0xf]  ;;  %v8414_v37 = vld [vmem:[%s14728_s3 + $0x35c] sm:$0xf0]  ;;  %v8154_v53 = vld [vmem:[%s14728_s3 + $0x154] sm:$0xf0] }
  0xf4   :  { %2822 = vmatpush.bf16.msrb.mxu3 %v8137_v0  ;;  %v8234_v0 = vld [vmem:[%s14728_s3 + $0x1f4] sm:$0xf0]  ;;  %v8417_v39 = vor.u32 %v10931_v36, %v8414_v37  ;;  %v8157_v61 = vor.u32 %v10866_v35, %v8154_v53  ;;  %v8572_v36 = vld [vmem:[%s14728_s3 + $0x488] sm:$0xf]  ;;  %v10973_v37 = vld [vmem:[%s14728_s3 + $0x498] sm:$0xf0] }
  0xf5   :  { %v1490_v56 = vpop.f32.mrf.mxu0  ;;  %v8237_v7 = vor.u32 %v10886_v63, %v8234_v0  ;;  %v1502_v16 = vadd.f32 %v1501_v42, %v1489_v29  ;;  %v8100_v42 = vld [vmem:[%s14728_s3 + $0xd0] sm:$0xf]  ;;  %v8060_v29 = vld [vmem:[%s14728_s3 + $0x80] sm:$0xf] }
  0xf6   :  { %2788 = vmatpush.bf16.msrb.mxu1 %v8193_v4  ;;  %v1514_v54 = vpop.f32.mrf.mxu3  ;;  %v1503_v9 = vpop.f32.mrf.mxu1  ;;  %v10941_v4 = vld [vmem:[%s14728_s3 + $0x39c] sm:$0xf]  ;;  %v8101_v49 = vor.u32 %v10854_v43, %v8100_v42  ;;  %v10904_v56 = vld [vmem:[%s14728_s3 + $0x270] sm:$0xf0]  ;;  %v8000_v43 = vld [vmem:[%s14728_s3 + $0x8] sm:$0xf] }
  0xf7   :  { %2801 = vmatpush.bf16.msrb.mxu2 %v8353_v47  ;;  %v8457_v13 = vor.u32 %v10941_v4, %v8454_v6  ;;  %v1515_v30 = vadd.f32 %v1514_v54, %v1502_v16  ;;  %v8080_v54 = vld [vmem:[%s14728_s3 + $0xa8] sm:$0xf]  ;;  %v8612_v4 = vld [vmem:[%s14728_s3 + $0x4d8] sm:$0xf]  ;;  %v10983_v6 = vld [vmem:[%s14728_s3 + $0x4e8] sm:$0xf0] }
  0xf8   :  { %2823 = vmatpush.bf16.msrb.mxu3 %v8117_v10  ;;  %v1477_v27 = vpop.f32.mrf.mxu2  ;;  %v10826_v10 = vld [vmem:[%s14728_s3 + $0x4] sm:$0xf]  ;;  %v8081_v63 = vor.u32 %v10849_v50, %v8080_v54  ;;  %v8260_v16 = vld [vmem:[%s14728_s3 + $0x210] sm:$0xf]  ;;  %v8552_v35 = vld [vmem:[%s14728_s3 + $0x460] sm:$0xf] }
  0xf9   :  { %v8437_v27 = vor.u32 %v10936_v19, %v8434_v20  ;;  %v10978_v19 = vld [vmem:[%s14728_s3 + $0x4c0] sm:$0xf0]  ;;  %v10911_v20 = vld [vmem:[%s14728_s3 + $0x2ac] sm:$0xf] }
  0xfa   :  { %2789 = vmatpush.bf16.msrb.mxu1 %v8173_v17 }
  0xfb   :  { %2802 = vmatpush.bf16.msrb.mxu2 %v8333_v57 }
  0xfc   :  { %2824 = vmatpush.bf16.msrb.mxu3 %v8097_v18  ;;  %v7997_v18 = vor.u32 %v10826_v10, %v7994_v11  ;;  %v8061_v10 = vor.u32 %v10844_v1, %v8060_v29  ;;  %v8613_v11 = vor.u32 %v10983_v6, %v8612_v4  ;;  %v8180_v4 = vld [vmem:[%s14728_s3 + $0x170] sm:$0xf]  ;;  %v10874_v6 = vld [vmem:[%s14728_s3 + $0x180] sm:$0xf0] }
  0xfd   :  { %v1540_v24 = vpop.f32.mrf.mxu0 }
  0xfe   :  { %2790 = vmatpush.bf16.msrb.mxu1 %v8153_v31  ;;  %v1516_v17 = vpop.f32.mrf.mxu3  ;;  %2809 = vmatpush.bf16.msra.mxu0 %v8613_v11  ;;  %v10958_v11 = vld [vmem:[%s14728_s3 + $0x420] sm:$0xf0] }
  0xff   :  { %2803 = vmatpush.bf16.msrb.mxu2 %v8313_v34  ;;  %v10899_v34 = vld [vmem:[%s14728_s3 + $0x248] sm:$0xf0]  ;;  %v10894_v17 = vld [vmem:[%s14728_s3 + $0x220] sm:$0xf0] }
 0x100   :  { %2825 = vmatpush.bf16.msrb.mxu3 %v8077_v32  ;;  %v8197_v32 = vor.u32 %v10876_v25, %v8194_v26  ;;  %v8334_v25 = vld [vmem:[%s14728_s3 + $0x2bc] sm:$0xf0]  ;;  %v8261_v26 = vor.u32 %v10894_v17, %v8260_v16  ;;  %v10869_v16 = vld [vmem:[%s14728_s3 + $0x158] sm:$0xf0]  ;;  %v10847_v17 = vld [vmem:[%s14728_s3 + $0xac] sm:$0xf] }
 0x102   :  { %2835 = vmatpush.bf16.msra.mxu1 %v8297_v38 }
 0x103   :  { %2848 = vmatpush.bf16.msra.mxu2 %v8457_v13 }
 0x104   :  { %2826 = vmatpush.bf16.msrb.mxu3 %v8057_v46  ;;  %v8394_v46 = vld [vmem:[%s14728_s3 + $0x334] sm:$0xf0] }
 0x105   :  { %v1527_v31 = vpop.f32.mrf.mxu2  ;;  %v1542_v21 = vpop.f32.mrf.mxu0  ;;  %v8397_v52 = vor.u32 %v10926_v45, %v8394_v46  ;;  %v8220_v45 = vld [vmem:[%s14728_s3 + $0x1c0] sm:$0xf] }
 0x106   :  { %2836 = vmatpush.bf16.msra.mxu1 %v8277_v48  ;;  %v1528_v38 = vadd.f32 %v1527_v31, %v1515_v30  ;;  %v8177_v48 = vor.u32 %v10871_v33, %v8174_v41  ;;  %v8337_v30 = vor.u32 %v10911_v20, %v8334_v25  ;;  %v8240_v31 = vld [vmem:[%s14728_s3 + $0x1e8] sm:$0xf]  ;;  %v8573_v33 = vor.u32 %v10973_v37, %v8572_v36  ;;  %v10968_v21 = vld [vmem:[%s14728_s3 + $0x470] sm:$0xf0]  ;;  %v8302_v20 = vld [vmem:[%s14728_s3 + $0x274] sm:$0xf0] }
 0x107   :  { %2849 = vmatpush.bf16.msra.mxu2 %v8437_v27  ;;  %v8020_v27 = vld [vmem:[%s14728_s3 + $0x30] sm:$0xf]  ;;  %v8553_v50 = vor.u32 %v10968_v21, %v8552_v35  ;;  %v10897_v37 = vld [vmem:[%s14728_s3 + $0x23c] sm:$0xf]  ;;  %v8262_v35 = vld [vmem:[%s14728_s3 + $0x224] sm:$0xf0] }
 0x108   :  { %2827 = vmatpush.bf16.msrb.mxu3 %v8037_v55  ;;  %v1541_v44 = vadd.f32 %v1540_v24, %v1528_v38  ;;  %v8300_v55 = vld [vmem:[%s14728_s3 + $0x260] sm:$0xf]  ;;  %v10906_v38 = vld [vmem:[%s14728_s3 + $0x284] sm:$0xf] }
 0x109   :  { %v8301_v9 = vor.u32 %v10904_v56, %v8300_v55 }
 0x10a   :  { %2837 = vmatpush.bf16.msra.mxu1 %v8257_v58  ;;  %v1727_v47 = vmax.f32 %v1541_v44, 0.0  ;;  %v10921_v58 = vld [vmem:[%s14728_s3 + $0x2fc] sm:$0xf] }
 0x10b   :  { %2850 = vmatpush.bf16.msra.mxu2 %v8417_v39  ;;  %v8377_v0 = vor.u32 %v10921_v58, %v8374_v60  ;;  %v8314_v39 = vld [vmem:[%s14728_s3 + $0x294] sm:$0xf0]  ;;  %v10829_v44 = vld [vmem:[%s14728_s3 + $0x18] sm:$0xf0]  ;;  %v10879_v58 = vld [vmem:[%s14728_s3 + $0x1a8] sm:$0xf0] }
 0x10c   :  { %2828 = vmatpush.bf16.msrb.mxu3 %v8017_v3  ;;  %v12066_v51 = vpack.c.bf16 %v1727_v47, %v1727_v47  ;;  %v8280_v3 = vld [vmem:[%s14728_s3 + $0x238] sm:$0xf]  ;;  %v8317_v46 = vor.u32 %v10906_v38, %v8314_v39  ;;  %v10884_v47 = vld [vmem:[%s14728_s3 + $0x1d0] sm:$0xf0]  ;;  %v8001_v53 = vor.u32 %v10829_v44, %v8000_v43  ;;  %v8122_v60 = vld [vmem:[%s14728_s3 + $0x10c] sm:$0xf0] }
 0x10d   :  { %v1529_v57 = vpop.f32.mrf.mxu2  ;;  %v8281_v13 = vor.u32 %v10899_v34, %v8280_v3  ;;  %v8221_v55 = vor.u32 %v10884_v47, %v8220_v45  ;;  %v8282_v38 = vld [vmem:[%s14728_s3 + $0x24c] sm:$0xf0]  ;;  %v10948_v39 = vld [vmem:[%s14728_s3 + $0x3d0] sm:$0xf0]  ;;  %v10981_v43 = vld [vmem:[%s14728_s3 + $0x4dc] sm:$0xf] }
 0x10e   :  { %2838 = vmatpush.bf16.msra.mxu1 %v8237_v7  ;;  %v12087_v2 = vpop.f32.mrf.mxu1  ;;  %v10916_v7 = vld [vmem:[%s14728_s3 + $0x2d4] sm:$0xf]  ;;  %v8200_v57 = vld [vmem:[%s14728_s3 + $0x198] sm:$0xf]  ;;  %v8614_v44 = vld [vmem:[%s14728_s3 + $0x4ec] sm:$0xf0]  ;;  %v8285_v45 = vor.u32 %v10897_v37, %v8282_v38 }
 0x10f   :  { %2851 = vmatpush.bf16.msra.mxu2 %v8397_v52  ;;  %2791 = vmatmul.bf16.vlgmr.msrb.gmra.mxu1 %v12066_v51  ;;  %v8357_v40 = vor.u32 %v10916_v7, %v8354_v12  ;;  %v312_v52 = vperm.slane %v11753_v62, 2  ;;  %v10857_v62 = vld [vmem:[%s14728_s3 + $0xfc] sm:$0xf]  ;;  %v8201_v1 = vor.u32 %v10879_v58, %v8200_v57  ;;  %v8102_v7 = vld [vmem:[%s14728_s3 + $0xe4] sm:$0xf0] }
 0x110   :  { %2829 = vmatpush.bf16.msrb.mxu3 %v7997_v18  ;;  %v8592_v18 = vld [vmem:[%s14728_s3 + $0x4b0] sm:$0xf]  ;;  %v8125_v3 = vor.u32 %v10857_v62, %v8122_v60  ;;  %v10832_v57 = vld [vmem:[%s14728_s3 + $0x34] sm:$0xf]  ;;  %v8022_v58 = vld [vmem:[%s14728_s3 + $0x44] sm:$0xf0] }
 0x111   :  { %v8593_v24 = vor.u32 %v10978_v19, %v8592_v18  ;;  %v8082_v18 = vld [vmem:[%s14728_s3 + $0xbc] sm:$0xf0]  ;;  %v10902_v19 = vld [vmem:[%s14728_s3 + $0x264] sm:$0xf]  ;;  %v8042_v47 = vld [vmem:[%s14728_s3 + $0x6c] sm:$0xf0] }
 0x112   :  { %2839 = vmatpush.bf16.msra.mxu1 %v8217_v22  ;;  %v8041_v22 = vor.u32 %v10839_v15, %v8040_v14  ;;  %v8181_v14 = vor.u32 %v10874_v6, %v8180_v4  ;;  %v10971_v4 = vld [vmem:[%s14728_s3 + $0x48c] sm:$0xf]  ;;  %v8574_v6 = vld [vmem:[%s14728_s3 + $0x49c] sm:$0xf0]  ;;  %v10961_v37 = vld [vmem:[%s14728_s3 + $0x43c] sm:$0xf] }
 0x113   :  { %2830 = vmatmul.bf16.vlgmr.msrb.gmra.mxu3 %v11886_v8  ;;  %2852 = vmatpush.bf16.msra.mxu2 %v8377_v0  ;;  %v1554_v0 = vadd.f32 %v12087_v2, %v312_v52  ;;  %v10852_v2 = vld [vmem:[%s14728_s3 + $0xd4] sm:$0xf]  ;;  %v8534_v38 = vld [vmem:[%s14728_s3 + $0x44c] sm:$0xf0] }
 0x114   :  { %2874 = vmatpush.bf16.msra.mxu3 %v8141_v23  ;;  %2810 = vmatpush.bf16.msra.mxu0 %v8593_v24  ;;  %v8105_v15 = vor.u32 %v10852_v2, %v8102_v7 }
 0x116   :  { %2840 = vmatpush.bf16.msra.mxu1 %v8197_v32  ;;  %v12128_v23 = vpop.f32.mrf.mxu3  ;;  %v1555_v28 = vpop.f32.mrf.mxu1  ;;  %v10889_v32 = vld [vmem:[%s14728_s3 + $0x1f8] sm:$0xf0] }
 0x117   :  { %2853 = vmatpush.bf16.msra.mxu2 %v8357_v40  ;;  %v8241_v41 = vor.u32 %v10889_v32, %v8240_v31  ;;  %v1567_v12 = vadd.f32 %v12128_v23, %v1554_v0  ;;  %v8160_v40 = vld [vmem:[%s14728_s3 + $0x148] sm:$0xf]  ;;  %v10953_v23 = vld [vmem:[%s14728_s3 + $0x3f8] sm:$0xf0]  ;;  %v8305_v28 = vor.u32 %v10902_v19, %v8302_v20  ;;  %v8062_v31 = vld [vmem:[%s14728_s3 + $0x94] sm:$0xf0] }
 0x118   :  { %2875 = vmatpush.bf16.msra.mxu3 %v8121_v5  ;;  %v8021_v5 = vor.u32 %v10834_v59, %v8020_v27  ;;  %2811 = vmatpush.bf16.msra.mxu0 %v8573_v33  ;;  %v8161_v27 = vor.u32 %v10869_v16, %v8160_v40  ;;  %v8085_v59 = vor.u32 %v10847_v17, %v8082_v18  ;;  %v8472_v33 = vld [vmem:[%s14728_s3 + $0x3c0] sm:$0xf]  ;;  %v10865_v40 = vld [vmem:[%s14728_s3 + $0x138] sm:$0xf0]  ;;  %v8440_v17 = vld [vmem:[%s14728_s3 + $0x378] sm:$0xf] }
 0x119   :  { %v10939_v18 = vld [vmem:[%s14728_s3 + $0x388] sm:$0xf0] }
 0x11a   :  { %2841 = vmatpush.bf16.msra.mxu1 %v8177_v48  ;;  %v10862_v48 = vld [vmem:[%s14728_s3 + $0x124] sm:$0xf] }
 0x11b   :  { %2854 = vmatpush.bf16.msra.mxu2 %v8337_v30  ;;  %v10842_v30 = vld [vmem:[%s14728_s3 + $0x84] sm:$0xf] }
 0x11c   :  { %2876 = vmatpush.bf16.msra.mxu3 %v8101_v49  ;;  %v8142_v49 = vld [vmem:[%s14728_s3 + $0x134] sm:$0xf0]  ;;  %2812 = vmatpush.bf16.msra.mxu0 %v8553_v50  ;;  %v8594_v50 = vld [vmem:[%s14728_s3 + $0x4c4] sm:$0xf0] }
 0x11d   :  { %v1579_v42 = vpop.f32.mrf.mxu0  ;;  %v8145_v56 = vor.u32 %v10862_v48, %v8142_v49  ;;  %v8617_v48 = vor.u32 %v10981_v43, %v8614_v44  ;;  %v10892_v49 = vld [vmem:[%s14728_s3 + $0x214] sm:$0xf]  ;;  %v8182_v44 = vld [vmem:[%s14728_s3 + $0x184] sm:$0xf0] }
 0x11e   :  { %2842 = vmatpush.bf16.msra.mxu1 %v8157_v61  ;;  %v1568_v54 = vpop.f32.mrf.mxu3  ;;  %v8532_v61 = vld [vmem:[%s14728_s3 + $0x438] sm:$0xf]  ;;  %v1580_v24 = vadd.f32 %v1579_v42, %v1567_v12  ;;  %v8473_v42 = vor.u32 %v10948_v39, %v8472_v33  ;;  %v8577_v12 = vor.u32 %v10971_v4, %v8574_v6  ;;  %v10872_v39 = vld [vmem:[%s14728_s3 + $0x174] sm:$0xf]  ;;  %v8068_v6 = vld [vmem:[%s14728_s3 + $0x88] sm:$0xf] }
 0x11f   :  { %2855 = vmatpush.bf16.msra.mxu2 %v8317_v46  ;;  %v10837_v46 = vld [vmem:[%s14728_s3 + $0x5c] sm:$0xf]  ;;  %v10976_v54 = vld [vmem:[%s14728_s3 + $0x4b4] sm:$0xf] }
 0x120   :  { %2877 = vmatpush.bf16.msra.mxu3 %v8081_v63  ;;  %v10963_v63 = vld [vmem:[%s14728_s3 + $0x448] sm:$0xf0]  ;;  %v8597_v60 = vor.u32 %v10976_v54, %v8594_v50 }
 0x121   :  { %2843 = vmatmul.bf16.vlgmr.msra.gmra.mxu1 %v12066_v51  ;;  %v8533_v29 = vor.u32 %v10963_v63, %v8532_v61  ;;  %v10887_v61 = vld [vmem:[%s14728_s3 + $0x1ec] sm:$0xf]  ;;  %v8242_v63 = vld [vmem:[%s14728_s3 + $0x1fc] sm:$0xf0] }
 0x122   :  { %2887 = vmatpush.bf16.msrb.mxu1 %v8301_v9  ;;  %v8245_v7 = vor.u32 %v10887_v61, %v8242_v63  ;;  %v10905_v61 = vld [vmem:[%s14728_s3 + $0x278] sm:$0xf0]  ;;  %v10924_v63 = vld [vmem:[%s14728_s3 + $0x310] sm:$0xf0] }
 0x123   :  { %2813 = vmatpush.bf16.msra.mxu0 %v8533_v29  ;;  %v8460_v29 = vld [vmem:[%s14728_s3 + $0x3a0] sm:$0xf] }
 0x124   :  { %2878 = vmatpush.bf16.msra.mxu3 %v8061_v10  ;;  %v8512_v10 = vld [vmem:[%s14728_s3 + $0x410] sm:$0xf] }
 0x125   :  { %v1592_v9 = vpop.f32.mrf.mxu2  ;;  %v1581_v34 = vpop.f32.mrf.mxu0 }
 0x126   :  { %2888 = vmatpush.bf16.msrb.mxu1 %v8281_v13  ;;  %v8513_v13 = vor.u32 %v10958_v11, %v8512_v10  ;;  %v10827_v34 = vld [vmem:[%s14728_s3 + $0xc] sm:$0xf]  ;;  %v8002_v10 = vld [vmem:[%s14728_s3 + $0x1c] sm:$0xf0]  ;;  %v10882_v11 = vld [vmem:[%s14728_s3 + $0x1c4] sm:$0xf] }
 0x127   :  { %v8005_v19 = vor.u32 %v10827_v34, %v8002_v10 }
 0x128   :  { %2879 = vmatpush.bf16.msra.mxu3 %v8041_v22  ;;  %2814 = vmatpush.bf16.msra.mxu0 %v8513_v13  ;;  %v8492_v22 = vld [vmem:[%s14728_s3 + $0x3e8] sm:$0xf] }
 0x12a   :  { %2889 = vmatpush.bf16.msrb.mxu1 %v8261_v26  ;;  %v8493_v26 = vor.u32 %v10953_v23, %v8492_v22  ;;  %v10966_v22 = vld [vmem:[%s14728_s3 + $0x464] sm:$0xf]  ;;  %v8554_v23 = vld [vmem:[%s14728_s3 + $0x474] sm:$0xf0] }
 0x12c   :  { %2880 = vmatpush.bf16.msra.mxu3 %v8021_v5  ;;  %2815 = vmatpush.bf16.msra.mxu0 %v8493_v26  ;;  %v1593_v5 = vadd.f32 %v1592_v9, %v1580_v24  ;;  %v10877_v26 = vld [vmem:[%s14728_s3 + $0x19c] sm:$0xf] }
 0x12d   :  { %v1594_v25 = vpop.f32.mrf.mxu2  ;;  %v1631_v32 = vpop.f32.mrf.mxu0 }
 0x12e   :  { %2890 = vmatpush.bf16.msrb.mxu1 %v8241_v41  ;;  %v1605_v36 = vpop.f32.mrf.mxu1  ;;  %v8065_v41 = vor.u32 %v10842_v30, %v8062_v31  ;;  %v8128_v30 = vld [vmem:[%s14728_s3 + $0x100] sm:$0xf]  ;;  %v10860_v31 = vld [vmem:[%s14728_s3 + $0x110] sm:$0xf0] }
 0x12f   :  { %v1606_v21 = vadd.f32 %v1605_v36, %v1593_v5  ;;  %v10934_v36 = vld [vmem:[%s14728_s3 + $0x360] sm:$0xf0]  ;;  %v8129_v33 = vor.u32 %v10860_v31, %v8128_v30 }
 0x130   :  { %2881 = vmatpush.bf16.msra.mxu3 %v8001_v53  ;;  %2816 = vmatpush.bf16.msra.mxu0 %v8473_v42  ;;  %v8045_v53 = vor.u32 %v10837_v46, %v8042_v47  ;;  %v8537_v42 = vor.u32 %v10961_v37, %v8534_v38  ;;  %v10855_v46 = vld [vmem:[%s14728_s3 + $0xe8] sm:$0xf0]  ;;  %v8400_v47 = vld [vmem:[%s14728_s3 + $0x328] sm:$0xf]  ;;  %v10914_v30 = vld [vmem:[%s14728_s3 + $0x2c0] sm:$0xf0] }
 0x131   :  { %v10835_v37 = vld [vmem:[%s14728_s3 + $0x48] sm:$0xf0] }
 0x132   :  { %2891 = vmatpush.bf16.msrb.mxu1 %v8221_v55 }
 0x133   :  { %2882 = vmatmul.bf16.vlgmr.msra.gmra.mxu3 %v11886_v8 }
 0x134   :  { %2926 = vmatpush.bf16.msrb.mxu3 %v8145_v56  ;;  %2861 = vmatpush.bf16.msrb.mxu0 %v8617_v48  ;;  %v8265_v56 = vor.u32 %v10892_v49, %v8262_v35  ;;  %v10929_v48 = vld [vmem:[%s14728_s3 + $0x338] sm:$0xf0]  ;;  %v10956_v49 = vld [vmem:[%s14728_s3 + $0x414] sm:$0xf]  ;;  %v8514_v35 = vld [vmem:[%s14728_s3 + $0x424] sm:$0xf0] }
 0x135   :  { %v1633_v62 = vpop.f32.mrf.mxu0  ;;  %v8517_v54 = vor.u32 %v10956_v49, %v8514_v35  ;;  %v8401_v50 = vor.u32 %v10929_v48, %v8400_v47  ;;  %v10942_v47 = vld [vmem:[%s14728_s3 + $0x3a4] sm:$0xf]  ;;  %v8462_v48 = vld [vmem:[%s14728_s3 + $0x3b4] sm:$0xf0]  ;;  %v8008_v49 = vld [vmem:[%s14728_s3 + $0x10] sm:$0xf] }
 0x136   :  { %2892 = vmatpush.bf16.msrb.mxu1 %v8201_v1  ;;  %v1618_v52 = vpop.f32.mrf.mxu3  ;;  %v1607_v0 = vpop.f32.mrf.mxu1  ;;  %v10944_v1 = vld [vmem:[%s14728_s3 + $0x3b0] sm:$0xf0]  ;;  %v8380_v62 = vld [vmem:[%s14728_s3 + $0x300] sm:$0xf]  ;;  %v10830_v35 = vld [vmem:[%s14728_s3 + $0x20] sm:$0xf0] }
 0x137   :  { %v1619_v55 = vadd.f32 %v1618_v52, %v1606_v21  ;;  %v8461_v13 = vor.u32 %v10944_v1, %v8460_v29  ;;  %v8185_v21 = vor.u32 %v10872_v39, %v8182_v44  ;;  %v10951_v0 = vld [vmem:[%s14728_s3 + $0x3ec] sm:$0xf]  ;;  %v8248_v39 = vld [vmem:[%s14728_s3 + $0x1f0] sm:$0xf]  ;;  %v8320_v44 = vld [vmem:[%s14728_s3 + $0x288] sm:$0xf] }
 0x138   :  { %2927 = vmatpush.bf16.msrb.mxu3 %v8125_v3  ;;  %2862 = vmatpush.bf16.msrb.mxu0 %v8597_v60  ;;  %v8025_v3 = vor.u32 %v10832_v57, %v8022_v58  ;;  %v10850_v57 = vld [vmem:[%s14728_s3 + $0xc0] sm:$0xf0]  ;;  %v8308_v60 = vld [vmem:[%s14728_s3 + $0x268] sm:$0xf] }
 0x139   :  { %v1632_v9 = vadd.f32 %v1631_v32, %v1619_v55  ;;  %v8420_v32 = vld [vmem:[%s14728_s3 + $0x350] sm:$0xf]  ;;  %v8162_v55 = vld [vmem:[%s14728_s3 + $0x15c] sm:$0xf0]  ;;  %v8309_v4 = vor.u32 %v10905_v61, %v8308_v60 }
 0x13a   :  { %2893 = vmatpush.bf16.msrb.mxu1 %v8181_v14  ;;  %v8222_v14 = vld [vmem:[%s14728_s3 + $0x1d4] sm:$0xf0]  ;;  %v8421_v43 = vor.u32 %v10934_v36, %v8420_v32  ;;  %v8208_v61 = vld [vmem:[%s14728_s3 + $0x1a0] sm:$0xf] }
 0x13b   :  { %v1728_v2 = vmax.f32 %v1632_v9, 0.0  ;;  %v8225_v24 = vor.u32 %v10882_v11, %v8222_v14  ;;  %v8494_v9 = vld [vmem:[%s14728_s3 + $0x3fc] sm:$0xf0]  ;;  %v8360_v11 = vld [vmem:[%s14728_s3 + $0x2d8] sm:$0xf] }
 0x13c   :  { %2928 = vmatpush.bf16.msrb.mxu3 %v8105_v15  ;;  %v8148_v15 = vld [vmem:[%s14728_s3 + $0x128] sm:$0xf]  ;;  %2863 = vmatpush.bf16.msrb.mxu0 %v8577_v12  ;;  %v8497_v34 = vor.u32 %v10951_v0, %v8494_v9  ;;  %v8288_v12 = vld [vmem:[%s14728_s3 + $0x240] sm:$0xf]  ;;  %v10919_v14 = vld [vmem:[%s14728_s3 + $0x2e8] sm:$0xf0] }
 0x13d   :  { %v12331_v16 = vpack.c.bf16 %v1728_v2, %v1728_v2  ;;  %v8149_v25 = vor.u32 %v10865_v40, %v8148_v15  ;;  %v10845_v2 = vld [vmem:[%s14728_s3 + $0x98] sm:$0xf0]  ;;  %v10946_v15 = vld [vmem:[%s14728_s3 + $0x3c4] sm:$0xf]  ;;  %v8474_v40 = vld [vmem:[%s14728_s3 + $0x3d4] sm:$0xf0] }
 0x13e   :  { %2894 = vmatpush.bf16.msrb.mxu1 %v8161_v27  ;;  %v1620_v20 = vpop.f32.mrf.mxu3  ;;  %v8557_v27 = vor.u32 %v10966_v22, %v8554_v23  ;;  %v10840_v22 = vld [vmem:[%s14728_s3 + $0x70] sm:$0xf0]  ;;  %v8028_v36 = vld [vmem:[%s14728_s3 + $0x38] sm:$0xf] }
 0x13f   :  { %2804 = vmatmul.bf16.vlgmr.msrb.gmra.mxu2 %v12331_v16  ;;  %v8048_v20 = vld [vmem:[%s14728_s3 + $0x60] sm:$0xf] }
 0x140   :  { %2929 = vmatpush.bf16.msrb.mxu3 %v8085_v59  ;;  %2900 = vmatpush.bf16.msrb.mxu2 %v8461_v13  ;;  %v8441_v59 = vor.u32 %v10939_v18, %v8440_v17  ;;  %v10900_v13 = vld [vmem:[%s14728_s3 + $0x250] sm:$0xf0]  ;;  %v8069_v17 = vor.u32 %v10845_v2, %v8068_v6  ;;  %v8477_v18 = vor.u32 %v10946_v15, %v8474_v40  ;;  %v10875_v6 = vld [vmem:[%s14728_s3 + $0x188] sm:$0xf0]  ;;  %v8168_v15 = vld [vmem:[%s14728_s3 + $0x150] sm:$0xf] }
 0x141   :  { %2895 = vmatmul.bf16.vlgmr.msrb.gmra.mxu1 %v12066_v51  ;;  %2864 = vmatpush.bf16.msrb.mxu0 %v8557_v27  ;;  %v11528_v27 = vld [vmem:[%s14727_s2] sm:$0xf]  ;;  %v8049_v31 = vor.u32 %v10840_v22, %v8048_v20  ;;  %v8382_v20 = vld [vmem:[%s14728_s3 + $0x314] sm:$0xf0] }
 0x142   :  { %2939 = vmatpush.bf16.msra.mxu1 %v8305_v28  ;;  %v8202_v28 = vld [vmem:[%s14728_s3 + $0x1ac] sm:$0xf0] }
 0x143   :  { %v8205_v5 = vor.u32 %v10877_v26, %v8202_v28  ;;  %v10895_v26 = vld [vmem:[%s14728_s3 + $0x228] sm:$0xf0]  ;;  %v8340_v28 = vld [vmem:[%s14728_s3 + $0x2b0] sm:$0xf] }
 0x144   :  { %2930 = vmatpush.bf16.msrb.mxu3 %v8065_v41  ;;  %2901 = vmatpush.bf16.msrb.mxu2 %v8441_v59  ;;  %v313_v59 = vperm.slane %v11528_v27, 3 }
 0x145   :  { %v12373_v41 = vpop.f32.mrf.mxu2  ;;  %2865 = vmatpush.bf16.msrb.mxu0 %v8537_v42  ;;  %v10890_v42 = vld [vmem:[%s14728_s3 + $0x200] sm:$0xf0] }
 0x146   :  { %2940 = vmatpush.bf16.msra.mxu1 %v8285_v45  ;;  %v8108_v45 = vld [vmem:[%s14728_s3 + $0xd8] sm:$0xf] }
 0x147   :  { %v8109_v52 = vor.u32 %v10855_v46, %v8108_v45  ;;  %v10909_v45 = vld [vmem:[%s14728_s3 + $0x298] sm:$0xf0]  ;;  %v8029_v46 = vor.u32 %v10835_v37, %v8028_v36  ;;  %v8600_v36 = vld [vmem:[%s14728_s3 + $0x4b8] sm:$0xf]  ;;  %v10979_v37 = vld [vmem:[%s14728_s3 + $0x4c8] sm:$0xf0] }
 0x148   :  { %2931 = vmatpush.bf16.msrb.mxu3 %v8045_v53  ;;  %v10867_v53 = vld [vmem:[%s14728_s3 + $0x14c] sm:$0xf]  ;;  %2902 = vmatpush.bf16.msrb.mxu2 %v8421_v43  ;;  %v1645_v43 = vadd.f32 %v12373_v41, %v313_v59  ;;  %v8249_v41 = vor.u32 %v10890_v42, %v8248_v39  ;;  %v10912_v39 = vld [vmem:[%s14728_s3 + $0x2b4] sm:$0xf]  ;;  %v8342_v42 = vld [vmem:[%s14728_s3 + $0x2c4] sm:$0xf0] }
 0x149   :  { %2866 = vmatpush.bf16.msrb.mxu0 %v8517_v54  ;;  %v8165_v29 = vor.u32 %v10867_v53, %v8162_v55  ;;  %v10885_v53 = vld [vmem:[%s14728_s3 + $0x1d8] sm:$0xf0]  ;;  %v8009_v55 = vor.u32 %v10830_v35, %v8008_v49  ;;  %v8560_v35 = vld [vmem:[%s14728_s3 + $0x468] sm:$0xf] }
 0x14a   :  { %2941 = vmatpush.bf16.msra.mxu1 %v8265_v56  ;;  %v8088_v56 = vld [vmem:[%s14728_s3 + $0xb0] sm:$0xf]  ;;  %v10945_v49 = vld [vmem:[%s14728_s3 + $0x3b8] sm:$0xf0] }
 0x14b   :  { %v8089_v1 = vor.u32 %v10850_v57, %v8088_v56  ;;  %v10937_v56 = vld [vmem:[%s14728_s3 + $0x37c] sm:$0xf]  ;;  %v8442_v57 = vld [vmem:[%s14728_s3 + $0x38c] sm:$0xf0] }
 0x14c   :  { %2932 = vmatpush.bf16.msrb.mxu3 %v8025_v3  ;;  %2903 = vmatpush.bf16.msrb.mxu2 %v8401_v50  ;;  %v8465_v50 = vor.u32 %v10942_v47, %v8462_v48  ;;  %v8445_v0 = vor.u32 %v10937_v56, %v8442_v57  ;;  %v10907_v47 = vld [vmem:[%s14728_s3 + $0x28c] sm:$0xf]  ;;  %v8322_v48 = vld [vmem:[%s14728_s3 + $0x29c] sm:$0xf0]  ;;  %v10964_v57 = vld [vmem:[%s14728_s3 + $0x450] sm:$0xf0] }
 0x14d   :  { %v12409_v58 = vpop.f32.mrf.mxu0  ;;  %v1646_v3 = vpop.f32.mrf.mxu2  ;;  %2867 = vmatpush.bf16.msrb.mxu0 %v8497_v34  ;;  %v8540_v56 = vld [vmem:[%s14728_s3 + $0x440] sm:$0xf] }
 0x14e   :  { %2942 = vmatpush.bf16.msra.mxu1 %v8245_v7  ;;  %v8381_v7 = vor.u32 %v10924_v63, %v8380_v62  ;;  %v12435_v10 = vpop.f32.mrf.mxu1  ;;  %v1658_v54 = vadd.f32 %v12409_v58, %v1645_v43  ;;  %v10880_v58 = vld [vmem:[%s14728_s3 + $0x1b0] sm:$0xf0]  ;;  %v8580_v43 = vld [vmem:[%s14728_s3 + $0x490] sm:$0xf] }
 0x14f   :  { %2856 = vmatmul.bf16.vlgmr.msra.gmra.mxu2 %v12331_v16  ;;  %v8209_v34 = vor.u32 %v10880_v58, %v8208_v61  ;;  %v8541_v61 = vor.u32 %v10964_v57, %v8540_v56  ;;  %v8428_v58 = vld [vmem:[%s14728_s3 + $0x358] sm:$0xf] }
 0x150   :  { %2933 = vmatpush.bf16.msrb.mxu3 %v8005_v19  ;;  %v8289_v19 = vor.u32 %v10900_v13, %v8288_v12  ;;  %2904 = vmatpush.bf16.msrb.mxu2 %v8381_v7  ;;  %v1671_v63 = vadd.f32 %v12435_v10, %v1658_v54  ;;  %v10927_v10 = vld [vmem:[%s14728_s3 + $0x32c] sm:$0xf] }
 0x151   :  { %2868 = vmatpush.bf16.msrb.mxu0 %v8477_v18 }
 0x152   :  { %2943 = vmatpush.bf16.msra.mxu1 %v8225_v24  ;;  %v8361_v24 = vor.u32 %v10919_v14, %v8360_v11  ;;  %v8402_v11 = vld [vmem:[%s14728_s3 + $0x33c] sm:$0xf0] }
 0x153   :  { %2934 = vmatmul.bf16.vlgmr.msrb.gmra.mxu3 %v11886_v8 }
 0x154   :  { %2978 = vmatpush.bf16.msra.mxu3 %v8149_v25  ;;  %v8268_v25 = vld [vmem:[%s14728_s3 + $0x218] sm:$0xf]  ;;  %2905 = vmatpush.bf16.msrb.mxu2 %v8361_v24 }
 0x155   :  { %v1659_v23 = vpop.f32.mrf.mxu0  ;;  %v8269_v32 = vor.u32 %v10895_v26, %v8268_v25  ;;  %v8620_v25 = vld [vmem:[%s14728_s3 + $0x4e0] sm:$0xf]  ;;  %v10984_v26 = vld [vmem:[%s14728_s3 + $0x4f0] sm:$0xf0] }
 0x156   :  { %2944 = vmatpush.bf16.msra.mxu1 %v8205_v5  ;;  %v1683_v38 = vpop.f32.mrf.mxu3  ;;  %v8341_v5 = vor.u32 %v10914_v30, %v8340_v28  ;;  %v8621_v28 = vor.u32 %v10984_v26, %v8620_v25  ;;  %v10917_v30 = vld [vmem:[%s14728_s3 + $0x2dc] sm:$0xf] }
 0x157   :  { %v1684_v2 = vadd.f32 %v1683_v38, %v1671_v63  ;;  %v10935_v63 = vld [vmem:[%s14728_s3 + $0x368] sm:$0xf0] }
 0x158   :  { %2979 = vmatpush.bf16.msra.mxu3 %v8129_v33  ;;  %v1672_v33 = vpop.f32.mrf.mxu1  ;;  %2906 = vmatpush.bf16.msrb.mxu2 %v8341_v5 }
 0x159   :  { %v8601_v33 = vor.u32 %v10979_v37, %v8600_v36 }
 0x15a   :  { %2945 = vmatpush.bf16.msra.mxu1 %v8185_v21  ;;  %v8321_v21 = vor.u32 %v10909_v45, %v8320_v44  ;;  %v10974_v44 = vld [vmem:[%s14728_s3 + $0x4a0] sm:$0xf0] }
 0x15c   :  { %2980 = vmatpush.bf16.msra.mxu3 %v8109_v52  ;;  %v8228_v52 = vld [vmem:[%s14728_s3 + $0x1c8] sm:$0xf]  ;;  %2907 = vmatpush.bf16.msrb.mxu2 %v8321_v21  ;;  %v10969_v21 = vld [vmem:[%s14728_s3 + $0x478] sm:$0xf0] }
 0x15d   :  { %v8229_v62 = vor.u32 %v10885_v53, %v8228_v52  ;;  %v8325_v52 = vor.u32 %v10907_v47, %v8322_v48  ;;  %v8561_v54 = vor.u32 %v10969_v21, %v8560_v35  ;;  %v8542_v47 = vld [vmem:[%s14728_s3 + $0x454] sm:$0xf0]  ;;  %v10957_v35 = vld [vmem:[%s14728_s3 + $0x41c] sm:$0xf]  ;;  %v8522_v21 = vld [vmem:[%s14728_s3 + $0x42c] sm:$0xf0] }
 0x15e   :  { %2946 = vmatpush.bf16.msra.mxu1 %v8165_v29  ;;  %v1685_v60 = vpop.f32.mrf.mxu3  ;;  %v10932_v29 = vld [vmem:[%s14728_s3 + $0x354] sm:$0xf] }
 0x15f   :  { %2908 = vmatmul.bf16.vlgmr.msrb.gmra.mxu2 %v12331_v16 }
 0x160   :  { %2981 = vmatpush.bf16.msra.mxu3 %v8089_v1  ;;  %2952 = vmatpush.bf16.msra.mxu2 %v8465_v50  ;;  %v1722_v9 = vpop.f32.mrf.mxu1  ;;  %v8422_v1 = vld [vmem:[%s14728_s3 + $0x364] sm:$0xf0]  ;;  %v8448_v50 = vld [vmem:[%s14728_s3 + $0x380] sm:$0xf] }
 0x161   :  { %2947 = vmatmul.bf16.vlgmr.msra.gmra.mxu1 %v12066_v51  ;;  %v8425_v7 = vor.u32 %v10932_v29, %v8422_v1  ;;  %v8429_v29 = vor.u32 %v10935_v63, %v8428_v58  ;;  %v10985_v58 = vld [vmem:[%s14728_s3 + $0x4f8] sm:$0xf0] }
 0x162   :  { %2991 = vmatpush.bf16.msrb.mxu1 %v8309_v4  ;;  %v8188_v4 = vld [vmem:[%s14728_s3 + $0x178] sm:$0xf] }
 0x163   :  { %v8189_v13 = vor.u32 %v10875_v6, %v8188_v4  ;;  %v8500_v4 = vld [vmem:[%s14728_s3 + $0x3f0] sm:$0xf]  ;;  %v10954_v6 = vld [vmem:[%s14728_s3 + $0x400] sm:$0xf0] }
 0x164   :  { %2982 = vmatpush.bf16.msra.mxu3 %v8069_v17  ;;  %2953 = vmatpush.bf16.msra.mxu2 %v8445_v0  ;;  %v8405_v17 = vor.u32 %v10927_v10, %v8402_v11  ;;  %v8520_v0 = vld [vmem:[%s14728_s3 + $0x418] sm:$0xf]  ;;  %v8388_v10 = vld [vmem:[%s14728_s3 + $0x308] sm:$0xf]  ;;  %v10925_v11 = vld [vmem:[%s14728_s3 + $0x318] sm:$0xf0] }
 0x165   :  { %v1696_v3 = vpop.f32.mrf.mxu2 }
 0x166   :  { %2992 = vmatpush.bf16.msrb.mxu1 %v8289_v19  ;;  %v1697_v12 = vadd.f32 %v1696_v3, %v1684_v2  ;;  %v10922_v19 = vld [vmem:[%s14728_s3 + $0x304] sm:$0xf]  ;;  %v8408_v3 = vld [vmem:[%s14728_s3 + $0x330] sm:$0xf] }
 0x167   :  { %v8385_v59 = vor.u32 %v10922_v19, %v8382_v20  ;;  %v8368_v19 = vld [vmem:[%s14728_s3 + $0x2e0] sm:$0xf]  ;;  %v10920_v20 = vld [vmem:[%s14728_s3 + $0x2f0] sm:$0xf0] }
 0x168   :  { %2983 = vmatpush.bf16.msra.mxu3 %v8049_v31  ;;  %2954 = vmatpush.bf16.msra.mxu2 %v8425_v7  ;;  %v1724_v18 = vpop.f32.mrf.mxu1  ;;  %v8362_v31 = vld [vmem:[%s14728_s3 + $0x2ec] sm:$0xf0]  ;;  %v8501_v7 = vor.u32 %v10954_v6, %v8500_v4  ;;  %v8369_v25 = vor.u32 %v10920_v20, %v8368_v19  ;;  %v10975_v4 = vld [vmem:[%s14728_s3 + $0x4a8] sm:$0xf0]  ;;  %v8744_v19 = vld [vmem:[#allocation4 + $0xe0] sm:$0xf] }
 0x169   :  { %v8365_v5 = vor.u32 %v10917_v30, %v8362_v31  ;;  %v8582_v30 = vld [vmem:[%s14728_s3 + $0x4a4] sm:$0xf0]  ;;  %v11016_v20 = vld [vmem:[#allocation4 + $0xec] sm:$0xf0] }
 0x16a   :  { %2993 = vmatpush.bf16.msrb.mxu1 %v8269_v32 }
 0x16c   :  { %2984 = vmatpush.bf16.msra.mxu3 %v8029_v46  ;;  %2955 = vmatpush.bf16.msra.mxu2 %v8405_v17  ;;  %v8581_v46 = vor.u32 %v10974_v44, %v8580_v43  ;;  %v10967_v43 = vld [vmem:[%s14728_s3 + $0x46c] sm:$0xf]  ;;  %v8562_v44 = vld [vmem:[%s14728_s3 + $0x47c] sm:$0xf0] }
 0x16d   :  { %v1709_v14 = vpop.f32.mrf.mxu0  ;;  %v1698_v23 = vpop.f32.mrf.mxu2 }
 0x16e   :  { %2994 = vmatpush.bf16.msrb.mxu1 %v8249_v41  ;;  %v1710_v40 = vadd.f32 %v1709_v14, %v1697_v12  ;;  %v8468_v41 = vld [vmem:[%s14728_s3 + $0x3a8] sm:$0xf]  ;;  %v10982_v14 = vld [vmem:[%s14728_s3 + $0x4e4] sm:$0xf]  ;;  %v8602_v23 = vld [vmem:[%s14728_s3 + $0x4cc] sm:$0xf0] }
 0x16f   :  { %v8469_v53 = vor.u32 %v10945_v49, %v8468_v41  ;;  %v8480_v12 = vld [vmem:[%s14728_s3 + $0x3c8] sm:$0xf] }
 0x170   :  { %2985 = vmatpush.bf16.msra.mxu3 %v8009_v55  ;;  %v1723_v22 = vadd.f32 %v1722_v9, %v1710_v40  ;;  %2956 = vmatpush.bf16.msra.mxu2 %v8385_v59  ;;  %v10940_v55 = vld [vmem:[%s14728_s3 + $0x390] sm:$0xf0]  ;;  %v10959_v9 = vld [vmem:[%s14728_s3 + $0x428] sm:$0xf0]  ;;  %v8389_v40 = vor.u32 %v10925_v11, %v8388_v10  ;;  %v8568_v10 = vld [vmem:[%s14728_s3 + $0x470] sm:$0xf] }
 0x171   :  { %v8449_v60 = vor.u32 %v10940_v55, %v8448_v50  ;;  %v8521_v1 = vor.u32 %v10959_v9, %v8520_v0  ;;  %v10915_v59 = vld [vmem:[%s14728_s3 + $0x2c8] sm:$0xf0]  ;;  %v8502_v50 = vld [vmem:[%s14728_s3 + $0x404] sm:$0xf0]  ;;  %v8608_v9 = vld [vmem:[%s14728_s3 + $0x4c0] sm:$0xf] }
 0x172   :  { %2995 = vmatpush.bf16.msrb.mxu1 %v8229_v62  ;;  %v1729_v27 = vmax.f32 %v1723_v22, 0.0  ;;  %v10977_v22 = vld [vmem:[%s14728_s3 + $0x4bc] sm:$0xf]  ;;  %v10970_v11 = vld [vmem:[%s14728_s3 + $0x480] sm:$0xf0] }
 0x173   :  { %2986 = vmatmul.bf16.vlgmr.msra.gmra.mxu3 %v11886_v8  ;;  %v10870_v8 = vld [vmem:[%s14728_s3 + $0x160] sm:$0xf0]  ;;  %v8605_v26 = vor.u32 %v10977_v22, %v8602_v23  ;;  %v8745_v23 = vor.u32 %v11016_v20, %v8744_v19  ;;  %v11064_v19 = vld [vmem:[#allocation4 + $0x26c] sm:$0xf0] }
 0x174   :  { %v8169_v24 = vor.u32 %v10870_v8, %v8168_v15  ;;  %v12573_v32 = vpack.c.bf16 %v1729_v27, %v1729_v27  ;;  %2957 = vmatpush.bf16.msra.mxu2 %v8365_v5  ;;  %v8622_v15 = vld [vmem:[%s14728_s3 + $0x4f4] sm:$0xf0]  ;;  %v12674_v8 = vld [vmem:[%s14729_s4] sm:$0x1f] }
 0x175   :  { %v1711_v38 = vpop.f32.mrf.mxu0  ;;  %v8625_v18 = vor.u32 %v10982_v14, %v8622_v15  ;;  %v8348_v27 = vld [vmem:[%s14728_s3 + $0x2b8] sm:$0xf]  ;;  %v8548_v15 = vld [vmem:[%s14728_s3 + $0x448] sm:$0xf]  ;;  %3917 = vmatpush.bf16.msrb.mxu3 %v8745_v23  ;;  %v1931_v20 = vperm.slane %v12674_v8, 3 }
 0x176   :  { %2996 = vmatpush.bf16.msrb.mxu1 %v8209_v34  ;;  %2817 = vmatmul.bf16.vlgmr.msra.gmra.mxu0 %v12573_v32  ;;  %v12595_v45 = vpop.f32.mrf.mxu3  ;;  %v10930_v34 = vld [vmem:[%s14728_s3 + $0x340] sm:$0xf0]  ;;  %v8349_v38 = vor.u32 %v10915_v59, %v8348_v27  ;;  %v11048_v27 = vld [vmem:[#allocation4 + $0x1ec] sm:$0xf0]  ;;  %v8728_v59 = vld [vmem:[#allocation4 + $0xc0] sm:$0xf] }
 0x177   :  { %2913 = vmatpush.bf16.msra.mxu0 %v8621_v28  ;;  %v8409_v2 = vor.u32 %v10930_v34, %v8408_v3  ;;  %v10972_v28 = vld [vmem:[%s14728_s3 + $0x494] sm:$0xf]  ;;  %v8588_v34 = vld [vmem:[%s14728_s3 + $0x498] sm:$0xf] }
 0x17a   :  { %2997 = vmatpush.bf16.msrb.mxu1 %v8189_v13  ;;  %v10949_v13 = vld [vmem:[%s14728_s3 + $0x3d8] sm:$0xf0] }
 0x17b   :  { %2914 = vmatpush.bf16.msra.mxu0 %v8601_v33  ;;  %v8481_v17 = vor.u32 %v10949_v13, %v8480_v12  ;;  %v8585_v33 = vor.u32 %v10972_v28, %v8582_v30  ;;  %v8569_v13 = vor.u32 %v10970_v11, %v8568_v10  ;;  %v11012_v30 = vld [vmem:[#allocation4 + $0xcc] sm:$0xf0]  ;;  %v8808_v10 = vld [vmem:[#allocation4 + $0x160] sm:$0xf] }
 0x17c   :  { %v11032_v11 = vld [vmem:[#allocation4 + $0x16c] sm:$0xf0] }
 0x17e   :  { %2998 = vmatpush.bf16.msrb.mxu1 %v8169_v24  ;;  %v2781_v62 = vpop.f32.mrf.mxu3  ;;  %v1928_v24 = vperm.slane %v12674_v8, 0 }
 0x17f   :  { %2915 = vmatpush.bf16.msra.mxu0 %v8581_v46  ;;  %v10962_v46 = vld [vmem:[%s14728_s3 + $0x444] sm:$0xf] }
 0x180   :  { %v2780_v31 = vadd.f32 %v12595_v45, %v1928_v24  ;;  %v8545_v49 = vor.u32 %v10962_v46, %v8542_v47  ;;  %v8528_v24 = vld [vmem:[%s14728_s3 + $0x420] sm:$0xf]  ;;  %v11008_v47 = vld [vmem:[#allocation4 + $0xac] sm:$0xf0] }
 0x181   :  { %2999 = vmatmul.bf16.vlgmr.msrb.gmra.mxu1 %v12066_v51  ;;  %v8345_v51 = vor.u32 %v10912_v39, %v8342_v42  ;;  %v8328_v39 = vld [vmem:[%s14728_s3 + $0x290] sm:$0xf]  ;;  %v10910_v42 = vld [vmem:[%s14728_s3 + $0x2a0] sm:$0xf0] }
 0x182   :  { %v8329_v45 = vor.u32 %v10910_v42, %v8328_v39  ;;  %v8508_v39 = vld [vmem:[%s14728_s3 + $0x3f8] sm:$0xf]  ;;  %v10955_v42 = vld [vmem:[%s14728_s3 + $0x408] sm:$0xf0] }
 0x183   :  { %2958 = vmatpush.bf16.msra.mxu2 %v8345_v51  ;;  %2916 = vmatpush.bf16.msra.mxu0 %v8561_v54  ;;  %v8565_v51 = vor.u32 %v10967_v43, %v8562_v44  ;;  %v10952_v54 = vld [vmem:[%s14728_s3 + $0x3f4] sm:$0xf]  ;;  %v8856_v44 = vld [vmem:[#allocation4 + $0x1c0] sm:$0xf] }
 0x184   :  { %v8505_v57 = vor.u32 %v10952_v54, %v8502_v50  ;;  %v8696_v54 = vld [vmem:[#allocation4 + $0x80] sm:$0xf]  ;;  %v8488_v50 = vld [vmem:[%s14728_s3 + $0x3d0] sm:$0xf] }
 0x186   :  { %2869 = vmatmul.bf16.vlgmr.msrb.gmra.mxu0 %v12573_v32 }
 0x187   :  { %2959 = vmatpush.bf16.msra.mxu2 %v8325_v52  ;;  %2917 = vmatpush.bf16.msra.mxu0 %v8541_v61  ;;  %v1929_v52 = vperm.slane %v12674_v8, 1  ;;  %v8628_v61 = vld [vmem:[%s14728_s3 + $0x4e8] sm:$0xf] }
 0x188   :  { %v8629_v0 = vor.u32 %v10985_v58, %v8628_v61  ;;  %v8968_v61 = vld [vmem:[#allocation4 + $0x2a0] sm:$0xf]  ;;  %v11072_v58 = vld [vmem:[#allocation4 + $0x2ac] sm:$0xf0] }
 0x18a   :  { %2960 = vmatmul.bf16.vlgmr.msra.gmra.mxu2 %v12331_v16 }
 0x18b   :  { %3004 = vmatpush.bf16.msrb.mxu2 %v8469_v53  ;;  %2918 = vmatpush.bf16.msra.mxu0 %v8521_v1  ;;  %v8525_v53 = vor.u32 %v10957_v35, %v8522_v21 }
 0x18c   :  { %v2792_v37 = vpop.f32.mrf.mxu1 }
 0x18d   :  { %v12703_v5 = vadd.f32 %v2792_v37, %v2780_v31  ;;  %v9000_v37 = vld [vmem:[#allocation4 + $0x2e0] sm:$0xf] }
 0x18f   :  { %3005 = vmatpush.bf16.msrb.mxu2 %v8449_v60  ;;  %2919 = vmatpush.bf16.msra.mxu0 %v8501_v7  ;;  %v8482_v60 = vld [vmem:[%s14728_s3 + $0x3dc] sm:$0xf0]  ;;  %v8589_v7 = vor.u32 %v10975_v4, %v8588_v34  ;;  %v11000_v34 = vld [vmem:[#allocation4 + $0x6c] sm:$0xf0] }
 0x193   :  { %3006 = vmatpush.bf16.msrb.mxu2 %v8429_v29  ;;  %2920 = vmatpush.bf16.msra.mxu0 %v8481_v17  ;;  %v10980_v29 = vld [vmem:[%s14728_s3 + $0x4d0] sm:$0xf0] }
 0x194   :  { %v2794_v41 = vpop.f32.mrf.mxu1  ;;  %v8609_v3 = vor.u32 %v10980_v29, %v8608_v9  ;;  %v8824_v9 = vld [vmem:[#allocation4 + $0x180] sm:$0xf]  ;;  %v11036_v29 = vld [vmem:[#allocation4 + $0x18c] sm:$0xf0] }
 0x195   :  { %v11076_v41 = vld [vmem:[#allocation4 + $0x2cc] sm:$0xf0] }
 0x196   :  { %v2831_v36 = vpop.f32.mrf.mxu3  ;;  %2921 = vmatmul.bf16.vlgmr.msra.gmra.mxu0 %v12573_v32 }
 0x197   :  { %3007 = vmatpush.bf16.msrb.mxu2 %v8409_v2  ;;  %2965 = vmatpush.bf16.msrb.mxu0 %v8625_v18  ;;  %v2832_v55 = vadd.f32 %v2831_v36, %v1929_v52  ;;  %v1930_v2 = vperm.slane %v12674_v8, 2  ;;  %v8729_v36 = vor.u32 %v11012_v30, %v8728_v59  ;;  %v8840_v52 = vld [vmem:[#allocation4 + $0x1a0] sm:$0xf]  ;;  %v10992_v59 = vld [vmem:[#allocation4 + $0x2c] sm:$0xf0] }
 0x198   :  { %v8920_v30 = vld [vmem:[#allocation4 + $0x240] sm:$0xf] }
 0x199   :  { %3918 = vmatpush.bf16.msrb.mxu3 %v8729_v36 }
 0x19b   :  { %3008 = vmatpush.bf16.msrb.mxu2 %v8389_v40  ;;  %2966 = vmatpush.bf16.msrb.mxu0 %v8605_v26  ;;  %v10965_v40 = vld [vmem:[%s14728_s3 + $0x458] sm:$0xf0]  ;;  %v8872_v26 = vld [vmem:[#allocation4 + $0x1e0] sm:$0xf] }
 0x19c   :  { %v8549_v22 = vor.u32 %v10965_v40, %v8548_v15  ;;  %v8873_v28 = vor.u32 %v11048_v27, %v8872_v26  ;;  %v8648_v27 = vld [vmem:[#allocation4 + $0x20] sm:$0xf] }
 0x19e   :  { %v2833_v48 = vpop.f32.mrf.mxu3  ;;  %v2844_v56 = vpop.f32.mrf.mxu1  ;;  %3930 = vmatpush.bf16.msra.mxu1 %v8873_v28  ;;  %v8649_v28 = vor.u32 %v10992_v59, %v8648_v27  ;;  %v11100_v27 = vld [vmem:[#allocation4 + $0x38c] sm:$0xf0]  ;;  %v11034_v59 = vld [vmem:[#allocation4 + $0x184] sm:$0xf] }
 0x19f   :  { %3009 = vmatpush.bf16.msrb.mxu2 %v8369_v25  ;;  %2967 = vmatpush.bf16.msrb.mxu0 %v8585_v33  ;;  %v12737_v62 = vadd.f32 %v2844_v56, %v2832_v55  ;;  %v10960_v25 = vld [vmem:[%s14728_s3 + $0x430] sm:$0xf0]  ;;  %v8984_v48 = vld [vmem:[#allocation4 + $0x2c0] sm:$0xf]  ;;  %v10950_v55 = vld [vmem:[%s14728_s3 + $0x3e0] sm:$0xf0] }
 0x1a0   :  { %v8529_v31 = vor.u32 %v10960_v25, %v8528_v24  ;;  %v8985_v21 = vor.u32 %v11076_v41, %v8984_v48  ;;  %v8792_v24 = vld [vmem:[#allocation4 + $0x140] sm:$0xf]  ;;  %v11028_v25 = vld [vmem:[#allocation4 + $0x14c] sm:$0xf0] }
 0x1a1   :  { %v8793_v26 = vor.u32 %v11028_v25, %v8792_v24  ;;  %v8698_v24 = vld [vmem:[#allocation4 + $0x90] sm:$0xf0] }
 0x1a3   :  { %3010 = vmatpush.bf16.msrb.mxu2 %v8349_v38  ;;  %2968 = vmatpush.bf16.msrb.mxu0 %v8565_v51  ;;  %v11080_v38 = vld [vmem:[#allocation4 + $0x2ec] sm:$0xf0]  ;;  %v8712_v51 = vld [vmem:[#allocation4 + $0xa0] sm:$0xf] }
 0x1a4   :  { %v9001_v43 = vor.u32 %v11080_v38, %v9000_v37  ;;  %v8713_v35 = vor.u32 %v11008_v47, %v8712_v51  ;;  %v8776_v38 = vld [vmem:[#allocation4 + $0x120] sm:$0xf]  ;;  %v11056_v47 = vld [vmem:[#allocation4 + $0x22c] sm:$0xf0] }
 0x1a5   :  { %v8904_v51 = vld [vmem:[#allocation4 + $0x220] sm:$0xf] }
 0x1a6   :  { %v2846_v1 = vpop.f32.mrf.mxu1  ;;  %3919 = vmatpush.bf16.msrb.mxu3 %v8713_v35  ;;  %v8905_v48 = vor.u32 %v11056_v47, %v8904_v51  ;;  %v11020_v35 = vld [vmem:[#allocation4 + $0x10c] sm:$0xf0]  ;;  %v8810_v51 = vld [vmem:[#allocation4 + $0x170] sm:$0xf0] }
 0x1a7   :  { %3011 = vmatpush.bf16.msrb.mxu2 %v8329_v45  ;;  %2969 = vmatpush.bf16.msrb.mxu0 %v8545_v49  ;;  %v11044_v45 = vld [vmem:[#allocation4 + $0x1cc] sm:$0xf0]  ;;  %v8509_v49 = vor.u32 %v10955_v42, %v8508_v39  ;;  %v8825_v1 = vor.u32 %v11036_v29, %v8824_v9 }
 0x1a8   :  { %v8857_v46 = vor.u32 %v11044_v45, %v8856_v44  ;;  %v8632_v44 = vld [vmem:[#allocation4] sm:$0xf]  ;;  %v10988_v45 = vld [vmem:[#allocation4 + $0xc] sm:$0xf0] }
 0x1aa   :  { %3012 = vmatmul.bf16.vlgmr.msrb.gmra.mxu2 %v12331_v16  ;;  %v10947_v16 = vld [vmem:[%s14728_s3 + $0x3cc] sm:$0xf]  ;;  %3931 = vmatpush.bf16.msra.mxu1 %v8857_v46  ;;  %v8633_v46 = vor.u32 %v10988_v45, %v8632_v44  ;;  %v11030_v45 = vld [vmem:[#allocation4 + $0x164] sm:$0xf] }
 0x1ab   :  { %2970 = vmatpush.bf16.msrb.mxu0 %v8525_v53  ;;  %v8485_v63 = vor.u32 %v10947_v16, %v8482_v60  ;;  %3943 = vmatpush.bf16.msra.mxu2 %v9001_v43  ;;  %v11040_v53 = vld [vmem:[#allocation4 + $0x1ac] sm:$0xf0]  ;;  %v8489_v60 = vor.u32 %v10950_v55, %v8488_v50  ;;  %v8813_v47 = vor.u32 %v11030_v45, %v8810_v51 }
 0x1ac   :  { %v8841_v56 = vor.u32 %v11040_v53, %v8840_v52  ;;  %v11014_v52 = vld [vmem:[#allocation4 + $0xe4] sm:$0xf]  ;;  %v8746_v53 = vld [vmem:[#allocation4 + $0xf0] sm:$0xf0]  ;;  %v11052_v55 = vld [vmem:[#allocation4 + $0x20c] sm:$0xf0] }
 0x1ad   :  { %v8749_v50 = vor.u32 %v11014_v52, %v8746_v53  ;;  %v11092_v52 = vld [vmem:[#allocation4 + $0x34c] sm:$0xf0]  ;;  %v11026_v53 = vld [vmem:[#allocation4 + $0x144] sm:$0xf] }
 0x1ae   :  { %3932 = vmatpush.bf16.msra.mxu1 %v8841_v56  ;;  %v9128_v56 = vld [vmem:[#allocation4 + $0x3e0] sm:$0xf] }
 0x1af   :  { %2971 = vmatpush.bf16.msrb.mxu0 %v8505_v57  ;;  %v11004_v57 = vld [vmem:[#allocation4 + $0x8c] sm:$0xf0]  ;;  %3944 = vmatpush.bf16.msra.mxu2 %v8985_v21 }
 0x1b0   :  { %v8697_v16 = vor.u32 %v11004_v57, %v8696_v54  ;;  %v8888_v54 = vld [vmem:[#allocation4 + $0x200] sm:$0xf]  ;;  %v11112_v57 = vld [vmem:[#allocation4 + $0x3ec] sm:$0xf0] }
 0x1b2   :  { %3920 = vmatpush.bf16.msrb.mxu3 %v8697_v16  ;;  %3933 = vmatpush.bf16.msra.mxu1 %v8825_v1  ;;  %v8889_v16 = vor.u32 %v11052_v55, %v8888_v54  ;;  %v8730_v1 = vld [vmem:[#allocation4 + $0xd0] sm:$0xf0] }
 0x1b3   :  { %2972 = vmatpush.bf16.msrb.mxu0 %v8485_v63  ;;  %v8794_v54 = vld [vmem:[#allocation4 + $0x150] sm:$0xf0] }
 0x1b6   :  { %v2883_v6 = vpop.f32.mrf.mxu3  ;;  %2973 = vmatmul.bf16.vlgmr.msrb.gmra.mxu0 %v12573_v32 }
 0x1b7   :  { %3017 = vmatpush.bf16.msra.mxu0 %v8629_v0  ;;  %v2884_v12 = vadd.f32 %v2883_v6, %v1930_v2  ;;  %v8969_v0 = vor.u32 %v11072_v58, %v8968_v61  ;;  %v8952_v6 = vld [vmem:[#allocation4 + $0x280] sm:$0xf]  ;;  %v11068_v2 = vld [vmem:[#allocation4 + $0x28c] sm:$0xf0]  ;;  %v11046_v61 = vld [vmem:[#allocation4 + $0x1e4] sm:$0xf] }
 0x1b8   :  { %v8874_v58 = vld [vmem:[#allocation4 + $0x1f0] sm:$0xf0] }
 0x1b9   :  { %3945 = vmatpush.bf16.msra.mxu2 %v8969_v0  ;;  %v11010_v0 = vld [vmem:[#allocation4 + $0xc4] sm:$0xf]  ;;  %v8877_v29 = vor.u32 %v11046_v61, %v8874_v58 }
 0x1ba   :  { %v10990_v58 = vld [vmem:[#allocation4 + $0x24] sm:$0xf] }
 0x1bb   :  { %3018 = vmatpush.bf16.msra.mxu0 %v8609_v3  ;;  %v8680_v3 = vld [vmem:[#allocation4 + $0x60] sm:$0xf] }
 0x1bc   :  { %v8681_v4 = vor.u32 %v11000_v34, %v8680_v3  ;;  %v9112_v3 = vld [vmem:[#allocation4 + $0x3c0] sm:$0xf]  ;;  %v11108_v34 = vld [vmem:[#allocation4 + $0x3cc] sm:$0xf0] }
 0x1be   :  { %v2896_v14 = vpop.f32.mrf.mxu1  ;;  %v2885_v18 = vpop.f32.mrf.mxu3  ;;  %3921 = vmatpush.bf16.msrb.mxu3 %v8681_v4  ;;  %v8733_v4 = vor.u32 %v11010_v0, %v8730_v1  ;;  %v8650_v0 = vld [vmem:[#allocation4 + $0x30] sm:$0xf0] }
 0x1bf   :  { %3019 = vmatpush.bf16.msra.mxu0 %v8589_v7  ;;  %v12777_v17 = vadd.f32 %v2896_v14, %v2884_v12  ;;  %v8953_v7 = vor.u32 %v11068_v2, %v8952_v6  ;;  %v8664_v12 = vld [vmem:[#allocation4 + $0x40] sm:$0xf]  ;;  %v10996_v14 = vld [vmem:[#allocation4 + $0x4c] sm:$0xf0]  ;;  %v9113_v6 = vor.u32 %v11108_v34, %v9112_v3  ;;  %v11042_v2 = vld [vmem:[#allocation4 + $0x1c4] sm:$0xf]  ;;  %v8653_v1 = vor.u32 %v10990_v58, %v8650_v0 }
 0x1c0   :  { %v8665_v40 = vor.u32 %v10996_v14, %v8664_v12  ;;  %v8936_v18 = vld [vmem:[#allocation4 + $0x260] sm:$0xf]  ;;  %v11006_v12 = vld [vmem:[#allocation4 + $0xa4] sm:$0xf]  ;;  %v11088_v34 = vld [vmem:[#allocation4 + $0x32c] sm:$0xf0] }
 0x1c1   :  { %3946 = vmatpush.bf16.msra.mxu2 %v8953_v7  ;;  %v8937_v23 = vor.u32 %v11064_v19, %v8936_v18  ;;  %v8858_v7 = vld [vmem:[#allocation4 + $0x1d0] sm:$0xf0]  ;;  %v11038_v19 = vld [vmem:[#allocation4 + $0x1a4] sm:$0xf]  ;;  %v9032_v3 = vld [vmem:[#allocation4 + $0x320] sm:$0xf] }
 0x1c2   :  { %v12797_v63 = vpop.f32.mrf.mxu2  ;;  %3922 = vmatpush.bf16.msrb.mxu3 %v8665_v40  ;;  %v11104_v40 = vld [vmem:[#allocation4 + $0x3ac] sm:$0xf0] }
 0x1c3   :  { %3020 = vmatpush.bf16.msra.mxu0 %v8569_v13  ;;  %v8809_v13 = vor.u32 %v11032_v11, %v8808_v10  ;;  %v8861_v10 = vor.u32 %v11042_v2, %v8858_v7 }
 0x1c5   :  { %3934 = vmatpush.bf16.msra.mxu1 %v8809_v13  ;;  %3947 = vmatpush.bf16.msra.mxu2 %v8937_v23  ;;  %v8714_v13 = vld [vmem:[#allocation4 + $0xb0] sm:$0xf0]  ;;  %v11002_v23 = vld [vmem:[#allocation4 + $0x84] sm:$0xf] }
 0x1c6   :  { %v2898_v33 = vpop.f32.mrf.mxu1  ;;  %3923 = vmatpush.bf16.msrb.mxu3 %v8649_v28  ;;  %v8717_v14 = vor.u32 %v11006_v12, %v8714_v13  ;;  %v8701_v25 = vor.u32 %v11002_v23, %v8698_v24  ;;  %v9016_v12 = vld [vmem:[#allocation4 + $0x300] sm:$0xf] }
 0x1c7   :  { %3021 = vmatpush.bf16.msra.mxu0 %v8549_v22  ;;  %v11024_v33 = vld [vmem:[#allocation4 + $0x12c] sm:$0xf0] }
 0x1c8   :  { %v8777_v43 = vor.u32 %v11024_v33, %v8776_v38 }
 0x1c9   :  { %3935 = vmatpush.bf16.msra.mxu1 %v8793_v26  ;;  %v9080_v26 = vld [vmem:[#allocation4 + $0x380] sm:$0xf] }
 0x1ca   :  { %v2807_v22 = vpop.f32.mrf.mxu2  ;;  %3924 = vmatpush.bf16.msrb.mxu3 %v8633_v46  ;;  %v9081_v28 = vor.u32 %v11100_v27, %v9080_v26  ;;  %v1932_v46 = vperm.slane %v12674_v8, 4  ;;  %v9114_v26 = vld [vmem:[#allocation4 + $0x3d0] sm:$0xf0] }
 0x1cb   :  { %3022 = vmatpush.bf16.msra.mxu0 %v8529_v31  ;;  %v11060_v31 = vld [vmem:[#allocation4 + $0x24c] sm:$0xf0] }
 0x1cc   :  { %v8921_v36 = vor.u32 %v11060_v31, %v8920_v30  ;;  %v8826_v30 = vld [vmem:[#allocation4 + $0x190] sm:$0xf0] }
 0x1cd   :  { %3936 = vmatpush.bf16.msra.mxu1 %v8777_v43  ;;  %v11096_v43 = vld [vmem:[#allocation4 + $0x36c] sm:$0xf0] }
 0x1ce   :  { %3948 = vmatpush.bf16.msra.mxu2 %v8921_v36  ;;  %v10998_v36 = vld [vmem:[#allocation4 + $0x64] sm:$0xf] }
 0x1cf   :  { %3023 = vmatpush.bf16.msra.mxu0 %v8509_v49  ;;  %v8760_v49 = vld [vmem:[#allocation4 + $0x100] sm:$0xf] }
 0x1d0   :  { %v8761_v21 = vor.u32 %v11020_v35, %v8760_v49  ;;  %v8666_v49 = vld [vmem:[#allocation4 + $0x50] sm:$0xf0]  ;;  %v9048_v35 = vld [vmem:[#allocation4 + $0x340] sm:$0xf] }
 0x1d1   :  { %v9049_v55 = vor.u32 %v11092_v52, %v9048_v35  ;;  %v11126_v35 = vld [vmem:[#allocation4 + $0x464] sm:$0xf] }
 0x1d2   :  { %v12803_v41 = vpop.f32.mrf.mxu2  ;;  %3949 = vmatpush.bf16.msra.mxu2 %v8905_v48  ;;  %3937 = vmatpush.bf16.msra.mxu1 %v8761_v21  ;;  %v10994_v48 = vld [vmem:[#allocation4 + $0x44] sm:$0xf] }
 0x1d3   :  { %3024 = vmatpush.bf16.msra.mxu0 %v8489_v60  ;;  %v9129_v60 = vor.u32 %v11112_v57, %v9128_v56  ;;  %v8669_v21 = vor.u32 %v10994_v48, %v8666_v49  ;;  %v8797_v56 = vor.u32 %v11026_v53, %v8794_v54  ;;  %v9066_v49 = vld [vmem:[#allocation4 + $0x370] sm:$0xf0]  ;;  %v9176_v54 = vld [vmem:[#allocation4 + $0x440] sm:$0xf] }
 0x1d6   :  { %v2935_v15 = vpop.f32.mrf.mxu3  ;;  %3025 = vmatmul.bf16.vlgmr.msra.gmra.mxu0 %v12573_v32  ;;  %3982 = vmatpush.bf16.msrb.mxu1 %v8749_v50  ;;  %v2806_v50 = vadd.f32 %v12797_v63, %v12703_v5  ;;  %v9033_v5 = vor.u32 %v11088_v34, %v9032_v3  ;;  %v11022_v63 = vld [vmem:[#allocation4 + $0x124] sm:$0xf] }
 0x1d7   :  { %v2936_v32 = vadd.f32 %v2935_v15, %v1931_v20  ;;  %3950 = vmatpush.bf16.msra.mxu2 %v8889_v16  ;;  %3956 = vmatpush.bf16.msrb.mxu0 %v9129_v60  ;;  %v9096_v15 = vld [vmem:[#allocation4 + $0x3a0] sm:$0xf]  ;;  %v8842_v20 = vld [vmem:[#allocation4 + $0x1b0] sm:$0xf0]  ;;  %v11086_v3 = vld [vmem:[#allocation4 + $0x324] sm:$0xf] }
 0x1d8   :  { %v9097_v18 = vor.u32 %v11104_v40, %v9096_v15  ;;  %v8845_v22 = vor.u32 %v11038_v19, %v8842_v20  ;;  %v11018_v15 = vld [vmem:[#allocation4 + $0x104] sm:$0xf]  ;;  %v8762_v40 = vld [vmem:[#allocation4 + $0x110] sm:$0xf0] }
 0x1d9   :  { %v8765_v19 = vor.u32 %v11018_v15, %v8762_v40  ;;  %v11110_v20 = vld [vmem:[#allocation4 + $0x3e4] sm:$0xf]  ;;  %v11116_v15 = vld [vmem:[#allocation4 + $0x40c] sm:$0xf0] }
 0x1da   :  { %v2859_v11 = vpop.f32.mrf.mxu2  ;;  %3983 = vmatpush.bf16.msrb.mxu1 %v8733_v4  ;;  %v11082_v40 = vld [vmem:[#allocation4 + $0x304] sm:$0xf] }
 0x1db   :  { %3995 = vmatpush.bf16.msrb.mxu2 %v8877_v29  ;;  %3957 = vmatpush.bf16.msrb.mxu0 %v9113_v6  ;;  %v8778_v6 = vld [vmem:[#allocation4 + $0x130] sm:$0xf0] }
 0x1dc   :  { %v8781_v2 = vor.u32 %v11022_v63, %v8778_v6  ;;  %v8634_v11 = vld [vmem:[#allocation4 + $0x10] sm:$0xf0]  ;;  %v11118_v63 = vld [vmem:[#allocation4 + $0x424] sm:$0xf] }
 0x1dd   :  { %v9162_v6 = vld [vmem:[#allocation4 + $0x430] sm:$0xf0] }
 0x1de   :  { %v2948_v37 = vpop.f32.mrf.mxu1  ;;  %v2937_v42 = vpop.f32.mrf.mxu3  ;;  %3984 = vmatpush.bf16.msrb.mxu1 %v8717_v14  ;;  %v11084_v14 = vld [vmem:[#allocation4 + $0x30c] sm:$0xf0] }
 0x1df   :  { %v12801_v39 = vadd.f32 %v2948_v37, %v2936_v32  ;;  %3996 = vmatpush.bf16.msrb.mxu2 %v8861_v10  ;;  %3958 = vmatpush.bf16.msrb.mxu0 %v9097_v18  ;;  %v8829_v32 = vor.u32 %v11034_v59, %v8826_v30  ;;  %v8682_v37 = vld [vmem:[#allocation4 + $0x70] sm:$0xf0]  ;;  %v9064_v42 = vld [vmem:[#allocation4 + $0x360] sm:$0xf]  ;;  %v10986_v10 = vld [vmem:[#allocation4 + $0x4] sm:$0xf]  ;;  %v9017_v18 = vor.u32 %v11084_v14, %v9016_v12 }
 0x1e0   :  { %v8685_v38 = vor.u32 %v10998_v36, %v8682_v37  ;;  %v9065_v44 = vor.u32 %v11096_v43, %v9064_v42  ;;  %v8637_v13 = vor.u32 %v10986_v10, %v8634_v11  ;;  %v11102_v30 = vld [vmem:[#allocation4 + $0x3a4] sm:$0xf]  ;;  %v9082_v43 = vld [vmem:[#allocation4 + $0x390] sm:$0xf0]  ;;  %v8752_v10 = vld [vmem:[#allocation4 + $0xe8] sm:$0xf] }
 0x1e1   :  { %v11098_v42 = vld [vmem:[#allocation4 + $0x384] sm:$0xf]  ;;  %v11017_v11 = vld [vmem:[#allocation4 + $0xf4] sm:$0xf0]  ;;  %v9144_v14 = vld [vmem:[#allocation4 + $0x400] sm:$0xf] }
 0x1e2   :  { %v12805_v31 = vpop.f32.mrf.mxu2  ;;  %3985 = vmatpush.bf16.msrb.mxu1 %v8701_v25  ;;  %v11106_v25 = vld [vmem:[#allocation4 + $0x3c4] sm:$0xf] }
 0x1e3   :  { %3997 = vmatpush.bf16.msrb.mxu2 %v8845_v22  ;;  %3959 = vmatpush.bf16.msrb.mxu0 %v9081_v28  ;;  %v9130_v22 = vld [vmem:[#allocation4 + $0x3f0] sm:$0xf0]  ;;  %v9117_v59 = vor.u32 %v11106_v25, %v9114_v26  ;;  %v2858_v28 = vadd.f32 %v12803_v41, %v12737_v62  ;;  %v11094_v62 = vld [vmem:[#allocation4 + $0x364] sm:$0xf]  ;;  %v2910_v0 = vadd.f32 %v12805_v31, %v12777_v17  ;;  %v8736_v26 = vld [vmem:[#allocation4 + $0xc8] sm:$0xf] }
 0x1e4   :  { %v9133_v24 = vor.u32 %v11110_v20, %v9130_v22  ;;  %v9069_v52 = vor.u32 %v11094_v62, %v9066_v49  ;;  %v9145_v31 = vor.u32 %v11116_v15, %v9144_v14  ;;  %v11078_v22 = vld [vmem:[#allocation4 + $0x2e4] sm:$0xf]  ;;  %v9120_v62 = vld [vmem:[#allocation4 + $0x3c8] sm:$0xf]  ;;  %v8922_v14 = vld [vmem:[#allocation4 + $0x250] sm:$0xf0] }
 0x1e5   :  { %v11070_v49 = vld [vmem:[#allocation4 + $0x2a4] sm:$0xf] }
 0x1e6   :  { %v2950_v9 = vpop.f32.mrf.mxu1  ;;  %3986 = vmatpush.bf16.msrb.mxu1 %v8685_v38 }
 0x1e7   :  { %3998 = vmatpush.bf16.msrb.mxu2 %v8829_v32  ;;  %3960 = vmatpush.bf16.msrb.mxu0 %v9065_v44  ;;  %v9098_v32 = vld [vmem:[#allocation4 + $0x3b0] sm:$0xf0]  ;;  %v9085_v44 = vor.u32 %v11098_v42, %v9082_v43  ;;  %v11074_v43 = vld [vmem:[#allocation4 + $0x2c4] sm:$0xf] }
 0x1e8   :  { %v9101_v37 = vor.u32 %v11102_v30, %v9098_v32  ;;  %v9136_v32 = vld [vmem:[#allocation4 + $0x3e8] sm:$0xf] }
 0x1ea   :  { %v2911_v16 = vpop.f32.mrf.mxu2  ;;  %3987 = vmatpush.bf16.msrb.mxu1 %v8669_v21  ;;  %v9194_v21 = vld [vmem:[#allocation4 + $0x470] sm:$0xf0] }
 0x1eb   :  { %3999 = vmatpush.bf16.msrb.mxu2 %v8813_v47  ;;  %3961 = vmatpush.bf16.msrb.mxu0 %v9049_v55  ;;  %v11128_v47 = vld [vmem:[#allocation4 + $0x46c] sm:$0xf0]  ;;  %v9197_v53 = vor.u32 %v11126_v35, %v9194_v21  ;;  %v11090_v55 = vld [vmem:[#allocation4 + $0x344] sm:$0xf]  ;;  %v8970_v35 = vld [vmem:[#allocation4 + $0x2b0] sm:$0xf0] }
 0x1ec   :  { %v11122_v16 = vld [vmem:[#allocation4 + $0x444] sm:$0xf] }
 0x1ee   :  { %3988 = vmatpush.bf16.msrb.mxu1 %v8653_v1  ;;  %v11120_v1 = vld [vmem:[#allocation4 + $0x42c] sm:$0xf0] }
 0x1ef   :  { %4000 = vmatpush.bf16.msrb.mxu2 %v8797_v56  ;;  %3962 = vmatpush.bf16.msrb.mxu0 %v9033_v5  ;;  %v9034_v5 = vld [vmem:[#allocation4 + $0x330] sm:$0xf0] }
 0x1f0   :  { %v9037_v12 = vor.u32 %v11086_v3, %v9034_v5 }
 0x1f2   :  { %3989 = vmatpush.bf16.msrb.mxu1 %v8637_v13  ;;  %v9165_v13 = vor.u32 %v11118_v63, %v9162_v6  ;;  %v8672_v63 = vld [vmem:[#allocation4 + $0x48] sm:$0xf]  ;;  %v10997_v6 = vld [vmem:[#allocation4 + $0x54] sm:$0xf0] }
 0x1f3   :  { %v2818_v60 = vpop.f32.mrf.mxu0  ;;  %4001 = vmatpush.bf16.msrb.mxu2 %v8781_v2  ;;  %3963 = vmatpush.bf16.msrb.mxu0 %v9017_v18  ;;  %v9018_v18 = vld [vmem:[#allocation4 + $0x310] sm:$0xf0]  ;;  %v8673_v15 = vor.u32 %v10997_v6, %v8672_v63  ;;  %v11117_v63 = vld [vmem:[#allocation4 + $0x414] sm:$0xf0]  ;;  %v11111_v6 = vld [vmem:[#allocation4 + $0x3ec] sm:$0xf] }
 0x1f4   :  { %v2819_v61 = vadd.f32 %v2818_v60, %v2806_v50  ;;  %v11124_v50 = vld [vmem:[#allocation4 + $0x44c] sm:$0xf0]  ;;  %v9178_v60 = vld [vmem:[#allocation4 + $0x450] sm:$0xf0]  ;;  %v9021_v20 = vor.u32 %v11082_v40, %v9018_v18  ;;  %v8656_v40 = vld [vmem:[#allocation4 + $0x28] sm:$0xf] }
 0x1f5   :  { %v9177_v56 = vor.u32 %v11124_v50, %v9176_v54  ;;  %v8973_v54 = vor.u32 %v11070_v49, %v8970_v35  ;;  %v9104_v50 = vld [vmem:[#allocation4 + $0x3a8] sm:$0xf]  ;;  %v11077_v35 = vld [vmem:[#allocation4 + $0x2d4] sm:$0xf0] }
 0x1f6   :  { %v2987_v33 = vpop.f32.mrf.mxu3  ;;  %v3030_v4 = vmax.f32 %v2819_v61, 0.0  ;;  %v9181_v61 = vor.u32 %v11122_v16, %v9178_v60  ;;  %v8954_v16 = vld [vmem:[#allocation4 + $0x290] sm:$0xf0]  ;;  %v9056_v18 = vld [vmem:[#allocation4 + $0x348] sm:$0xf] }
 0x1f7   :  { %v2988_v57 = vadd.f32 %v2987_v33, %v1932_v46  ;;  %4002 = vmatpush.bf16.msrb.mxu2 %v8765_v19  ;;  %4021 = vmatpush.bf16.msra.mxu0 %v9133_v24  ;;  %v9192_v46 = vld [vmem:[#allocation4 + $0x460] sm:$0xf]  ;;  %v8753_v19 = vor.u32 %v11017_v11, %v8752_v10  ;;  %v11114_v24 = vld [vmem:[#allocation4 + $0x404] sm:$0xf]  ;;  %v9072_v10 = vld [vmem:[#allocation4 + $0x368] sm:$0xf] }
 0x1f8   :  { %v12812_v7 = vpack.c.bf16 %v3030_v4, %v3030_v4  ;;  %v9193_v48 = vor.u32 %v11128_v47, %v9192_v46  ;;  %v11009_v46 = vld [vmem:[#allocation4 + $0xb4] sm:$0xf0]  ;;  %v8992_v49 = vld [vmem:[#allocation4 + $0x2c8] sm:$0xf] }
 0x1f9   :  { %v11097_v11 = vld [vmem:[#allocation4 + $0x374] sm:$0xf0] }
 0x1fa   :  { %3925 = vmatmul.bf16.vlgmr.msrb.gmra.mxu3 %v12812_v7 }
 0x1fb   :  { %v2820_v23 = vpop.f32.mrf.mxu0  ;;  %4022 = vmatpush.bf16.msra.mxu0 %v9117_v59  ;;  %3973 = vmatpush.bf16.msra.mxu3 %v9193_v48 }
 0x1fc   :  { %v9002_v23 = vld [vmem:[#allocation4 + $0x2f0] sm:$0xf0] }
 0x1fd   :  { %v9005_v59 = vor.u32 %v11078_v22, %v9002_v23  ;;  %v8640_v23 = vld [vmem:[#allocation4 + $0x8] sm:$0xf] }
 0x1fe   :  { %v3000_v8 = vpop.f32.mrf.mxu1  ;;  %v2989_v29 = vpop.f32.mrf.mxu3 }
 0x1ff   :  { %v12810_v9 = vadd.f32 %v3000_v8, %v2988_v57  ;;  %4023 = vmatpush.bf16.msra.mxu0 %v9101_v37  ;;  %v9050_v57 = vld [vmem:[#allocation4 + $0x350] sm:$0xf0]  ;;  %3974 = vmatpush.bf16.msra.mxu3 %v9177_v56  ;;  %v9160_v29 = vld [vmem:[#allocation4 + $0x420] sm:$0xf] }
 0x200   :  { %v9053_v8 = vor.u32 %v11090_v55, %v9050_v57  ;;  %v9161_v4 = vor.u32 %v11120_v1, %v9160_v29  ;;  %v11105_v55 = vld [vmem:[#allocation4 + $0x3b4] sm:$0xf0]  ;;  %v11066_v57 = vld [vmem:[#allocation4 + $0x284] sm:$0xf] }
 0x201   :  { %v9105_v56 = vor.u32 %v11105_v55, %v9104_v50  ;;  %v11101_v29 = vld [vmem:[#allocation4 + $0x394] sm:$0xf0] }
 0x202   :  { %v11085_v55 = vld [vmem:[#allocation4 + $0x314] sm:$0xf0] }
 0x203   :  { %v2870_v36 = vpop.f32.mrf.mxu0  ;;  %4024 = vmatpush.bf16.msra.mxu0 %v9085_v44  ;;  %3975 = vmatpush.bf16.msra.mxu3 %v9161_v4  ;;  %v8986_v44 = vld [vmem:[#allocation4 + $0x2d0] sm:$0xf0] }
 0x204   :  { %v2871_v38 = vadd.f32 %v2870_v36, %v2858_v28  ;;  %v9146_v28 = vld [vmem:[#allocation4 + $0x410] sm:$0xf0]  ;;  %v11113_v36 = vld [vmem:[#allocation4 + $0x3f4] sm:$0xf0]  ;;  %v8989_v47 = vor.u32 %v11074_v43, %v8986_v44  ;;  %v9200_v43 = vld [vmem:[#allocation4 + $0x468] sm:$0xf] }
 0x205   :  { %v9149_v30 = vor.u32 %v11114_v24, %v9146_v28  ;;  %v9137_v42 = vor.u32 %v11113_v36, %v9136_v32  ;;  %v8938_v4 = vld [vmem:[#allocation4 + $0x270] sm:$0xf0]  ;;  %v9008_v32 = vld [vmem:[#allocation4 + $0x2e8] sm:$0xf]  ;;  %v11129_v44 = vld [vmem:[#allocation4 + $0x474] sm:$0xf0] }
 0x206   :  { %v3002_v27 = vpop.f32.mrf.mxu1  ;;  %v3031_v33 = vmax.f32 %v2871_v38, 0.0  ;;  %v8906_v28 = vld [vmem:[#allocation4 + $0x230] sm:$0xf0] }
 0x207   :  { %4025 = vmatpush.bf16.msra.mxu0 %v9069_v52  ;;  %v11013_v27 = vld [vmem:[#allocation4 + $0xd4] sm:$0xf0]  ;;  %3976 = vmatpush.bf16.msra.mxu3 %v9145_v31  ;;  %v8704_v52 = vld [vmem:[#allocation4 + $0x88] sm:$0xf] }
 0x208   :  { %v12817_v45 = vpack.c.bf16 %v3031_v33, %v3031_v33  ;;  %v8737_v38 = vor.u32 %v11013_v27, %v8736_v26  ;;  %v8720_v33 = vld [vmem:[#allocation4 + $0xa8] sm:$0xf]  ;;  %v10989_v27 = vld [vmem:[#allocation4 + $0x14] sm:$0xf0] }
 0x209   :  { %v8721_v21 = vor.u32 %v11009_v46, %v8720_v33 }
 0x20a   :  { %3938 = vmatmul.bf16.vlgmr.msra.gmra.mxu1 %v12817_v45 }
 0x20b   :  { %v2872_v41 = vpop.f32.mrf.mxu0  ;;  %4038 = vmatpush.bf16.msra.mxu1 %v9197_v53  ;;  %4026 = vmatpush.bf16.msra.mxu0 %v9053_v8  ;;  %v11005_v53 = vld [vmem:[#allocation4 + $0x94] sm:$0xf0]  ;;  %v8688_v8 = vld [vmem:[#allocation4 + $0x68] sm:$0xf] }
 0x20c   :  { %4008 = vmatpush.bf16.msrb.mxu3 %v9005_v59  ;;  %v11109_v41 = vld [vmem:[#allocation4 + $0x3d4] sm:$0xf0]  ;;  %v8705_v60 = vor.u32 %v11005_v53, %v8704_v52  ;;  %v11054_v59 = vld [vmem:[#allocation4 + $0x224] sm:$0xf]  ;;  %v9184_v53 = vld [vmem:[#allocation4 + $0x448] sm:$0xf] }
 0x20d   :  { %v12819_v51 = vpop.f32.mrf.mxu2  ;;  %v9121_v48 = vor.u32 %v11109_v41, %v9120_v62  ;;  %v8909_v36 = vor.u32 %v11054_v59, %v8906_v28  ;;  %v8890_v62 = vld [vmem:[#allocation4 + $0x210] sm:$0xf0]  ;;  %v11099_v59 = vld [vmem:[#allocation4 + $0x38c] sm:$0xf]  ;;  %v9090_v28 = vld [vmem:[#allocation4 + $0x398] sm:$0xf0] }
 0x20e   :  { %v2962_v24 = vadd.f32 %v12819_v51, %v12801_v39  ;;  %v8641_v51 = vor.u32 %v10989_v27, %v8640_v23  ;;  %v11057_v27 = vld [vmem:[#allocation4 + $0x234] sm:$0xf0] }
 0x20f   :  { %4039 = vmatpush.bf16.msra.mxu1 %v9181_v61  ;;  %4027 = vmatpush.bf16.msra.mxu0 %v9037_v12  ;;  %v11001_v61 = vld [vmem:[#allocation4 + $0x74] sm:$0xf0]  ;;  %v9073_v12 = vor.u32 %v11097_v11, %v9072_v10 }
 0x210   :  { %4009 = vmatpush.bf16.msrb.mxu3 %v8989_v47  ;;  %v8689_v5 = vor.u32 %v11001_v61, %v8688_v8  ;;  %v11050_v47 = vld [vmem:[#allocation4 + $0x204] sm:$0xf]  ;;  %v8976_v8 = vld [vmem:[#allocation4 + $0x2a8] sm:$0xf]  ;;  %v11073_v61 = vld [vmem:[#allocation4 + $0x2b4] sm:$0xf0] }
 0x211   :  { %v8893_v50 = vor.u32 %v11050_v47, %v8890_v62  ;;  %v8882_v47 = vld [vmem:[#allocation4 + $0x1f8] sm:$0xf0]  ;;  %v11079_v62 = vld [vmem:[#allocation4 + $0x2ec] sm:$0xf] }
 0x213   :  { %v2922_v34 = vpop.f32.mrf.mxu0  ;;  %4040 = vmatpush.bf16.msra.mxu1 %v9165_v13  ;;  %4028 = vmatpush.bf16.msra.mxu0 %v9021_v20  ;;  %v11058_v13 = vld [vmem:[#allocation4 + $0x244] sm:$0xf] }
 0x214   :  { %v2923_v2 = vadd.f32 %v2922_v34, %v2910_v0  ;;  %4010 = vmatpush.bf16.msrb.mxu3 %v8973_v54  ;;  %v9088_v0 = vld [vmem:[#allocation4 + $0x388] sm:$0xf]  ;;  %v11062_v34 = vld [vmem:[#allocation4 + $0x264] sm:$0xf]  ;;  %v8925_v31 = vor.u32 %v11058_v13, %v8922_v14  ;;  %v11125_v54 = vld [vmem:[#allocation4 + $0x454] sm:$0xf0] }
 0x215   :  { %v2963_v58 = vpop.f32.mrf.mxu2  ;;  %v9089_v3 = vor.u32 %v11101_v29, %v9088_v0  ;;  %v11121_v0 = vld [vmem:[#allocation4 + $0x434] sm:$0xf0]  ;;  %v8977_v29 = vor.u32 %v11073_v61, %v8976_v8  ;;  %v8944_v13 = vld [vmem:[#allocation4 + $0x268] sm:$0xf]  ;;  %v9058_v8 = vld [vmem:[#allocation4 + $0x358] sm:$0xf0] }
 0x216   :  { %v3032_v17 = vmax.f32 %v2923_v2, 0.0  ;;  %v8957_v58 = vor.u32 %v11066_v57, %v8954_v16  ;;  %v8941_v2 = vor.u32 %v11062_v34, %v8938_v4  ;;  %v8993_v16 = vor.u32 %v11077_v35, %v8992_v49  ;;  %v8960_v34 = vld [vmem:[#allocation4 + $0x288] sm:$0xf]  ;;  %v11069_v4 = vld [vmem:[#allocation4 + $0x294] sm:$0xf0] }
 0x217   :  { %4041 = vmatpush.bf16.msra.mxu1 %v9149_v30  ;;  %v8961_v10 = vor.u32 %v11069_v4, %v8960_v34  ;;  %v11065_v14 = vld [vmem:[#allocation4 + $0x274] sm:$0xf0]  ;;  %v9074_v49 = vld [vmem:[#allocation4 + $0x378] sm:$0xf0] }
 0x218   :  { %v12824_v25 = vpack.c.bf16 %v3032_v17, %v3032_v17  ;;  %4011 = vmatpush.bf16.msrb.mxu3 %v8957_v58  ;;  %v10993_v17 = vld [vmem:[#allocation4 + $0x34] sm:$0xf0]  ;;  %v9168_v58 = vld [vmem:[#allocation4 + $0x428] sm:$0xf] }
 0x219   :  { %v8657_v26 = vor.u32 %v10993_v17, %v8656_v40  ;;  %v9122_v40 = vld [vmem:[#allocation4 + $0x3d8] sm:$0xf0]  ;;  %v8945_v17 = vor.u32 %v11065_v14, %v8944_v13  ;;  %v8832_v14 = vld [vmem:[#allocation4 + $0x188] sm:$0xf] }
 0x21a   :  { %3951 = vmatmul.bf16.vlgmr.msra.gmra.mxu2 %v12824_v25  ;;  %3990 = vmatmul.bf16.vlgmr.msrb.gmra.mxu1 %v12812_v7 }
 0x21b   :  { %4047 = vmatpush.bf16.msra.mxu2 %v8753_v19  ;;  %v2924_v37 = vpop.f32.mrf.mxu0  ;;  %4086 = vmatpush.bf16.msrb.mxu1 %v9137_v42  ;;  %v11093_v19 = vld [vmem:[#allocation4 + $0x354] sm:$0xf0] }
 0x21c   :  { %4012 = vmatpush.bf16.msrb.mxu3 %v8941_v2  ;;  %v9057_v22 = vor.u32 %v11093_v19, %v9056_v18  ;;  %v9040_v37 = vld [vmem:[#allocation4 + $0x328] sm:$0xf]  ;;  %v11081_v42 = vld [vmem:[#allocation4 + $0x2f4] sm:$0xf0]  ;;  %v9138_v2 = vld [vmem:[#allocation4 + $0x3f8] sm:$0xf0] }
 0x21d   :  { %v9009_v41 = vor.u32 %v11081_v42, %v9008_v32  ;;  %v8928_v18 = vld [vmem:[#allocation4 + $0x248] sm:$0xf]  ;;  %v11061_v19 = vld [vmem:[#allocation4 + $0x254] sm:$0xf0] }
 0x21e   :  { %v8929_v23 = vor.u32 %v11061_v19, %v8928_v18  ;;  %v8834_v18 = vld [vmem:[#allocation4 + $0x198] sm:$0xf0]  ;;  %v11067_v19 = vld [vmem:[#allocation4 + $0x28c] sm:$0xf] }
 0x21f   :  { %4048 = vmatpush.bf16.msra.mxu2 %v8737_v38  ;;  %4087 = vmatpush.bf16.msrb.mxu1 %v9121_v48  ;;  %v11089_v38 = vld [vmem:[#allocation4 + $0x334] sm:$0xf0]  ;;  %v9201_v48 = vor.u32 %v11129_v44, %v9200_v43  ;;  %v8880_v43 = vld [vmem:[#allocation4 + $0x1e8] sm:$0xf] }
 0x220   :  { %4013 = vmatpush.bf16.msrb.mxu3 %v8925_v31  ;;  %v9041_v46 = vor.u32 %v11089_v38, %v9040_v37  ;;  %v9093_v37 = vor.u32 %v11099_v59, %v9090_v28  ;;  %v8896_v38 = vld [vmem:[#allocation4 + $0x208] sm:$0xf]  ;;  %v11049_v44 = vld [vmem:[#allocation4 + $0x1f4] sm:$0xf0] }
 0x221   :  { %v11033_v59 = vld [vmem:[#allocation4 + $0x174] sm:$0xf0] }
 0x223   :  { %4049 = vmatpush.bf16.msra.mxu2 %v8721_v21  ;;  %4088 = vmatpush.bf16.msrb.mxu1 %v9105_v56  ;;  %v9024_v21 = vld [vmem:[#allocation4 + $0x308] sm:$0xf] }
 0x224   :  { %4014 = vmatpush.bf16.msrb.mxu3 %v8909_v36  ;;  %v9025_v56 = vor.u32 %v11085_v55, %v9024_v21  ;;  %v8864_v21 = vld [vmem:[#allocation4 + $0x1c8] sm:$0xf]  ;;  %v11043_v55 = vld [vmem:[#allocation4 + $0x1cc] sm:$0xf] }
 0x227   :  { %4050 = vmatpush.bf16.msra.mxu2 %v8705_v60  ;;  %4089 = vmatpush.bf16.msrb.mxu1 %v9089_v3  ;;  %v9185_v60 = vor.u32 %v11125_v54, %v9184_v53  ;;  %v9169_v3 = vor.u32 %v11121_v0, %v9168_v58  ;;  %v11045_v53 = vld [vmem:[#allocation4 + $0x1d4] sm:$0xf0] }
 0x228   :  { %4015 = vmatpush.bf16.msrb.mxu3 %v8893_v50  ;;  %v8865_v58 = vor.u32 %v11045_v53, %v8864_v21  ;;  %v11023_v21 = vld [vmem:[#allocation4 + $0x12c] sm:$0xf]  ;;  %v8786_v53 = vld [vmem:[#allocation4 + $0x138] sm:$0xf0] }
 0x22a   :  { %4003 = vmatmul.bf16.vlgmr.msrb.gmra.mxu2 %v12817_v45 }
 0x22b   :  { %4051 = vmatpush.bf16.msra.mxu2 %v8689_v5  ;;  %4090 = vmatpush.bf16.msrb.mxu1 %v9073_v12  ;;  %v9152_v5 = vld [vmem:[#allocation4 + $0x408] sm:$0xf]  ;;  %v9141_v12 = vor.u32 %v11111_v6, %v9138_v2  ;;  %v11071_v6 = vld [vmem:[#allocation4 + $0x2ac] sm:$0xf]  ;;  %v8978_v2 = vld [vmem:[#allocation4 + $0x2b8] sm:$0xf0] }
 0x22c   :  { %v9153_v11 = vor.u32 %v11117_v63, %v9152_v5  ;;  %v11039_v5 = vld [vmem:[#allocation4 + $0x1ac] sm:$0xf]  ;;  %v8850_v63 = vld [vmem:[#allocation4 + $0x1b8] sm:$0xf0] }
 0x22d   :  { %v12828_v1 = vpop.f32.mrf.mxu2  ;;  %v8853_v13 = vor.u32 %v11039_v5, %v8850_v63  ;;  %v11011_v63 = vld [vmem:[#allocation4 + $0xcc] sm:$0xf] }
 0x22f   :  { %4052 = vmatpush.bf16.msra.mxu2 %v8673_v15  ;;  %4091 = vmatpush.bf16.msrb.mxu1 %v9057_v22  ;;  %v11107_v15 = vld [vmem:[#allocation4 + $0x3cc] sm:$0xf]  ;;  %v9106_v22 = vld [vmem:[#allocation4 + $0x3b8] sm:$0xf0] }
 0x230   :  { %v9125_v31 = vor.u32 %v11107_v15, %v9122_v40  ;;  %v11037_v15 = vld [vmem:[#allocation4 + $0x194] sm:$0xf0]  ;;  %v8981_v40 = vor.u32 %v11071_v6, %v8978_v2  ;;  %v8738_v6 = vld [vmem:[#allocation4 + $0xd8] sm:$0xf0] }
 0x231   :  { %v8741_v2 = vor.u32 %v11011_v63, %v8738_v6 }
 0x233   :  { %v2974_v30 = vpop.f32.mrf.mxu0  ;;  %4053 = vmatpush.bf16.msra.mxu2 %v8657_v26  ;;  %4092 = vmatpush.bf16.msrb.mxu1 %v9041_v46  ;;  %v8912_v26 = vld [vmem:[#allocation4 + $0x228] sm:$0xf]  ;;  %v11047_v46 = vld [vmem:[#allocation4 + $0x1ec] sm:$0xf] }
 0x234   :  { %v2975_v33 = vadd.f32 %v2974_v30, %v2962_v24  ;;  %v3014_v30 = vadd.f32 %v12828_v1, %v12810_v9  ;;  %v8913_v32 = vor.u32 %v11057_v27, %v8912_v26  ;;  %v8881_v9 = vor.u32 %v11049_v44, %v8880_v43  ;;  %v8816_v27 = vld [vmem:[#allocation4 + $0x168] sm:$0xf]  ;;  %v11029_v44 = vld [vmem:[#allocation4 + $0x154] sm:$0xf0] }
 0x235   :  { %v3015_v20 = vpop.f32.mrf.mxu2  ;;  %v8885_v35 = vor.u32 %v11047_v46, %v8882_v47  ;;  %v8800_v43 = vld [vmem:[#allocation4 + $0x148] sm:$0xf]  ;;  %v11027_v47 = vld [vmem:[#allocation4 + $0x14c] sm:$0xf] }
 0x236   :  { %v3033_v39 = vmax.f32 %v2975_v33, 0.0  ;;  %v11103_v20 = vld [vmem:[#allocation4 + $0x3ac] sm:$0xf]  ;;  %v11053_v33 = vld [vmem:[#allocation4 + $0x214] sm:$0xf0] }
 0x237   :  { %4054 = vmatpush.bf16.msra.mxu2 %v8641_v51  ;;  %4093 = vmatpush.bf16.msrb.mxu1 %v9025_v56  ;;  %v9109_v24 = vor.u32 %v11103_v20, %v9106_v22  ;;  %v8866_v56 = vld [vmem:[#allocation4 + $0x1d8] sm:$0xf0]  ;;  %v11083_v22 = vld [vmem:[#allocation4 + $0x30c] sm:$0xf] }
 0x238   :  { %v12833_v52 = vpack.c.bf16 %v3033_v39, %v3033_v39  ;;  %v9010_v39 = vld [vmem:[#allocation4 + $0x2f8] sm:$0xf0]  ;;  %v8869_v0 = vor.u32 %v11043_v55, %v8866_v56  ;;  %v8789_v56 = vor.u32 %v11023_v21, %v8786_v53  ;;  %v11143_v21 = vld [vmem:[#allocation6 + $0x68] sm:$0xf0]  ;;  %v9248_v53 = vld [vmem:[#allocation6 + $0x48] sm:$0xf] }
 0x239   :  { %v9013_v54 = vor.u32 %v11079_v62, %v9010_v39  ;;  %v8962_v20 = vld [vmem:[#allocation4 + $0x298] sm:$0xf0]  ;;  %v11059_v39 = vld [vmem:[#allocation4 + $0x24c] sm:$0xf] }
 0x23a   :  { %3964 = vmatmul.bf16.vlgmr.msrb.gmra.mxu0 %v12833_v52  ;;  %4055 = vmatmul.bf16.vlgmr.msra.gmra.mxu2 %v12812_v7  ;;  %v8965_v28 = vor.u32 %v11067_v19, %v8962_v20  ;;  %v8802_v62 = vld [vmem:[#allocation4 + $0x158] sm:$0xf0]  ;;  %v12858_v19 = vld [vmem:[%s14731_s6] sm:$0xf]  ;;  %v10995_v20 = vld [vmem:[#allocation4 + $0x4c] sm:$0xf] }
 0x23b   :  { %4073 = vmatpush.bf16.msrb.mxu0 %v9009_v41  ;;  %v2976_v57 = vpop.f32.mrf.mxu0  ;;  %4103 = vmatpush.bf16.msrb.mxu2 %v9201_v48  ;;  %v8897_v41 = vor.u32 %v11053_v33, %v8896_v38  ;;  %v11095_v48 = vld [vmem:[#allocation4 + $0x36c] sm:$0xf]  ;;  %v8946_v38 = vld [vmem:[#allocation4 + $0x278] sm:$0xf0]  ;;  %v8817_v33 = vor.u32 %v11033_v59, %v8816_v27 }
 0x23c   :  { %v9077_v50 = vor.u32 %v11095_v48, %v9074_v49  ;;  %v11075_v57 = vld [vmem:[#allocation4 + $0x2cc] sm:$0xf]  ;;  %v8805_v48 = vor.u32 %v11027_v47, %v8802_v62  ;;  %v8784_v49 = vld [vmem:[#allocation4 + $0x128] sm:$0xf]  ;;  %v8658_v59 = vld [vmem:[#allocation4 + $0x38] sm:$0xf0] }
 0x23d   :  { %v10991_v27 = vld [vmem:[#allocation4 + $0x2c] sm:$0xf] }
 0x23e   :  { %v11127_v62 = vld [vmem:[#allocation4 + $0x46c] sm:$0xf] }
 0x23f   :  { %4074 = vmatpush.bf16.msrb.mxu0 %v8993_v16  ;;  %4104 = vmatpush.bf16.msrb.mxu2 %v9185_v60  ;;  %v8994_v16 = vld [vmem:[#allocation4 + $0x2d8] sm:$0xf0]  ;;  %v11091_v60 = vld [vmem:[#allocation4 + $0x34c] sm:$0xf] }
 0x240   :  { %v8997_v34 = vor.u32 %v11075_v57, %v8994_v16  ;;  %v9061_v4 = vor.u32 %v11091_v60, %v9058_v8  ;;  %v8768_v57 = vld [vmem:[#allocation4 + $0x108] sm:$0xf]  ;;  %v11021_v16 = vld [vmem:[#allocation4 + $0x114] sm:$0xf0]  ;;  %v11019_v60 = vld [vmem:[#allocation4 + $0x10c] sm:$0xf] }
 0x243   :  { %4075 = vmatpush.bf16.msrb.mxu0 %v8977_v29  ;;  %4105 = vmatpush.bf16.msrb.mxu2 %v9169_v3  ;;  %v8848_v29 = vld [vmem:[#allocation4 + $0x1a8] sm:$0xf]  ;;  %v11041_v3 = vld [vmem:[#allocation4 + $0x1b4] sm:$0xf0] }
 0x247   :  { %4076 = vmatpush.bf16.msrb.mxu0 %v8961_v10  ;;  %4106 = vmatpush.bf16.msrb.mxu2 %v9153_v11  ;;  %v11087_v10 = vld [vmem:[#allocation4 + $0x32c] sm:$0xf]  ;;  %v9042_v11 = vld [vmem:[#allocation4 + $0x338] sm:$0xf0] }
 0x24a   :  { %4029 = vmatmul.bf16.vlgmr.msra.gmra.mxu0 %v12833_v52 }
 0x24b   :  { %4151 = vmatpush.bf16.msra.mxu2 %v9141_v12  ;;  %4077 = vmatpush.bf16.msrb.mxu0 %v8945_v17  ;;  %v8849_v12 = vor.u32 %v11041_v3, %v8848_v29  ;;  %v9045_v17 = vor.u32 %v11087_v10, %v9042_v11  ;;  %v8898_v29 = vld [vmem:[#allocation4 + $0x218] sm:$0xf0]  ;;  %v8769_v3 = vor.u32 %v11021_v16, %v8768_v57  ;;  %v11007_v10 = vld [vmem:[#allocation4 + $0xac] sm:$0xf] }
 0x24c   :  { %v8722_v11 = vld [vmem:[#allocation4 + $0xb8] sm:$0xf0]  ;;  %v11119_v57 = vld [vmem:[#allocation4 + $0x42c] sm:$0xf] }
 0x24d   :  { %v9170_v16 = vld [vmem:[#allocation4 + $0x438] sm:$0xf0] }
 0x24f   :  { %4152 = vmatpush.bf16.msra.mxu2 %v9125_v31  ;;  %4078 = vmatpush.bf16.msrb.mxu0 %v8929_v23  ;;  %v11035_v31 = vld [vmem:[#allocation4 + $0x18c] sm:$0xf]  ;;  %v9026_v23 = vld [vmem:[#allocation4 + $0x318] sm:$0xf0] }
 0x250   :  { %v8837_v26 = vor.u32 %v11035_v31, %v8834_v18 }
 0x253   :  { %v3026_v36 = vpop.f32.mrf.mxu0  ;;  %4153 = vmatpush.bf16.msra.mxu2 %v9109_v24  ;;  %4079 = vmatpush.bf16.msrb.mxu0 %v8913_v32  ;;  %v8833_v24 = vor.u32 %v11037_v15, %v8832_v14  ;;  %v11031_v32 = vld [vmem:[#allocation4 + $0x16c] sm:$0xf]  ;;  %v8706_v14 = vld [vmem:[#allocation4 + $0x98] sm:$0xf0] }
 0x254   :  { %v3027_v42 = vadd.f32 %v3026_v36, %v3014_v30  ;;  %v9029_v30 = vor.u32 %v11083_v22, %v9026_v23  ;;  %v8818_v36 = vld [vmem:[#allocation4 + $0x178] sm:$0xf0]  ;;  %v9296_v22 = vld [vmem:[#allocation6 + $0xa8] sm:$0xf]  ;;  %v3186_v23 = vperm.slane %v12858_v19, 0 }
 0x256   :  { %v3034_v51 = vmax.f32 %v3027_v42, 0.0  ;;  %v8821_v42 = vor.u32 %v11031_v32, %v8818_v36  ;;  %v11149_v32 = vld [vmem:[#allocation6 + $0x98] sm:$0xf0]  ;;  %v9272_v36 = vld [vmem:[#allocation6 + $0x78] sm:$0xf] }
 0x257   :  { %4154 = vmatpush.bf16.msra.mxu2 %v9093_v37  ;;  %4080 = vmatpush.bf16.msrb.mxu0 %v8897_v41  ;;  %v11063_v37 = vld [vmem:[#allocation4 + $0x26c] sm:$0xf]  ;;  %v8801_v41 = vor.u32 %v11029_v44, %v8800_v43 }
 0x258   :  { %v12840_v1 = vpack.c.bf16 %v3034_v51, %v3034_v51  ;;  %v8949_v46 = vor.u32 %v11063_v37, %v8946_v38  ;;  %v8930_v51 = vld [vmem:[#allocation4 + $0x258] sm:$0xf0]  ;;  %v8661_v38 = vor.u32 %v10991_v27, %v8658_v59  ;;  %v10987_v44 = vld [vmem:[#allocation4 + $0xc] sm:$0xf]  ;;  %v11148_v27 = vld [vmem:[#allocation6 + $0x94] sm:$0xf] }
 0x259   :  { %v9286_v59 = vld [vmem:[#allocation6 + $0x9c] sm:$0xf0] }
 0x25a   :  { %9206 = vmatmul.msk.bf16.vlgmr.msra.gmra.mxu3 %vm1358_vm0, %v12840_v1  ;;  %9207 = vmatmul.msk.bf16.vlgmr.msra.gmra.mxu1 %vm1358_vm0, %v12840_v1 }
 0x25b   :  { %4060 = vmatpush.bf16.msra.mxu3 %v8881_v9  ;;  %v3028_v61 = vpop.f32.mrf.mxu0  ;;  %9208 = vmatmul.msk.bf16.vlgmr.msrb.gmra.mxu2 %vm1358_vm0, %v12840_v1  ;;  %v11025_v9 = vld [vmem:[#allocation4 + $0x134] sm:$0xf0] }
 0x25c   :  { %4125 = vmatpush.bf16.msra.mxu0 %v8885_v35  ;;  %4138 = vmatpush.bf16.msra.mxu1 %v9013_v54  ;;  %v8933_v35 = vor.u32 %v11059_v39, %v8930_v51  ;;  %v11055_v54 = vld [vmem:[#allocation4 + $0x22c] sm:$0xf]  ;;  %v8785_v55 = vor.u32 %v11025_v9, %v8784_v49  ;;  %v8770_v61 = vld [vmem:[#allocation4 + $0x118] sm:$0xf0] }
 0x25d   :  { %4155 = vmatpush.bf16.msra.mxu2 %v9077_v50  ;;  %4081 = vmatmul.bf16.vlgmr.msrb.gmra.mxu0 %v12824_v25  ;;  %v8914_v50 = vld [vmem:[#allocation4 + $0x238] sm:$0xf0]  ;;  %v11123_v49 = vld [vmem:[#allocation4 + $0x44c] sm:$0xf] }
 0x25e   :  { %v8917_v8 = vor.u32 %v11055_v54, %v8914_v50  ;;  %v9202_v39 = vld [vmem:[#allocation4 + $0x478] sm:$0xf0] }
 0x25f   :  { %4061 = vmatpush.bf16.msra.mxu3 %v8865_v58  ;;  %v8754_v58 = vld [vmem:[#allocation4 + $0xf8] sm:$0xf0] }
 0x260   :  { %4126 = vmatpush.bf16.msra.mxu0 %v8869_v0  ;;  %4139 = vmatpush.bf16.msra.mxu1 %v8997_v34  ;;  %v11051_v0 = vld [vmem:[#allocation4 + $0x20c] sm:$0xf]  ;;  %v8773_v34 = vor.u32 %v11019_v60, %v8770_v61  ;;  %v9186_v9 = vld [vmem:[#allocation4 + $0x458] sm:$0xf0] }
 0x261   :  { %4156 = vmatpush.bf16.msra.mxu2 %v9061_v4  ;;  %v8901_v5 = vor.u32 %v11051_v0, %v8898_v29  ;;  %v9189_v50 = vor.u32 %v11123_v49, %v9186_v9  ;;  %v11115_v61 = vld [vmem:[#allocation4 + $0x40c] sm:$0xf]  ;;  %v11137_v0 = vld [vmem:[#allocation6 + $0x38] sm:$0xf0]  ;;  %v9392_v29 = vld [vmem:[#allocation6 + $0x168] sm:$0xf] }
 0x263   :  { %4062 = vmatpush.bf16.msra.mxu3 %v8849_v12  ;;  %v8725_v12 = vor.u32 %v11007_v10, %v8722_v11  ;;  %v11173_v10 = vld [vmem:[#allocation6 + $0x158] sm:$0xf0] }
 0x264   :  { %4127 = vmatpush.bf16.msra.mxu0 %v8853_v13  ;;  %4140 = vmatpush.bf16.msra.mxu1 %v8981_v40  ;;  %v11003_v13 = vld [vmem:[#allocation4 + $0x8c] sm:$0xf] }
 0x265   :  { %4157 = vmatpush.bf16.msra.mxu2 %v9045_v17  ;;  %v8709_v15 = vor.u32 %v11003_v13, %v8706_v14  ;;  %v10999_v40 = vld [vmem:[#allocation4 + $0x6c] sm:$0xf]  ;;  %v8690_v17 = vld [vmem:[#allocation4 + $0x78] sm:$0xf0]  ;;  %v9212_v14 = vld [vmem:[#allocation6] sm:$0xf] }
 0x266   :  { %v8693_v18 = vor.u32 %v10999_v40, %v8690_v17  ;;  %v9368_v40 = vld [vmem:[#allocation6 + $0x138] sm:$0xf] }
 0x267   :  { %4063 = vmatpush.bf16.msra.mxu3 %v8833_v24 }
 0x268   :  { %4128 = vmatpush.bf16.msra.mxu0 %v8837_v26  ;;  %4141 = vmatpush.bf16.msra.mxu1 %v8965_v28 }
 0x269   :  { %4158 = vmatpush.bf16.msra.mxu2 %v9029_v30  ;;  %v9284_v30 = vld [vmem:[#allocation6 + $0x90] sm:$0xf] }
 0x26a   :  { %4016 = vmatmul.bf16.vlgmr.msrb.gmra.mxu3 %v12824_v25  ;;  %4094 = vmatmul.bf16.vlgmr.msrb.gmra.mxu1 %v12833_v52 }
 0x26b   :  { %4064 = vmatpush.bf16.msra.mxu3 %v8817_v33  ;;  %v9285_v33 = vor.u32 %v11149_v32, %v9284_v30  ;;  %v9289_v30 = vor.u32 %v11148_v27, %v9286_v59  ;;  %v9344_v32 = vld [vmem:[#allocation6 + $0x108] sm:$0xf] }
 0x26c   :  { %4129 = vmatpush.bf16.msra.mxu0 %v8821_v42  ;;  %4159 = vmatmul.bf16.vlgmr.msra.gmra.mxu2 %v12833_v52  ;;  %v11015_v52 = vld [vmem:[#allocation4 + $0xec] sm:$0xf]  ;;  %v11146_v42 = vld [vmem:[#allocation6 + $0x80] sm:$0xf0]  ;;  %v9370_v59 = vld [vmem:[#allocation6 + $0x144] sm:$0xf0] }
 0x26d   :  { %4142 = vmatpush.bf16.msra.mxu1 %v8949_v46  ;;  %v8757_v4 = vor.u32 %v11015_v52, %v8754_v58  ;;  %v8642_v46 = vld [vmem:[#allocation4 + $0x18] sm:$0xf0]  ;;  %v9273_v51 = vor.u32 %v11146_v42, %v9272_v36  ;;  %v9236_v58 = vld [vmem:[#allocation6 + $0x30] sm:$0xf]  ;;  %v11164_v36 = vld [vmem:[#allocation6 + $0x110] sm:$0xf0] }
 0x26e   :  { %v9154_v52 = vld [vmem:[#allocation4 + $0x418] sm:$0xf0]  ;;  %v9488_v42 = vld [vmem:[#allocation6 + $0x228] sm:$0xf] }
 0x26f   :  { %4065 = vmatpush.bf16.msra.mxu3 %v8801_v41  ;;  %v8645_v41 = vor.u32 %v10987_v44, %v8642_v46  ;;  %v9157_v6 = vor.u32 %v11115_v61, %v9154_v52  ;;  %v9308_v61 = vld [vmem:[#allocation6 + $0xc0] sm:$0xf]  ;;  %v11155_v52 = vld [vmem:[#allocation6 + $0xc8] sm:$0xf0] }
 0x270   :  { %4130 = vmatpush.bf16.msra.mxu0 %v8805_v48  ;;  %v9205_v48 = vor.u32 %v11127_v62, %v9202_v39  ;;  %v11161_v62 = vld [vmem:[#allocation6 + $0xf8] sm:$0xf0] }
 0x271   :  { %4143 = vmatpush.bf16.msra.mxu1 %v8933_v35  ;;  %v9260_v35 = vld [vmem:[#allocation6 + $0x60] sm:$0xf] }
 0x273   :  { %4066 = vmatpush.bf16.msra.mxu3 %v8785_v55  ;;  %v9261_v55 = vor.u32 %v11143_v21, %v9260_v35  ;;  %v11197_v35 = vld [vmem:[#allocation6 + $0x218] sm:$0xf0]  ;;  %v9320_v21 = vld [vmem:[#allocation6 + $0xd8] sm:$0xf] }
 0x274   :  { %4131 = vmatpush.bf16.msra.mxu0 %v8789_v56  ;;  %v11140_v56 = vld [vmem:[#allocation6 + $0x50] sm:$0xf0] }
 0x275   :  { %4144 = vmatpush.bf16.msra.mxu1 %v8917_v8  ;;  %v9249_v60 = vor.u32 %v11140_v56, %v9248_v53  ;;  %v9173_v8 = vor.u32 %v11119_v57, %v9170_v16  ;;  %v11158_v53 = vld [vmem:[#allocation6 + $0xe0] sm:$0xf0]  ;;  %v9250_v56 = vld [vmem:[#allocation6 + $0x54] sm:$0xf0] }
 0x276   :  { %v9464_v16 = vld [vmem:[#allocation6 + $0x1f8] sm:$0xf] }
 0x277   :  { %4067 = vmatpush.bf16.msra.mxu3 %v8769_v3  ;;  %v9237_v3 = vor.u32 %v11137_v0, %v9236_v58  ;;  %v9309_v58 = vor.u32 %v11155_v52, %v9308_v61  ;;  %v9322_v61 = vld [vmem:[#allocation6 + $0xe4] sm:$0xf0] }
 0x278   :  { %4132 = vmatpush.bf16.msra.mxu0 %v8773_v34  ;;  %v11176_v34 = vld [vmem:[#allocation6 + $0x170] sm:$0xf0] }
 0x279   :  { %4145 = vmatpush.bf16.msra.mxu1 %v8901_v5  ;;  %v11134_v5 = vld [vmem:[#allocation6 + $0x20] sm:$0xf0] }
 0x27a   :  { %4068 = vmatmul.bf16.vlgmr.msra.gmra.mxu3 %v12817_v45 }
 0x27b   :  { %4112 = vmatpush.bf16.msrb.mxu3 %v8757_v4  ;;  %4133 = vmatmul.bf16.vlgmr.msra.gmra.mxu0 %v12817_v45  ;;  %v8674_v45 = vld [vmem:[#allocation4 + $0x58] sm:$0xf0]  ;;  %v9224_v4 = vld [vmem:[#allocation6 + $0x18] sm:$0xf] }
 0x27c   :  { %4146 = vmatmul.bf16.vlgmr.msra.gmra.mxu1 %v12824_v25  ;;  %v11152_v25 = vld [vmem:[#allocation6 + $0xb0] sm:$0xf0]  ;;  %v8677_v24 = vor.u32 %v10995_v20, %v8674_v45  ;;  %v9225_v11 = vor.u32 %v11134_v5, %v9224_v4  ;;  %v11151_v20 = vld [vmem:[#allocation6 + $0xac] sm:$0xf]  ;;  %v9298_v45 = vld [vmem:[#allocation6 + $0xb4] sm:$0xf0] }
 0x27d   :  { %v3926_v31 = vpop.f32.mrf.mxu3  ;;  %v9297_v26 = vor.u32 %v11152_v25, %v9296_v22  ;;  %v9301_v25 = vor.u32 %v11151_v20, %v9298_v45 }
 0x27e   :  { %v3927_v37 = vadd.f32 %v3926_v31, %v3186_v23  ;;  %v9356_v23 = vld [vmem:[#allocation6 + $0x120] sm:$0xf] }
 0x27f   :  { %4113 = vmatpush.bf16.msrb.mxu3 %v8741_v2  ;;  %4829 = vmatpush.bf16.msrb.mxu0 %v9297_v26  ;;  %v9393_v2 = vor.u32 %v11176_v34, %v9392_v29  ;;  %v11136_v29 = vld [vmem:[#allocation6 + $0x34] sm:$0xf]  ;;  %v11175_v34 = vld [vmem:[#allocation6 + $0x16c] sm:$0xf] }
 0x281   :  { %4842 = vmatpush.bf16.msrb.mxu1 %v9393_v2  ;;  %v9452_v2 = vld [vmem:[#allocation6 + $0x1e0] sm:$0xf] }
 0x283   :  { %4114 = vmatpush.bf16.msrb.mxu3 %v8725_v12  ;;  %4830 = vmatpush.bf16.msrb.mxu0 %v9285_v33  ;;  %v9274_v33 = vld [vmem:[#allocation6 + $0x84] sm:$0xf0] }
 0x285   :  { %v3928_v28 = vpop.f32.mrf.mxu3 }
 0x287   :  { %4115 = vmatpush.bf16.msrb.mxu3 %v8709_v15  ;;  %v3939_v43 = vpop.f32.mrf.mxu1  ;;  %4831 = vmatpush.bf16.msrb.mxu0 %v9273_v51  ;;  %v11131_v15 = vld [vmem:[#allocation6 + $0x8] sm:$0xf0]  ;;  %v11142_v51 = vld [vmem:[#allocation6 + $0x64] sm:$0xf] }
 0x288   :  { %v12861_v47 = vadd.f32 %v3939_v43, %v3927_v37  ;;  %v9213_v31 = vor.u32 %v11131_v15, %v9212_v14  ;;  %v11145_v37 = vld [vmem:[#allocation6 + $0x7c] sm:$0xf]  ;;  %v11200_v43 = vld [vmem:[#allocation6 + $0x230] sm:$0xf0]  ;;  %v9226_v14 = vld [vmem:[#allocation6 + $0x24] sm:$0xf0] }
 0x289   :  { %v9277_v44 = vor.u32 %v11145_v37, %v9274_v33  ;;  %v9489_v46 = vor.u32 %v11200_v43, %v9488_v42  ;;  %v11172_v15 = vld [vmem:[#allocation6 + $0x154] sm:$0xf]  ;;  %v11166_v37 = vld [vmem:[#allocation6 + $0x124] sm:$0xf]  ;;  %v9416_v42 = vld [vmem:[#allocation6 + $0x198] sm:$0xf] }
 0x28a   :  { %v11182_v43 = vld [vmem:[#allocation6 + $0x1a0] sm:$0xf0] }
 0x28b   :  { %4116 = vmatpush.bf16.msrb.mxu3 %v8693_v18  ;;  %4832 = vmatpush.bf16.msrb.mxu0 %v9261_v55  ;;  %v11170_v18 = vld [vmem:[#allocation6 + $0x140] sm:$0xf0]  ;;  %v11139_v55 = vld [vmem:[#allocation6 + $0x4c] sm:$0xf] }
 0x28c   :  { %v9369_v22 = vor.u32 %v11170_v18, %v9368_v40  ;;  %4855 = vmatpush.bf16.msrb.mxu2 %v9489_v46  ;;  %v9253_v57 = vor.u32 %v11139_v55, %v9250_v56  ;;  %v11188_v18 = vld [vmem:[#allocation6 + $0x1d0] sm:$0xf0]  ;;  %v11163_v46 = vld [vmem:[#allocation6 + $0x10c] sm:$0xf] }
 0x28d   :  { %v11196_v56 = vld [vmem:[#allocation6 + $0x214] sm:$0xf] }
 0x28f   :  { %4117 = vmatpush.bf16.msrb.mxu3 %v8677_v24  ;;  %v3941_v54 = vpop.f32.mrf.mxu1  ;;  %4833 = vmatpush.bf16.msrb.mxu0 %v9249_v60  ;;  %v11167_v24 = vld [vmem:[#allocation6 + $0x128] sm:$0xf0]  ;;  %v11194_v60 = vld [vmem:[#allocation6 + $0x200] sm:$0xf0] }
 0x290   :  { %v9357_v26 = vor.u32 %v11167_v24, %v9356_v23  ;;  %v9214_v23 = vld [vmem:[#allocation6 + $0xc] sm:$0xf0]  ;;  %v11169_v24 = vld [vmem:[#allocation6 + $0x13c] sm:$0xf] }
 0x293   :  { %4118 = vmatpush.bf16.msrb.mxu3 %v8661_v38  ;;  %4834 = vmatpush.bf16.msrb.mxu0 %v9237_v3  ;;  %v9345_v38 = vor.u32 %v11164_v36, %v9344_v32  ;;  %v9238_v3 = vld [vmem:[#allocation6 + $0x3c] sm:$0xf0]  ;;  %v9373_v32 = vor.u32 %v11169_v24, %v9370_v59  ;;  %v9560_v59 = vld [vmem:[#allocation6 + $0x2b8] sm:$0xf] }
 0x294   :  { %v9241_v5 = vor.u32 %v11136_v29, %v9238_v3  ;;  %v9466_v29 = vld [vmem:[#allocation6 + $0x204] sm:$0xf0] }
 0x297   :  { %4119 = vmatpush.bf16.msrb.mxu3 %v8645_v41  ;;  %v12864_v63 = vpop.f32.mrf.mxu1  ;;  %4835 = vmatpush.bf16.msrb.mxu0 %v9225_v11  ;;  %v9262_v41 = vld [vmem:[#allocation6 + $0x6c] sm:$0xf0] }
 0x298   :  { %v9265_v9 = vor.u32 %v11142_v51, %v9262_v41 }
 0x29a   :  { %4120 = vmatmul.bf16.vlgmr.msrb.gmra.mxu3 %v12812_v7  ;;  %v9380_v7 = vld [vmem:[#allocation6 + $0x150] sm:$0xf] }
 0x29b   :  { %4168 = vmatpush.bf16.msra.mxu3 %v9205_v48  ;;  %v9381_v12 = vor.u32 %v11173_v10, %v9380_v7  ;;  %4836 = vmatpush.bf16.msrb.mxu0 %v9213_v31  ;;  %v9476_v48 = vld [vmem:[#allocation6 + $0x210] sm:$0xf]  ;;  %v11191_v7 = vld [vmem:[#allocation6 + $0x1e8] sm:$0xf0]  ;;  %v9440_v31 = vld [vmem:[#allocation6 + $0x1c8] sm:$0xf] }
 0x29c   :  { %v9477_v54 = vor.u32 %v11197_v35, %v9476_v48  ;;  %v9453_v11 = vor.u32 %v11191_v7, %v9452_v2  ;;  %v9441_v45 = vor.u32 %v11188_v18, %v9440_v31  ;;  %v11199_v35 = vld [vmem:[#allocation6 + $0x22c] sm:$0xf]  ;;  %v9310_v2 = vld [vmem:[#allocation6 + $0xcc] sm:$0xf0] }
 0x29d   :  { %v12866_v13 = vpop.f32.mrf.mxu2  ;;  %4843 = vmatpush.bf16.msrb.mxu1 %v9381_v12  ;;  %v11133_v12 = vld [vmem:[#allocation6 + $0x1c] sm:$0xf] }
 0x29e   :  { %4856 = vmatpush.bf16.msrb.mxu2 %v9477_v54  ;;  %v9229_v40 = vor.u32 %v11133_v12, %v9226_v14  ;;  %v11160_v54 = vld [vmem:[#allocation6 + $0xf4] sm:$0xf]  ;;  %v9454_v12 = vld [vmem:[#allocation6 + $0x1ec] sm:$0xf0] }
 0x29f   :  { %4169 = vmatpush.bf16.msra.mxu3 %v9189_v50  ;;  %v3993_v17 = vpop.f32.mrf.mxu1  ;;  %4881 = vmatpush.bf16.msra.mxu0 %v9301_v25  ;;  %v9321_v50 = vor.u32 %v11158_v53, %v9320_v21  ;;  %v11130_v25 = vld [vmem:[#allocation6 + $0x4] sm:$0xf]  ;;  %v9490_v21 = vld [vmem:[#allocation6 + $0x234] sm:$0xf0] }
 0x2a0   :  { %v9382_v17 = vld [vmem:[#allocation6 + $0x15c] sm:$0xf0]  ;;  %v9217_v27 = vor.u32 %v11130_v25, %v9214_v23  ;;  %v9493_v53 = vor.u32 %v11199_v35, %v9490_v21  ;;  %v11153_v25 = vld [vmem:[#allocation6 + $0xb8] sm:$0xf0]  ;;  %v9442_v23 = vld [vmem:[#allocation6 + $0x1d4] sm:$0xf0] }
 0x2a1   :  { %4844 = vmatpush.bf16.msrb.mxu1 %v9369_v22  ;;  %v9385_v20 = vor.u32 %v11172_v15, %v9382_v17  ;;  %v9572_v15 = vld [vmem:[#allocation6 + $0x2d0] sm:$0xf]  ;;  %v3953_v17 = vadd.f32 %v12866_v13, %v12861_v47  ;;  %v9292_v13 = vld [vmem:[#allocation6 + $0x98] sm:$0xf]  ;;  %v9418_v35 = vld [vmem:[#allocation6 + $0x1a4] sm:$0xf0] }
 0x2a3   :  { %4170 = vmatpush.bf16.msra.mxu3 %v9173_v8  ;;  %4882 = vmatpush.bf16.msra.mxu0 %v9289_v30  ;;  %v9465_v8 = vor.u32 %v11194_v60, %v9464_v16  ;;  %v11185_v30 = vld [vmem:[#allocation6 + $0x1b8] sm:$0xf0] }
 0x2a5   :  { %v3954_v28 = vpop.f32.mrf.mxu2  ;;  %4845 = vmatpush.bf16.msrb.mxu1 %v9357_v26  ;;  %4857 = vmatpush.bf16.msrb.mxu2 %v9465_v8  ;;  %v11157_v8 = vld [vmem:[#allocation6 + $0xdc] sm:$0xf] }
 0x2a6   :  { %v9428_v28 = vld [vmem:[#allocation6 + $0x1b0] sm:$0xf]  ;;  %v9325_v52 = vor.u32 %v11157_v8, %v9322_v61  ;;  %v11144_v8 = vld [vmem:[#allocation6 + $0x70] sm:$0xf0] }
 0x2a7   :  { %4171 = vmatpush.bf16.msra.mxu3 %v9157_v6  ;;  %4883 = vmatpush.bf16.msra.mxu0 %v9277_v44  ;;  %v9394_v6 = vld [vmem:[#allocation6 + $0x174] sm:$0xf0]  ;;  %v9429_v36 = vor.u32 %v11185_v30, %v9428_v28  ;;  %v9417_v44 = vor.u32 %v11182_v43, %v9416_v42  ;;  %v11218_v28 = vld [vmem:[#allocation6 + $0x2c0] sm:$0xf0]  ;;  %v9430_v42 = vld [vmem:[#allocation6 + $0x1bc] sm:$0xf0] }
 0x2a8   :  { %v9397_v10 = vor.u32 %v11175_v34, %v9394_v6  ;;  %v9584_v34 = vld [vmem:[#allocation6 + $0x2e8] sm:$0xf]  ;;  %v11154_v6 = vld [vmem:[#allocation6 + $0xc4] sm:$0xf] }
 0x2a9   :  { %4846 = vmatpush.bf16.msrb.mxu1 %v9345_v38  ;;  %4858 = vmatpush.bf16.msrb.mxu2 %v9453_v11  ;;  %v9358_v38 = vld [vmem:[#allocation6 + $0x12c] sm:$0xf0]  ;;  %v9313_v7 = vor.u32 %v11154_v6, %v9310_v2  ;;  %v11190_v11 = vld [vmem:[#allocation6 + $0x1e4] sm:$0xf]  ;;  %v9512_v2 = vld [vmem:[#allocation6 + $0x258] sm:$0xf] }
 0x2aa   :  { %9209 = vmatmul.msk.bf16.vlgmr.msra.gmra.mxu3 %vm1358_vm0, %v12840_v1  ;;  %v9332_v1 = vld [vmem:[#allocation6 + $0xf0] sm:$0xf]  ;;  %v9361_v33 = vor.u32 %v11166_v37, %v9358_v38  ;;  %v9457_v14 = vor.u32 %v11190_v11, %v9454_v12 }
 0x2ab   :  { %v9333_v39 = vor.u32 %v11161_v62, %v9332_v1  ;;  %4884 = vmatpush.bf16.msra.mxu0 %v9265_v9  ;;  %v9346_v1 = vld [vmem:[#allocation6 + $0x114] sm:$0xf0]  ;;  %v9404_v62 = vld [vmem:[#allocation6 + $0x180] sm:$0xf]  ;;  %v9256_v12 = vld [vmem:[#allocation6 + $0x50] sm:$0xf] }
 0x2ac   :  { %v9349_v41 = vor.u32 %v11163_v46, %v9346_v1  ;;  %v11215_v46 = vld [vmem:[#allocation6 + $0x2a8] sm:$0xf0] }
 0x2ad   :  { %v12870_v49 = vpop.f32.mrf.mxu2  ;;  %4847 = vmatpush.bf16.msrb.mxu1 %v9333_v39  ;;  %4859 = vmatpush.bf16.msrb.mxu2 %v9441_v45  ;;  %v11179_v39 = vld [vmem:[#allocation6 + $0x188] sm:$0xf0] }
 0x2ae   :  { %v9405_v48 = vor.u32 %v11179_v39, %v9404_v62 }
 0x2af   :  { %4885 = vmatpush.bf16.msra.mxu0 %v9253_v57  ;;  %v9478_v57 = vld [vmem:[#allocation6 + $0x21c] sm:$0xf0] }
 0x2b0   :  { %v9481_v16 = vor.u32 %v11196_v56, %v9478_v57 }
 0x2b1   :  { %4848 = vmatpush.bf16.msrb.mxu1 %v9321_v50  ;;  %4860 = vmatpush.bf16.msrb.mxu2 %v9429_v36  ;;  %v9334_v50 = vld [vmem:[#allocation6 + $0xfc] sm:$0xf0] }
 0x2b2   :  { %v9337_v55 = vor.u32 %v11160_v54, %v9334_v50  ;;  %v9536_v54 = vld [vmem:[#allocation6 + $0x288] sm:$0xf]  ;;  %v11212_v50 = vld [vmem:[#allocation6 + $0x290] sm:$0xf0] }
 0x2b3   :  { %4886 = vmatpush.bf16.msra.mxu0 %v9241_v5  ;;  %v9537_v56 = vor.u32 %v11212_v50, %v9536_v54  ;;  %v11171_v54 = vld [vmem:[#allocation6 + $0x148] sm:$0xf0] }
 0x2b5   :  { %v4006_v4 = vpop.f32.mrf.mxu2  ;;  %4849 = vmatpush.bf16.msrb.mxu1 %v9309_v58  ;;  %4861 = vmatpush.bf16.msrb.mxu2 %v9417_v44  ;;  %v11193_v58 = vld [vmem:[#allocation6 + $0x1fc] sm:$0xf]  ;;  %v9548_v44 = vld [vmem:[#allocation6 + $0x2a0] sm:$0xf] }
 0x2b6   :  { %v9469_v3 = vor.u32 %v11193_v58, %v9466_v29  ;;  %v11224_v4 = vld [vmem:[#allocation6 + $0x2f0] sm:$0xf0]  ;;  %v9549_v1 = vor.u32 %v11215_v46, %v9548_v44  ;;  %v9406_v58 = vld [vmem:[#allocation6 + $0x18c] sm:$0xf0] }
 0x2b7   :  { %v12872_v0 = vpop.f32.mrf.mxu0  ;;  %4887 = vmatpush.bf16.msra.mxu0 %v9229_v40  ;;  %v9585_v5 = vor.u32 %v11224_v4, %v9584_v34  ;;  %v11221_v40 = vld [vmem:[#allocation6 + $0x2d8] sm:$0xf0]  ;;  %v9524_v29 = vld [vmem:[#allocation6 + $0x270] sm:$0xf]  ;;  %v11220_v46 = vld [vmem:[#allocation6 + $0x2d4] sm:$0xf] }
 0x2b8   :  { %v9573_v31 = vor.u32 %v11221_v40, %v9572_v15  ;;  %v3966_v45 = vadd.f32 %v12872_v0, %v3953_v17  ;;  %v11184_v0 = vld [vmem:[#allocation6 + $0x1b4] sm:$0xf]  ;;  %v11209_v34 = vld [vmem:[#allocation6 + $0x278] sm:$0xf0] }
 0x2b9   :  { %4894 = vmatpush.bf16.msra.mxu1 %v9397_v10  ;;  %4862 = vmatpush.bf16.msrb.mxu2 %v9405_v48  ;;  %v9433_v43 = vor.u32 %v11184_v0, %v9430_v42  ;;  %v11147_v48 = vld [vmem:[#allocation6 + $0x88] sm:$0xf0]  ;;  %v9388_v42 = vld [vmem:[#allocation6 + $0x158] sm:$0xf] }
 0x2ba   :  { %4868 = vmatpush.bf16.msrb.mxu3 %v9585_v5  ;;  %v9525_v5 = vor.u32 %v11209_v34, %v9524_v29 }
 0x2bb   :  { %4888 = vmatpush.bf16.msra.mxu0 %v9217_v27 }
 0x2bd   :  { %4895 = vmatpush.bf16.msra.mxu1 %v9385_v20  ;;  %v12874_v26 = vpop.f32.mrf.mxu2  ;;  %4907 = vmatpush.bf16.msra.mxu2 %v9493_v53  ;;  %v11187_v20 = vld [vmem:[#allocation6 + $0x1cc] sm:$0xf] }
 0x2be   :  { %4869 = vmatpush.bf16.msrb.mxu3 %v9573_v31  ;;  %v9445_v27 = vor.u32 %v11187_v20, %v9442_v23 }
 0x2bf   :  { %v3967_v22 = vpop.f32.mrf.mxu0 }
 0x2c0   :  { %v9304_v22 = vld [vmem:[#allocation6 + $0xb0] sm:$0xf] }
 0x2c1   :  { %4896 = vmatpush.bf16.msra.mxu1 %v9373_v32  ;;  %4908 = vmatpush.bf16.msra.mxu2 %v9481_v16  ;;  %v9561_v32 = vor.u32 %v11218_v28, %v9560_v59  ;;  %v9305_v47 = vor.u32 %v11153_v25, %v9304_v22  ;;  %v11203_v22 = vld [vmem:[#allocation6 + $0x248] sm:$0xf0]  ;;  %v11177_v59 = vld [vmem:[#allocation6 + $0x178] sm:$0xf0] }
 0x2c2   :  { %v11223_v28 = vld [vmem:[#allocation6 + $0x2ec] sm:$0xf] }
 0x2c3   :  { %4870 = vmatpush.bf16.msrb.mxu3 %v9561_v32 }
 0x2c5   :  { %4897 = vmatpush.bf16.msra.mxu1 %v9361_v33  ;;  %v4058_v9 = vpop.f32.mrf.mxu2  ;;  %4909 = vmatpush.bf16.msra.mxu2 %v9469_v3  ;;  %v11150_v33 = vld [vmem:[#allocation6 + $0xa0] sm:$0xf0] }
 0x2c6   :  { %v9293_v39 = vor.u32 %v11150_v33, %v9292_v13  ;;  %v11181_v9 = vld [vmem:[#allocation6 + $0x19c] sm:$0xf]  ;;  %v9232_v33 = vld [vmem:[#allocation6 + $0x20] sm:$0xf] }
 0x2c7   :  { %v12876_v51 = vpop.f32.mrf.mxu0  ;;  %4871 = vmatpush.bf16.msrb.mxu3 %v9549_v1  ;;  %v9421_v53 = vor.u32 %v11181_v9, %v9418_v35  ;;  %v9574_v1 = vld [vmem:[#allocation6 + $0x2dc] sm:$0xf0]  ;;  %v9220_v9 = vld [vmem:[#allocation6 + $0x8] sm:$0xf] }
 0x2c9   :  { %4898 = vmatpush.bf16.msra.mxu1 %v9349_v41  ;;  %4910 = vmatpush.bf16.msra.mxu2 %v9457_v14  ;;  %v9280_v41 = vld [vmem:[#allocation6 + $0x80] sm:$0xf]  ;;  %v11141_v14 = vld [vmem:[#allocation6 + $0x58] sm:$0xf0] }
 0x2ca   :  { %v9281_v16 = vor.u32 %v11147_v48, %v9280_v41  ;;  %v9257_v20 = vor.u32 %v11141_v14, %v9256_v12  ;;  %v11165_v12 = vld [vmem:[#allocation6 + $0x118] sm:$0xf0] }
 0x2cb   :  { %4872 = vmatpush.bf16.msrb.mxu3 %v9537_v56  ;;  %v9562_v56 = vld [vmem:[#allocation6 + $0x2c4] sm:$0xf0] }
 0x2cd   :  { %4899 = vmatpush.bf16.msra.mxu1 %v9337_v55  ;;  %4911 = vmatpush.bf16.msra.mxu2 %v9445_v27  ;;  %v3187_v55 = vperm.slane %v12858_v19, 1  ;;  %v9400_v27 = vld [vmem:[#allocation6 + $0x170] sm:$0xf] }
 0x2cf   :  { %v4032_v60 = vpop.f32.mrf.mxu0  ;;  %v3992_v4 = vadd.f32 %v12864_v63, %v3187_v55  ;;  %4873 = vmatpush.bf16.msrb.mxu3 %v9525_v5  ;;  %v9500_v63 = vld [vmem:[#allocation6 + $0x240] sm:$0xf]  ;;  %v11217_v55 = vld [vmem:[#allocation6 + $0x2bc] sm:$0xf] }
 0x2d0   :  { %v9268_v60 = vld [vmem:[#allocation6 + $0x68] sm:$0xf] }
 0x2d1   :  { %4900 = vmatpush.bf16.msra.mxu1 %v9325_v52  ;;  %4912 = vmatpush.bf16.msra.mxu2 %v9433_v43  ;;  %v11178_v52 = vld [vmem:[#allocation6 + $0x184] sm:$0xf]  ;;  %v9269_v6 = vor.u32 %v11144_v8, %v9268_v60  ;;  %v4005_v11 = vadd.f32 %v12870_v49, %v3992_v4  ;;  %v9501_v49 = vor.u32 %v11203_v22, %v9500_v63  ;;  %v9550_v4 = vld [vmem:[#allocation6 + $0x2ac] sm:$0xf0] }
 0x2d2   :  { %v9409_v3 = vor.u32 %v11178_v52, %v9406_v58  ;;  %v11174_v43 = vld [vmem:[#allocation6 + $0x160] sm:$0xf0]  ;;  %v9565_v60 = vor.u32 %v11217_v55, %v9562_v56  ;;  %v9364_v52 = vld [vmem:[#allocation6 + $0x128] sm:$0xf]  ;;  %v11168_v58 = vld [vmem:[#allocation6 + $0x130] sm:$0xf0] }
 0x2d3   :  { %v9389_v48 = vor.u32 %v11174_v43, %v9388_v42  ;;  %v9365_v5 = vor.u32 %v11168_v58, %v9364_v52  ;;  %v9436_v56 = vld [vmem:[#allocation6 + $0x1b8] sm:$0xf]  ;;  %v9424_v52 = vld [vmem:[#allocation6 + $0x1a0] sm:$0xf]  ;;  %v11183_v58 = vld [vmem:[#allocation6 + $0x1a8] sm:$0xf0] }
 0x2d5   :  { %4901 = vmatpush.bf16.msra.mxu1 %v9313_v7  ;;  %4913 = vmatpush.bf16.msra.mxu2 %v9421_v53  ;;  %v11206_v7 = vld [vmem:[#allocation6 + $0x260] sm:$0xf0]  ;;  %v9376_v53 = vld [vmem:[#allocation6 + $0x140] sm:$0xf] }
 0x2d6   :  { %v9513_v15 = vor.u32 %v11206_v7, %v9512_v2 }
 0x2d7   :  { %v12878_v10 = vpop.f32.mrf.mxu1 }
 0x2d8   :  { %4874 = vmatpush.bf16.msrb.mxu3 %v9513_v15  ;;  %v9496_v15 = vld [vmem:[#allocation6 + $0x230] sm:$0xf] }
 0x2d9   :  { %4914 = vmatpush.bf16.msra.mxu2 %v9409_v3  ;;  %v11214_v3 = vld [vmem:[#allocation6 + $0x2a4] sm:$0xf] }
 0x2da   :  { %v12882_v18 = vpop.f32.mrf.mxu0 }
 0x2dc   :  { %4875 = vmatpush.bf16.msrb.mxu3 %v9501_v49 }
 0x2dd   :  { %v3978_v24 = vpop.f32.mrf.mxu3 }
 0x2de   :  { %v3979_v30 = vadd.f32 %v3978_v24, %v3966_v45  ;;  %v12885_v36 = vpop.f32.mrf.mxu2  ;;  %v9244_v45 = vld [vmem:[#allocation6 + $0x38] sm:$0xf]  ;;  %v11138_v24 = vld [vmem:[#allocation6 + $0x40] sm:$0xf0] }
 0x2df   :  { %v4045_v38 = vpop.f32.mrf.mxu1  ;;  %v9245_v13 = vor.u32 %v11138_v24, %v9244_v45 }
 0x2e0   :  { %v12887_v37 = vpack.c.bf16 %v3979_v30, %v3979_v30  ;;  %v9586_v30 = vld [vmem:[#allocation6 + $0x2f4] sm:$0xf0]  ;;  %v9401_v38 = vor.u32 %v11177_v59, %v9400_v27  ;;  %v11208_v27 = vld [vmem:[#allocation6 + $0x274] sm:$0xf]  ;;  %v9526_v59 = vld [vmem:[#allocation6 + $0x27c] sm:$0xf0] }
 0x2e2   :  { %4837 = vmatmul.bf16.vlgmr.msrb.gmra.mxu0 %v12887_v37  ;;  %v4084_v62 = vpop.f32.mrf.mxu0 }
 0x2e3   :  { %4933 = vmatpush.bf16.msrb.mxu0 %v9305_v47  ;;  %v9589_v47 = vor.u32 %v11223_v28, %v9586_v30  ;;  %v3188_v62 = vperm.slane %v12858_v19, 2  ;;  %v9529_v28 = vor.u32 %v11208_v27, %v9526_v59  ;;  %v9532_v27 = vld [vmem:[#allocation6 + $0x278] sm:$0xf]  ;;  %v11210_v59 = vld [vmem:[#allocation6 + $0x280] sm:$0xf0] }
 0x2e5   :  { %v3980_v21 = vpop.f32.mrf.mxu3  ;;  %4920 = vmatpush.bf16.msra.mxu3 %v9589_v47  ;;  %v4057_v8 = vadd.f32 %v12874_v26, %v3188_v62  ;;  %v11159_v47 = vld [vmem:[#allocation6 + $0xe8] sm:$0xf0]  ;;  %v11192_v62 = vld [vmem:[#allocation6 + $0x1f0] sm:$0xf0] }
 0x2e6   :  { %v4110_v57 = vpop.f32.mrf.mxu2  ;;  %v11132_v21 = vld [vmem:[#allocation6 + $0x10] sm:$0xf0] }
 0x2e7   :  { %4934 = vmatpush.bf16.msrb.mxu0 %v9293_v39  ;;  %v12891_v61 = vpop.f32.mrf.mxu1  ;;  %v9221_v57 = vor.u32 %v11132_v21, %v9220_v9 }
 0x2eb   :  { %4935 = vmatpush.bf16.msrb.mxu0 %v9281_v16  ;;  %v9377_v16 = vor.u32 %v11171_v54, %v9376_v53  ;;  %v9448_v53 = vld [vmem:[#allocation6 + $0x1d0] sm:$0xf]  ;;  %v11189_v54 = vld [vmem:[#allocation6 + $0x1d8] sm:$0xf0] }
 0x2ec   :  { %v9449_v55 = vor.u32 %v11189_v54, %v9448_v53  ;;  %v9918_v53 = vld [vmem:[%s14734_s9 + $0x2c0] sm:$0xf0] }
 0x2ed   :  { %v4017_v40 = vpop.f32.mrf.mxu3 }
 0x2ee   :  { %v4018_v17 = vadd.f32 %v4017_v40, %v4005_v11  ;;  %v9352_v11 = vld [vmem:[#allocation6 + $0x110] sm:$0xf]  ;;  %v11201_v40 = vld [vmem:[#allocation6 + $0x238] sm:$0xf0] }
 0x2ef   :  { %v12895_v31 = vpop.f32.mrf.mxu2  ;;  %4936 = vmatpush.bf16.msrb.mxu0 %v9269_v6  ;;  %v4097_v23 = vpop.f32.mrf.mxu1  ;;  %v9553_v6 = vor.u32 %v11214_v3, %v9550_v4  ;;  %v9353_v45 = vor.u32 %v11165_v12, %v9352_v11  ;;  %v9497_v24 = vor.u32 %v11201_v40, %v9496_v15  ;;  %v9425_v3 = vor.u32 %v11183_v58, %v9424_v52  ;;  %v11180_v4 = vld [vmem:[#allocation6 + $0x190] sm:$0xf0]  ;;  %v11225_v11 = vld [vmem:[#allocation6 + $0x2f8] sm:$0xf0]  ;;  %v9580_v40 = vld [vmem:[#allocation6 + $0x2d8] sm:$0xf] }
 0x2f0   :  { %v4031_v25 = vadd.f32 %v12876_v51, %v4018_v17  ;;  %v11135_v51 = vld [vmem:[#allocation6 + $0x28] sm:$0xf0]  ;;  %v9788_v58 = vld [vmem:[%s14734_s9 + $0x180] sm:$0xf] }
 0x2f1   :  { %v9233_v41 = vor.u32 %v11135_v51, %v9232_v33  ;;  %v11211_v17 = vld [vmem:[#allocation6 + $0x28c] sm:$0xf]  ;;  %v11205_v33 = vld [vmem:[#allocation6 + $0x25c] sm:$0xf]  ;;  %v9514_v51 = vld [vmem:[#allocation6 + $0x264] sm:$0xf0] }
 0x2f2   :  { %v4044_v32 = vadd.f32 %v12878_v10, %v4031_v25  ;;  %4889 = vmatmul.bf16.vlgmr.msra.gmra.mxu0 %v12887_v37  ;;  %v9577_v10 = vor.u32 %v11220_v46, %v9574_v1  ;;  %v9340_v25 = vld [vmem:[#allocation6 + $0xf8] sm:$0xf]  ;;  %v9517_v43 = vor.u32 %v11205_v33, %v9514_v51  ;;  %v11156_v46 = vld [vmem:[#allocation6 + $0xd0] sm:$0xf0]  ;;  %v10046_v51 = vld [vmem:[%s14734_s9 + $0x3c0] sm:$0xf0] }
 0x2f3   :  { %4937 = vmatpush.bf16.msrb.mxu0 %v9257_v20  ;;  %v9538_v20 = vld [vmem:[#allocation6 + $0x294] sm:$0xf0] }
 0x2f4   :  { %v12900_v0 = vpack.c.bf16 %v4044_v32, %v4044_v32  ;;  %4921 = vmatpush.bf16.msra.mxu3 %v9577_v10  ;;  %v9541_v63 = vor.u32 %v11211_v17, %v9538_v20  ;;  %v9328_v32 = vld [vmem:[#allocation6 + $0xe0] sm:$0xf]  ;;  %v9460_v10 = vld [vmem:[#allocation6 + $0x1e8] sm:$0xf]  ;;  %v11222_v17 = vld [vmem:[#allocation6 + $0x2e0] sm:$0xf0] }
 0x2f5   :  { %v4019_v44 = vpop.f32.mrf.mxu3  ;;  %v9329_v42 = vor.u32 %v11159_v47, %v9328_v32  ;;  %v9461_v21 = vor.u32 %v11192_v62, %v9460_v10  ;;  %v9568_v20 = vld [vmem:[#allocation6 + $0x2c0] sm:$0xf]  ;;  %v11204_v32 = vld [vmem:[#allocation6 + $0x250] sm:$0xf0]  ;;  %v9982_v62 = vld [vmem:[%s14734_s9 + $0x340] sm:$0xf0] }
 0x2f6   :  { %4850 = vmatmul.bf16.vlgmr.msrb.gmra.mxu1 %v12900_v0  ;;  %v9316_v44 = vld [vmem:[#allocation6 + $0xc8] sm:$0xf] }
 0x2f7   :  { %v4162_v39 = vpop.f32.mrf.mxu2  ;;  %4938 = vmatpush.bf16.msrb.mxu0 %v9245_v13  ;;  %4946 = vmatpush.bf16.msrb.mxu1 %v9401_v38  ;;  %v9472_v13 = vld [vmem:[#allocation6 + $0x200] sm:$0xf]  ;;  %v11195_v38 = vld [vmem:[#allocation6 + $0x208] sm:$0xf0] }
 0x2f8   :  { %v12904_v35 = vpop.f32.mrf.mxu0  ;;  %4922 = vmatpush.bf16.msra.mxu3 %v9565_v60  ;;  %v9473_v1 = vor.u32 %v11195_v38, %v9472_v13  ;;  %v11202_v39 = vld [vmem:[#allocation6 + $0x244] sm:$0xf]  ;;  %v11346_v13 = vld [vmem:[%s14734_s9 + $0x3bc] sm:$0xf0] }
 0x2f9   :  { %v12906_v50 = vpop.f32.mrf.mxu1  ;;  %v11338_v38 = vld [vmem:[%s14734_s9 + $0x384] sm:$0xf] }
 0x2fb   :  { %4939 = vmatpush.bf16.msrb.mxu0 %v9233_v41  ;;  %4947 = vmatpush.bf16.msrb.mxu1 %v9389_v48  ;;  %v9502_v41 = vld [vmem:[#allocation6 + $0x24c] sm:$0xf0]  ;;  %v9317_v48 = vor.u32 %v11156_v46, %v9316_v44  ;;  %v9980_v44 = vld [vmem:[%s14734_s9 + $0x300] sm:$0xf] }
 0x2fc   :  { %4923 = vmatpush.bf16.msra.mxu3 %v9553_v6  ;;  %v9505_v9 = vor.u32 %v11202_v39, %v9502_v41  ;;  %v11330_v46 = vld [vmem:[%s14734_s9 + $0x33c] sm:$0xf0] }
 0x2fd   :  { %v4069_v29 = vpop.f32.mrf.mxu3  ;;  %v9981_v10 = vor.u32 %v11330_v46, %v9980_v44  ;;  %v9916_v41 = vld [vmem:[%s14734_s9 + $0x280] sm:$0xf]  ;;  %v11226_v46 = vld [vmem:[%s14734_s9 + $0x4] sm:$0xf] }
 0x2fe   :  { %v4070_v34 = vadd.f32 %v4069_v29, %v4057_v8 }
 0x2ff   :  { %4940 = vmatpush.bf16.msrb.mxu0 %v9221_v57  ;;  %4948 = vmatpush.bf16.msrb.mxu1 %v9377_v16  ;;  %v11186_v57 = vld [vmem:[#allocation6 + $0x1c0] sm:$0xf0]  ;;  %v3189_v16 = vperm.slane %v12858_v19, 3 }
 0x300   :  { %v4083_v2 = vadd.f32 %v12882_v18, %v4070_v34  ;;  %v4136_v7 = vpop.f32.mrf.mxu0  ;;  %v11162_v18 = vld [vmem:[#allocation6 + $0x100] sm:$0xf0]  ;;  %4924 = vmatpush.bf16.msra.mxu3 %v9541_v63  ;;  %v9437_v60 = vor.u32 %v11186_v57, %v9436_v56  ;;  %v9412_v34 = vld [vmem:[#allocation6 + $0x188] sm:$0xf]  ;;  %v9852_v56 = vld [vmem:[%s14734_s9 + $0x200] sm:$0xf] }
 0x301   :  { %v4149_v14 = vpop.f32.mrf.mxu1  ;;  %v9341_v30 = vor.u32 %v11162_v18, %v9340_v25  ;;  %v9413_v6 = vor.u32 %v11180_v4, %v9412_v34  ;;  %v9592_v7 = vld [vmem:[#allocation6 + $0x2f0] sm:$0xf]  ;;  %v11216_v25 = vld [vmem:[#allocation6 + $0x2b0] sm:$0xf0]  ;;  %v11298_v57 = vld [vmem:[%s14734_s9 + $0x23c] sm:$0xf0] }
 0x302   :  { %v4096_v26 = vadd.f32 %v12891_v61, %v4083_v2  ;;  %4941 = vmatmul.bf16.vlgmr.msrb.gmra.mxu0 %v12887_v37  ;;  %v9484_v61 = vld [vmem:[#allocation6 + $0x218] sm:$0xf]  ;;  %v11198_v37 = vld [vmem:[#allocation6 + $0x220] sm:$0xf0]  ;;  %v9593_v15 = vor.u32 %v11225_v11, %v9592_v7  ;;  %v9544_v18 = vld [vmem:[#allocation6 + $0x290] sm:$0xf] }
 0x303   :  { %4949 = vmatpush.bf16.msrb.mxu1 %v9365_v5  ;;  %v11474_v4 = vld [vmem:[%s14734_s9 + $0x7bc] sm:$0xf0]  ;;  %v10558_v7 = vld [vmem:[%s14734_s9 + $0x7c0] sm:$0xf0] }
 0x304   :  { %v4109_v22 = vadd.f32 %v12885_v36, %v4096_v26  ;;  %v9485_v36 = vor.u32 %v11198_v37, %v9484_v61  ;;  %4925 = vmatpush.bf16.msra.mxu3 %v9529_v28  ;;  %v9520_v61 = vld [vmem:[#allocation6 + $0x260] sm:$0xf]  ;;  %v11207_v37 = vld [vmem:[#allocation6 + $0x268] sm:$0xf0] }
 0x305   :  { %v4071_v23 = vpop.f32.mrf.mxu3  ;;  %v9521_v28 = vor.u32 %v11207_v37, %v9520_v61  ;;  %v9724_v11 = vld [vmem:[%s14734_s9 + $0x100] sm:$0xf]  ;;  %v9662_v61 = vld [vmem:[%s14734_s9 + $0xc0] sm:$0xf0] }
 0x306   :  { %v4179_v49 = vpack.c.bf16 %v4109_v22, %v4109_v22  ;;  %4902 = vmatmul.bf16.vlgmr.msra.gmra.mxu1 %v12900_v0  ;;  %v11213_v23 = vld [vmem:[#allocation6 + $0x298] sm:$0xf0] }
 0x307   :  { %4950 = vmatpush.bf16.msrb.mxu1 %v9353_v45  ;;  %v11219_v45 = vld [vmem:[#allocation6 + $0x2c8] sm:$0xf0] }
 0x308   :  { %4863 = vmatmul.bf16.vlgmr.msrb.gmra.mxu2 %v4179_v49  ;;  %4926 = vmatpush.bf16.msra.mxu3 %v9517_v43  ;;  %v9569_v22 = vor.u32 %v11219_v45, %v9568_v20  ;;  %v11258_v20 = vld [vmem:[%s14734_s9 + $0x104] sm:$0xf] }
 0x309   :  { %4959 = vmatpush.bf16.msrb.mxu2 %v9497_v24  ;;  %v9545_v24 = vor.u32 %v11213_v23, %v9544_v18  ;;  %v9726_v45 = vld [vmem:[%s14734_s9 + $0x140] sm:$0xf0]  ;;  %v9660_v18 = vld [vmem:[%s14734_s9 + $0x80] sm:$0xf] }
 0x30a   :  { %v11250_v23 = vld [vmem:[%s14734_s9 + $0xbc] sm:$0xf0] }
 0x30b   :  { %4951 = vmatpush.bf16.msrb.mxu1 %v9341_v30  ;;  %v9508_v30 = vld [vmem:[#allocation6 + $0x248] sm:$0xf] }
 0x30c   :  { %4927 = vmatpush.bf16.msra.mxu3 %v9505_v9  ;;  %v9509_v47 = vor.u32 %v11204_v32, %v9508_v30  ;;  %v11306_v9 = vld [vmem:[%s14734_s9 + $0x284] sm:$0xf] }
 0x30d   :  { %4960 = vmatpush.bf16.msrb.mxu2 %v9485_v36  ;;  %v10044_v36 = vld [vmem:[%s14734_s9 + $0x380] sm:$0xf]  ;;  %v9921_v54 = vor.u32 %v11306_v9, %v9918_v53  ;;  %v11434_v30 = vld [vmem:[%s14734_s9 + $0x684] sm:$0xf]  ;;  %v10052_v9 = vld [vmem:[%s14734_s9 + $0x388] sm:$0xf] }
 0x30e   :  { %v10045_v33 = vor.u32 %v11346_v13, %v10044_v36  ;;  %v10430_v32 = vld [vmem:[%s14734_s9 + $0x6c0] sm:$0xf0]  ;;  %v11339_v53 = vld [vmem:[%s14734_s9 + $0x38c] sm:$0xf] }
 0x30f   :  { %4952 = vmatpush.bf16.msrb.mxu1 %v9329_v42  ;;  %v10049_v42 = vor.u32 %v11338_v38, %v10046_v51  ;;  %v10433_v13 = vor.u32 %v11434_v30, %v10430_v32  ;;  %v11234_v38 = vld [vmem:[%s14734_s9 + $0x3c] sm:$0xf0] }
 0x310   :  { %6562 = vmatpush.bf16.msra.mxu0 %v10045_v33  ;;  %v10364_v33 = vld [vmem:[%s14734_s9 + $0x600] sm:$0xf] }
 0x311   :  { %4961 = vmatpush.bf16.msrb.mxu2 %v9473_v1  ;;  %v11322_v1 = vld [vmem:[%s14734_s9 + $0x304] sm:$0xf]  ;;  %v11426_v51 = vld [vmem:[%s14734_s9 + $0x63c] sm:$0xf0] }
 0x312   :  { %v9985_v39 = vor.u32 %v11322_v1, %v9982_v62  ;;  %v10365_v44 = vor.u32 %v11426_v51, %v10364_v33  ;;  %v9598_v1 = vld [vmem:[%s14734_s9 + $0x40] sm:$0xf0]  ;;  %v10108_v32 = vld [vmem:[%s14734_s9 + $0x400] sm:$0xf] }
 0x313   :  { %4953 = vmatpush.bf16.msrb.mxu1 %v9317_v48  ;;  %v11314_v48 = vld [vmem:[%s14734_s9 + $0x2bc] sm:$0xf0]  ;;  %v9601_v62 = vor.u32 %v11226_v46, %v9598_v1  ;;  %v11283_v46 = vld [vmem:[%s14734_s9 + $0x1c4] sm:$0xf0] }
 0x314   :  { %6563 = vmatpush.bf16.msra.mxu0 %v9981_v10  ;;  %v11418_v10 = vld [vmem:[%s14734_s9 + $0x604] sm:$0xf]  ;;  %v10564_v1 = vld [vmem:[%s14734_s9 + $0x788] sm:$0xf] }
 0x315   :  { %4962 = vmatpush.bf16.msrb.mxu2 %v9461_v21  ;;  %v9917_v21 = vor.u32 %v11314_v48, %v9916_v41 }
 0x316   :  { %4954 = vmatmul.bf16.vlgmr.msrb.gmra.mxu1 %v12900_v0 }
 0x318   :  { %4915 = vmatmul.bf16.vlgmr.msra.gmra.mxu2 %v4179_v49  ;;  %6564 = vmatpush.bf16.msra.mxu0 %v9917_v21  ;;  %v11347_v21 = vld [vmem:[%s14734_s9 + $0x3c4] sm:$0xf0] }
 0x319   :  { %4963 = vmatpush.bf16.msrb.mxu2 %v9449_v55 }
 0x31d   :  { %v4121_v8 = vpop.f32.mrf.mxu3  ;;  %4964 = vmatpush.bf16.msrb.mxu2 %v9437_v60  ;;  %v9853_v60 = vor.u32 %v11298_v57, %v9852_v56  ;;  %v10300_v56 = vld [vmem:[%s14734_s9 + $0x580] sm:$0xf] }
 0x31e   :  { %v4122_v29 = vadd.f32 %v4121_v8, %v3189_v16  ;;  %v11290_v16 = vld [vmem:[%s14734_s9 + $0x204] sm:$0xf]  ;;  %v11410_v57 = vld [vmem:[%s14734_s9 + $0x5bc] sm:$0xf0] }
 0x31f   :  { %v9854_v8 = vld [vmem:[%s14734_s9 + $0x240] sm:$0xf0]  ;;  %6565 = vmatpush.bf16.msra.mxu0 %v9853_v60  ;;  %v10301_v60 = vor.u32 %v11410_v57, %v10300_v56  ;;  %v11267_v56 = vld [vmem:[%s14734_s9 + $0x144] sm:$0xf0] }
 0x320   :  { %v4135_v5 = vadd.f32 %v12904_v35, %v4122_v29  ;;  %v9581_v35 = vor.u32 %v11222_v17, %v9580_v40  ;;  %v9857_v52 = vor.u32 %v11290_v16, %v9854_v8  ;;  %v11282_v29 = vld [vmem:[%s14734_s9 + $0x1bc] sm:$0xf0]  ;;  %v11402_v8 = vld [vmem:[%s14734_s9 + $0x584] sm:$0xf]  ;;  %v10500_v57 = vld [vmem:[%s14734_s9 + $0x708] sm:$0xf] }
 0x321   :  { %4965 = vmatpush.bf16.msrb.mxu2 %v9425_v3  ;;  %v10556_v3 = vld [vmem:[%s14734_s9 + $0x780] sm:$0xf]  ;;  %v9789_v34 = vor.u32 %v11282_v29, %v9788_v58  ;;  %v9988_v58 = vld [vmem:[%s14734_s9 + $0x308] sm:$0xf] }
 0x322   :  { %v4148_v2 = vadd.f32 %v12906_v50, %v4135_v5  ;;  %v9556_v50 = vld [vmem:[#allocation6 + $0x2a8] sm:$0xf]  ;;  %v11274_v5 = vld [vmem:[%s14734_s9 + $0x184] sm:$0xf]  ;;  %v11458_v40 = vld [vmem:[%s14734_s9 + $0x73c] sm:$0xf0] }
 0x323   :  { %6566 = vmatpush.bf16.msra.mxu0 %v9789_v34  ;;  %v11323_v34 = vld [vmem:[%s14734_s9 + $0x30c] sm:$0xf] }
 0x324   :  { %v4161_v19 = vadd.f32 %v12895_v31, %v4148_v2  ;;  %v9557_v31 = vor.u32 %v11216_v25, %v9556_v50  ;;  %v10494_v50 = vld [vmem:[%s14734_s9 + $0x740] sm:$0xf0] }
 0x325   :  { %v4123_v0 = vpop.f32.mrf.mxu3  ;;  %4966 = vmatpush.bf16.msrb.mxu2 %v9413_v6  ;;  %v9790_v6 = vld [vmem:[%s14734_s9 + $0x1c0] sm:$0xf0] }
 0x326   :  { %v10557_v0 = vor.u32 %v11474_v4, %v10556_v3  ;;  %v9793_v2 = vor.u32 %v11274_v5, %v9790_v6  ;;  %v11331_v3 = vld [vmem:[%s14734_s9 + $0x344] sm:$0xf0]  ;;  %v9990_v4 = vld [vmem:[%s14734_s9 + $0x348] sm:$0xf0] }
 0x327   :  { %v9989_v6 = vor.u32 %v11331_v3, %v9988_v58  ;;  %v9734_v58 = vld [vmem:[%s14734_s9 + $0x148] sm:$0xf0] }
 0x328   :  { %4967 = vmatmul.bf16.vlgmr.msrb.gmra.mxu2 %v4179_v49  ;;  %v9533_v49 = vor.u32 %v11210_v59, %v9532_v27  ;;  %6575 = vmatpush.bf16.msra.mxu1 %v10557_v0  ;;  %v9661_v27 = vor.u32 %v11250_v23, %v9660_v18  ;;  %v11442_v59 = vld [vmem:[%s14734_s9 + $0x6bc] sm:$0xf0]  ;;  %v9993_v0 = vor.u32 %v11323_v34, %v9990_v4  ;;  %v11370_v18 = vld [vmem:[%s14734_s9 + $0x484] sm:$0xf]  ;;  %v10502_v34 = vld [vmem:[%s14734_s9 + $0x748] sm:$0xf0] }
 0x329   :  { %6588 = vmatpush.bf16.msra.mxu2 %v10049_v42  ;;  %v10174_v23 = vld [vmem:[%s14734_s9 + $0x4c0] sm:$0xf0] }
 0x32d   :  { %v4173_v12 = vpop.f32.mrf.mxu3  ;;  %6589 = vmatpush.bf16.msra.mxu2 %v9985_v39  ;;  %v10366_v39 = vld [vmem:[%s14734_s9 + $0x640] sm:$0xf0] }
 0x32e   :  { %v4174_v14 = vadd.f32 %v4173_v12, %v4161_v19  ;;  %v11466_v19 = vld [vmem:[%s14734_s9 + $0x784] sm:$0xf]  ;;  %v10369_v41 = vor.u32 %v11418_v10, %v10366_v39  ;;  %v11275_v39 = vld [vmem:[%s14734_s9 + $0x18c] sm:$0xf] }
 0x330   :  { %v4180_v26 = vpack.c.bf16 %v4174_v14, %v4174_v14  ;;  %v10561_v14 = vor.u32 %v11466_v19, %v10558_v7  ;;  %v11394_v19 = vld [vmem:[%s14734_s9 + $0x53c] sm:$0xf0]  ;;  %v11386_v7 = vld [vmem:[%s14734_s9 + $0x504] sm:$0xf] }
 0x331   :  { %6590 = vmatpush.bf16.msra.mxu2 %v9921_v54  ;;  %v10053_v54 = vor.u32 %v11347_v21, %v10052_v9  ;;  %v11467_v21 = vld [vmem:[%s14734_s9 + $0x78c] sm:$0xf] }
 0x332   :  { %4876 = vmatmul.bf16.vlgmr.msrb.gmra.mxu3 %v4180_v26 }
 0x333   :  { %4972 = vmatpush.bf16.msrb.mxu3 %v9593_v15  ;;  %v11266_v15 = vld [vmem:[%s14734_s9 + $0x13c] sm:$0xf0] }
 0x334   :  { %v9725_v17 = vor.u32 %v11266_v15, %v9724_v11 }
 0x335   :  { %v4175_v63 = vpop.f32.mrf.mxu3  ;;  %6591 = vmatpush.bf16.msra.mxu2 %v9857_v52  ;;  %v10302_v52 = vld [vmem:[%s14734_s9 + $0x5c0] sm:$0xf0] }
 0x336   :  { %v11450_v63 = vld [vmem:[%s14734_s9 + $0x704] sm:$0xf]  ;;  %6567 = vmatpush.bf16.msra.mxu0 %v9725_v17  ;;  %v10305_v29 = vor.u32 %v11402_v8, %v10302_v52  ;;  %v11315_v17 = vld [vmem:[%s14734_s9 + $0x2c4] sm:$0xf0]  ;;  %v11259_v52 = vld [vmem:[%s14734_s9 + $0x10c] sm:$0xf] }
 0x337   :  { %4973 = vmatpush.bf16.msrb.mxu3 %v9581_v35  ;;  %v10497_v25 = vor.u32 %v11450_v63, %v10494_v50  ;;  %v10172_v63 = vld [vmem:[%s14734_s9 + $0x480] sm:$0xf]  ;;  %v9737_v3 = vor.u32 %v11259_v52, %v9734_v58  ;;  %v10118_v52 = vld [vmem:[%s14734_s9 + $0x448] sm:$0xf0] }
 0x339   :  { %6592 = vmatpush.bf16.msra.mxu2 %v9793_v2  ;;  %v10236_v2 = vld [vmem:[%s14734_s9 + $0x500] sm:$0xf] }
 0x33a   :  { %6568 = vmatpush.bf16.msra.mxu0 %v9661_v27  ;;  %v10237_v11 = vor.u32 %v11394_v19, %v10236_v2  ;;  %v10177_v27 = vor.u32 %v11370_v18, %v10174_v23  ;;  %v9668_v2 = vld [vmem:[%s14734_s9 + $0x88] sm:$0xf] }
 0x33b   :  { %4974 = vmatpush.bf16.msrb.mxu3 %v9569_v22  ;;  %v9729_v22 = vor.u32 %v11258_v20, %v9726_v45  ;;  %v9926_v45 = vld [vmem:[%s14734_s9 + $0x2c8] sm:$0xf0]  ;;  %v11251_v19 = vld [vmem:[%s14734_s9 + $0xc4] sm:$0xf0] }
 0x33c   :  { %v11427_v23 = vld [vmem:[%s14734_s9 + $0x644] sm:$0xf0] }
 0x33d   :  { %6593 = vmatpush.bf16.msra.mxu2 %v9729_v22  ;;  %v11378_v22 = vld [vmem:[%s14734_s9 + $0x4bc] sm:$0xf0] }
 0x33f   :  { %4975 = vmatpush.bf16.msrb.mxu3 %v9557_v31 }
 0x342   :  { %4928 = vmatmul.bf16.vlgmr.msra.gmra.mxu3 %v4180_v26 }
 0x343   :  { %4976 = vmatpush.bf16.msrb.mxu3 %v9545_v24  ;;  %v10428_v24 = vld [vmem:[%s14734_s9 + $0x680] sm:$0xf] }
 0x344   :  { %v10429_v37 = vor.u32 %v11442_v59, %v10428_v24  ;;  %v9860_v24 = vld [vmem:[%s14734_s9 + $0x208] sm:$0xf] }
 0x345   :  { %v11299_v59 = vld [vmem:[%s14734_s9 + $0x244] sm:$0xf0] }
 0x347   :  { %4977 = vmatpush.bf16.msrb.mxu3 %v9533_v49  ;;  %v11242_v49 = vld [vmem:[%s14734_s9 + $0x84] sm:$0xf] }
 0x34b   :  { %4978 = vmatpush.bf16.msrb.mxu3 %v9521_v28  ;;  %v9665_v28 = vor.u32 %v11242_v49, %v9662_v61  ;;  %v11291_v49 = vld [vmem:[%s14734_s9 + $0x20c] sm:$0xf] }
 0x34c   :  { %v9862_v61 = vld [vmem:[%s14734_s9 + $0x248] sm:$0xf0] }
 0x34d   :  { %6594 = vmatpush.bf16.msra.mxu2 %v9665_v28  ;;  %v9861_v28 = vor.u32 %v11299_v59, %v9860_v24  ;;  %v9865_v30 = vor.u32 %v11291_v49, %v9862_v61  ;;  %v11227_v24 = vld [vmem:[%s14734_s9 + $0xc] sm:$0xf] }
 0x34e   :  { %v11419_v61 = vld [vmem:[%s14734_s9 + $0x60c] sm:$0xf] }
 0x34f   :  { %4979 = vmatpush.bf16.msrb.mxu3 %v9509_v47  ;;  %v9596_v47 = vld [vmem:[%s14734_s9] sm:$0xf] }
 0x350   :  { %v9597_v42 = vor.u32 %v11234_v38, %v9596_v47  ;;  %v11362_v47 = vld [vmem:[%s14734_s9 + $0x43c] sm:$0xf0]  ;;  %v10110_v38 = vld [vmem:[%s14734_s9 + $0x440] sm:$0xf0] }
 0x351   :  { %6595 = vmatpush.bf16.msra.mxu2 %v9601_v62  ;;  %v11475_v62 = vld [vmem:[%s14734_s9 + $0x7c4] sm:$0xf0] }
 0x352   :  { %4980 = vmatmul.bf16.vlgmr.msrb.gmra.mxu3 %v4180_v26  ;;  %v10492_v26 = vld [vmem:[%s14734_s9 + $0x700] sm:$0xf]  ;;  %6569 = vmatpush.bf16.msra.mxu0 %v9597_v42 }
 0x353   :  { %v10493_v35 = vor.u32 %v11458_v40, %v10492_v26  ;;  %6601 = vmatpush.bf16.msra.mxu3 %v10561_v14  ;;  %v10238_v14 = vld [vmem:[%s14734_s9 + $0x540] sm:$0xf0]  ;;  %v9924_v40 = vld [vmem:[%s14734_s9 + $0x288] sm:$0xf] }
 0x354   :  { %v10241_v15 = vor.u32 %v11386_v7, %v10238_v14  ;;  %v9925_v20 = vor.u32 %v11315_v17, %v9924_v40  ;;  %v10436_v7 = vld [vmem:[%s14734_s9 + $0x688] sm:$0xf]  ;;  %v9670_v40 = vld [vmem:[%s14734_s9 + $0xc8] sm:$0xf0] }
 0x355   :  { %6576 = vmatpush.bf16.msra.mxu1 %v10493_v35  ;;  %v11307_v35 = vld [vmem:[%s14734_s9 + $0x28c] sm:$0xf]  ;;  %v11443_v14 = vld [vmem:[%s14734_s9 + $0x6c4] sm:$0xf0] }
 0x356   :  { %6614 = vmatpush.bf16.msrb.mxu0 %v10053_v54  ;;  %v9929_v50 = vor.u32 %v11307_v35, %v9926_v45  ;;  %v9732_v54 = vld [vmem:[%s14734_s9 + $0x108] sm:$0xf]  ;;  %v10437_v17 = vor.u32 %v11443_v14, %v10436_v7  ;;  %v10438_v45 = vld [vmem:[%s14734_s9 + $0x6c8] sm:$0xf0]  ;;  %v11348_v14 = vld [vmem:[%s14734_s9 + $0x3cc] sm:$0xf0] }
 0x357   :  { %6602 = vmatpush.bf16.msra.mxu3 %v10497_v25  ;;  %v10173_v25 = vor.u32 %v11378_v22, %v10172_v63  ;;  %v9604_v22 = vld [vmem:[%s14734_s9 + $0x8] sm:$0xf] }
 0x359   :  { %6577 = vmatpush.bf16.msra.mxu1 %v10429_v37 }
 0x35a   :  { %6615 = vmatpush.bf16.msrb.mxu0 %v9989_v6 }
 0x35b   :  { %6603 = vmatpush.bf16.msra.mxu3 %v10433_v13  ;;  %v10109_v13 = vor.u32 %v11362_v47, %v10108_v32  ;;  %v10308_v47 = vld [vmem:[%s14734_s9 + $0x588] sm:$0xf] }
 0x35d   :  { %6578 = vmatpush.bf16.msra.mxu1 %v10365_v44  ;;  %v9796_v44 = vld [vmem:[%s14734_s9 + $0x188] sm:$0xf] }
 0x35e   :  { %6616 = vmatpush.bf16.msrb.mxu0 %v9925_v20  ;;  %v9797_v10 = vor.u32 %v11283_v46, %v9796_v44  ;;  %v11435_v20 = vld [vmem:[%s14734_s9 + $0x68c] sm:$0xf]  ;;  %v10244_v44 = vld [vmem:[%s14734_s9 + $0x508] sm:$0xf] }
 0x35f   :  { %v12931_v43 = vpop.f32.mrf.mxu0  ;;  %6604 = vmatpush.bf16.msra.mxu3 %v10369_v41  ;;  %v9798_v41 = vld [vmem:[%s14734_s9 + $0x1c8] sm:$0xf0]  ;;  %v10441_v63 = vor.u32 %v11435_v20, %v10438_v45  ;;  %v11395_v46 = vld [vmem:[%s14734_s9 + $0x544] sm:$0xf0]  ;;  %v11332_v20 = vld [vmem:[%s14734_s9 + $0x34c] sm:$0xf0] }
 0x360   :  { %v9801_v9 = vor.u32 %v11275_v39, %v9798_v41  ;;  %v11324_v45 = vld [vmem:[%s14734_s9 + $0x314] sm:$0xf] }
 0x361   :  { %6579 = vmatpush.bf16.msra.mxu1 %v10301_v60  ;;  %v9733_v60 = vor.u32 %v11267_v56, %v9732_v54  ;;  %v10182_v54 = vld [vmem:[%s14734_s9 + $0x4c8] sm:$0xf0]  ;;  %v13310_v56 = vld [vmem:[%s14733_s8] sm:$0x7] }
 0x362   :  { %6617 = vmatpush.bf16.msrb.mxu0 %v9861_v28  ;;  %v4311_v58 = vperm.slane %v13310_v56, 0 }
 0x363   :  { %6605 = vmatpush.bf16.msra.mxu3 %v10305_v29  ;;  %v11451_v29 = vld [vmem:[%s14734_s9 + $0x70c] sm:$0xf] }
 0x364   :  { %v10505_v4 = vor.u32 %v11451_v29, %v10502_v34  ;;  %v4839_v34 = vadd.f32 %v12931_v43, %v4311_v58  ;;  %v10062_v43 = vld [vmem:[%s14734_s9 + $0x3d0] sm:$0xf0] }
 0x365   :  { %6580 = vmatpush.bf16.msra.mxu1 %v10237_v11  ;;  %v9669_v11 = vor.u32 %v11251_v19, %v9668_v2  ;;  %v10060_v19 = vld [vmem:[%s14734_s9 + $0x390] sm:$0xf]  ;;  %v11260_v58 = vld [vmem:[%s14734_s9 + $0x114] sm:$0xf] }
 0x366   :  { %6618 = vmatpush.bf16.msrb.mxu0 %v9797_v10  ;;  %v10245_v10 = vor.u32 %v11395_v46, %v10244_v44  ;;  %v9804_v46 = vld [vmem:[%s14734_s9 + $0x190] sm:$0xf] }
 0x367   :  { %v4840_v55 = vpop.f32.mrf.mxu0  ;;  %6606 = vmatpush.bf16.msra.mxu3 %v10241_v15  ;;  %v11243_v15 = vld [vmem:[%s14734_s9 + $0x8c] sm:$0xf] }
 0x368   :  { %v10054_v55 = vld [vmem:[%s14734_s9 + $0x3c8] sm:$0xf0]  ;;  %v9673_v35 = vor.u32 %v11243_v15, %v9670_v40  ;;  %v11340_v15 = vld [vmem:[%s14734_s9 + $0x394] sm:$0xf] }
 0x369   :  { %v10057_v16 = vor.u32 %v11339_v53, %v10054_v55  ;;  %6581 = vmatpush.bf16.msra.mxu1 %v10173_v25  ;;  %v10566_v53 = vld [vmem:[%s14734_s9 + $0x7c8] sm:$0xf0]  ;;  %v10372_v25 = vld [vmem:[%s14734_s9 + $0x608] sm:$0xf]  ;;  %v10065_v40 = vor.u32 %v11340_v15, %v10062_v43  ;;  %v10444_v43 = vld [vmem:[%s14734_s9 + $0x690] sm:$0xf] }
 0x36a   :  { %v10569_v55 = vor.u32 %v11467_v21, %v10566_v53  ;;  %6619 = vmatpush.bf16.msrb.mxu0 %v9733_v60  ;;  %v10373_v59 = vor.u32 %v11427_v23, %v10372_v25  ;;  %v11371_v21 = vld [vmem:[%s14734_s9 + $0x48c] sm:$0xf]  ;;  %v9932_v23 = vld [vmem:[%s14734_s9 + $0x290] sm:$0xf] }
 0x36b   :  { %6640 = vmatpush.bf16.msrb.mxu2 %v10057_v16  ;;  %6607 = vmatpush.bf16.msra.mxu3 %v10177_v27  ;;  %v11459_v16 = vld [vmem:[%s14734_s9 + $0x744] sm:$0xf0]  ;;  %v9606_v27 = vld [vmem:[%s14734_s9 + $0x48] sm:$0xf0] }
 0x36c   :  { %v10501_v8 = vor.u32 %v11459_v16, %v10500_v57  ;;  %v9609_v49 = vor.u32 %v11227_v24, %v9606_v27  ;;  %v10116_v57 = vld [vmem:[%s14734_s9 + $0x408] sm:$0xf]  ;;  %v11355_v60 = vld [vmem:[%s14734_s9 + $0x40c] sm:$0xf]  ;;  %v11316_v24 = vld [vmem:[%s14734_s9 + $0x2cc] sm:$0xf0] }
 0x36d   :  { %6582 = vmatpush.bf16.msra.mxu1 %v10109_v13  ;;  %v11403_v13 = vld [vmem:[%s14734_s9 + $0x58c] sm:$0xf]  ;;  %v11363_v16 = vld [vmem:[%s14734_s9 + $0x444] sm:$0xf0]  ;;  %v10121_v29 = vor.u32 %v11355_v60, %v10118_v52  ;;  %v11308_v27 = vld [vmem:[%s14734_s9 + $0x294] sm:$0xf] }
 0x36e   :  { %6620 = vmatpush.bf16.msrb.mxu0 %v9669_v11  ;;  %v10508_v52 = vld [vmem:[%s14734_s9 + $0x710] sm:$0xf] }
 0x36f   :  { %v12996_v12 = vpop.f32.mrf.mxu0  ;;  %6641 = vmatpush.bf16.msrb.mxu2 %v9993_v0 }
 0x373   :  { %v13019_v31 = vpop.f32.mrf.mxu1  ;;  %6642 = vmatpush.bf16.msrb.mxu2 %v9929_v50  ;;  %v11235_v50 = vld [vmem:[%s14734_s9 + $0x44] sm:$0xf0] }
 0x374   :  { %v9605_v18 = vor.u32 %v11235_v50, %v9604_v22  ;;  %v4312_v22 = vperm.slane %v13310_v56, 1 }
 0x376   :  { %6621 = vmatpush.bf16.msrb.mxu0 %v9605_v18 }
 0x377   :  { %v4892_v36 = vpop.f32.mrf.mxu0  ;;  %6643 = vmatpush.bf16.msrb.mxu2 %v9865_v30 }
 0x378   :  { %v11354_v36 = vld [vmem:[%s14734_s9 + $0x404] sm:$0xf] }
 0x379   :  { %v10113_v33 = vor.u32 %v11354_v36, %v10110_v38  ;;  %v11411_v36 = vld [vmem:[%s14734_s9 + $0x5c4] sm:$0xf0] }
 0x37a   :  { %v10309_v38 = vor.u32 %v11411_v36, %v10308_v47  ;;  %v11300_v47 = vld [vmem:[%s14734_s9 + $0x24c] sm:$0xf0]  ;;  %v11292_v36 = vld [vmem:[%s14734_s9 + $0x214] sm:$0xf] }
 0x37b   :  { %v4853_v48 = vpop.f32.mrf.mxu1  ;;  %6608 = vmatpush.bf16.msra.mxu3 %v10113_v33  ;;  %6644 = vmatpush.bf16.msrb.mxu2 %v9801_v9  ;;  %v10310_v33 = vld [vmem:[%s14734_s9 + $0x5c8] sm:$0xf0]  ;;  %v11379_v9 = vld [vmem:[%s14734_s9 + $0x4c4] sm:$0xf0] }
 0x37c   :  { %v10565_v48 = vor.u32 %v11475_v62, %v10564_v1  ;;  %v11387_v1 = vld [vmem:[%s14734_s9 + $0x50c] sm:$0xf] }
 0x37d   :  { %v10246_v62 = vld [vmem:[%s14734_s9 + $0x548] sm:$0xf0] }
 0x37e   :  { %6627 = vmatpush.bf16.msrb.mxu1 %v10565_v48  ;;  %v10249_v39 = vor.u32 %v11387_v1, %v10246_v62  ;;  %v10180_v48 = vld [vmem:[%s14734_s9 + $0x488] sm:$0xf]  ;;  %v11284_v1 = vld [vmem:[%s14734_s9 + $0x1cc] sm:$0xf0]  ;;  %v11276_v62 = vld [vmem:[%s14734_s9 + $0x194] sm:$0xf] }
 0x37f   :  { %v13105_v5 = vpop.f32.mrf.mxu0  ;;  %6653 = vmatpush.bf16.msrb.mxu3 %v10569_v55  ;;  %6645 = vmatpush.bf16.msrb.mxu2 %v9737_v3  ;;  %v10181_v53 = vor.u32 %v11379_v9, %v10180_v48  ;;  %v10185_v55 = vor.u32 %v11371_v21, %v10182_v54  ;;  %v11468_v48 = vld [vmem:[%s14734_s9 + $0x794] sm:$0xf]  ;;  %v4313_v21 = vperm.slane %v13310_v56, 2  ;;  %v9805_v54 = vor.u32 %v11284_v1, %v9804_v46  ;;  %v11460_v56 = vld [vmem:[%s14734_s9 + $0x74c] sm:$0xf0] }
 0x380   :  { %v10574_v9 = vld [vmem:[%s14734_s9 + $0x7d0] sm:$0xf0] }
 0x382   :  { %6628 = vmatpush.bf16.msrb.mxu1 %v10501_v8  ;;  %v10117_v8 = vor.u32 %v11363_v16, %v10116_v57  ;;  %v9740_v57 = vld [vmem:[%s14734_s9 + $0x110] sm:$0xf] }
 0x383   :  { %v13119_v26 = vpop.f32.mrf.mxu1  ;;  %6654 = vmatpush.bf16.msrb.mxu3 %v10505_v4  ;;  %6646 = vmatpush.bf16.msrb.mxu2 %v9673_v35  ;;  %v4852_v4 = vadd.f32 %v13019_v31, %v4839_v34  ;;  %v11268_v16 = vld [vmem:[%s14734_s9 + $0x14c] sm:$0xf0]  ;;  %v11452_v34 = vld [vmem:[%s14734_s9 + $0x714] sm:$0xf] }
 0x386   :  { %6629 = vmatpush.bf16.msrb.mxu1 %v10437_v17  ;;  %v9996_v17 = vld [vmem:[%s14734_s9 + $0x310] sm:$0xf] }
 0x387   :  { %v4944_v37 = vpop.f32.mrf.mxu0  ;;  %6655 = vmatpush.bf16.msrb.mxu3 %v10441_v63  ;;  %6647 = vmatpush.bf16.msrb.mxu2 %v9609_v49  ;;  %v9998_v63 = vld [vmem:[%s14734_s9 + $0x350] sm:$0xf0]  ;;  %v9997_v25 = vor.u32 %v11332_v20, %v9996_v17  ;;  %v4891_v49 = vadd.f32 %v12996_v12, %v4312_v22 }
 0x388   :  { %v10374_v37 = vld [vmem:[%s14734_s9 + $0x648] sm:$0xf0]  ;;  %v10001_v18 = vor.u32 %v11324_v45, %v9998_v63  ;;  %v9870_v12 = vld [vmem:[%s14734_s9 + $0x250] sm:$0xf0] }
 0x389   :  { %v10377_v28 = vor.u32 %v11419_v61, %v10374_v37  ;;  %v9933_v61 = vor.u32 %v11316_v24, %v9932_v23  ;;  %v9678_v17 = vld [vmem:[%s14734_s9 + $0xd0] sm:$0xf0]  ;;  %v11428_v24 = vld [vmem:[%s14734_s9 + $0x64c] sm:$0xf0] }
 0x38a   :  { %6630 = vmatpush.bf16.msrb.mxu1 %v10373_v59  ;;  %v9934_v59 = vld [vmem:[%s14734_s9 + $0x2d0] sm:$0xf0] }
 0x38b   :  { %v13169_v51 = vpop.f32.mrf.mxu2  ;;  %v4905_v42 = vpop.f32.mrf.mxu1  ;;  %6656 = vmatpush.bf16.msrb.mxu3 %v10377_v28  ;;  %v9937_v37 = vor.u32 %v11308_v27, %v9934_v59  ;;  %v9868_v28 = vld [vmem:[%s14734_s9 + $0x210] sm:$0xf]  ;;  %v11436_v20 = vld [vmem:[%s14734_s9 + $0x694] sm:$0xf] }
 0x38c   :  { %v10313_v42 = vor.u32 %v11403_v13, %v10310_v33  ;;  %v11612_v13 = vmov 0   ;;  %v9869_v33 = vor.u32 %v11300_v47, %v9868_v28  ;;  %v10446_v45 = vld [vmem:[%s14734_s9 + $0x6d0] sm:$0xf0]  ;;  %v10068_v28 = vld [vmem:[%s14734_s9 + $0x398] sm:$0xf] }
 0x38d   :  { %11490 = vset.pattern.permute.xlu1 %v11612_v13  ;;  %11491 = vset.pattern.permute.xlu0 %v11612_v13  ;;  %v11228_v27 = vld [vmem:[%s14734_s9 + $0x14] sm:$0xf]  ;;  %v11349_v47 = vld [vmem:[%s14734_s9 + $0x3d4] sm:$0xf0] }
 0x38e   :  { %6631 = vmatpush.bf16.msrb.mxu1 %v10309_v38  ;;  %v9614_v59 = vld [vmem:[%s14734_s9 + $0x50] sm:$0xf0]  ;;  %v10069_v46 = vor.u32 %v11349_v47, %v10068_v28  ;;  %v10582_v28 = vld [vmem:[%s14734_s9 + $0x7d8] sm:$0xf0] }
 0x38f   :  { %6657 = vmatpush.bf16.msrb.mxu3 %v10313_v42  ;;  %v9873_v42 = vor.u32 %v11292_v36, %v9870_v12  ;;  %v10070_v36 = vld [vmem:[%s14734_s9 + $0x3d8] sm:$0xf0] }
 0x392   :  { %6632 = vmatpush.bf16.msrb.mxu1 %v10245_v10  ;;  %v10572_v10 = vld [vmem:[%s14734_s9 + $0x790] sm:$0xf] }
 0x393   :  { %v4866_v6 = vpop.f32.mrf.mxu2  ;;  %v13219_v0 = vpop.f32.mrf.mxu1  ;;  %6658 = vmatpush.bf16.msrb.mxu3 %v10249_v39  ;;  %v9806_v39 = vld [vmem:[%s14734_s9 + $0x1d0] sm:$0xf0] }
 0x394   :  { %v4865_v6 = vadd.f32 %v13169_v51, %v4852_v4  ;;  %v10061_v51 = vor.u32 %v11348_v14, %v10060_v19  ;;  %v9809_v60 = vor.u32 %v11276_v62, %v9806_v39  ;;  %v10510_v4 = vld [vmem:[%s14734_s9 + $0x750] sm:$0xf0]  ;;  %v10509_v19 = vor.u32 %v11460_v56, %v10508_v52  ;;  %v10004_v62 = vld [vmem:[%s14734_s9 + $0x318] sm:$0xf] }
 0x395   :  { %v10513_v15 = vor.u32 %v11452_v34, %v10510_v4  ;;  %v11333_v39 = vld [vmem:[%s14734_s9 + $0x354] sm:$0xf0]  ;;  %v9942_v34 = vld [vmem:[%s14734_s9 + $0x2d8] sm:$0xf0] }
 0x396   :  { %6633 = vmatpush.bf16.msrb.mxu1 %v10181_v53  ;;  %v9940_v52 = vld [vmem:[%s14734_s9 + $0x298] sm:$0xf] }
 0x397   :  { %6659 = vmatpush.bf16.msrb.mxu3 %v10185_v55 }
 0x39a   :  { %6634 = vmatpush.bf16.msrb.mxu1 %v10117_v8  ;;  %v10577_v8 = vor.u32 %v11468_v48, %v10574_v9  ;;  %v10006_v48 = vld [vmem:[%s14734_s9 + $0x358] sm:$0xf0] }
 0x39b   :  { %v13269_v30 = vpop.f32.mrf.mxu2  ;;  %v4957_v32 = vpop.f32.mrf.mxu1  ;;  %6660 = vmatpush.bf16.msrb.mxu3 %v10121_v29  ;;  %v9742_v29 = vld [vmem:[%s14734_s9 + $0x150] sm:$0xf0] }
 0x39c   :  { %v4904_v32 = vadd.f32 %v13119_v26, %v4891_v49  ;;  %v9745_v14 = vor.u32 %v11260_v58, %v9742_v29  ;;  %v11317_v58 = vld [vmem:[%s14734_s9 + $0x2d4] sm:$0xf0]  ;;  %v11309_v29 = vld [vmem:[%s14734_s9 + $0x29c] sm:$0xf] }
 0x39e   :  { %v4917_v38 = vadd.f32 %v13269_v30, %v4904_v32  ;;  %v11476_v30 = vld [vmem:[%s14734_s9 + $0x7cc] sm:$0xf0] }
 0x39f   :  { %v10573_v55 = vor.u32 %v11476_v30, %v10572_v10  ;;  %v11404_v10 = vld [vmem:[%s14734_s9 + $0x594] sm:$0xf] }
 0x3a0   :  { %v10318_v30 = vld [vmem:[%s14734_s9 + $0x5d0] sm:$0xf0] }
 0x3a3   :  { %v4918_v41 = vpop.f32.mrf.mxu2 }
 0x3ab   :  { %v13325_v3 = vpop.f32.mrf.mxu2 }
 0x3b3   :  { %v4970_v11 = vpop.f32.mrf.mxu2 }
 0x3b4   :  { %v11252_v11 = vld [vmem:[%s14734_s9 + $0xcc] sm:$0xf0] }
 0x3b5   :  { %v4877_v2 = vpop.f32.mrf.mxu3 }
 0x3b6   :  { %v4878_v7 = vadd.f32 %v4877_v2, %v4865_v6  ;;  %v9741_v2 = vor.u32 %v11268_v16, %v9740_v57  ;;  %v10005_v57 = vor.u32 %v11333_v39, %v10004_v62  ;;  %v9684_v39 = vld [vmem:[%s14734_s9 + $0x98] sm:$0xf] }
 0x3b8   :  { %v4985_v31 = vmax.f32 %v4878_v7, 0.0  ;;  %v9676_v7 = vld [vmem:[%s14734_s9 + $0x90] sm:$0xf] }
 0x3b9   :  { %v9677_v22 = vor.u32 %v11252_v11, %v9676_v7  ;;  %v11380_v7 = vld [vmem:[%s14734_s9 + $0x4cc] sm:$0xf0]  ;;  %v9941_v11 = vor.u32 %v11317_v58, %v9940_v52  ;;  %v11237_v58 = vld [vmem:[%s14734_s9 + $0x54] sm:$0xf0] }
 0x3ba   :  { %v13345_v35 = vpack.c.bf16 %v4985_v31, %v4985_v31  ;;  %v11444_v31 = vld [vmem:[%s14734_s9 + $0x6cc] sm:$0xf0] }
 0x3bc   :  { %6570 = vmatmul.bf16.vlgmr.msra.gmra.mxu0 %v13345_v35  ;;  %6596 = vmatmul.bf16.vlgmr.msra.gmra.mxu2 %v13345_v35 }
 0x3bd   :  { %6666 = vmatpush.bf16.msra.mxu0 %v10061_v51  ;;  %6692 = vmatpush.bf16.msra.mxu2 %v10065_v40  ;;  %v4879_v50 = vpop.f32.mrf.mxu3  ;;  %v11244_v51 = vld [vmem:[%s14734_s9 + $0x94] sm:$0xf]  ;;  %v4943_v40 = vadd.f32 %v13105_v5, %v4313_v21  ;;  %v9612_v5 = vld [vmem:[%s14734_s9 + $0x10] sm:$0xf]  ;;  %v10321_v21 = vor.u32 %v11404_v10, %v10318_v30 }
 0x3be   :  { %v10445_v50 = vor.u32 %v11444_v31, %v10444_v43  ;;  %v9681_v23 = vor.u32 %v11244_v51, %v9678_v17  ;;  %v10190_v43 = vld [vmem:[%s14734_s9 + $0x4d0] sm:$0xf0]  ;;  %v9876_v31 = vld [vmem:[%s14734_s9 + $0x218] sm:$0xf]  ;;  %v9878_v17 = vld [vmem:[%s14734_s9 + $0x258] sm:$0xf0] }
 0x3bf   :  { %v4956_v63 = vadd.f32 %v13219_v0, %v4943_v40  ;;  %v10449_v0 = vor.u32 %v11436_v20, %v10446_v45  ;;  %v11301_v51 = vld [vmem:[%s14734_s9 + $0x254] sm:$0xf0]  ;;  %v11293_v40 = vld [vmem:[%s14734_s9 + $0x21c] sm:$0xf]  ;;  %v10124_v45 = vld [vmem:[%s14734_s9 + $0x410] sm:$0xf] }
 0x3c1   :  { %6667 = vmatpush.bf16.msra.mxu0 %v9997_v25  ;;  %6693 = vmatpush.bf16.msra.mxu2 %v10001_v18  ;;  %v11236_v25 = vld [vmem:[%s14734_s9 + $0x4c] sm:$0xf0]  ;;  %v4969_v49 = vadd.f32 %v13325_v3, %v4956_v63  ;;  %v11341_v3 = vld [vmem:[%s14734_s9 + $0x39c] sm:$0xf] }
 0x3c2   :  { %v10380_v18 = vld [vmem:[%s14734_s9 + $0x610] sm:$0xf]  ;;  %v9613_v13 = vor.u32 %v11236_v25, %v9612_v5  ;;  %v10073_v1 = vor.u32 %v11341_v3, %v10070_v36  ;;  %v10126_v5 = vld [vmem:[%s14734_s9 + $0x450] sm:$0xf0]  ;;  %v9877_v25 = vor.u32 %v11301_v51, %v9876_v31  ;;  %v10078_v31 = vld [vmem:[%s14734_s9 + $0x3e0] sm:$0xf0] }
 0x3c5   :  { %6668 = vmatpush.bf16.msra.mxu0 %v9933_v61  ;;  %6694 = vmatpush.bf16.msra.mxu2 %v9937_v37  ;;  %v4929_v26 = vpop.f32.mrf.mxu3  ;;  %v11420_v61 = vld [vmem:[%s14734_s9 + $0x614] sm:$0xf] }
 0x3c6   :  { %v4930_v44 = vadd.f32 %v4929_v26, %v4917_v38  ;;  %v10382_v37 = vld [vmem:[%s14734_s9 + $0x650] sm:$0xf0]  ;;  %v10381_v38 = vor.u32 %v11428_v24, %v10380_v18  ;;  %v9617_v26 = vor.u32 %v11228_v27, %v9614_v59  ;;  %v9881_v18 = vor.u32 %v11293_v40, %v9878_v17  ;;  %v11477_v24 = vld [vmem:[%s14734_s9 + $0x7d4] sm:$0xf0]  ;;  %v11277_v59 = vld [vmem:[%s14734_s9 + $0x19c] sm:$0xf] }
 0x3c7   :  { %v11285_v27 = vld [vmem:[%s14734_s9 + $0x1d4] sm:$0xf0] }
 0x3c8   :  { %v4986_v41 = vmax.f32 %v4930_v44, 0.0  ;;  %v11412_v44 = vld [vmem:[%s14734_s9 + $0x5cc] sm:$0xf0] }
 0x3c9   :  { %6669 = vmatpush.bf16.msra.mxu0 %v9869_v33  ;;  %6695 = vmatpush.bf16.msra.mxu2 %v9873_v42  ;;  %v10385_v33 = vor.u32 %v11420_v61, %v10382_v37  ;;  %v10316_v42 = vld [vmem:[%s14734_s9 + $0x590] sm:$0xf]  ;;  %v11469_v37 = vld [vmem:[%s14734_s9 + $0x79c] sm:$0xf] }
 0x3ca   :  { %v13411_v53 = vpack.c.bf16 %v4986_v41, %v4986_v41  ;;  %v11325_v41 = vld [vmem:[%s14734_s9 + $0x31c] sm:$0xf]  ;;  %v10317_v9 = vor.u32 %v11412_v44, %v10316_v42 }
 0x3cb   :  { %v10009_v16 = vor.u32 %v11325_v41, %v10006_v48  ;;  %v11261_v42 = vld [vmem:[%s14734_s9 + $0x11c] sm:$0xf]  ;;  %v10452_v41 = vld [vmem:[%s14734_s9 + $0x698] sm:$0xf] }
 0x3cc   :  { %6583 = vmatmul.bf16.vlgmr.msra.gmra.mxu1 %v13411_v53  ;;  %6609 = vmatmul.bf16.vlgmr.msra.gmra.mxu3 %v13411_v53  ;;  %v9750_v44 = vld [vmem:[%s14734_s9 + $0x158] sm:$0xf0]  ;;  %v11445_v48 = vld [vmem:[%s14734_s9 + $0x6d4] sm:$0xf0] }
 0x3cd   :  { %6622 = vmatmul.bf16.vlgmr.msrb.gmra.mxu0 %v13345_v35  ;;  %6648 = vmatmul.bf16.vlgmr.msrb.gmra.mxu2 %v13345_v35  ;;  %v4931_v6 = vpop.f32.mrf.mxu3  ;;  %v9753_v62 = vor.u32 %v11261_v42, %v9750_v44  ;;  %v11381_v42 = vld [vmem:[%s14734_s9 + $0x4d4] sm:$0xf0]  ;;  %v11373_v44 = vld [vmem:[%s14734_s9 + $0x49c] sm:$0xf] }
 0x3ce   :  { %6670 = vmatpush.bf16.msra.mxu0 %v9805_v54  ;;  %6679 = vmatpush.bf16.msra.mxu1 %v10573_v55  ;;  %v10252_v54 = vld [vmem:[%s14734_s9 + $0x510] sm:$0xf] }
 0x3cf   :  { %6696 = vmatpush.bf16.msra.mxu2 %v9809_v60  ;;  %6705 = vmatpush.bf16.msra.mxu3 %v10577_v8  ;;  %v11396_v55 = vld [vmem:[%s14734_s9 + $0x54c] sm:$0xf0]  ;;  %v11388_v60 = vld [vmem:[%s14734_s9 + $0x514] sm:$0xf] }
 0x3d0   :  { %v10254_v8 = vld [vmem:[%s14734_s9 + $0x550] sm:$0xf0]  ;;  %v10253_v6 = vor.u32 %v11396_v55, %v10252_v54  ;;  %v11245_v54 = vld [vmem:[%s14734_s9 + $0x9c] sm:$0xf] }
 0x3d1   :  { %v9686_v55 = vld [vmem:[%s14734_s9 + $0xd8] sm:$0xf0] }
 0x3d2   :  { %6671 = vmatpush.bf16.msra.mxu0 %v9741_v2  ;;  %6680 = vmatpush.bf16.msra.mxu1 %v10509_v19  ;;  %v10257_v2 = vor.u32 %v11388_v60, %v10254_v8  ;;  %v10188_v19 = vld [vmem:[%s14734_s9 + $0x490] sm:$0xf]  ;;  %v10453_v60 = vor.u32 %v11445_v48, %v10452_v41  ;;  %v9620_v8 = vld [vmem:[%s14734_s9 + $0x18] sm:$0xf] }
 0x3d3   :  { %6697 = vmatpush.bf16.msra.mxu2 %v9745_v14  ;;  %6706 = vmatpush.bf16.msra.mxu3 %v10513_v15  ;;  %v9945_v14 = vor.u32 %v11309_v29, %v9942_v34  ;;  %v11372_v15 = vld [vmem:[%s14734_s9 + $0x494] sm:$0xf]  ;;  %v10189_v20 = vor.u32 %v11380_v7, %v10188_v19  ;;  %v10388_v29 = vld [vmem:[%s14734_s9 + $0x618] sm:$0xf]  ;;  %v11421_v19 = vld [vmem:[%s14734_s9 + $0x61c] sm:$0xf]  ;;  %v9621_v51 = vor.u32 %v11237_v58, %v9620_v8 }
 0x3d4   :  { %v10193_v63 = vor.u32 %v11372_v15, %v10190_v43  ;;  %v11429_v34 = vld [vmem:[%s14734_s9 + $0x654] sm:$0xf0]  ;;  %v10390_v7 = vld [vmem:[%s14734_s9 + $0x658] sm:$0xf0]  ;;  %v11342_v43 = vld [vmem:[%s14734_s9 + $0x3a4] sm:$0xf] }
 0x3d5   :  { %v4981_v32 = vpop.f32.mrf.mxu3  ;;  %v10389_v15 = vor.u32 %v11429_v34, %v10388_v29  ;;  %v10393_v17 = vor.u32 %v11421_v19, %v10390_v7  ;;  %v10132_v48 = vld [vmem:[%s14734_s9 + $0x418] sm:$0xf]  ;;  %v11286_v8 = vld [vmem:[%s14734_s9 + $0x1dc] sm:$0xf0]  ;;  %v11278_v58 = vld [vmem:[%s14734_s9 + $0x1a4] sm:$0xf] }
 0x3d6   :  { %6672 = vmatpush.bf16.msra.mxu0 %v9677_v22  ;;  %6681 = vmatpush.bf16.msra.mxu1 %v10445_v50  ;;  %v4982_v12 = vadd.f32 %v4981_v32, %v4969_v49  ;;  %v11364_v22 = vld [vmem:[%s14734_s9 + $0x44c] sm:$0xf0]  ;;  %v11356_v50 = vld [vmem:[%s14734_s9 + $0x414] sm:$0xf]  ;;  %v9814_v49 = vld [vmem:[%s14734_s9 + $0x1d8] sm:$0xf0] }
 0x3d7   :  { %6698 = vmatpush.bf16.msra.mxu2 %v9681_v23  ;;  %6707 = vmatpush.bf16.msra.mxu3 %v10449_v0  ;;  %v9812_v23 = vld [vmem:[%s14734_s9 + $0x198] sm:$0xf]  ;;  %v10125_v61 = vor.u32 %v11364_v22, %v10124_v45  ;;  %v10129_v32 = vor.u32 %v11356_v50, %v10126_v5  ;;  %v9817_v36 = vor.u32 %v11277_v59, %v9814_v49  ;;  %v11405_v22 = vld [vmem:[%s14734_s9 + $0x59c] sm:$0xf]  ;;  %v9822_v29 = vld [vmem:[%s14734_s9 + $0x1e0] sm:$0xf0] }
 0x3d8   :  { %11492 = vtanh.f32 %v4982_v12  ;;  %v10580_v0 = vld [vmem:[%s14734_s9 + $0x798] sm:$0xf]  ;;  %v9813_v3 = vor.u32 %v11285_v27, %v9812_v23  ;;  %v10081_v50 = vor.u32 %v11342_v43, %v10078_v31  ;;  %v10326_v5 = vld [vmem:[%s14734_s9 + $0x5d8] sm:$0xf0]  ;;  %v11326_v23 = vld [vmem:[%s14734_s9 + $0x324] sm:$0xf] }
 0x3d9   :  { %v10581_v47 = vor.u32 %v11477_v24, %v10580_v0  ;;  %v9748_v12 = vld [vmem:[%s14734_s9 + $0x118] sm:$0xf]  ;;  %v10014_v0 = vld [vmem:[%s14734_s9 + $0x360] sm:$0xf0]  ;;  %v10329_v27 = vor.u32 %v11405_v22, %v10326_v5  ;;  %v10524_v43 = vld [vmem:[%s14734_s9 + $0x720] sm:$0xf] }
 0x3da   :  { %6673 = vmatpush.bf16.msra.mxu0 %v9613_v13  ;;  %6682 = vmatpush.bf16.msra.mxu1 %v10381_v38  ;;  %v10516_v13 = vld [vmem:[%s14734_s9 + $0x718] sm:$0xf]  ;;  %v9692_v5 = vld [vmem:[%s14734_s9 + $0xa0] sm:$0xf] }
 0x3db   :  { %6699 = vmatpush.bf16.msra.mxu2 %v9617_v26  ;;  %6708 = vmatpush.bf16.msra.mxu3 %v10385_v33  ;;  %v11461_v38 = vld [vmem:[%s14734_s9 + $0x754] sm:$0xf0]  ;;  %v10585_v26 = vor.u32 %v11469_v37, %v10582_v28  ;;  %v11389_v37 = vld [vmem:[%s14734_s9 + $0x51c] sm:$0xf]  ;;  %v10017_v28 = vor.u32 %v11326_v23, %v10014_v0  ;;  %v11446_v0 = vld [vmem:[%s14734_s9 + $0x6dc] sm:$0xf0] }
 0x3dc   :  { %6635 = vmatmul.bf16.vlgmr.msrb.gmra.mxu1 %v13411_v53  ;;  %6661 = vmatmul.bf16.vlgmr.msrb.gmra.mxu3 %v13411_v53  ;;  %v11269_v33 = vld [vmem:[%s14734_s9 + $0x154] sm:$0xf0]  ;;  %v10517_v10 = vor.u32 %v11461_v38, %v10516_v13 }
 0x3dd   :  { %v4983_v56 = vpop.f32.mrf.mxu3  ;;  %6674 = vmatmul.bf16.vlgmr.msra.gmra.mxu0 %v13345_v35  ;;  %v9749_v30 = vor.u32 %v11269_v33, %v9748_v12  ;;  %v10324_v45 = vld [vmem:[%s14734_s9 + $0x598] sm:$0xf]  ;;  %v9950_v12 = vld [vmem:[%s14734_s9 + $0x2e0] sm:$0xf0] }
 0x3de   :  { %6718 = vmatpush.bf16.msrb.mxu0 %v10069_v46  ;;  %v11493_v4 = vpop.eup %11492  ;;  %6683 = vmatpush.bf16.msra.mxu1 %v10317_v9  ;;  %v11453_v46 = vld [vmem:[%s14734_s9 + $0x71c] sm:$0xf]  ;;  %v9689_v56 = vor.u32 %v11245_v54, %v9686_v55  ;;  %v10260_v49 = vld [vmem:[%s14734_s9 + $0x518] sm:$0xf] }
 0x3df   :  { %6744 = vmatpush.bf16.msrb.mxu2 %v10073_v1  ;;  %6709 = vmatpush.bf16.msra.mxu3 %v10321_v21  ;;  %v10518_v1 = vld [vmem:[%s14734_s9 + $0x758] sm:$0xf0]  ;;  %v11253_v21 = vld [vmem:[%s14734_s9 + $0xd4] sm:$0xf0] }
 0x3e0   :  { %6700 = vmatmul.bf16.vlgmr.msra.gmra.mxu2 %v13345_v35  ;;  %7113 = vperm.xlu1 %11490, %v11493_v4   ;;  %v10521_v9 = vor.u32 %v11453_v46, %v10518_v1  ;;  %v9685_v52 = vor.u32 %v11253_v21, %v9684_v39  ;;  %v10196_v33 = vld [vmem:[%s14734_s9 + $0x498] sm:$0xf]  ;;  %v10198_v1 = vld [vmem:[%s14734_s9 + $0x4d8] sm:$0xf0]  ;;  %v9886_v39 = vld [vmem:[%s14734_s9 + $0x260] sm:$0xf0] }
 0x3e1   :  { %v10197_v41 = vor.u32 %v11381_v42, %v10196_v33  ;;  %v11365_v54 = vld [vmem:[%s14734_s9 + $0x454] sm:$0xf0]  ;;  %v11357_v55 = vld [vmem:[%s14734_s9 + $0x41c] sm:$0xf]  ;;  %v10398_v33 = vld [vmem:[%s14734_s9 + $0x660] sm:$0xf0] }
 0x3e2   :  { %6719 = vmatpush.bf16.msrb.mxu0 %v10005_v57  ;;  %6684 = vmatpush.bf16.msra.mxu1 %v10253_v6  ;;  %v11437_v57 = vld [vmem:[%s14734_s9 + $0x69c] sm:$0xf]  ;;  %v10133_v34 = vor.u32 %v11365_v54, %v10132_v48  ;;  %v10084_v42 = vld [vmem:[%s14734_s9 + $0x3a8] sm:$0xf]  ;;  %v10332_v48 = vld [vmem:[%s14734_s9 + $0x5a0] sm:$0xf] }
 0x3e3   :  { %6745 = vmatpush.bf16.msrb.mxu2 %v10009_v16  ;;  %6710 = vmatpush.bf16.msra.mxu3 %v10257_v2  ;;  %v10454_v16 = vld [vmem:[%s14734_s9 + $0x6d8] sm:$0xf0] }
 0x3e4   :  { %v10457_v4 = vor.u32 %v11437_v57, %v10454_v16  ;;  %v11229_v6 = vld [vmem:[%s14734_s9 + $0x1c] sm:$0xf] }
 0x3e5   :  { %v9622_v2 = vld [vmem:[%s14734_s9 + $0x58] sm:$0xf0] }
 0x3e6   :  { %6720 = vmatpush.bf16.msrb.mxu0 %v9941_v11  ;;  %6685 = vmatpush.bf16.msra.mxu1 %v10189_v20  ;;  %v10076_v11 = vld [vmem:[%s14734_s9 + $0x3a0] sm:$0xf]  ;;  %v9625_v40 = vor.u32 %v11229_v6, %v9622_v2  ;;  %v10134_v57 = vld [vmem:[%s14734_s9 + $0x458] sm:$0xf0]  ;;  %v10590_v6 = vld [vmem:[%s14734_s9 + $0x7e0] sm:$0xf0] }
 0x3e7   :  { %6746 = vmatpush.bf16.msrb.mxu2 %v9945_v14  ;;  %6711 = vmatpush.bf16.msra.mxu3 %v10193_v63  ;;  %v11350_v14 = vld [vmem:[%s14734_s9 + $0x3dc] sm:$0xf0]  ;;  %v11413_v63 = vld [vmem:[%s14734_s9 + $0x5d4] sm:$0xf0]  ;;  %v10137_v2 = vor.u32 %v11357_v55, %v10134_v57  ;;  %v10334_v55 = vld [vmem:[%s14734_s9 + $0x5e0] sm:$0xf0] }
 0x3e8   :  { %v10077_v20 = vor.u32 %v11350_v14, %v10076_v11  ;;  %v10325_v24 = vor.u32 %v11413_v63, %v10324_v45  ;;  %v9825_v11 = vor.u32 %v11278_v58, %v9822_v29  ;;  %v9756_v14 = vld [vmem:[%s14734_s9 + $0x120] sm:$0xf]  ;;  %v10526_v45 = vld [vmem:[%s14734_s9 + $0x760] sm:$0xf0]  ;;  %v10020_v57 = vld [vmem:[%s14734_s9 + $0x328] sm:$0xf] }
 0x3e9   :  { %v10268_v29 = vld [vmem:[%s14734_s9 + $0x520] sm:$0xf] }
 0x3ea   :  { %6721 = vmatpush.bf16.msrb.mxu0 %v9877_v25  ;;  %6686 = vmatpush.bf16.msra.mxu1 %v10125_v61  ;;  %v10012_v25 = vld [vmem:[%s14734_s9 + $0x320] sm:$0xf]  ;;  %v11397_v61 = vld [vmem:[%s14734_s9 + $0x554] sm:$0xf0] }
 0x3eb   :  { %6747 = vmatpush.bf16.msrb.mxu2 %v9881_v18  ;;  %6712 = vmatpush.bf16.msra.mxu3 %v10129_v32  ;;  %v11334_v18 = vld [vmem:[%s14734_s9 + $0x35c] sm:$0xf0]  ;;  %v10262_v32 = vld [vmem:[%s14734_s9 + $0x558] sm:$0xf0]  ;;  %v10261_v13 = vor.u32 %v11397_v61, %v10260_v49  ;;  %v10462_v49 = vld [vmem:[%s14734_s9 + $0x6e0] sm:$0xf0] }
 0x3ec   :  { %v10013_v59 = vor.u32 %v11334_v18, %v10012_v25  ;;  %v10265_v38 = vor.u32 %v11389_v37, %v10262_v32  ;;  %v11254_v25 = vld [vmem:[%s14734_s9 + $0xdc] sm:$0xf0] }
 0x3ed   :  { %6687 = vmatmul.bf16.vlgmr.msra.gmra.mxu1 %v13411_v53  ;;  %v10460_v18 = vld [vmem:[%s14734_s9 + $0x6a0] sm:$0xf]  ;;  %v9693_v61 = vor.u32 %v11254_v25, %v9692_v5  ;;  %v9894_v5 = vld [vmem:[%s14734_s9 + $0x268] sm:$0xf0] }
 0x3ee   :  { %6731 = vmatpush.bf16.msrb.mxu1 %v10581_v47  ;;  %6722 = vmatpush.bf16.msrb.mxu0 %v9813_v3  ;;  %v9948_v47 = vld [vmem:[%s14734_s9 + $0x2a0] sm:$0xf] }
 0x3ef   :  { %6748 = vmatpush.bf16.msrb.mxu2 %v9817_v36  ;;  %6757 = vmatpush.bf16.msrb.mxu3 %v10585_v26  ;;  %v11318_v3 = vld [vmem:[%s14734_s9 + $0x2dc] sm:$0xf0]  ;;  %v11310_v36 = vld [vmem:[%s14734_s9 + $0x2a4] sm:$0xf] }
 0x3f0   :  { %6713 = vmatmul.bf16.vlgmr.msra.gmra.mxu3 %v13411_v53  ;;  %v9949_v26 = vor.u32 %v11318_v3, %v9948_v47  ;;  %v9953_v46 = vor.u32 %v11310_v36, %v9950_v12  ;;  %v9628_v37 = vld [vmem:[%s14734_s9 + $0x20] sm:$0xf] }
 0x3f1   :  { %v11238_v47 = vld [vmem:[%s14734_s9 + $0x5c] sm:$0xf0] }
 0x3f2   :  { %6732 = vmatpush.bf16.msrb.mxu1 %v10517_v10  ;;  %6723 = vmatpush.bf16.msrb.mxu0 %v9749_v30  ;;  %v9884_v10 = vld [vmem:[%s14734_s9 + $0x220] sm:$0xf] }
 0x3f3   :  { %6749 = vmatpush.bf16.msrb.mxu2 %v9753_v62  ;;  %6758 = vmatpush.bf16.msrb.mxu3 %v10521_v9  ;;  %v11302_v30 = vld [vmem:[%s14734_s9 + $0x25c] sm:$0xf0]  ;;  %v11294_v62 = vld [vmem:[%s14734_s9 + $0x224] sm:$0xf]  ;;  %v10201_v9 = vor.u32 %v11373_v44, %v10198_v1  ;;  %v11351_v44 = vld [vmem:[%s14734_s9 + $0x3e4] sm:$0xf0] }
 0x3f4   :  { %v9885_v21 = vor.u32 %v11302_v30, %v9884_v10  ;;  %v9889_v16 = vor.u32 %v11294_v62, %v9886_v39  ;;  %v10396_v3 = vld [vmem:[%s14734_s9 + $0x620] sm:$0xf]  ;;  %v11343_v1 = vld [vmem:[%s14734_s9 + $0x3ac] sm:$0xf] }
 0x3f5   :  { %v11430_v36 = vld [vmem:[%s14734_s9 + $0x65c] sm:$0xf0]  ;;  %v10086_v10 = vld [vmem:[%s14734_s9 + $0x3e8] sm:$0xf0] }
 0x3f6   :  { %6733 = vmatpush.bf16.msrb.mxu1 %v10453_v60  ;;  %6724 = vmatpush.bf16.msrb.mxu0 %v9685_v52  ;;  %v9820_v60 = vld [vmem:[%s14734_s9 + $0x1a0] sm:$0xf]  ;;  %v10397_v30 = vor.u32 %v11430_v36, %v10396_v3  ;;  %v10089_v54 = vor.u32 %v11343_v1, %v10086_v10  ;;  %v9830_v3 = vld [vmem:[%s14734_s9 + $0x1e8] sm:$0xf0]  ;;  %v10532_v1 = vld [vmem:[%s14734_s9 + $0x728] sm:$0xf] }
 0x3f7   :  { %6750 = vmatpush.bf16.msrb.mxu2 %v9689_v56  ;;  %6759 = vmatpush.bf16.msrb.mxu3 %v10457_v4  ;;  %v10588_v52 = vld [vmem:[%s14734_s9 + $0x7a0] sm:$0xf]  ;;  %v11470_v4 = vld [vmem:[%s14734_s9 + $0x7a4] sm:$0xf]  ;;  %v9821_v19 = vor.u32 %v11286_v8, %v9820_v60  ;;  %v11327_v60 = vld [vmem:[%s14734_s9 + $0x32c] sm:$0xf] }
 0x3f8   :  { %v11478_v56 = vld [vmem:[%s14734_s9 + $0x7dc] sm:$0xf0]  ;;  %v10593_v31 = vor.u32 %v11470_v4, %v10590_v6  ;;  %v10022_v8 = vld [vmem:[%s14734_s9 + $0x368] sm:$0xf0]  ;;  %v11390_v4 = vld [vmem:[%s14734_s9 + $0x524] sm:$0xf] }
 0x3f9   :  { %v10589_v7 = vor.u32 %v11478_v56, %v10588_v52  ;;  %v10025_v6 = vor.u32 %v11327_v60, %v10022_v8  ;;  %v11447_v8 = vld [vmem:[%s14734_s9 + $0x6e4] sm:$0xf0] }
 0x3fa   :  { %6734 = vmatpush.bf16.msrb.mxu1 %v10389_v15  ;;  %6725 = vmatpush.bf16.msrb.mxu0 %v9621_v51  ;;  %v11270_v15 = vld [vmem:[%s14734_s9 + $0x15c] sm:$0xf0] }
 0x3fb   :  { %6751 = vmatpush.bf16.msrb.mxu2 %v9625_v40  ;;  %6760 = vmatpush.bf16.msrb.mxu3 %v10393_v17  ;;  %v11462_v51 = vld [vmem:[%s14734_s9 + $0x75c] sm:$0xf0]  ;;  %v11262_v40 = vld [vmem:[%s14734_s9 + $0x124] sm:$0xf]  ;;  %v9757_v63 = vor.u32 %v11270_v15, %v9756_v14  ;;  %v9958_v14 = vld [vmem:[%s14734_s9 + $0x2e8] sm:$0xf0] }
 0x3fc   :  { %v9758_v17 = vld [vmem:[%s14734_s9 + $0x160] sm:$0xf0]  ;;  %v10525_v22 = vor.u32 %v11462_v51, %v10524_v43  ;;  %v10204_v51 = vld [vmem:[%s14734_s9 + $0x4a0] sm:$0xf] }
 0x3fd   :  { %6726 = vmatmul.bf16.vlgmr.msrb.gmra.mxu0 %v13345_v35 }
 0x3fe   :  { %6770 = vmatpush.bf16.msra.mxu0 %v10077_v20  ;;  %6752 = vmatmul.bf16.vlgmr.msrb.gmra.mxu2 %v13345_v35  ;;  %v11454_v20 = vld [vmem:[%s14734_s9 + $0x724] sm:$0xf] }
 0x3ff   :  { %6796 = vmatpush.bf16.msra.mxu2 %v10081_v50  ;;  %6735 = vmatpush.bf16.msrb.mxu1 %v10325_v24  ;;  %v9761_v50 = vor.u32 %v11262_v40, %v9758_v17  ;;  %v10529_v23 = vor.u32 %v11454_v20, %v10526_v45  ;;  %v11246_v24 = vld [vmem:[%s14734_s9 + $0xa4] sm:$0xf]  ;;  %v11382_v40 = vld [vmem:[%s14734_s9 + $0x4dc] sm:$0xf0] }
 0x400   :  { %6761 = vmatpush.bf16.msrb.mxu3 %v10329_v27  ;;  %v9694_v27 = vld [vmem:[%s14734_s9 + $0xe0] sm:$0xf0]  ;;  %v10205_v25 = vor.u32 %v11382_v40, %v10204_v51  ;;  %v10406_v51 = vld [vmem:[%s14734_s9 + $0x668] sm:$0xf0]  ;;  %v10092_v40 = vld [vmem:[%s14734_s9 + $0x3b0] sm:$0xf] }
 0x401   :  { %v9697_v32 = vor.u32 %v11246_v24, %v9694_v27  ;;  %v11374_v17 = vld [vmem:[%s14734_s9 + $0x4a4] sm:$0xf]  ;;  %v11366_v24 = vld [vmem:[%s14734_s9 + $0x45c] sm:$0xf0] }
 0x402   :  { %6771 = vmatpush.bf16.msra.mxu0 %v10013_v59  ;;  %v11438_v59 = vld [vmem:[%s14734_s9 + $0x6a4] sm:$0xf] }
 0x403   :  { %6797 = vmatpush.bf16.msra.mxu2 %v10017_v28  ;;  %6736 = vmatpush.bf16.msrb.mxu1 %v10261_v13  ;;  %v10461_v28 = vor.u32 %v11446_v0, %v10460_v18  ;;  %v10465_v12 = vor.u32 %v11438_v59, %v10462_v49  ;;  %v11230_v13 = vld [vmem:[%s14734_s9 + $0x24] sm:$0xf]  ;;  %v10140_v18 = vld [vmem:[%s14734_s9 + $0x420] sm:$0xf] }
 0x404   :  { %6762 = vmatpush.bf16.msrb.mxu3 %v10265_v38  ;;  %v9630_v38 = vld [vmem:[%s14734_s9 + $0x60] sm:$0xf0]  ;;  %v10141_v36 = vor.u32 %v11366_v24, %v10140_v18  ;;  %v10340_v18 = vld [vmem:[%s14734_s9 + $0x5a8] sm:$0xf] }
 0x405   :  { %v9633_v62 = vor.u32 %v11230_v13, %v9630_v38  ;;  %v10206_v45 = vld [vmem:[%s14734_s9 + $0x4e0] sm:$0xf0]  ;;  %v10598_v13 = vld [vmem:[%s14734_s9 + $0x7e8] sm:$0xf0] }
 0x406   :  { %6772 = vmatpush.bf16.msra.mxu0 %v9949_v26  ;;  %v11422_v26 = vld [vmem:[%s14734_s9 + $0x624] sm:$0xf] }
 0x407   :  { %6798 = vmatpush.bf16.msra.mxu2 %v9953_v46  ;;  %6737 = vmatpush.bf16.msrb.mxu1 %v10197_v41  ;;  %v9629_v46 = vor.u32 %v11238_v47, %v9628_v37  ;;  %v10401_v39 = vor.u32 %v11422_v26, %v10398_v33  ;;  %v10085_v41 = vor.u32 %v11351_v44, %v10084_v42  ;;  %v11358_v27 = vld [vmem:[%s14734_s9 + $0x424] sm:$0xf]  ;;  %v11287_v37 = vld [vmem:[%s14734_s9 + $0x1e4] sm:$0xf0]  ;;  %v11279_v47 = vld [vmem:[%s14734_s9 + $0x1ac] sm:$0xf] }
 0x408   :  { %6763 = vmatpush.bf16.msrb.mxu3 %v10201_v9  ;;  %v11414_v9 = vld [vmem:[%s14734_s9 + $0x5dc] sm:$0xf0]  ;;  %v10142_v59 = vld [vmem:[%s14734_s9 + $0x460] sm:$0xf0]  ;;  %v9833_v42 = vor.u32 %v11279_v47, %v9830_v3  ;;  %v9764_v44 = vld [vmem:[%s14734_s9 + $0x128] sm:$0xf] }
 0x409   :  { %v10333_v52 = vor.u32 %v11414_v9, %v10332_v48  ;;  %v10145_v38 = vor.u32 %v11358_v27, %v10142_v59  ;;  %v10534_v48 = vld [vmem:[%s14734_s9 + $0x768] sm:$0xf0]  ;;  %v10028_v59 = vld [vmem:[%s14734_s9 + $0x330] sm:$0xf]  ;;  %v10276_v3 = vld [vmem:[%s14734_s9 + $0x528] sm:$0xf] }
 0x40a   :  { %6773 = vmatpush.bf16.msra.mxu0 %v9885_v21  ;;  %v11406_v21 = vld [vmem:[%s14734_s9 + $0x5a4] sm:$0xf]  ;;  %v10342_v27 = vld [vmem:[%s14734_s9 + $0x5e8] sm:$0xf0] }
 0x40b   :  { %6799 = vmatpush.bf16.msra.mxu2 %v9889_v16  ;;  %6738 = vmatpush.bf16.msrb.mxu1 %v10133_v34  ;;  %v11335_v16 = vld [vmem:[%s14734_s9 + $0x364] sm:$0xf0]  ;;  %v10337_v56 = vor.u32 %v11406_v21, %v10334_v55  ;;  %v11398_v34 = vld [vmem:[%s14734_s9 + $0x55c] sm:$0xf0] }
 0x40c   :  { %6764 = vmatpush.bf16.msrb.mxu3 %v10137_v2  ;;  %v10021_v58 = vor.u32 %v11335_v16, %v10020_v57  ;;  %v10270_v2 = vld [vmem:[%s14734_s9 + $0x560] sm:$0xf0]  ;;  %v10269_v15 = vor.u32 %v11398_v34, %v10268_v29  ;;  %v9700_v55 = vld [vmem:[%s14734_s9 + $0xa8] sm:$0xf]  ;;  %v10470_v29 = vld [vmem:[%s14734_s9 + $0x6e8] sm:$0xf0] }
 0x40d   :  { %v10273_v43 = vor.u32 %v11390_v4, %v10270_v2  ;;  %v11255_v57 = vld [vmem:[%s14734_s9 + $0xe4] sm:$0xf0] }
 0x40e   :  { %6774 = vmatpush.bf16.msra.mxu0 %v9821_v19  ;;  %6739 = vmatmul.bf16.vlgmr.msrb.gmra.mxu1 %v13411_v53  ;;  %v9956_v19 = vld [vmem:[%s14734_s9 + $0x2a8] sm:$0xf]  ;;  %v9701_v34 = vor.u32 %v11255_v57, %v9700_v55  ;;  %v11296_v55 = vld [vmem:[%s14734_s9 + $0x234] sm:$0xf] }
 0x40f   :  { %6783 = vmatpush.bf16.msra.mxu1 %v10589_v7  ;;  %6800 = vmatpush.bf16.msra.mxu2 %v9825_v11  ;;  %v11319_v7 = vld [vmem:[%s14734_s9 + $0x2e4] sm:$0xf0]  ;;  %v11311_v11 = vld [vmem:[%s14734_s9 + $0x2ac] sm:$0xf]  ;;  %v9902_v57 = vld [vmem:[%s14734_s9 + $0x270] sm:$0xf0] }
 0x410   :  { %6809 = vmatpush.bf16.msra.mxu3 %v10593_v31  ;;  %v9957_v31 = vor.u32 %v11319_v7, %v9956_v19  ;;  %v9961_v20 = vor.u32 %v11311_v11, %v9958_v14  ;;  %v10468_v16 = vld [vmem:[%s14734_s9 + $0x6a8] sm:$0xf] }
 0x411   :  { %6765 = vmatmul.bf16.vlgmr.msrb.gmra.mxu3 %v13411_v53  ;;  %v9636_v4 = vld [vmem:[%s14734_s9 + $0x28] sm:$0xf] }
 0x412   :  { %6775 = vmatpush.bf16.msra.mxu0 %v9757_v63  ;;  %v9892_v63 = vld [vmem:[%s14734_s9 + $0x228] sm:$0xf] }
 0x413   :  { %6784 = vmatpush.bf16.msra.mxu1 %v10525_v22  ;;  %6801 = vmatpush.bf16.msra.mxu2 %v9761_v50  ;;  %v11303_v22 = vld [vmem:[%s14734_s9 + $0x264] sm:$0xf0]  ;;  %v11295_v50 = vld [vmem:[%s14734_s9 + $0x22c] sm:$0xf] }
 0x414   :  { %6810 = vmatpush.bf16.msra.mxu3 %v10529_v23  ;;  %v10209_v23 = vor.u32 %v11374_v17, %v10206_v45  ;;  %v9893_v0 = vor.u32 %v11303_v22, %v9892_v63  ;;  %v9897_v49 = vor.u32 %v11295_v50, %v9894_v5  ;;  %v11239_v19 = vld [vmem:[%s14734_s9 + $0x64] sm:$0xf0]  ;;  %v11352_v17 = vld [vmem:[%s14734_s9 + $0x3ec] sm:$0xf0]  ;;  %v11344_v45 = vld [vmem:[%s14734_s9 + $0x3b4] sm:$0xf] }
 0x415   :  { %v10404_v7 = vld [vmem:[%s14734_s9 + $0x628] sm:$0xf]  ;;  %v10094_v63 = vld [vmem:[%s14734_s9 + $0x3f0] sm:$0xf0] }
 0x416   :  { %6776 = vmatpush.bf16.msra.mxu0 %v9693_v61  ;;  %v9828_v61 = vld [vmem:[%s14734_s9 + $0x1a8] sm:$0xf]  ;;  %v10097_v24 = vor.u32 %v11344_v45, %v10094_v63 }
 0x417   :  { %6785 = vmatpush.bf16.msra.mxu1 %v10461_v28  ;;  %6802 = vmatpush.bf16.msra.mxu2 %v9697_v32  ;;  %v10596_v28 = vld [vmem:[%s14734_s9 + $0x7a8] sm:$0xf]  ;;  %v9829_v26 = vor.u32 %v11287_v37, %v9828_v61  ;;  %v11328_v61 = vld [vmem:[%s14734_s9 + $0x334] sm:$0xf] }
 0x418   :  { %6811 = vmatpush.bf16.msra.mxu3 %v10465_v12  ;;  %v11479_v32 = vld [vmem:[%s14734_s9 + $0x7e4] sm:$0xf0]  ;;  %v11471_v12 = vld [vmem:[%s14734_s9 + $0x7ac] sm:$0xf]  ;;  %v10030_v37 = vld [vmem:[%s14734_s9 + $0x370] sm:$0xf0] }
 0x419   :  { %v10597_v33 = vor.u32 %v11479_v32, %v10596_v28  ;;  %v10601_v10 = vor.u32 %v11471_v12, %v10598_v13  ;;  %v11431_v11 = vld [vmem:[%s14734_s9 + $0x664] sm:$0xf0]  ;;  %v11391_v12 = vld [vmem:[%s14734_s9 + $0x52c] sm:$0xf]  ;;  %v10033_v13 = vor.u32 %v11328_v61, %v10030_v37 }
 0x41a   :  { %6777 = vmatpush.bf16.msra.mxu0 %v9629_v46  ;;  %v11271_v46 = vld [vmem:[%s14734_s9 + $0x164] sm:$0xf0]  ;;  %v10405_v22 = vor.u32 %v11431_v11, %v10404_v7  ;;  %v11480_v7 = vld [vmem:[%s14734_s9 + $0x7ec] sm:$0xf0]  ;;  %v11280_v11 = vld [vmem:[%s14734_s9 + $0x1b4] sm:$0xf] }
 0x41b   :  { %6786 = vmatpush.bf16.msra.mxu1 %v10397_v30  ;;  %6803 = vmatpush.bf16.msra.mxu2 %v9633_v62  ;;  %v11463_v30 = vld [vmem:[%s14734_s9 + $0x764] sm:$0xf0]  ;;  %v11263_v62 = vld [vmem:[%s14734_s9 + $0x12c] sm:$0xf]  ;;  %v9765_v9 = vor.u32 %v11271_v46, %v9764_v44  ;;  %v9966_v44 = vld [vmem:[%s14734_s9 + $0x2f0] sm:$0xf0] }
 0x41c   :  { %6812 = vmatpush.bf16.msra.mxu3 %v10401_v39  ;;  %v9766_v39 = vld [vmem:[%s14734_s9 + $0x168] sm:$0xf0]  ;;  %v10533_v21 = vor.u32 %v11463_v30, %v10532_v1 }
 0x41d   :  { %6778 = vmatmul.bf16.vlgmr.msra.gmra.mxu0 %v13345_v35 }
 0x41e   :  { %6822 = vmatpush.bf16.msrb.mxu0 %v10085_v41  ;;  %6804 = vmatmul.bf16.vlgmr.msra.gmra.mxu2 %v13345_v35  ;;  %v11455_v41 = vld [vmem:[%s14734_s9 + $0x72c] sm:$0xf] }
 0x41f   :  { %6848 = vmatpush.bf16.msrb.mxu2 %v10089_v54  ;;  %6787 = vmatpush.bf16.msra.mxu1 %v10333_v52  ;;  %v9769_v54 = vor.u32 %v11263_v62, %v9766_v39  ;;  %v10537_v60 = vor.u32 %v11455_v41, %v10534_v48  ;;  %v11247_v52 = vld [vmem:[%s14734_s9 + $0xac] sm:$0xf]  ;;  %v10212_v62 = vld [vmem:[%s14734_s9 + $0x4a8] sm:$0xf] }
 0x420   :  { %6813 = vmatpush.bf16.msra.mxu3 %v10337_v56  ;;  %v9702_v56 = vld [vmem:[%s14734_s9 + $0xe8] sm:$0xf0]  ;;  %v11383_v39 = vld [vmem:[%s14734_s9 + $0x4e4] sm:$0xf0] }
 0x421   :  { %v9705_v2 = vor.u32 %v11247_v52, %v9702_v56  ;;  %v11375_v41 = vld [vmem:[%s14734_s9 + $0x4ac] sm:$0xf]  ;;  %v11367_v56 = vld [vmem:[%s14734_s9 + $0x464] sm:$0xf0] }
 0x422   :  { %6823 = vmatpush.bf16.msrb.mxu0 %v10021_v58  ;;  %v11439_v58 = vld [vmem:[%s14734_s9 + $0x6ac] sm:$0xf] }
 0x423   :  { %6849 = vmatpush.bf16.msrb.mxu2 %v10025_v6  ;;  %6788 = vmatpush.bf16.msra.mxu1 %v10269_v15  ;;  %v10469_v6 = vor.u32 %v11447_v8, %v10468_v16  ;;  %v10473_v14 = vor.u32 %v11439_v58, %v10470_v29  ;;  %v11231_v15 = vld [vmem:[%s14734_s9 + $0x2c] sm:$0xf]  ;;  %v10213_v16 = vor.u32 %v11383_v39, %v10212_v62 }
 0x424   :  { %6814 = vmatpush.bf16.msra.mxu3 %v10273_v43  ;;  %v9638_v43 = vld [vmem:[%s14734_s9 + $0x68] sm:$0xf0] }
 0x425   :  { %v9641_v50 = vor.u32 %v11231_v15, %v9638_v43  ;;  %v11359_v58 = vld [vmem:[%s14734_s9 + $0x42c] sm:$0xf]  ;;  %v11472_v43 = vld [vmem:[%s14734_s9 + $0x7b4] sm:$0xf] }
 0x426   :  { %6824 = vmatpush.bf16.msrb.mxu0 %v9957_v31  ;;  %v11423_v31 = vld [vmem:[%s14734_s9 + $0x62c] sm:$0xf] }
 0x427   :  { %6850 = vmatpush.bf16.msrb.mxu2 %v9961_v20  ;;  %6789 = vmatpush.bf16.msra.mxu1 %v10205_v25  ;;  %v9637_v20 = vor.u32 %v11239_v19, %v9636_v4  ;;  %v10409_v5 = vor.u32 %v11423_v31, %v10406_v51  ;;  %v10093_v25 = vor.u32 %v11352_v17, %v10092_v40  ;;  %v10150_v29 = vld [vmem:[%s14734_s9 + $0x468] sm:$0xf0]  ;;  %v9836_v4 = vld [vmem:[%s14734_s9 + $0x1b0] sm:$0xf]  ;;  %v10606_v31 = vld [vmem:[%s14734_s9 + $0x7f0] sm:$0xf0] }
 0x428   :  { %6815 = vmatpush.bf16.msra.mxu3 %v10209_v23  ;;  %v11415_v23 = vld [vmem:[%s14734_s9 + $0x5e4] sm:$0xf0]  ;;  %v14211_v51 = vld [vmem:[%s14735_s10] sm:$0xff]  ;;  %v10153_v40 = vor.u32 %v11359_v58, %v10150_v29  ;;  %v11345_v58 = vld [vmem:[%s14734_s9 + $0x3bc] sm:$0xf] }
 0x429   :  { %v10341_v28 = vor.u32 %v11415_v23, %v10340_v18  ;;  %v11464_v18 = vld [vmem:[%s14734_s9 + $0x76c] sm:$0xf0]  ;;  %v11264_v23 = vld [vmem:[%s14734_s9 + $0x134] sm:$0xf]  ;;  %v10102_v29 = vld [vmem:[%s14734_s9 + $0x3f8] sm:$0xf0] }
 0x42a   :  { %6825 = vmatpush.bf16.msrb.mxu0 %v9893_v0  ;;  %v11407_v0 = vld [vmem:[%s14734_s9 + $0x5ac] sm:$0xf] }
 0x42b   :  { %6851 = vmatpush.bf16.msrb.mxu2 %v9897_v49  ;;  %6790 = vmatpush.bf16.msra.mxu1 %v10141_v36  ;;  %v11336_v49 = vld [vmem:[%s14734_s9 + $0x36c] sm:$0xf0]  ;;  %v10345_v32 = vor.u32 %v11407_v0, %v10342_v27  ;;  %v11399_v36 = vld [vmem:[%s14734_s9 + $0x564] sm:$0xf0]  ;;  %v9774_v0 = vld [vmem:[%s14734_s9 + $0x170] sm:$0xf0] }
 0x42c   :  { %6816 = vmatpush.bf16.msra.mxu3 %v10145_v38  ;;  %v10029_v47 = vor.u32 %v11336_v49, %v10028_v59  ;;  %v10278_v38 = vld [vmem:[%s14734_s9 + $0x568] sm:$0xf0]  ;;  %v10277_v46 = vor.u32 %v11399_v36, %v10276_v3  ;;  %v11456_v27 = vld [vmem:[%s14734_s9 + $0x734] sm:$0xf]  ;;  %v9777_v37 = vor.u32 %v11264_v23, %v9774_v0  ;;  %v10284_v0 = vld [vmem:[%s14734_s9 + $0x530] sm:$0xf] }
 0x42d   :  { %v10281_v1 = vor.u32 %v11391_v12, %v10278_v38  ;;  %v10542_v59 = vld [vmem:[%s14734_s9 + $0x770] sm:$0xf0]  ;;  %v11448_v12 = vld [vmem:[%s14734_s9 + $0x6ec] sm:$0xf0] }
 0x42e   :  { %6826 = vmatpush.bf16.msrb.mxu0 %v9829_v26  ;;  %6791 = vmatmul.bf16.vlgmr.msra.gmra.mxu1 %v13411_v53  ;;  %v9964_v26 = vld [vmem:[%s14734_s9 + $0x2b0] sm:$0xf]  ;;  %v10545_v3 = vor.u32 %v11456_v27, %v10542_v59  ;;  %v9710_v38 = vld [vmem:[%s14734_s9 + $0xf0] sm:$0xf0] }
 0x42f   :  { %6835 = vmatpush.bf16.msrb.mxu1 %v10597_v33  ;;  %6852 = vmatpush.bf16.msrb.mxu2 %v9833_v42  ;;  %v11320_v33 = vld [vmem:[%s14734_s9 + $0x2ec] sm:$0xf0]  ;;  %v11312_v42 = vld [vmem:[%s14734_s9 + $0x2b4] sm:$0xf] }
 0x430   :  { %6861 = vmatpush.bf16.msrb.mxu3 %v10601_v10  ;;  %v9965_v10 = vor.u32 %v11320_v33, %v9964_v26  ;;  %v9969_v48 = vor.u32 %v11312_v42, %v9966_v44  ;;  %v11440_v33 = vld [vmem:[%s14734_s9 + $0x6b4] sm:$0xf]  ;;  %v5251_v44 = vperm.slane %v14211_v51, 1 }
 0x431   :  { %6817 = vmatmul.bf16.vlgmr.msra.gmra.mxu3 %v13411_v53  ;;  %v10478_v42 = vld [vmem:[%s14734_s9 + $0x6f0] sm:$0xf0] }
 0x432   :  { %6827 = vmatpush.bf16.msrb.mxu0 %v9765_v9  ;;  %v10214_v9 = vld [vmem:[%s14734_s9 + $0x4e8] sm:$0xf0]  ;;  %v11392_v27 = vld [vmem:[%s14734_s9 + $0x534] sm:$0xf] }
 0x433   :  { %6836 = vmatpush.bf16.msrb.mxu1 %v10533_v21  ;;  %6853 = vmatpush.bf16.msrb.mxu2 %v9769_v54  ;;  %v9900_v21 = vld [vmem:[%s14734_s9 + $0x230] sm:$0xf]  ;;  %v10217_v8 = vor.u32 %v11375_v41, %v10214_v9 }
 0x434   :  { %6862 = vmatpush.bf16.msrb.mxu3 %v10537_v60  ;;  %v11304_v54 = vld [vmem:[%s14734_s9 + $0x26c] sm:$0xf0]  ;;  %v10148_v60 = vld [vmem:[%s14734_s9 + $0x428] sm:$0xf] }
 0x435   :  { %v9901_v52 = vor.u32 %v11304_v54, %v9900_v21  ;;  %v10149_v15 = vor.u32 %v11367_v56, %v10148_v60  ;;  %v10412_v9 = vld [vmem:[%s14734_s9 + $0x630] sm:$0xf]  ;;  %v10481_v54 = vor.u32 %v11440_v33, %v10478_v42  ;;  %v10414_v60 = vld [vmem:[%s14734_s9 + $0x670] sm:$0xf0] }
 0x436   :  { %6828 = vmatpush.bf16.msrb.mxu0 %v9701_v34  ;;  %v9905_v34 = vor.u32 %v11296_v55, %v9902_v57  ;;  %v11432_v21 = vld [vmem:[%s14734_s9 + $0x66c] sm:$0xf0]  ;;  %v11232_v55 = vld [vmem:[%s14734_s9 + $0x34] sm:$0xf] }
 0x437   :  { %6837 = vmatpush.bf16.msrb.mxu1 %v10469_v6  ;;  %6854 = vmatpush.bf16.msrb.mxu2 %v9705_v2  ;;  %v11288_v6 = vld [vmem:[%s14734_s9 + $0x1ec] sm:$0xf0]  ;;  %v9646_v57 = vld [vmem:[%s14734_s9 + $0x70] sm:$0xf0] }
 0x438   :  { %6863 = vmatpush.bf16.msrb.mxu3 %v10473_v14  ;;  %v10604_v2 = vld [vmem:[%s14734_s9 + $0x7b0] sm:$0xf]  ;;  %v9838_v14 = vld [vmem:[%s14734_s9 + $0x1f0] sm:$0xf0]  ;;  %v9837_v17 = vor.u32 %v11288_v6, %v9836_v4  ;;  %v10413_v4 = vor.u32 %v11432_v21, %v10412_v9  ;;  %v9649_v6 = vor.u32 %v11232_v55, %v9646_v57  ;;  %v5253_v9 = vperm.slane %v14211_v51, 3 }
 0x439   :  { %v14144_v30 = vpop.f32.mrf.mxu0  ;;  %v10605_v45 = vor.u32 %v11480_v7, %v10604_v2  ;;  %v9841_v63 = vor.u32 %v11280_v11, %v9838_v14  ;;  %v10348_v14 = vld [vmem:[%s14734_s9 + $0x5b0] sm:$0xf]  ;;  %v11376_v33 = vld [vmem:[%s14734_s9 + $0x4b4] sm:$0xf] }
 0x43a   :  { %6829 = vmatpush.bf16.msrb.mxu0 %v9637_v20  ;;  %v10156_v55 = vld [vmem:[%s14734_s9 + $0x430] sm:$0xf] }
 0x43b   :  { %6838 = vmatpush.bf16.msrb.mxu1 %v10405_v22  ;;  %6855 = vmatpush.bf16.msrb.mxu2 %v9641_v50  ;;  %v9772_v22 = vld [vmem:[%s14734_s9 + $0x130] sm:$0xf] }
 0x43c   :  { %6864 = vmatpush.bf16.msrb.mxu3 %v10409_v5  ;;  %v11272_v50 = vld [vmem:[%s14734_s9 + $0x16c] sm:$0xf0] }
 0x43d   :  { %6830 = vmatmul.bf16.vlgmr.msrb.gmra.mxu0 %v13345_v35  ;;  %v10540_v5 = vld [vmem:[%s14734_s9 + $0x730] sm:$0xf]  ;;  %v9773_v49 = vor.u32 %v11272_v50, %v9772_v22  ;;  %v11329_v22 = vld [vmem:[%s14734_s9 + $0x33c] sm:$0xf] }
 0x43e   :  { %6874 = vmatpush.bf16.msra.mxu0 %v10093_v25  ;;  %6856 = vmatmul.bf16.vlgmr.msrb.gmra.mxu2 %v13345_v35  ;;  %v10609_v25 = vor.u32 %v11472_v43, %v10606_v31  ;;  %v10541_v61 = vor.u32 %v11464_v18, %v10540_v5  ;;  %v10105_v43 = vor.u32 %v11345_v58, %v10102_v29  ;;  %v10038_v50 = vld [vmem:[%s14734_s9 + $0x378] sm:$0xf0]  ;;  %v9844_v29 = vld [vmem:[%s14734_s9 + $0x1b8] sm:$0xf] }
 0x43f   :  { %6900 = vmatpush.bf16.msra.mxu2 %v10097_v24  ;;  %6839 = vmatpush.bf16.msrb.mxu1 %v10341_v28  ;;  %v14191_v19 = vpop.f32.mrf.mxu2  ;;  %v5250_v24 = vperm.slane %v14211_v51, 0  ;;  %v9708_v28 = vld [vmem:[%s14734_s9 + $0xb0] sm:$0xf]  ;;  %v10041_v59 = vor.u32 %v11329_v22, %v10038_v50  ;;  %v9780_v22 = vld [vmem:[%s14734_s9 + $0x138] sm:$0xf] }
 0x440   :  { %6865 = vmatpush.bf16.msrb.mxu3 %v10345_v32  ;;  %v11256_v32 = vld [vmem:[%s14734_s9 + $0xec] sm:$0xf0]  ;;  %v11273_v50 = vld [vmem:[%s14734_s9 + $0x174] sm:$0xf0] }
 0x441   :  { %v6573_v20 = vpop.f32.mrf.mxu0  ;;  %v6572_v26 = vadd.f32 %v14144_v30, %v5250_v24  ;;  %v11400_v24 = vld [vmem:[%s14734_s9 + $0x56c] sm:$0xf0] }
 0x442   :  { %6875 = vmatpush.bf16.msra.mxu0 %v10029_v47  ;;  %v10476_v47 = vld [vmem:[%s14734_s9 + $0x6b0] sm:$0xf]  ;;  %v10036_v20 = vld [vmem:[%s14734_s9 + $0x338] sm:$0xf] }
 0x443   :  { %6901 = vmatpush.bf16.msra.mxu2 %v10033_v13  ;;  %6840 = vmatpush.bf16.msrb.mxu1 %v10277_v46  ;;  %v11248_v13 = vld [vmem:[%s14734_s9 + $0xb4] sm:$0xf]  ;;  %v9709_v46 = vor.u32 %v11256_v32, %v9708_v28  ;;  %v10477_v30 = vor.u32 %v11448_v12, %v10476_v47  ;;  %v5252_v28 = vperm.slane %v14211_v51, 2  ;;  %v11313_v32 = vld [vmem:[%s14734_s9 + $0x2bc] sm:$0xf] }
 0x444   :  { %6866 = vmatpush.bf16.msrb.mxu3 %v10281_v1  ;;  %v9713_v62 = vor.u32 %v11248_v13, %v9710_v38  ;;  %v9974_v47 = vld [vmem:[%s14734_s9 + $0x2f8] sm:$0xf0]  ;;  %v10220_v38 = vld [vmem:[%s14734_s9 + $0x4b0] sm:$0xf] }
 0x445   :  { %v9977_v42 = vor.u32 %v11313_v32, %v9974_v47 }
 0x446   :  { %6876 = vmatpush.bf16.msra.mxu0 %v9965_v10  ;;  %v9644_v10 = vld [vmem:[%s14734_s9 + $0x30] sm:$0xf] }
 0x447   :  { %6902 = vmatpush.bf16.msra.mxu2 %v9969_v48  ;;  %6841 = vmatpush.bf16.msrb.mxu1 %v10213_v16  ;;  %v6599_v36 = vpop.f32.mrf.mxu2  ;;  %v11240_v48 = vld [vmem:[%s14734_s9 + $0x6c] sm:$0xf0]  ;;  %v11424_v16 = vld [vmem:[%s14734_s9 + $0x634] sm:$0xf] }
 0x448   :  { %6867 = vmatpush.bf16.msrb.mxu3 %v10217_v8  ;;  %v10100_v8 = vld [vmem:[%s14734_s9 + $0x3b8] sm:$0xf]  ;;  %v9645_v56 = vor.u32 %v11240_v48, %v9644_v10  ;;  %v10417_v2 = vor.u32 %v11424_v16, %v10414_v60  ;;  %v9910_v48 = vld [vmem:[%s14734_s9 + $0x278] sm:$0xf0] }
 0x449   :  { %v6584_v1 = vpop.f32.mrf.mxu1  ;;  %v11305_v10 = vld [vmem:[%s14734_s9 + $0x274] sm:$0xf0] }
 0x44a   :  { %6877 = vmatpush.bf16.msra.mxu0 %v9901_v52  ;;  %v14269_v39 = vadd.f32 %v6584_v1, %v6572_v26  ;;  %v14271_v41 = vpop.f32.mrf.mxu0  ;;  %v11353_v52 = vld [vmem:[%s14734_s9 + $0x3f4] sm:$0xf0]  ;;  %v11384_v26 = vld [vmem:[%s14734_s9 + $0x4ec] sm:$0xf0] }
 0x44b   :  { %6903 = vmatpush.bf16.msra.mxu2 %v9905_v34  ;;  %6842 = vmatpush.bf16.msrb.mxu1 %v10149_v15  ;;  %v6598_v34 = vadd.f32 %v14191_v19, %v5251_v44  ;;  %v10101_v7 = vor.u32 %v11353_v52, %v10100_v8  ;;  %v11416_v15 = vld [vmem:[%s14734_s9 + $0x5ec] sm:$0xf0]  ;;  %v11408_v19 = vld [vmem:[%s14734_s9 + $0x5b4] sm:$0xf]  ;;  %v9908_v1 = vld [vmem:[%s14734_s9 + $0x238] sm:$0xf]  ;;  %v10221_v21 = vor.u32 %v11384_v26, %v10220_v38 }
 0x44c   :  { %6868 = vmatpush.bf16.msrb.mxu3 %v10153_v40  ;;  %v10349_v5 = vor.u32 %v11416_v15, %v10348_v14  ;;  %v9909_v60 = vor.u32 %v11305_v10, %v9908_v1  ;;  %v11368_v8 = vld [vmem:[%s14734_s9 + $0x46c] sm:$0xf0]  ;;  %v11360_v52 = vld [vmem:[%s14734_s9 + $0x434] sm:$0xf]  ;;  %v11473_v14 = vld [vmem:[%s14734_s9 + $0x7bc] sm:$0xf] }
 0x44d   :  { %v10614_v15 = vld [vmem:[%s14734_s9 + $0x7f8] sm:$0xf0]  ;;  %v11449_v38 = vld [vmem:[%s14734_s9 + $0x6f4] sm:$0xf0] }
 0x44e   :  { %6878 = vmatpush.bf16.msra.mxu0 %v9837_v17  ;;  %6843 = vmatmul.bf16.vlgmr.msrb.gmra.mxu1 %v13411_v53  ;;  %v10350_v17 = vld [vmem:[%s14734_s9 + $0x5f0] sm:$0xf0]  ;;  %v11249_v26 = vld [vmem:[%s14734_s9 + $0xbc] sm:$0xf] }
 0x44f   :  { %6887 = vmatpush.bf16.msra.mxu1 %v10605_v45  ;;  %6904 = vmatpush.bf16.msra.mxu2 %v9841_v63  ;;  %v6610_v11 = vpop.f32.mrf.mxu3  ;;  %v11337_v45 = vld [vmem:[%s14734_s9 + $0x374] sm:$0xf0]  ;;  %v10353_v18 = vor.u32 %v11408_v19, %v10350_v17 }
 0x450   :  { %6913 = vmatpush.bf16.msra.mxu3 %v10609_v25  ;;  %v14316_v31 = vadd.f32 %v6610_v11, %v6598_v34  ;;  %v14318_v40 = vpop.f32.mrf.mxu2  ;;  %v10037_v23 = vor.u32 %v11337_v45, %v10036_v20  ;;  %v11289_v34 = vld [vmem:[%s14734_s9 + $0x1f4] sm:$0xf0]  ;;  %v10157_v11 = vor.u32 %v11368_v8, %v10156_v55 }
 0x451   :  { %6869 = vmatmul.bf16.vlgmr.msrb.gmra.mxu3 %v13411_v53  ;;  %v6586_v63 = vpop.f32.mrf.mxu1  ;;  %v6650_v19 = vadd.f32 %v14318_v40, %v5253_v9  ;;  %v9845_v17 = vor.u32 %v11289_v34, %v9844_v29  ;;  %v10548_v40 = vld [vmem:[%s14734_s9 + $0x738] sm:$0xf]  ;;  %v5255_v34 = vperm.slane %v14211_v51, 5 }
 0x452   :  { %6879 = vmatpush.bf16.msra.mxu0 %v9773_v49  ;;  %v6625_v25 = vpop.f32.mrf.mxu0  ;;  %v10286_v49 = vld [vmem:[%s14734_s9 + $0x570] sm:$0xf0]  ;;  %v10420_v9 = vld [vmem:[%s14734_s9 + $0x638] sm:$0xf] }
 0x453   :  { %6888 = vmatpush.bf16.msra.mxu1 %v10541_v61  ;;  %6905 = vmatpush.bf16.msra.mxu2 %v9777_v37  ;;  %v9972_v61 = vld [vmem:[%s14734_s9 + $0x2b8] sm:$0xf]  ;;  %v10289_v36 = vor.u32 %v11392_v27, %v10286_v49  ;;  %v10550_v49 = vld [vmem:[%s14734_s9 + $0x778] sm:$0xf0] }
 0x454   :  { %6914 = vmatpush.bf16.msra.mxu3 %v10545_v3  ;;  %v11321_v37 = vld [vmem:[%s14734_s9 + $0x2f4] sm:$0xf0]  ;;  %v10285_v3 = vor.u32 %v11400_v24, %v10284_v0  ;;  %v9782_v0 = vld [vmem:[%s14734_s9 + $0x178] sm:$0xf0] }
 0x455   :  { %v9973_v12 = vor.u32 %v11321_v37, %v9972_v61  ;;  %v5254_v61 = vperm.slane %v14211_v51, 4  ;;  %v11433_v55 = vld [vmem:[%s14734_s9 + $0x674] sm:$0xf0] }
 0x456   :  { %6880 = vmatpush.bf16.msra.mxu0 %v9709_v46  ;;  %v10222_v46 = vld [vmem:[%s14734_s9 + $0x4f0] sm:$0xf0] }
 0x457   :  { %6889 = vmatpush.bf16.msra.mxu1 %v10477_v30  ;;  %6906 = vmatpush.bf16.msra.mxu2 %v9713_v62  ;;  %v6612_v13 = vpop.f32.mrf.mxu3  ;;  %v6624_v30 = vadd.f32 %v14271_v41, %v5252_v28  ;;  %v11297_v62 = vld [vmem:[%s14734_s9 + $0x23c] sm:$0xf]  ;;  %v10225_v41 = vor.u32 %v11376_v33, %v10222_v46  ;;  %v9781_v28 = vor.u32 %v11273_v50, %v9780_v22 }
 0x458   :  { %6915 = vmatpush.bf16.msra.mxu3 %v10481_v54  ;;  %v6651_v44 = vpop.f32.mrf.mxu2  ;;  %v9913_v58 = vor.u32 %v11297_v62, %v9910_v48  ;;  %v9718_v33 = vld [vmem:[%s14734_s9 + $0xf8] sm:$0xf0]  ;;  %v9652_v62 = vld [vmem:[%s14734_s9 + $0x38] sm:$0xf] }
 0x459   :  { %v6636_v54 = vpop.f32.mrf.mxu1  ;;  %v10486_v44 = vld [vmem:[%s14734_s9 + $0x6f8] sm:$0xf0]  ;;  %v9721_v10 = vor.u32 %v11249_v26, %v9718_v33  ;;  %v11241_v48 = vld [vmem:[%s14734_s9 + $0x74] sm:$0xf0]  ;;  %v5256_v26 = vperm.slane %v14211_v51, 6 }
 0x45a   :  { %6881 = vmatpush.bf16.msra.mxu0 %v9645_v56  ;;  %v14391_v57 = vadd.f32 %v6636_v54, %v6624_v30  ;;  %v14393_v16 = vpop.f32.mrf.mxu0  ;;  %v10158_v56 = vld [vmem:[%s14734_s9 + $0x470] sm:$0xf0]  ;;  %v9653_v29 = vor.u32 %v11241_v48, %v9652_v62 }
 0x45b   :  { %6890 = vmatpush.bf16.msra.mxu1 %v10413_v4  ;;  %6907 = vmatpush.bf16.msra.mxu2 %v9649_v6  ;;  %v10612_v4 = vld [vmem:[%s14734_s9 + $0x7b8] sm:$0xf] }
 0x45c   :  { %6916 = vmatpush.bf16.msra.mxu3 %v10417_v2  ;;  %v11481_v6 = vld [vmem:[%s14734_s9 + $0x7f4] sm:$0xf0]  ;;  %v11281_v2 = vld [vmem:[%s14734_s9 + $0x1bc] sm:$0xf] }
 0x45d   :  { %6882 = vmatmul.bf16.vlgmr.msra.gmra.mxu0 %v13345_v35  ;;  %v10613_v20 = vor.u32 %v11481_v6, %v10612_v4  ;;  %v10421_v4 = vor.u32 %v11433_v55, %v10420_v9 }
 0x45e   :  { %6926 = vmatpush.bf16.msrb.mxu0 %v10101_v7  ;;  %6908 = vmatmul.bf16.vlgmr.msra.gmra.mxu2 %v13345_v35  ;;  %v9846_v7 = vld [vmem:[%s14734_s9 + $0x1f8] sm:$0xf0] }
 0x45f   :  { %6952 = vmatpush.bf16.msrb.mxu2 %v10105_v43  ;;  %6891 = vmatpush.bf16.msra.mxu1 %v10349_v5  ;;  %v10161_v43 = vor.u32 %v11360_v52, %v10158_v56  ;;  %v9849_v45 = vor.u32 %v11281_v2, %v9846_v7  ;;  %v6662_v63 = vpop.f32.mrf.mxu3  ;;  %v10617_v5 = vor.u32 %v11473_v14, %v10614_v15  ;;  %v10422_v56 = vld [vmem:[%s14734_s9 + $0x678] sm:$0xf0]  ;;  %v10356_v7 = vld [vmem:[%s14734_s9 + $0x5b8] sm:$0xf] }
 0x460   :  { %6917 = vmatpush.bf16.msra.mxu3 %v10353_v18  ;;  %v14438_v25 = vadd.f32 %v6662_v63, %v6650_v19  ;;  %v11465_v18 = vld [vmem:[%s14734_s9 + $0x774] sm:$0xf0]  ;;  %v11409_v14 = vld [vmem:[%s14734_s9 + $0x5bc] sm:$0xf] }
 0x461   :  { %v6638_v27 = vpop.f32.mrf.mxu1  ;;  %v10549_v32 = vor.u32 %v11465_v18, %v10548_v40  ;;  %v10358_v15 = vld [vmem:[%s14734_s9 + $0x5f8] sm:$0xf0]  ;;  %v11401_v63 = vld [vmem:[%s14734_s9 + $0x574] sm:$0xf0] }
 0x462   :  { %6927 = vmatpush.bf16.msrb.mxu0 %v10037_v23  ;;  %v11265_v23 = vld [vmem:[%s14734_s9 + $0x13c] sm:$0xf]  ;;  %v6677_v37 = vpop.f32.mrf.mxu0 }
 0x463   :  { %6953 = vmatpush.bf16.msrb.mxu2 %v10041_v59  ;;  %6892 = vmatpush.bf16.msra.mxu1 %v10285_v3  ;;  %v6701_v24 = vpop.f32.mrf.mxu2  ;;  %v11457_v59 = vld [vmem:[%s14734_s9 + $0x73c] sm:$0xf]  ;;  %v9785_v47 = vor.u32 %v11265_v23, %v9782_v0  ;;  %v9716_v3 = vld [vmem:[%s14734_s9 + $0xb8] sm:$0xf] }
 0x464   :  { %6918 = vmatpush.bf16.msra.mxu3 %v10289_v36  ;;  %v11257_v36 = vld [vmem:[%s14734_s9 + $0xf4] sm:$0xf0]  ;;  %v10553_v13 = vor.u32 %v11457_v59, %v10550_v49  ;;  %v6702_v19 = vadd.f32 %v6701_v24, %v5255_v34  ;;  %v11393_v40 = vld [vmem:[%s14734_s9 + $0x53c] sm:$0xf] }
 0x465   :  { %v9717_v46 = vor.u32 %v11257_v36, %v9716_v3  ;;  %v10228_v0 = vld [vmem:[%s14734_s9 + $0x4b8] sm:$0xf]  ;;  %v11377_v27 = vld [vmem:[%s14734_s9 + $0x4bc] sm:$0xf] }
 0x466   :  { %6928 = vmatpush.bf16.msrb.mxu0 %v9973_v12  ;;  %v10484_v12 = vld [vmem:[%s14734_s9 + $0x6b8] sm:$0xf]  ;;  %v10166_v3 = vld [vmem:[%s14734_s9 + $0x478] sm:$0xf0] }
 0x467   :  { %6954 = vmatpush.bf16.msrb.mxu2 %v9977_v42  ;;  %6893 = vmatpush.bf16.msra.mxu1 %v10221_v21  ;;  %v11441_v42 = vld [vmem:[%s14734_s9 + $0x6bc] sm:$0xf]  ;;  %v10485_v1 = vor.u32 %v11449_v38, %v10484_v12  ;;  %v6664_v30 = vpop.f32.mrf.mxu3  ;;  %v6676_v21 = vadd.f32 %v14393_v16, %v5254_v61  ;;  %v11385_v24 = vld [vmem:[%s14734_s9 + $0x4f4] sm:$0xf0] }
 0x468   :  { %6919 = vmatpush.bf16.msra.mxu3 %v10225_v41  ;;  %v10489_v54 = vor.u32 %v11441_v42, %v10486_v44  ;;  %v11233_v41 = vld [vmem:[%s14734_s9 + $0x3c] sm:$0xf]  ;;  %v10229_v49 = vor.u32 %v11385_v24, %v10228_v0 }
 0x469   :  { %v11425_v16 = vld [vmem:[%s14734_s9 + $0x63c] sm:$0xf] }
 0x46a   :  { %6929 = vmatpush.bf16.msrb.mxu0 %v9909_v60  ;;  %v9654_v60 = vld [vmem:[%s14734_s9 + $0x78] sm:$0xf0]  ;;  %v6688_v52 = vpop.f32.mrf.mxu1  ;;  %v10425_v2 = vor.u32 %v11425_v16, %v10422_v56 }
 0x46b   :  { %6955 = vmatpush.bf16.msrb.mxu2 %v9913_v58  ;;  %6894 = vmatpush.bf16.msra.mxu1 %v10157_v11  ;;  %v6703_v8 = vpop.f32.mrf.mxu2  ;;  %v14507_v58 = vadd.f32 %v6688_v52, %v6676_v21  ;;  %v9657_v6 = vor.u32 %v11233_v41, %v9654_v60  ;;  %v11417_v11 = vld [vmem:[%s14734_s9 + $0x5f4] sm:$0xf0] }
 0x46c   :  { %6920 = vmatpush.bf16.msra.mxu3 %v10161_v43  ;;  %v10357_v43 = vor.u32 %v11417_v11, %v10356_v7 }
 0x46e   :  { %6930 = vmatpush.bf16.msrb.mxu0 %v9845_v17  ;;  %6895 = vmatmul.bf16.vlgmr.msra.gmra.mxu1 %v13411_v53  ;;  %v10361_v17 = vor.u32 %v11409_v14, %v10358_v15 }
 0x46f   :  { %6939 = vmatpush.bf16.msrb.mxu1 %v10613_v20  ;;  %6956 = vmatpush.bf16.msrb.mxu2 %v9849_v45  ;;  %v10292_v45 = vld [vmem:[%s14734_s9 + $0x538] sm:$0xf] }
 0x470   :  { %6965 = vmatpush.bf16.msrb.mxu3 %v10617_v5  ;;  %v10294_v5 = vld [vmem:[%s14734_s9 + $0x578] sm:$0xf0]  ;;  %v10293_v18 = vor.u32 %v11401_v63, %v10292_v45 }
 0x471   :  { %6921 = vmatmul.bf16.vlgmr.msra.gmra.mxu3 %v13411_v53  ;;  %v10297_v23 = vor.u32 %v11393_v40, %v10294_v5 }
 0x472   :  { %6931 = vmatpush.bf16.msrb.mxu0 %v9781_v28  ;;  %v6690_v50 = vpop.f32.mrf.mxu1  ;;  %v10164_v28 = vld [vmem:[%s14734_s9 + $0x438] sm:$0xf] }
 0x473   :  { %6940 = vmatpush.bf16.msrb.mxu1 %v10549_v32  ;;  %6957 = vmatpush.bf16.msrb.mxu2 %v9785_v47  ;;  %v6714_v20 = vpop.f32.mrf.mxu3  ;;  %v11369_v32 = vld [vmem:[%s14734_s9 + $0x474] sm:$0xf0]  ;;  %v11361_v47 = vld [vmem:[%s14734_s9 + $0x43c] sm:$0xf] }
 0x474   :  { %6966 = vmatpush.bf16.msrb.mxu3 %v10553_v13  ;;  %v14529_v22 = vadd.f32 %v6714_v20, %v6702_v19  ;;  %v10165_v36 = vor.u32 %v11369_v32, %v10164_v28  ;;  %v10169_v12 = vor.u32 %v11361_v47, %v10166_v3 }
 0x476   :  { %6932 = vmatpush.bf16.msrb.mxu0 %v9717_v46 }
 0x477   :  { %6941 = vmatpush.bf16.msrb.mxu1 %v10485_v1  ;;  %6958 = vmatpush.bf16.msrb.mxu2 %v9721_v10  ;;  %v5257_v1 = vperm.slane %v14211_v51, 7 }
 0x478   :  { %6967 = vmatpush.bf16.msrb.mxu3 %v10489_v54 }
 0x47a   :  { %6933 = vmatpush.bf16.msrb.mxu0 %v9653_v29  ;;  %v6727_v59 = vpop.f32.mrf.mxu0 }
 0x47b   :  { %6942 = vmatpush.bf16.msrb.mxu1 %v10421_v4  ;;  %6959 = vmatpush.bf16.msrb.mxu2 %v9657_v6  ;;  %v6716_v37 = vpop.f32.mrf.mxu3  ;;  %v6728_v42 = vadd.f32 %v6727_v59, %v5256_v26 }
 0x47c   :  { %6968 = vmatpush.bf16.msrb.mxu3 %v10425_v2 }
 0x47d   :  { %6934 = vmatmul.bf16.vlgmr.msrb.gmra.mxu0 %v13345_v35 }
 0x47e   :  { %6960 = vmatmul.bf16.vlgmr.msrb.gmra.mxu2 %v13345_v35  ;;  %v10230_v35 = vld [vmem:[%s14734_s9 + $0x4f8] sm:$0xf0] }
 0x47f   :  { %6943 = vmatpush.bf16.msrb.mxu1 %v10357_v43  ;;  %v10233_v61 = vor.u32 %v11377_v27, %v10230_v35 }
 0x480   :  { %6969 = vmatpush.bf16.msrb.mxu3 %v10361_v17 }
 0x481   :  { %v6753_v13 = vpop.f32.mrf.mxu2 }
 0x482   :  { %v6729_v38 = vpop.f32.mrf.mxu0  ;;  %v6754_v10 = vadd.f32 %v6753_v13, %v5257_v1  ;;  %v6978_v1 = vmax.f32 %v14269_v39, %v14507_v58 }
 0x483   :  { %6944 = vmatpush.bf16.msrb.mxu1 %v10293_v18  ;;  %v6979_v38 = vmax.f32 %v14316_v31, %v14529_v22 }
 0x484   :  { %6970 = vmatpush.bf16.msrb.mxu3 %v10297_v23 }
 0x487   :  { %6945 = vmatpush.bf16.msrb.mxu1 %v10229_v49 }
 0x488   :  { %6971 = vmatpush.bf16.msrb.mxu3 %v10233_v61 }
 0x489   :  { %v6755_v33 = vpop.f32.mrf.mxu2 }
 0x48b   :  { %6946 = vmatpush.bf16.msrb.mxu1 %v10165_v36  ;;  %v6740_v44 = vpop.f32.mrf.mxu1 }
 0x48c   :  { %6972 = vmatpush.bf16.msrb.mxu3 %v10169_v12  ;;  %v14565_v46 = vadd.f32 %v6740_v44, %v6728_v42 }
 0x48e   :  { %6947 = vmatmul.bf16.vlgmr.msrb.gmra.mxu1 %v13411_v53 }
 0x48f   :  { %6973 = vmatmul.bf16.vlgmr.msrb.gmra.mxu3 %v13411_v53  ;;  %v5247_v53 = vld [vmem:[%s14735_s10 + $0x8] sm:$0xff] }
 0x490   :  { %v5258_v41 = vperm.slane %v5247_v53, 0  ;;  %v5259_v51 = vperm.slane %v5247_v53, 1  ;;  %v5260_v14 = vperm.slane %v5247_v53, 2  ;;  %v5261_v61 = vperm.slane %v5247_v53, 3 }
 0x491   :  { %v5263_v37 = vperm.slane %v5247_v53, 5  ;;  %v5262_v32 = vperm.slane %v5247_v53, 4  ;;  %v5264_v47 = vperm.slane %v5247_v53, 6  ;;  %v5265_v13 = vperm.slane %v5247_v53, 7 }
 0x493   :  { %v6742_v48 = vpop.f32.mrf.mxu1 }
 0x494   :  { %v6766_v30 = vpop.f32.mrf.mxu3 }
 0x495   :  { %v14568_v62 = vadd.f32 %v6766_v30, %v6754_v10  ;;  %v6980_v10 = vmax.f32 %v14391_v57, %v14565_v46 }
 0x497   :  { %v6981_v30 = vmax.f32 %v14438_v25, %v14568_v62 }
 0x49a   :  { %v6779_v9 = vpop.f32.mrf.mxu0 }
 0x49b   :  { %v6780_v8 = vadd.f32 %v6779_v9, %v5258_v41 }
 0x49c   :  { %v6768_v21 = vpop.f32.mrf.mxu3 }
 0x4a1   :  { %v6805_v54 = vpop.f32.mrf.mxu2 }
 0x4a2   :  { %v6781_v55 = vpop.f32.mrf.mxu0  ;;  %v6806_v56 = vadd.f32 %v6805_v54, %v5259_v51 }
 0x4a9   :  { %v6807_v60 = vpop.f32.mrf.mxu2 }
 0x4ab   :  { %v6792_v52 = vpop.f32.mrf.mxu1 }
 0x4ac   :  { %v14573_v16 = vadd.f32 %v6792_v52, %v6780_v8 }
 0x4ae   :  { %v6982_v55 = vmax.f32 %v6978_v1, %v14573_v16 }
 0x4b3   :  { %v6794_v4 = vpop.f32.mrf.mxu1 }
 0x4b4   :  { %v6818_v29 = vpop.f32.mrf.mxu3 }
 0x4b5   :  { %v14575_v34 = vadd.f32 %v6818_v29, %v6806_v56 }
 0x4b7   :  { %v6983_v48 = vmax.f32 %v6979_v38, %v14575_v34 }
 0x4ba   :  { %v6831_v6 = vpop.f32.mrf.mxu0 }
 0x4bb   :  { %v6832_v19 = vadd.f32 %v6831_v6, %v5260_v14 }
 0x4bc   :  { %v6820_v2 = vpop.f32.mrf.mxu3 }
 0x4c1   :  { %v6857_v7 = vpop.f32.mrf.mxu2 }
 0x4c2   :  { %v6833_v11 = vpop.f32.mrf.mxu0  ;;  %v6858_v36 = vadd.f32 %v6857_v7, %v5261_v61 }
 0x4c9   :  { %v6859_v15 = vpop.f32.mrf.mxu2 }
 0x4cb   :  { %v6844_v43 = vpop.f32.mrf.mxu1 }
 0x4cc   :  { %v14577_v17 = vadd.f32 %v6844_v43, %v6832_v19 }
 0x4ce   :  { %v6984_v41 = vmax.f32 %v6980_v10, %v14577_v17 }
 0x4d3   :  { %v6846_v45 = vpop.f32.mrf.mxu1 }
 0x4d4   :  { %v6870_v20 = vpop.f32.mrf.mxu3 }
 0x4d5   :  { %v6871_v26 = vadd.f32 %v6870_v20, %v6858_v36 }
 0x4d7   :  { %v6985_v60 = vmax.f32 %v6981_v30, %v6871_v26 }
 0x4da   :  { %v6883_v63 = vpop.f32.mrf.mxu0 }
 0x4db   :  { %v6884_v33 = vadd.f32 %v6883_v63, %v5262_v32 }
 0x4dc   :  { %v6872_v50 = vpop.f32.mrf.mxu3 }
 0x4e1   :  { %v6909_v40 = vpop.f32.mrf.mxu2 }
 0x4e2   :  { %v6885_v5 = vpop.f32.mrf.mxu0  ;;  %v6910_v12 = vadd.f32 %v6909_v40, %v5263_v37 }
 0x4e9   :  { %v6911_v18 = vpop.f32.mrf.mxu2 }
 0x4eb   :  { %v6896_v23 = vpop.f32.mrf.mxu1 }
 0x4ec   :  { %v6897_v9 = vadd.f32 %v6896_v23, %v6884_v33 }
 0x4ee   :  { %v6986_v56 = vmax.f32 %v6982_v55, %v6897_v9 }
 0x4f3   :  { %v6898_v24 = vpop.f32.mrf.mxu1 }
 0x4f4   :  { %v6922_v0 = vpop.f32.mrf.mxu3 }
 0x4f5   :  { %v14581_v42 = vadd.f32 %v6922_v0, %v6910_v12 }
 0x4f7   :  { %v6987_v8 = vmax.f32 %v6983_v48, %v14581_v42 }
 0x4f9   :  { %v6990_v6 = vmax.f32 %v6986_v56, %v6987_v8 }
 0x4fa   :  { %v6935_v27 = vpop.f32.mrf.mxu0 }
 0x4fb   :  { %v6936_v44 = vadd.f32 %v6935_v27, %v5264_v47 }
 0x4fc   :  { %v6924_v35 = vpop.f32.mrf.mxu3 }
 0x501   :  { %v6961_v59 = vpop.f32.mrf.mxu2 }
 0x502   :  { %v6937_v49 = vpop.f32.mrf.mxu0  ;;  %v6962_v21 = vadd.f32 %v6961_v59, %v5265_v13 }
 0x509   :  { %v6963_v28 = vpop.f32.mrf.mxu2 }
 0x50b   :  { %v6948_v3 = vpop.f32.mrf.mxu1 }
 0x50c   :  { %v14590_v54 = vadd.f32 %v6948_v3, %v6936_v44 }
 0x50e   :  { %v6988_v29 = vmax.f32 %v6984_v41, %v14590_v54 }
 0x512   :  { %v6974_v53 = vpop.f32.mrf.mxu3 }
 0x513   :  { %v14595_v52 = vadd.f32 %v6974_v53, %v6962_v21  ;;  %v6950_v51 = vpop.f32.mrf.mxu1 }
 0x515   :  { %v6989_v4 = vmax.f32 %v6985_v60, %v14595_v52 }
 0x517   :  { %v6991_v2 = vmax.f32 %v6988_v29, %v6989_v4 }
 0x519   :  { %v6992_v7 = vmax.f32 %v6990_v6, %v6991_v2 }
 0x51a   :  { %v6976_v11 = vpop.f32.mrf.mxu3 }
 0x51b   :  { %6993 = vmax.xlane.f32.xlu0 %v6992_v7 }
 0x58e   :  { %v6994_v14 = vpop.xlane.xlu0 %6993 }
 0x58f   :  { %v14600_v15 = vsub.f32 %v14269_v39, %v6994_v14  ;;  %v14603_v19 = vsub.f32 %v14316_v31, %v6994_v14  ;;  %v14606_v43 = vsub.f32 %v14391_v57, %v6994_v14  ;;  %v14609_v20 = vsub.f32 %v14438_v25, %v6994_v14 }
 0x590   :  { %v14614_v50 = vsub.f32 %v14507_v58, %v6994_v14  ;;  %v14618_v39 = vsub.f32 %v14529_v22, %v6994_v14  ;;  %v14622_v57 = vsub.f32 %v14565_v46, %v6994_v14  ;;  %v14626_v5 = vsub.f32 %v14568_v62, %v6994_v14 }
 0x591   :  { %v7011_v45 = vmul.f32 1.442695, %v14600_v15  ;;  %v7013_v63 = vmul.f32 1.442695, %v14603_v19  ;;  %v7015_v40 = vmul.f32 1.442695, %v14606_v43  ;;  %v14630_v22 = vsub.f32 %v14573_v16, %v6994_v14 }
 0x592   :  { %v7017_v31 = vmul.f32 1.442695, %v14609_v20  ;;  %v7019_v25 = vmul.f32 1.442695, %v14614_v50  ;;  %v7021_v58 = vmul.f32 1.442695, %v14618_v39  ;;  %v14634_v27 = vsub.f32 %v14575_v34, %v6994_v14 }
 0x593   :  { %11494 = vpow2.f32 %v7011_v45  ;;  %v7023_v0 = vmul.f32 1.442695, %v14622_v57  ;;  %v7025_v62 = vmul.f32 1.442695, %v14626_v5  ;;  %v14638_v49 = vsub.f32 %v14577_v17, %v6994_v14 }
 0x594   :  { %11496 = vpow2.f32 %v7013_v63  ;;  %v7027_v16 = vmul.f32 1.442695, %v14630_v22  ;;  %v14641_v28 = vsub.f32 %v6871_v26, %v6994_v14  ;;  %v7029_v32 = vmul.f32 1.442695, %v14634_v27 }
 0x595   :  { %11498 = vpow2.f32 %v7015_v40  ;;  %v14644_v3 = vsub.f32 %v6897_v9, %v6994_v14  ;;  %v7031_v36 = vmul.f32 1.442695, %v14638_v49  ;;  %v14648_v13 = vsub.f32 %v14581_v42, %v6994_v14 }
 0x596   :  { %11500 = vpow2.f32 %v7017_v31  ;;  %v7033_v38 = vmul.f32 1.442695, %v14641_v28  ;;  %v14652_v44 = vsub.f32 %v14590_v54, %v6994_v14  ;;  %v14656_v48 = vsub.f32 %v14595_v52, %v6994_v14 }
 0x597   :  { %11502 = vpow2.f32 %v7019_v25  ;;  %v7035_v1 = vmul.f32 1.442695, %v14644_v3  ;;  %v7037_v42 = vmul.f32 1.442695, %v14648_v13  ;;  %v7078_v40 = vlaneseq }
 0x598   :  { %11504 = vpow2.f32 %v7021_v58  ;;  %v7039_v55 = vmul.f32 1.442695, %v14652_v44  ;;  %v7041_v54 = vmul.f32 1.442695, %v14656_v48 }
 0x599   :  { %v11495_v18 = vpop.eup %11494  ;;  %11506 = vpow2.f32 %v7023_v0  ;;  %v7079_v0 = vand.u32 127, %v7078_v40 }
 0x59a   :  { %v11497_v23 = vpop.eup %11496  ;;  %11508 = vpow2.f32 %v7025_v62  ;;  %v7114_v62 = vpop.permute.xlu1 %7113 }
 0x59b   :  { %v7043_v24 = vadd.f32 %v11497_v23, %v11495_v18  ;;  %v11499_v46 = vpop.eup %11498  ;;  %11510 = vpow2.f32 %v7027_v16 }
 0x59c   :  { %v11501_v59 = vpop.eup %11500  ;;  %11512 = vpow2.f32 %v7029_v32 }
 0x59d   :  { %v7044_v35 = vadd.f32 %v11499_v46, %v7043_v24  ;;  %v11503_v37 = vpop.eup %11502  ;;  %11514 = vpow2.f32 %v7031_v36 }
 0x59e   :  { %v11505_v47 = vpop.eup %11504  ;;  %11516 = vpow2.f32 %v7033_v38 }
 0x59f   :  { %v7045_v61 = vadd.f32 %v11501_v59, %v7044_v35  ;;  %v11507_v17 = vpop.eup %11506  ;;  %11518 = vpow2.f32 %v7035_v1 }
 0x5a0   :  { %v11509_v33 = vpop.eup %11508  ;;  %11520 = vpow2.f32 %v7037_v42 }
 0x5a1   :  { %v7046_v34 = vadd.f32 %v11503_v37, %v7045_v61  ;;  %v11511_v30 = vpop.eup %11510  ;;  %11522 = vpow2.f32 %v7039_v55 }
 0x5a2   :  { %v11513_v21 = vpop.eup %11512  ;;  %11524 = vpow2.f32 %v7041_v54 }
 0x5a3   :  { %v7047_v12 = vadd.f32 %v11505_v47, %v7046_v34  ;;  %v11515_v41 = vpop.eup %11514 }
 0x5a4   :  { %v11517_v8 = vpop.eup %11516 }
 0x5a5   :  { %v7048_v26 = vadd.f32 %v11507_v17, %v7047_v12  ;;  %v11519_v56 = vpop.eup %11518 }
 0x5a6   :  { %v11521_v29 = vpop.eup %11520 }
 0x5a7   :  { %v7049_v10 = vadd.f32 %v11509_v33, %v7048_v26  ;;  %v11523_v6 = vpop.eup %11522 }
 0x5a8   :  { %v11525_v7 = vpop.eup %11524 }
 0x5a9   :  { %v7050_v9 = vadd.f32 %v11511_v30, %v7049_v10 }
 0x5ab   :  { %v7051_v53 = vadd.f32 %v11513_v21, %v7050_v9 }
 0x5ad   :  { %v7052_v60 = vadd.f32 %v11515_v41, %v7051_v53 }
 0x5af   :  { %v7053_v51 = vadd.f32 %v11517_v8, %v7052_v60 }
 0x5b1   :  { %v7054_v52 = vadd.f32 %v11519_v56, %v7053_v51 }
 0x5b3   :  { %v7055_v4 = vadd.f32 %v11521_v29, %v7054_v52 }
 0x5b5   :  { %v7056_v2 = vadd.f32 %v11523_v6, %v7055_v4 }
 0x5b7   :  { %v7057_v11 = vadd.f32 %v11525_v7, %v7056_v2 }
 0x5b9   :  { %7058 = vadd.xlane.f32.xlu0 %v7057_v11 }
 0x62c   :  { %v7059_v14 = vpop.xlane.xlu0 %7058 }
 0x62d   :  { %11526 = vlog2.f32 %v7059_v14 }
 0x633   :  { %v11527_v45 = vpop.eup %11526 }
 0x634   :  { %v7061_v63 = vmul.f32 0.6931472, %v11527_v45 }
 0x636   :  { %v7062_v31 = vsub.f32 %v14600_v15, %v7061_v63  ;;  %v7063_v25 = vsub.f32 %v14603_v19, %v7061_v63  ;;  %v7064_v58 = vsub.f32 %v14606_v43, %v7061_v63  ;;  %v7065_v18 = vsub.f32 %v14609_v20, %v7061_v63 }
 0x637   :  { %v7066_v23 = vsub.f32 %v14614_v50, %v7061_v63  ;;  %v7067_v24 = vsub.f32 %v14618_v39, %v7061_v63  ;;  %v7068_v15 = vsub.f32 %v14622_v57, %v7061_v63  ;;  %v7069_v19 = vsub.f32 %v14626_v5, %v7061_v63 }
 0x638   :  { %7132 = vst [vmem:[%s14736_s11] sm:$0xff] %v7062_v31  ;;  %v7070_v43 = vsub.f32 %v14630_v22, %v7061_v63  ;;  %v7094_v20 = vadd.s32 1920, %v7079_v0  ;;  %v7071_v50 = vsub.f32 %v14634_v27, %v7061_v63  ;;  %v7072_v39 = vsub.f32 %v14638_v49, %v7061_v63 }
 0x639   :  { %7133 = vst [vmem:[%s14736_s11 + $0x8] sm:$0xff] %v7063_v25  ;;  %v7073_v57 = vsub.f32 %v14641_v28, %v7061_v63  ;;  %v7074_v5 = vsub.f32 %v14644_v3, %v7061_v63  ;;  %v7077_v22 = vsub.f32 %v14656_v48, %v7061_v63  ;;  %v7075_v46 = vsub.f32 %v14648_v13, %v7061_v63 }
 0x63a   :  { %7134 = vst [vmem:[%s14736_s11 + $0x10] sm:$0xff] %v7064_v58  ;;  %vm7110_vm1 = vcmp.eq.s32.totalorder %v7094_v20, 1968  ;;  %v7076_v27 = vsub.f32 %v14652_v44, %v7061_v63 }
 0x63b   :  { %7135 = vst [vmem:[%s14736_s11 + $0x18] sm:$0xff] %v7065_v18  ;;  %v7131_v35 = vsel %vm7110_vm1, %v7114_v62, %v7077_v22 }
 0x63c   :  { %7136 = vst [vmem:[%s14736_s11 + $0x20] sm:$0xff] %v7066_v23 }
 0x63d   :  { %7137 = vst [vmem:[%s14736_s11 + $0x28] sm:$0xff] %v7067_v24 }
 0x63e   :  { %7138 = vst [vmem:[%s14736_s11 + $0x30] sm:$0xff] %v7068_v15 }
 0x63f   :  { %7139 = vst [vmem:[%s14736_s11 + $0x38] sm:$0xff] %v7069_v19 }
 0x640   :  { %7140 = vst [vmem:[%s14736_s11 + $0x40] sm:$0xff] %v7070_v43 }
 0x641   :  { %7141 = vst [vmem:[%s14736_s11 + $0x48] sm:$0xff] %v7071_v50 }
 0x642   :  { %7142 = vst [vmem:[%s14736_s11 + $0x50] sm:$0xff] %v7072_v39 }
 0x643   :  { %7143 = vst [vmem:[%s14736_s11 + $0x58] sm:$0xff] %v7073_v57 }
 0x644   :  { %7144 = vst [vmem:[%s14736_s11 + $0x60] sm:$0xff] %v7074_v5 }
 0x645   :  { %7145 = vst [vmem:[%s14736_s11 + $0x68] sm:$0xff] %v7075_v46 }
 0x646   :  { %7146 = vst [vmem:[%s14736_s11 + $0x70] sm:$0xff] %v7076_v27 }
 0x647   :  { %7147 = vst [vmem:[%s14736_s11 + $0x78] sm:$0xff] %v7131_v35 }
 0x648   :  { %7152 = vsyncpa [#allocation3], 1 }
 0x649   :  { %7153 = vsyncpa [#allocation5], 1 }

</bundles_post_ra>
